<compile_context>
chip_gen: v5e
topology: v5e:2x2
jax: 0.10.0
libtpu: 0.0.40
codegen_flags: <defaults>
</compile_context>

<pallas_src>
import numpy as np
import jax
import jax.numpy as jnp
from jax import lax
from jax.experimental import pallas as pl
from jax.experimental.pallas import tpu as pltpu

# ---------------- static architecture constants (from the module) -----------
CNN_HW = 40                    # cnn_input_dim = (40, 40)
KSZ = 4                        # cnn_kernel_sizes = (4, 4)
C1, C2 = 32, 32                # cnn_channel_sizes = (1, 32, 32)
H1 = CNN_HW + 2 - KSZ + 1      # 39  (conv1, padding=1)
HP = (H1 - 2) // 2 + 1         # 19  (MaxPool2d(2))
HPP = HP + 2                   # 21  (pooled map + zero border for conv2 pad=1)
H2 = HP + 2 - KSZ + 1          # 18  (conv2, padding=1)
FLAT = C2 * H2 * H2            # 10368
PROJ_OUT = 12                  # cnn_output_dim
OBS_DIM = 15
MLP_IN = OBS_DIM + PROJ_OUT    # 27
HID = 256                      # mlp_layer_sizes = (27, 256, 256)
IN_DIM = OBS_DIM + CNN_HW * CNN_HW  # 1615

SLOT = 512                     # per-image flattened 21x21 grid (441), padded
GRID_PTS = HPP * HPP           # 441
TAPS = [(dy, dx) for dy in range(KSZ) for dx in range(KSZ)]
PARITIES = [(0, 0), (0, 1), (1, 0), (1, 1)]


# ------------------------------ fused kernel --------------------------------
def fused_kernel(o1_ref, imgf_ref, mask_ref,
                 w1m_ref, b1c_ref, w2t_ref, b2c_ref,
                 wpc_ref, bp_ref, w1a_ref, w1b_ref, b1m_ref, w2m_ref, b2m_ref,
                 out_ref,
                 patch_ref, ppf_ref, soft3_ref):
    """Whole forward for one batch tile of TB images.

    Data layout inside the kernel: channels on sublanes, TB*512 flattened
    (21x21-embedded) spatial positions on lanes.
      imgf_ref : (1, 4, TB*512+64)  parity planes, flattened & zero-padded
      mask_ref : (1, TB*512)        1.0 at valid pooled positions (19x19)
      out_ref  : (1, TB, 256)       final MLP output (lane-dense)
    Scratch:
      patch_ref: (16, TB*512)       conv1 im2col rows (reused per parity)
      ppf_ref  : (32, TB*512+128)   zero-padded pooled map (conv2 input)
      soft3_ref: (32, TB, 512)      softmax output, re-sliced per image
    """
    f32 = jnp.float32
    TB = o1_ref.shape[1]
    N = TB * SLOT

    imgs = imgf_ref[0]                                       # (4, N+64)

    # ---- conv1 + bias + ReLU + MaxPool(2), parity decomposition ------------
    best = None
    for (py, px) in PARITIES:
        for t, (dy, dx) in enumerate(TAPS):
            u, v = py + dy, px + dx
            q = (u % 2) * 2 + (v % 2)
            off = (u // 2) * HPP + (v // 2)
            patch_ref[t:t + 1] = imgs[q:q + 1, off:off + N]
        conv1_p = jnp.dot(w1m_ref[...], patch_ref[...],
                          preferred_element_type=f32)        # (32, N)
        best = conv1_p if best is None else jnp.maximum(best, conv1_p)
    pooled = jnp.maximum(best + b1c_ref[...], 0.0)           # (32, N)

    # ---- zero-padded conv2 input (memset once + one masked interior store) -
    ppf_ref[...] = jnp.zeros(ppf_ref.shape, f32)
    ppf_ref[:, HPP + 1:HPP + 1 + N] = pooled * mask_ref[...]

    # ---- conv2: 16 shift-matmuls, f32 accumulation --------------------------
    acc = None
    for t, (dy, dx) in enumerate(TAPS):
        off2 = dy * HPP + dx
        sl = ppf_ref[:, off2:off2 + N]                       # (32, N)
        term = jnp.dot(w2t_ref[t], sl, preferred_element_type=f32)
        acc = term if acc is None else acc + term
    a2 = jnp.maximum(acc + b2c_ref[...], 0.0)                # (32, N)

    # ---- Softmax2d over channels (sublane tree reductions) ------------------
    m = a2
    for h in (16, 8, 4, 2, 1):
        m = jnp.maximum(m[:h], m[h:2 * h])                   # -> (1, N)
    e = jnp.exp(a2 - m)
    s = e
    for h in (16, 8, 4, 2, 1):
        s = s[:h] + s[h:2 * h]                               # -> (1, N)
    soft = e * pl.reciprocal(s, approx=False)                # (32, N)

    # ---- projection (fused; zero weights kill invalid embedded positions) ---
    for b in range(TB):
        soft3_ref[:, b, :] = soft[:, b * SLOT:(b + 1) * SLOT]
    o2 = jnp.zeros((TB, PROJ_OUT), f32)
    for c in range(C2):
        o2 = o2 + lax.dot_general(
            soft3_ref[c], wpc_ref[c],
            dimension_numbers=(((1,), (1,)), ((), ())),
            preferred_element_type=f32)                      # (TB, 12)
    o2 = o2 + bp_ref[...]

    # ---- MLP: cat((o1, o2)) @ W1.T split into two dots ----------------------
    h1 = (jnp.dot(o1_ref[0], w1a_ref[...], preferred_element_type=f32)
          + jnp.dot(o2, w1b_ref[...], preferred_element_type=f32)
          + b1m_ref[...])
    h1 = jnp.maximum(h1, 0.0)
    out = jnp.dot(h1, w2m_ref[...], preferred_element_type=f32) + b2m_ref[...]
    out_ref[0] = jnp.maximum(out, 0.0)


# ------------------------------ pallas wrapper -------------------------------
def _pick_tb(batch):
    """Largest tile in {8,4,2,1} that divides B and leaves >=2 grid steps."""
    for tb in (8, 4, 2, 1):
        if batch % tb == 0 and batch // tb >= 2:
            return tb
    return 1


def fused_forward(prep, o1r, imgf, mask, TB):
    nsteps = o1r.shape[0]
    N = TB * SLOT
    return pl.pallas_call(
        fused_kernel,
        out_shape=jax.ShapeDtypeStruct((nsteps, TB, HID), jnp.float32),
        grid=(nsteps,),
        in_specs=[
            pl.BlockSpec((1, TB, OBS_DIM), lambda i: (i, 0, 0)),
            pl.BlockSpec((1, 4, N + 64), lambda i: (i, 0, 0)),
            pl.BlockSpec((1, N), lambda i: (0, 0)),
            pl.BlockSpec((C1, KSZ * KSZ), lambda i: (0, 0)),
            pl.BlockSpec((C1, 1), lambda i: (0, 0)),
            pl.BlockSpec((KSZ * KSZ, C2, C1), lambda i: (0, 0, 0)),
            pl.BlockSpec((C2, 1), lambda i: (0, 0)),
            pl.BlockSpec((C2, PROJ_OUT, SLOT), lambda i: (0, 0, 0)),
            pl.BlockSpec((1, PROJ_OUT), lambda i: (0, 0)),
            pl.BlockSpec((OBS_DIM, HID), lambda i: (0, 0)),
            pl.BlockSpec((PROJ_OUT, HID), lambda i: (0, 0)),
            pl.BlockSpec((1, HID), lambda i: (0, 0)),
            pl.BlockSpec((HID, HID), lambda i: (0, 0)),
            pl.BlockSpec((1, HID), lambda i: (0, 0)),
        ],
        out_specs=pl.BlockSpec((1, TB, HID), lambda i: (i, 0, 0)),
        scratch_shapes=[
            pltpu.VMEM((KSZ * KSZ, N), jnp.float32),
            pltpu.VMEM((C1, N + 128), jnp.float32),
            pltpu.VMEM((C2, TB, SLOT), jnp.float32),
        ],
        compiler_params=pltpu.CompilerParams(
            dimension_semantics=("parallel",)),
    )(o1r, imgf, mask,
      prep["w1m"], prep["b1c"], prep["w2t"], prep["b2c"],
      prep["wpc"], prep["bp"], prep["w1a"], prep["w1b"],
      prep["b1m"], prep["w2m"], prep["b2m"])


# ------------------------- parameter initialization -------------------------
def init_params(key):
    """Deterministic synthetic params, PyTorch layout conventions."""
    ks = jax.random.split(key, 10)

    def u(k, shape, fan_in):
        bound = 1.0 / np.sqrt(fan_in)
        return jax.random.uniform(k, shape, jnp.float32, -bound, bound)

    return {
        "w_conv1": u(ks[0], (C1, 1, KSZ, KSZ), 1 * KSZ * KSZ),     # OIHW
        "b_conv1": u(ks[1], (C1,), 1 * KSZ * KSZ),
        "w_conv2": u(ks[2], (C2, C1, KSZ, KSZ), C1 * KSZ * KSZ),   # OIHW
        "b_conv2": u(ks[3], (C2,), C1 * KSZ * KSZ),
        "w_proj":  u(ks[4], (PROJ_OUT, FLAT), FLAT),               # (out, in)
        "b_proj":  u(ks[5], (PROJ_OUT,), FLAT),
        "w_mlp1":  u(ks[6], (HID, MLP_IN), MLP_IN),                # (out, in)
        "b_mlp1":  u(ks[7], (HID,), MLP_IN),
        "w_mlp2":  u(ks[8], (HID, HID), HID),                      # (out, in)
        "b_mlp2":  u(ks[9], (HID,), HID),
    }


def prepare_params(params):
    """One-time weight permutations (hoisted out of the jitted forward)."""
    # proj weights to embedded layout (32, 12, 512):
    #   wpc[c, j, y2*21 + x2] = w_proj[j, c*324 + y2*18 + x2], zero elsewhere.
    wp = params["w_proj"].reshape(PROJ_OUT, C2, H2, H2)
    wpc = jnp.zeros((PROJ_OUT, C2, HPP, HPP), jnp.float32)
    wpc = wpc.at[:, :, :H2, :H2].set(wp)
    wpc = wpc.reshape(PROJ_OUT, C2, GRID_PTS)
    wpc = jnp.pad(wpc, ((0, 0), (0, 0), (0, SLOT - GRID_PTS)))
    wpc = wpc.transpose(1, 0, 2)                                   # (32,12,512)
    return {
        # conv1: (O,1,4,4) -> (32 out, 16 taps)
        "w1m": params["w_conv1"].reshape(C1, KSZ * KSZ),
        "b1c": params["b_conv1"].reshape(C1, 1),
        # conv2: (O,I,4,4) -> (16 taps, 32 out, 32 in)
        "w2t": params["w_conv2"].transpose(2, 3, 0, 1).reshape(KSZ * KSZ, C2, C1),
        "b2c": params["b_conv2"].reshape(C2, 1),
        "wpc": wpc,
        "bp": params["b_proj"].reshape(1, PROJ_OUT),
        "w1a": params["w_mlp1"][:, :OBS_DIM].T,                    # (15, 256)
        "w1b": params["w_mlp1"][:, OBS_DIM:].T,                    # (12, 256)
        "b1m": params["b_mlp1"].reshape(1, HID),
        "w2m": params["w_mlp2"].T,                                 # (256, 256)
        "b2m": params["b_mlp2"].reshape(1, HID),
    }


# ------------------------------ forward pass ---------------------------------
@jax.jit
def cnn_mlp_forward(prep, s):
    s = s.astype(jnp.float32)
    B = s.shape[0]
    TB = _pick_tb(B)
    nsteps = B // TB

    o1 = s[:, :OBS_DIM].reshape(nsteps, TB, OBS_DIM)
    img = s[:, OBS_DIM:OBS_DIM + CNN_HW * CNN_HW].reshape(B, CNN_HW, CNN_HW)

    # pad + parity split + flatten (cheap XLA glue on ~8 KB/image):
    #   plane[q = ul*2+vl][Y*21 + X] = img_pad[2Y+ul, 2X+vl]
    img_pad = jnp.pad(img, ((0, 0), (1, 1), (1, 1)))               # (B, 42, 42)
    planes = (img_pad.reshape(B, HPP, 2, HPP, 2)
              .transpose(0, 2, 4, 1, 3)                            # (B,2,2,21,21)
              .reshape(B, 4, GRID_PTS))
    planes = jnp.pad(planes, ((0, 0), (0, 0), (0, SLOT - GRID_PTS)))
    imgf = (planes.reshape(nsteps, TB, 4, SLOT)
            .transpose(0, 2, 1, 3)
            .reshape(nsteps, 4, TB * SLOT))
    imgf = jnp.pad(imgf, ((0, 0), (0, 0), (0, 64)))                # slack for shifts

    # valid-pooled-position mask (1 at yy,xx in [0,19) of each 512-slot slab)
    pmask = jnp.zeros((HPP, HPP), jnp.float32).at[:HP, :HP].set(1.0)
    pmask = jnp.pad(pmask.reshape(GRID_PTS), (0, SLOT - GRID_PTS))
    pmask = jnp.tile(pmask, (TB,)).reshape(1, TB * SLOT)

    out = fused_forward(prep, o1, imgf, pmask, TB)                 # (nsteps,TB,256)
    return out.reshape(B, HID)


# --------------------------- pure-JAX reference ------------------------------
@jax.jit
def reference_forward(params, s):
    s = s.astype(jnp.float32)
    B = s.shape[0]
    o1 = s[:, :OBS_DIM]
    img = s[:, OBS_DIM:].reshape(B, 1, CNN_HW, CNN_HW)
    dn = ("NCHW", "OIHW", "NCHW")
    y = lax.conv_general_dilated(img, params["w_conv1"], (1, 1),
                                 [(1, 1), (1, 1)], dimension_numbers=dn)
    y = jnp.maximum(y + params["b_conv1"].reshape(1, C1, 1, 1), 0.0)
    y = lax.reduce_window(y, -jnp.inf, lax.max, (1, 1, 2, 2), (1, 1, 2, 2), "VALID")
    y = lax.conv_general_dilated(y, params["w_conv2"], (1, 1),
                                 [(1, 1), (1, 1)], dimension_numbers=dn)
    y = jnp.maximum(y + params["b_conv2"].reshape(1, C2, 1, 1), 0.0)
    y = jax.nn.softmax(y, axis=1)
    o2 = y.reshape(B, -1) @ params["w_proj"].T + params["b_proj"]
    o = jnp.concatenate([o1, o2], axis=1)
    h = jnp.maximum(o @ params["w_mlp1"].T + params["b_mlp1"], 0.0)
    return jnp.maximum(h @ params["w_mlp2"].T + params["b_mlp2"], 0.0)


if __name__ == "__main__":
    params = init_params(jax.random.PRNGKey(42))
    prep = prepare_params(params)
    x = jax.random.normal(jax.random.PRNGKey(0), (2, IN_DIM), jnp.float32)

    out = jax.block_until_ready(cnn_mlp_forward(prep, x))

    assert out.shape == (2, HID), out.shape
    assert bool(jnp.all(jnp.isfinite(out)))

    ref = jax.block_until_ready(reference_forward(params, x))
    assert bool(jnp.allclose(out, ref, rtol=2e-3, atol=2e-3)), \
        float(jnp.max(jnp.abs(out - ref)))

    print("KERNEL_OK")
</pallas_src>

<mosaic_0001>
module attributes {stable_mosaic.version = 11 : i64} {
  func.func @fused_kernel(%arg0: i32, %arg1: memref<1x1x15xf32, #tpu.memory_space<vmem>>, %arg2: memref<1x4x576xf32, #tpu.memory_space<vmem>>, %arg3: memref<1x512xf32, #tpu.memory_space<vmem>>, %arg4: memref<32x16xf32, #tpu.memory_space<vmem>>, %arg5: memref<32x1xf32, #tpu.memory_space<vmem>>, %arg6: memref<16x32x32xf32, #tpu.memory_space<vmem>>, %arg7: memref<32x1xf32, #tpu.memory_space<vmem>>, %arg8: memref<32x12x512xf32, #tpu.memory_space<vmem>>, %arg9: memref<1x12xf32, #tpu.memory_space<vmem>>, %arg10: memref<15x256xf32, #tpu.memory_space<vmem>>, %arg11: memref<12x256xf32, #tpu.memory_space<vmem>>, %arg12: memref<1x256xf32, #tpu.memory_space<vmem>>, %arg13: memref<256x256xf32, #tpu.memory_space<vmem>>, %arg14: memref<1x256xf32, #tpu.memory_space<vmem>>, %arg15: memref<1x1x256xf32, #tpu.memory_space<vmem>>, %arg16: memref<16x512xf32, #tpu.memory_space<vmem>>, %arg17: memref<32x640xf32, #tpu.memory_space<vmem>>, %arg18: memref<32x1x512xf32, #tpu.memory_space<vmem>>) attributes {dimension_semantics = [#tpu.dimension_semantics<parallel>], iteration_bounds = array<i64: 2>, scalar_prefetch = 0 : i64, scratch_operands = 3 : i64, tpu.core_type = #tpu.core_type<tc>, window_params = [{transform_indices = @transform_0, window_bounds = array<i64: 1, 1, 15>}, {transform_indices = @transform_1, window_bounds = array<i64: 1, 4, 576>}, {pipeline_mode = #tpu.pipeline_mode<synchronous>, transform_indices = @transform_2, window_bounds = array<i64: 1, 512>}, {pipeline_mode = #tpu.pipeline_mode<synchronous>, transform_indices = @transform_3, window_bounds = array<i64: 32, 16>}, {pipeline_mode = #tpu.pipeline_mode<synchronous>, transform_indices = @transform_4, window_bounds = array<i64: 32, 1>}, {pipeline_mode = #tpu.pipeline_mode<synchronous>, transform_indices = @transform_5, window_bounds = array<i64: 16, 32, 32>}, {pipeline_mode = #tpu.pipeline_mode<synchronous>, transform_indices = @transform_6, window_bounds = array<i64: 32, 1>}, {pipeline_mode = #tpu.pipeline_mode<synchronous>, transform_indices = @transform_7, window_bounds = array<i64: 32, 12, 512>}, {pipeline_mode = #tpu.pipeline_mode<synchronous>, transform_indices = @transform_8, window_bounds = array<i64: 1, 12>}, {pipeline_mode = #tpu.pipeline_mode<synchronous>, transform_indices = @transform_9, window_bounds = array<i64: 15, 256>}, {pipeline_mode = #tpu.pipeline_mode<synchronous>, transform_indices = @transform_10, window_bounds = array<i64: 12, 256>}, {pipeline_mode = #tpu.pipeline_mode<synchronous>, transform_indices = @transform_11, window_bounds = array<i64: 1, 256>}, {pipeline_mode = #tpu.pipeline_mode<synchronous>, transform_indices = @transform_12, window_bounds = array<i64: 256, 256>}, {pipeline_mode = #tpu.pipeline_mode<synchronous>, transform_indices = @transform_13, window_bounds = array<i64: 1, 256>}, {transform_indices = @transform_14, window_bounds = array<i64: 1, 1, 256>}]} {
    %c0 = arith.constant 0 : index
    %c0_0 = arith.constant 0 : index
    %c0_1 = arith.constant 0 : index
    %0 = vector.load %arg2[%c0, %c0_0, %c0_1] : memref<1x4x576xf32, #tpu.memory_space<vmem>>, vector<1x4x576xf32>
    %1 = vector.shape_cast %0 : vector<1x4x576xf32> to vector<4x576xf32>
    %2 = vector.extract_strided_slice %1 {offsets = [0, 0], sizes = [1, 512], strides = [1, 1]} : vector<4x576xf32> to vector<1x512xf32>
    %c0_2 = arith.constant 0 : index
    %c0_3 = arith.constant 0 : index
    %3 = vector.load %arg16[%c0_2, %c0_3] : memref<16x512xf32, #tpu.memory_space<vmem>>, vector<1x512xf32>
    tpu.vector_store %arg16[%c0_2, %c0_3], %2 {strides = array<i32>} : memref<16x512xf32, #tpu.memory_space<vmem>>, vector<1x512xf32>,
    %4 = vector.extract_strided_slice %1 {offsets = [1, 0], sizes = [1, 512], strides = [1, 1]} : vector<4x576xf32> to vector<1x512xf32>
    %c1 = arith.constant 1 : index
    %c0_4 = arith.constant 0 : index
    %5 = vector.load %arg16[%c1, %c0_4] : memref<16x512xf32, #tpu.memory_space<vmem>>, vector<1x512xf32>
    tpu.vector_store %arg16[%c1, %c0_4], %4 {strides = array<i32>} : memref<16x512xf32, #tpu.memory_space<vmem>>, vector<1x512xf32>,
    %6 = vector.extract_strided_slice %1 {offsets = [0, 1], sizes = [1, 512], strides = [1, 1]} : vector<4x576xf32> to vector<1x512xf32>
    %c2 = arith.constant 2 : index
    %c0_5 = arith.constant 0 : index
    %7 = vector.load %arg16[%c2, %c0_5] : memref<16x512xf32, #tpu.memory_space<vmem>>, vector<1x512xf32>
    tpu.vector_store %arg16[%c2, %c0_5], %6 {strides = array<i32>} : memref<16x512xf32, #tpu.memory_space<vmem>>, vector<1x512xf32>,
    %8 = vector.extract_strided_slice %1 {offsets = [1, 1], sizes = [1, 512], strides = [1, 1]} : vector<4x576xf32> to vector<1x512xf32>
    %c3 = arith.constant 3 : index
    %c0_6 = arith.constant 0 : index
    %9 = vector.load %arg16[%c3, %c0_6] : memref<16x512xf32, #tpu.memory_space<vmem>>, vector<1x512xf32>
    tpu.vector_store %arg16[%c3, %c0_6], %8 {strides = array<i32>} : memref<16x512xf32, #tpu.memory_space<vmem>>, vector<1x512xf32>,
    %10 = vector.extract_strided_slice %1 {offsets = [2, 0], sizes = [1, 512], strides = [1, 1]} : vector<4x576xf32> to vector<1x512xf32>
    %c4 = arith.constant 4 : index
    %c0_7 = arith.constant 0 : index
    %11 = vector.load %arg16[%c4, %c0_7] : memref<16x512xf32, #tpu.memory_space<vmem>>, vector<1x512xf32>
    tpu.vector_store %arg16[%c4, %c0_7], %10 {strides = array<i32>} : memref<16x512xf32, #tpu.memory_space<vmem>>, vector<1x512xf32>,
    %12 = vector.extract_strided_slice %1 {offsets = [3, 0], sizes = [1, 512], strides = [1, 1]} : vector<4x576xf32> to vector<1x512xf32>
    %c5 = arith.constant 5 : index
    %c0_8 = arith.constant 0 : index
    %13 = vector.load %arg16[%c5, %c0_8] : memref<16x512xf32, #tpu.memory_space<vmem>>, vector<1x512xf32>
    tpu.vector_store %arg16[%c5, %c0_8], %12 {strides = array<i32>} : memref<16x512xf32, #tpu.memory_space<vmem>>, vector<1x512xf32>,
    %14 = vector.extract_strided_slice %1 {offsets = [2, 1], sizes = [1, 512], strides = [1, 1]} : vector<4x576xf32> to vector<1x512xf32>
    %c6 = arith.constant 6 : index
    %c0_9 = arith.constant 0 : index
    %15 = vector.load %arg16[%c6, %c0_9] : memref<16x512xf32, #tpu.memory_space<vmem>>, vector<1x512xf32>
    tpu.vector_store %arg16[%c6, %c0_9], %14 {strides = array<i32>} : memref<16x512xf32, #tpu.memory_space<vmem>>, vector<1x512xf32>,
    %16 = vector.extract_strided_slice %1 {offsets = [3, 1], sizes = [1, 512], strides = [1, 1]} : vector<4x576xf32> to vector<1x512xf32>
    %c7 = arith.constant 7 : index
    %c0_10 = arith.constant 0 : index
    %17 = vector.load %arg16[%c7, %c0_10] : memref<16x512xf32, #tpu.memory_space<vmem>>, vector<1x512xf32>
    tpu.vector_store %arg16[%c7, %c0_10], %16 {strides = array<i32>} : memref<16x512xf32, #tpu.memory_space<vmem>>, vector<1x512xf32>,
    %18 = vector.extract_strided_slice %1 {offsets = [0, 21], sizes = [1, 512], strides = [1, 1]} : vector<4x576xf32> to vector<1x512xf32>
    %c8 = arith.constant 8 : index
    %c0_11 = arith.constant 0 : index
    %19 = vector.load %arg16[%c8, %c0_11] : memref<16x512xf32, #tpu.memory_space<vmem>>, vector<1x512xf32>
    tpu.vector_store %arg16[%c8, %c0_11], %18 {strides = array<i32>} : memref<16x512xf32, #tpu.memory_space<vmem>>, vector<1x512xf32>,
    %20 = vector.extract_strided_slice %1 {offsets = [1, 21], sizes = [1, 512], strides = [1, 1]} : vector<4x576xf32> to vector<1x512xf32>
    %c9 = arith.constant 9 : index
    %c0_12 = arith.constant 0 : index
    %21 = vector.load %arg16[%c9, %c0_12] : memref<16x512xf32, #tpu.memory_space<vmem>>, vector<1x512xf32>
    tpu.vector_store %arg16[%c9, %c0_12], %20 {strides = array<i32>} : memref<16x512xf32, #tpu.memory_space<vmem>>, vector<1x512xf32>,
    %22 = vector.extract_strided_slice %1 {offsets = [0, 22], sizes = [1, 512], strides = [1, 1]} : vector<4x576xf32> to vector<1x512xf32>
    %c10 = arith.constant 10 : index
    %c0_13 = arith.constant 0 : index
    %23 = vector.load %arg16[%c10, %c0_13] : memref<16x512xf32, #tpu.memory_space<vmem>>, vector<1x512xf32>
    tpu.vector_store %arg16[%c10, %c0_13], %22 {strides = array<i32>} : memref<16x512xf32, #tpu.memory_space<vmem>>, vector<1x512xf32>,
    %24 = vector.extract_strided_slice %1 {offsets = [1, 22], sizes = [1, 512], strides = [1, 1]} : vector<4x576xf32> to vector<1x512xf32>
    %c11 = arith.constant 11 : index
    %c0_14 = arith.constant 0 : index
    %25 = vector.load %arg16[%c11, %c0_14] : memref<16x512xf32, #tpu.memory_space<vmem>>, vector<1x512xf32>
    tpu.vector_store %arg16[%c11, %c0_14], %24 {strides = array<i32>} : memref<16x512xf32, #tpu.memory_space<vmem>>, vector<1x512xf32>,
    %26 = vector.extract_strided_slice %1 {offsets = [2, 21], sizes = [1, 512], strides = [1, 1]} : vector<4x576xf32> to vector<1x512xf32>
    %c12 = arith.constant 12 : index
    %c0_15 = arith.constant 0 : index
    %27 = vector.load %arg16[%c12, %c0_15] : memref<16x512xf32, #tpu.memory_space<vmem>>, vector<1x512xf32>
    tpu.vector_store %arg16[%c12, %c0_15], %26 {strides = array<i32>} : memref<16x512xf32, #tpu.memory_space<vmem>>, vector<1x512xf32>,
    %28 = vector.extract_strided_slice %1 {offsets = [3, 21], sizes = [1, 512], strides = [1, 1]} : vector<4x576xf32> to vector<1x512xf32>
    %c13 = arith.constant 13 : index
    %c0_16 = arith.constant 0 : index
    %29 = vector.load %arg16[%c13, %c0_16] : memref<16x512xf32, #tpu.memory_space<vmem>>, vector<1x512xf32>
    tpu.vector_store %arg16[%c13, %c0_16], %28 {strides = array<i32>} : memref<16x512xf32, #tpu.memory_space<vmem>>, vector<1x512xf32>,
    %30 = vector.extract_strided_slice %1 {offsets = [2, 22], sizes = [1, 512], strides = [1, 1]} : vector<4x576xf32> to vector<1x512xf32>
    %c14 = arith.constant 14 : index
    %c0_17 = arith.constant 0 : index
    %31 = vector.load %arg16[%c14, %c0_17] : memref<16x512xf32, #tpu.memory_space<vmem>>, vector<1x512xf32>
    tpu.vector_store %arg16[%c14, %c0_17], %30 {strides = array<i32>} : memref<16x512xf32, #tpu.memory_space<vmem>>, vector<1x512xf32>,
    %32 = vector.extract_strided_slice %1 {offsets = [3, 22], sizes = [1, 512], strides = [1, 1]} : vector<4x576xf32> to vector<1x512xf32>
    %c15 = arith.constant 15 : index
    %c0_18 = arith.constant 0 : index
    %33 = vector.load %arg16[%c15, %c0_18] : memref<16x512xf32, #tpu.memory_space<vmem>>, vector<1x512xf32>
    tpu.vector_store %arg16[%c15, %c0_18], %32 {strides = array<i32>} : memref<16x512xf32, #tpu.memory_space<vmem>>, vector<1x512xf32>,
    %c0_19 = arith.constant 0 : index
    %c0_20 = arith.constant 0 : index
    %34 = vector.load %arg4[%c0_19, %c0_20] : memref<32x16xf32, #tpu.memory_space<vmem>>, vector<32x16xf32>
    %c0_21 = arith.constant 0 : index
    %c0_22 = arith.constant 0 : index
    %35 = vector.load %arg16[%c0_21, %c0_22] : memref<16x512xf32, #tpu.memory_space<vmem>>, vector<16x512xf32>
    %cst = arith.constant dense<0.000000e+00> : vector<32x512xf32>
    %36 = tpu.matmul %34, %35, %cst {dimension_numbers = #tpu.dot_dimension_numbers<[1], [0], [0], [1], [0, 0, 1, 1], [], []>} : vector<32x16xf32>, vector<16x512xf32>, vector<32x512xf32> -> vector<32x512xf32>
    %37 = vector.extract_strided_slice %1 {offsets = [1, 0], sizes = [1, 512], strides = [1, 1]} : vector<4x576xf32> to vector<1x512xf32>
    %c0_23 = arith.constant 0 : index
    %c0_24 = arith.constant 0 : index
    %38 = vector.load %arg16[%c0_23, %c0_24] : memref<16x512xf32, #tpu.memory_space<vmem>>, vector<1x512xf32>
    tpu.vector_store %arg16[%c0_23, %c0_24], %37 {strides = array<i32>} : memref<16x512xf32, #tpu.memory_space<vmem>>, vector<1x512xf32>,
    %39 = vector.extract_strided_slice %1 {offsets = [0, 1], sizes = [1, 512], strides = [1, 1]} : vector<4x576xf32> to vector<1x512xf32>
    %c1_25 = arith.constant 1 : index
    %c0_26 = arith.constant 0 : index
    %40 = vector.load %arg16[%c1_25, %c0_26] : memref<16x512xf32, #tpu.memory_space<vmem>>, vector<1x512xf32>
    tpu.vector_store %arg16[%c1_25, %c0_26], %39 {strides = array<i32>} : memref<16x512xf32, #tpu.memory_space<vmem>>, vector<1x512xf32>,
    %41 = vector.extract_strided_slice %1 {offsets = [1, 1], sizes = [1, 512], strides = [1, 1]} : vector<4x576xf32> to vector<1x512xf32>
    %c2_27 = arith.constant 2 : index
    %c0_28 = arith.constant 0 : index
    %42 = vector.load %arg16[%c2_27, %c0_28] : memref<16x512xf32, #tpu.memory_space<vmem>>, vector<1x512xf32>
    tpu.vector_store %arg16[%c2_27, %c0_28], %41 {strides = array<i32>} : memref<16x512xf32, #tpu.memory_space<vmem>>, vector<1x512xf32>,
    %43 = vector.extract_strided_slice %1 {offsets = [0, 2], sizes = [1, 512], strides = [1, 1]} : vector<4x576xf32> to vector<1x512xf32>
    %c3_29 = arith.constant 3 : index
    %c0_30 = arith.constant 0 : index
    %44 = vector.load %arg16[%c3_29, %c0_30] : memref<16x512xf32, #tpu.memory_space<vmem>>, vector<1x512xf32>
    tpu.vector_store %arg16[%c3_29, %c0_30], %43 {strides = array<i32>} : memref<16x512xf32, #tpu.memory_space<vmem>>, vector<1x512xf32>,
    %45 = vector.extract_strided_slice %1 {offsets = [3, 0], sizes = [1, 512], strides = [1, 1]} : vector<4x576xf32> to vector<1x512xf32>
    %c4_31 = arith.constant 4 : index
    %c0_32 = arith.constant 0 : index
    %46 = vector.load %arg16[%c4_31, %c0_32] : memref<16x512xf32, #tpu.memory_space<vmem>>, vector<1x512xf32>
    tpu.vector_store %arg16[%c4_31, %c0_32], %45 {strides = array<i32>} : memref<16x512xf32, #tpu.memory_space<vmem>>, vector<1x512xf32>,
    %47 = vector.extract_strided_slice %1 {offsets = [2, 1], sizes = [1, 512], strides = [1, 1]} : vector<4x576xf32> to vector<1x512xf32>
    %c5_33 = arith.constant 5 : index
    %c0_34 = arith.constant 0 : index
    %48 = vector.load %arg16[%c5_33, %c0_34] : memref<16x512xf32, #tpu.memory_space<vmem>>, vector<1x512xf32>
    tpu.vector_store %arg16[%c5_33, %c0_34], %47 {strides = array<i32>} : memref<16x512xf32, #tpu.memory_space<vmem>>, vector<1x512xf32>,
    %49 = vector.extract_strided_slice %1 {offsets = [3, 1], sizes = [1, 512], strides = [1, 1]} : vector<4x576xf32> to vector<1x512xf32>
    %c6_35 = arith.constant 6 : index
    %c0_36 = arith.constant 0 : index
    %50 = vector.load %arg16[%c6_35, %c0_36] : memref<16x512xf32, #tpu.memory_space<vmem>>, vector<1x512xf32>
    tpu.vector_store %arg16[%c6_35, %c0_36], %49 {strides = array<i32>} : memref<16x512xf32, #tpu.memory_space<vmem>>, vector<1x512xf32>,
    %51 = vector.extract_strided_slice %1 {offsets = [2, 2], sizes = [1, 512], strides = [1, 1]} : vector<4x576xf32> to vector<1x512xf32>
    %c7_37 = arith.constant 7 : index
    %c0_38 = arith.constant 0 : index
    %52 = vector.load %arg16[%c7_37, %c0_38] : memref<16x512xf32, #tpu.memory_space<vmem>>, vector<1x512xf32>
    tpu.vector_store %arg16[%c7_37, %c0_38], %51 {strides = array<i32>} : memref<16x512xf32, #tpu.memory_space<vmem>>, vector<1x512xf32>,
    %53 = vector.extract_strided_slice %1 {offsets = [1, 21], sizes = [1, 512], strides = [1, 1]} : vector<4x576xf32> to vector<1x512xf32>
    %c8_39 = arith.constant 8 : index
    %c0_40 = arith.constant 0 : index
    %54 = vector.load %arg16[%c8_39, %c0_40] : memref<16x512xf32, #tpu.memory_space<vmem>>, vector<1x512xf32>
    tpu.vector_store %arg16[%c8_39, %c0_40], %53 {strides = array<i32>} : memref<16x512xf32, #tpu.memory_space<vmem>>, vector<1x512xf32>,
    %55 = vector.extract_strided_slice %1 {offsets = [0, 22], sizes = [1, 512], strides = [1, 1]} : vector<4x576xf32> to vector<1x512xf32>
    %c9_41 = arith.constant 9 : index
    %c0_42 = arith.constant 0 : index
    %56 = vector.load %arg16[%c9_41, %c0_42] : memref<16x512xf32, #tpu.memory_space<vmem>>, vector<1x512xf32>
    tpu.vector_store %arg16[%c9_41, %c0_42], %55 {strides = array<i32>} : memref<16x512xf32, #tpu.memory_space<vmem>>, vector<1x512xf32>,
    %57 = vector.extract_strided_slice %1 {offsets = [1, 22], sizes = [1, 512], strides = [1, 1]} : vector<4x576xf32> to vector<1x512xf32>
    %c10_43 = arith.constant 10 : index
    %c0_44 = arith.constant 0 : index
    %58 = vector.load %arg16[%c10_43, %c0_44] : memref<16x512xf32, #tpu.memory_space<vmem>>, vector<1x512xf32>
    tpu.vector_store %arg16[%c10_43, %c0_44], %57 {strides = array<i32>} : memref<16x512xf32, #tpu.memory_space<vmem>>, vector<1x512xf32>,
    %59 = vector.extract_strided_slice %1 {offsets = [0, 23], sizes = [1, 512], strides = [1, 1]} : vector<4x576xf32> to vector<1x512xf32>
    %c11_45 = arith.constant 11 : index
    %c0_46 = arith.constant 0 : index
    %60 = vector.load %arg16[%c11_45, %c0_46] : memref<16x512xf32, #tpu.memory_space<vmem>>, vector<1x512xf32>
    tpu.vector_store %arg16[%c11_45, %c0_46], %59 {strides = array<i32>} : memref<16x512xf32, #tpu.memory_space<vmem>>, vector<1x512xf32>,
    %61 = vector.extract_strided_slice %1 {offsets = [3, 21], sizes = [1, 512], strides = [1, 1]} : vector<4x576xf32> to vector<1x512xf32>
    %c12_47 = arith.constant 12 : index
    %c0_48 = arith.constant 0 : index
    %62 = vector.load %arg16[%c12_47, %c0_48] : memref<16x512xf32, #tpu.memory_space<vmem>>, vector<1x512xf32>
    tpu.vector_store %arg16[%c12_47, %c0_48], %61 {strides = array<i32>} : memref<16x512xf32, #tpu.memory_space<vmem>>, vector<1x512xf32>,
    %63 = vector.extract_strided_slice %1 {offsets = [2, 22], sizes = [1, 512], strides = [1, 1]} : vector<4x576xf32> to vector<1x512xf32>
    %c13_49 = arith.constant 13 : index
    %c0_50 = arith.constant 0 : index
    %64 = vector.load %arg16[%c13_49, %c0_50] : memref<16x512xf32, #tpu.memory_space<vmem>>, vector<1x512xf32>
    tpu.vector_store %arg16[%c13_49, %c0_50], %63 {strides = array<i32>} : memref<16x512xf32, #tpu.memory_space<vmem>>, vector<1x512xf32>,
    %65 = vector.extract_strided_slice %1 {offsets = [3, 22], sizes = [1, 512], strides = [1, 1]} : vector<4x576xf32> to vector<1x512xf32>
    %c14_51 = arith.constant 14 : index
    %c0_52 = arith.constant 0 : index
    %66 = vector.load %arg16[%c14_51, %c0_52] : memref<16x512xf32, #tpu.memory_space<vmem>>, vector<1x512xf32>
    tpu.vector_store %arg16[%c14_51, %c0_52], %65 {strides = array<i32>} : memref<16x512xf32, #tpu.memory_space<vmem>>, vector<1x512xf32>,
    %67 = vector.extract_strided_slice %1 {offsets = [2, 23], sizes = [1, 512], strides = [1, 1]} : vector<4x576xf32> to vector<1x512xf32>
    %c15_53 = arith.constant 15 : index
    %c0_54 = arith.constant 0 : index
    %68 = vector.load %arg16[%c15_53, %c0_54] : memref<16x512xf32, #tpu.memory_space<vmem>>, vector<1x512xf32>
    tpu.vector_store %arg16[%c15_53, %c0_54], %67 {strides = array<i32>} : memref<16x512xf32, #tpu.memory_space<vmem>>, vector<1x512xf32>,
    %c0_55 = arith.constant 0 : index
    %c0_56 = arith.constant 0 : index
    %69 = vector.load %arg4[%c0_55, %c0_56] : memref<32x16xf32, #tpu.memory_space<vmem>>, vector<32x16xf32>
    %c0_57 = arith.constant 0 : index
    %c0_58 = arith.constant 0 : index
    %70 = vector.load %arg16[%c0_57, %c0_58] : memref<16x512xf32, #tpu.memory_space<vmem>>, vector<16x512xf32>
    %cst_59 = arith.constant dense<0.000000e+00> : vector<32x512xf32>
    %71 = tpu.matmul %69, %70, %cst_59 {dimension_numbers = #tpu.dot_dimension_numbers<[1], [0], [0], [1], [0, 0, 1, 1], [], []>} : vector<32x16xf32>, vector<16x512xf32>, vector<32x512xf32> -> vector<32x512xf32>
    %72 = arith.maximumf %36, %71 : vector<32x512xf32>
    %73 = vector.extract_strided_slice %1 {offsets = [2, 0], sizes = [1, 512], strides = [1, 1]} : vector<4x576xf32> to vector<1x512xf32>
    %c0_60 = arith.constant 0 : index
    %c0_61 = arith.constant 0 : index
    %74 = vector.load %arg16[%c0_60, %c0_61] : memref<16x512xf32, #tpu.memory_space<vmem>>, vector<1x512xf32>
    tpu.vector_store %arg16[%c0_60, %c0_61], %73 {strides = array<i32>} : memref<16x512xf32, #tpu.memory_space<vmem>>, vector<1x512xf32>,
    %75 = vector.extract_strided_slice %1 {offsets = [3, 0], sizes = [1, 512], strides = [1, 1]} : vector<4x576xf32> to vector<1x512xf32>
    %c1_62 = arith.constant 1 : index
    %c0_63 = arith.constant 0 : index
    %76 = vector.load %arg16[%c1_62, %c0_63] : memref<16x512xf32, #tpu.memory_space<vmem>>, vector<1x512xf32>
    tpu.vector_store %arg16[%c1_62, %c0_63], %75 {strides = array<i32>} : memref<16x512xf32, #tpu.memory_space<vmem>>, vector<1x512xf32>,
    %77 = vector.extract_strided_slice %1 {offsets = [2, 1], sizes = [1, 512], strides = [1, 1]} : vector<4x576xf32> to vector<1x512xf32>
    %c2_64 = arith.constant 2 : index
    %c0_65 = arith.constant 0 : index
    %78 = vector.load %arg16[%c2_64, %c0_65] : memref<16x512xf32, #tpu.memory_space<vmem>>, vector<1x512xf32>
    tpu.vector_store %arg16[%c2_64, %c0_65], %77 {strides = array<i32>} : memref<16x512xf32, #tpu.memory_space<vmem>>, vector<1x512xf32>,
    %79 = vector.extract_strided_slice %1 {offsets = [3, 1], sizes = [1, 512], strides = [1, 1]} : vector<4x576xf32> to vector<1x512xf32>
    %c3_66 = arith.constant 3 : index
    %c0_67 = arith.constant 0 : index
    %80 = vector.load %arg16[%c3_66, %c0_67] : memref<16x512xf32, #tpu.memory_space<vmem>>, vector<1x512xf32>
    tpu.vector_store %arg16[%c3_66, %c0_67], %79 {strides = array<i32>} : memref<16x512xf32, #tpu.memory_space<vmem>>, vector<1x512xf32>,
    %81 = vector.extract_strided_slice %1 {offsets = [0, 21], sizes = [1, 512], strides = [1, 1]} : vector<4x576xf32> to vector<1x512xf32>
    %c4_68 = arith.constant 4 : index
    %c0_69 = arith.constant 0 : index
    %82 = vector.load %arg16[%c4_68, %c0_69] : memref<16x512xf32, #tpu.memory_space<vmem>>, vector<1x512xf32>
    tpu.vector_store %arg16[%c4_68, %c0_69], %81 {strides = array<i32>} : memref<16x512xf32, #tpu.memory_space<vmem>>, vector<1x512xf32>,
    %83 = vector.extract_strided_slice %1 {offsets = [1, 21], sizes = [1, 512], strides = [1, 1]} : vector<4x576xf32> to vector<1x512xf32>
    %c5_70 = arith.constant 5 : index
    %c0_71 = arith.constant 0 : index
    %84 = vector.load %arg16[%c5_70, %c0_71] : memref<16x512xf32, #tpu.memory_space<vmem>>, vector<1x512xf32>
    tpu.vector_store %arg16[%c5_70, %c0_71], %83 {strides = array<i32>} : memref<16x512xf32, #tpu.memory_space<vmem>>, vector<1x512xf32>,
    %85 = vector.extract_strided_slice %1 {offsets = [0, 22], sizes = [1, 512], strides = [1, 1]} : vector<4x576xf32> to vector<1x512xf32>
    %c6_72 = arith.constant 6 : index
    %c0_73 = arith.constant 0 : index
    %86 = vector.load %arg16[%c6_72, %c0_73] : memref<16x512xf32, #tpu.memory_space<vmem>>, vector<1x512xf32>
    tpu.vector_store %arg16[%c6_72, %c0_73], %85 {strides = array<i32>} : memref<16x512xf32, #tpu.memory_space<vmem>>, vector<1x512xf32>,
    %87 = vector.extract_strided_slice %1 {offsets = [1, 22], sizes = [1, 512], strides = [1, 1]} : vector<4x576xf32> to vector<1x512xf32>
    %c7_74 = arith.constant 7 : index
    %c0_75 = arith.constant 0 : index
    %88 = vector.load %arg16[%c7_74, %c0_75] : memref<16x512xf32, #tpu.memory_space<vmem>>, vector<1x512xf32>
    tpu.vector_store %arg16[%c7_74, %c0_75], %87 {strides = array<i32>} : memref<16x512xf32, #tpu.memory_space<vmem>>, vector<1x512xf32>,
    %89 = vector.extract_strided_slice %1 {offsets = [2, 21], sizes = [1, 512], strides = [1, 1]} : vector<4x576xf32> to vector<1x512xf32>
    %c8_76 = arith.constant 8 : index
    %c0_77 = arith.constant 0 : index
    %90 = vector.load %arg16[%c8_76, %c0_77] : memref<16x512xf32, #tpu.memory_space<vmem>>, vector<1x512xf32>
    tpu.vector_store %arg16[%c8_76, %c0_77], %89 {strides = array<i32>} : memref<16x512xf32, #tpu.memory_space<vmem>>, vector<1x512xf32>,
    %91 = vector.extract_strided_slice %1 {offsets = [3, 21], sizes = [1, 512], strides = [1, 1]} : vector<4x576xf32> to vector<1x512xf32>
    %c9_78 = arith.constant 9 : index
    %c0_79 = arith.constant 0 : index
    %92 = vector.load %arg16[%c9_78, %c0_79] : memref<16x512xf32, #tpu.memory_space<vmem>>, vector<1x512xf32>
    tpu.vector_store %arg16[%c9_78, %c0_79], %91 {strides = array<i32>} : memref<16x512xf32, #tpu.memory_space<vmem>>, vector<1x512xf32>,
    %93 = vector.extract_strided_slice %1 {offsets = [2, 22], sizes = [1, 512], strides = [1, 1]} : vector<4x576xf32> to vector<1x512xf32>
    %c10_80 = arith.constant 10 : index
    %c0_81 = arith.constant 0 : index
    %94 = vector.load %arg16[%c10_80, %c0_81] : memref<16x512xf32, #tpu.memory_space<vmem>>, vector<1x512xf32>
    tpu.vector_store %arg16[%c10_80, %c0_81], %93 {strides = array<i32>} : memref<16x512xf32, #tpu.memory_space<vmem>>, vector<1x512xf32>,
    %95 = vector.extract_strided_slice %1 {offsets = [3, 22], sizes = [1, 512], strides = [1, 1]} : vector<4x576xf32> to vector<1x512xf32>
    %c11_82 = arith.constant 11 : index
    %c0_83 = arith.constant 0 : index
    %96 = vector.load %arg16[%c11_82, %c0_83] : memref<16x512xf32, #tpu.memory_space<vmem>>, vector<1x512xf32>
    tpu.vector_store %arg16[%c11_82, %c0_83], %95 {strides = array<i32>} : memref<16x512xf32, #tpu.memory_space<vmem>>, vector<1x512xf32>,
    %97 = vector.extract_strided_slice %1 {offsets = [0, 42], sizes = [1, 512], strides = [1, 1]} : vector<4x576xf32> to vector<1x512xf32>
    %c12_84 = arith.constant 12 : index
    %c0_85 = arith.constant 0 : index
    %98 = vector.load %arg16[%c12_84, %c0_85] : memref<16x512xf32, #tpu.memory_space<vmem>>, vector<1x512xf32>
    tpu.vector_store %arg16[%c12_84, %c0_85], %97 {strides = array<i32>} : memref<16x512xf32, #tpu.memory_space<vmem>>, vector<1x512xf32>,
    %99 = vector.extract_strided_slice %1 {offsets = [1, 42], sizes = [1, 512], strides = [1, 1]} : vector<4x576xf32> to vector<1x512xf32>
    %c13_86 = arith.constant 13 : index
    %c0_87 = arith.constant 0 : index
    %100 = vector.load %arg16[%c13_86, %c0_87] : memref<16x512xf32, #tpu.memory_space<vmem>>, vector<1x512xf32>
    tpu.vector_store %arg16[%c13_86, %c0_87], %99 {strides = array<i32>} : memref<16x512xf32, #tpu.memory_space<vmem>>, vector<1x512xf32>,
    %101 = vector.extract_strided_slice %1 {offsets = [0, 43], sizes = [1, 512], strides = [1, 1]} : vector<4x576xf32> to vector<1x512xf32>
    %c14_88 = arith.constant 14 : index
    %c0_89 = arith.constant 0 : index
    %102 = vector.load %arg16[%c14_88, %c0_89] : memref<16x512xf32, #tpu.memory_space<vmem>>, vector<1x512xf32>
    tpu.vector_store %arg16[%c14_88, %c0_89], %101 {strides = array<i32>} : memref<16x512xf32, #tpu.memory_space<vmem>>, vector<1x512xf32>,
    %103 = vector.extract_strided_slice %1 {offsets = [1, 43], sizes = [1, 512], strides = [1, 1]} : vector<4x576xf32> to vector<1x512xf32>
    %c15_90 = arith.constant 15 : index
    %c0_91 = arith.constant 0 : index
    %104 = vector.load %arg16[%c15_90, %c0_91] : memref<16x512xf32, #tpu.memory_space<vmem>>, vector<1x512xf32>
    tpu.vector_store %arg16[%c15_90, %c0_91], %103 {strides = array<i32>} : memref<16x512xf32, #tpu.memory_space<vmem>>, vector<1x512xf32>,
    %c0_92 = arith.constant 0 : index
    %c0_93 = arith.constant 0 : index
    %105 = vector.load %arg4[%c0_92, %c0_93] : memref<32x16xf32, #tpu.memory_space<vmem>>, vector<32x16xf32>
    %c0_94 = arith.constant 0 : index
    %c0_95 = arith.constant 0 : index
    %106 = vector.load %arg16[%c0_94, %c0_95] : memref<16x512xf32, #tpu.memory_space<vmem>>, vector<16x512xf32>
    %cst_96 = arith.constant dense<0.000000e+00> : vector<32x512xf32>
    %107 = tpu.matmul %105, %106, %cst_96 {dimension_numbers = #tpu.dot_dimension_numbers<[1], [0], [0], [1], [0, 0, 1, 1], [], []>} : vector<32x16xf32>, vector<16x512xf32>, vector<32x512xf32> -> vector<32x512xf32>
    %108 = arith.maximumf %72, %107 : vector<32x512xf32>
    %109 = vector.extract_strided_slice %1 {offsets = [3, 0], sizes = [1, 512], strides = [1, 1]} : vector<4x576xf32> to vector<1x512xf32>
    %c0_97 = arith.constant 0 : index
    %c0_98 = arith.constant 0 : index
    %110 = vector.load %arg16[%c0_97, %c0_98] : memref<16x512xf32, #tpu.memory_space<vmem>>, vector<1x512xf32>
    tpu.vector_store %arg16[%c0_97, %c0_98], %109 {strides = array<i32>} : memref<16x512xf32, #tpu.memory_space<vmem>>, vector<1x512xf32>,
    %111 = vector.extract_strided_slice %1 {offsets = [2, 1], sizes = [1, 512], strides = [1, 1]} : vector<4x576xf32> to vector<1x512xf32>
    %c1_99 = arith.constant 1 : index
    %c0_100 = arith.constant 0 : index
    %112 = vector.load %arg16[%c1_99, %c0_100] : memref<16x512xf32, #tpu.memory_space<vmem>>, vector<1x512xf32>
    tpu.vector_store %arg16[%c1_99, %c0_100], %111 {strides = array<i32>} : memref<16x512xf32, #tpu.memory_space<vmem>>, vector<1x512xf32>,
    %113 = vector.extract_strided_slice %1 {offsets = [3, 1], sizes = [1, 512], strides = [1, 1]} : vector<4x576xf32> to vector<1x512xf32>
    %c2_101 = arith.constant 2 : index
    %c0_102 = arith.constant 0 : index
    %114 = vector.load %arg16[%c2_101, %c0_102] : memref<16x512xf32, #tpu.memory_space<vmem>>, vector<1x512xf32>
    tpu.vector_store %arg16[%c2_101, %c0_102], %113 {strides = array<i32>} : memref<16x512xf32, #tpu.memory_space<vmem>>, vector<1x512xf32>,
    %115 = vector.extract_strided_slice %1 {offsets = [2, 2], sizes = [1, 512], strides = [1, 1]} : vector<4x576xf32> to vector<1x512xf32>
    %c3_103 = arith.constant 3 : index
    %c0_104 = arith.constant 0 : index
    %116 = vector.load %arg16[%c3_103, %c0_104] : memref<16x512xf32, #tpu.memory_space<vmem>>, vector<1x512xf32>
    tpu.vector_store %arg16[%c3_103, %c0_104], %115 {strides = array<i32>} : memref<16x512xf32, #tpu.memory_space<vmem>>, vector<1x512xf32>,
    %117 = vector.extract_strided_slice %1 {offsets = [1, 21], sizes = [1, 512], strides = [1, 1]} : vector<4x576xf32> to vector<1x512xf32>
    %c4_105 = arith.constant 4 : index
    %c0_106 = arith.constant 0 : index
    %118 = vector.load %arg16[%c4_105, %c0_106] : memref<16x512xf32, #tpu.memory_space<vmem>>, vector<1x512xf32>
    tpu.vector_store %arg16[%c4_105, %c0_106], %117 {strides = array<i32>} : memref<16x512xf32, #tpu.memory_space<vmem>>, vector<1x512xf32>,
    %119 = vector.extract_strided_slice %1 {offsets = [0, 22], sizes = [1, 512], strides = [1, 1]} : vector<4x576xf32> to vector<1x512xf32>
    %c5_107 = arith.constant 5 : index
    %c0_108 = arith.constant 0 : index
    %120 = vector.load %arg16[%c5_107, %c0_108] : memref<16x512xf32, #tpu.memory_space<vmem>>, vector<1x512xf32>
    tpu.vector_store %arg16[%c5_107, %c0_108], %119 {strides = array<i32>} : memref<16x512xf32, #tpu.memory_space<vmem>>, vector<1x512xf32>,
    %121 = vector.extract_strided_slice %1 {offsets = [1, 22], sizes = [1, 512], strides = [1, 1]} : vector<4x576xf32> to vector<1x512xf32>
    %c6_109 = arith.constant 6 : index
    %c0_110 = arith.constant 0 : index
    %122 = vector.load %arg16[%c6_109, %c0_110] : memref<16x512xf32, #tpu.memory_space<vmem>>, vector<1x512xf32>
    tpu.vector_store %arg16[%c6_109, %c0_110], %121 {strides = array<i32>} : memref<16x512xf32, #tpu.memory_space<vmem>>, vector<1x512xf32>,
    %123 = vector.extract_strided_slice %1 {offsets = [0, 23], sizes = [1, 512], strides = [1, 1]} : vector<4x576xf32> to vector<1x512xf32>
    %c7_111 = arith.constant 7 : index
    %c0_112 = arith.constant 0 : index
    %124 = vector.load %arg16[%c7_111, %c0_112] : memref<16x512xf32, #tpu.memory_space<vmem>>, vector<1x512xf32>
    tpu.vector_store %arg16[%c7_111, %c0_112], %123 {strides = array<i32>} : memref<16x512xf32, #tpu.memory_space<vmem>>, vector<1x512xf32>,
    %125 = vector.extract_strided_slice %1 {offsets = [3, 21], sizes = [1, 512], strides = [1, 1]} : vector<4x576xf32> to vector<1x512xf32>
    %c8_113 = arith.constant 8 : index
    %c0_114 = arith.constant 0 : index
    %126 = vector.load %arg16[%c8_113, %c0_114] : memref<16x512xf32, #tpu.memory_space<vmem>>, vector<1x512xf32>
    tpu.vector_store %arg16[%c8_113, %c0_114], %125 {strides = array<i32>} : memref<16x512xf32, #tpu.memory_space<vmem>>, vector<1x512xf32>,
    %127 = vector.extract_strided_slice %1 {offsets = [2, 22], sizes = [1, 512], strides = [1, 1]} : vector<4x576xf32> to vector<1x512xf32>
    %c9_115 = arith.constant 9 : index
    %c0_116 = arith.constant 0 : index
    %128 = vector.load %arg16[%c9_115, %c0_116] : memref<16x512xf32, #tpu.memory_space<vmem>>, vector<1x512xf32>
    tpu.vector_store %arg16[%c9_115, %c0_116], %127 {strides = array<i32>} : memref<16x512xf32, #tpu.memory_space<vmem>>, vector<1x512xf32>,
    %129 = vector.extract_strided_slice %1 {offsets = [3, 22], sizes = [1, 512], strides = [1, 1]} : vector<4x576xf32> to vector<1x512xf32>
    %c10_117 = arith.constant 10 : index
    %c0_118 = arith.constant 0 : index
    %130 = vector.load %arg16[%c10_117, %c0_118] : memref<16x512xf32, #tpu.memory_space<vmem>>, vector<1x512xf32>
    tpu.vector_store %arg16[%c10_117, %c0_118], %129 {strides = array<i32>} : memref<16x512xf32, #tpu.memory_space<vmem>>, vector<1x512xf32>,
    %131 = vector.extract_strided_slice %1 {offsets = [2, 23], sizes = [1, 512], strides = [1, 1]} : vector<4x576xf32> to vector<1x512xf32>
    %c11_119 = arith.constant 11 : index
    %c0_120 = arith.constant 0 : index
    %132 = vector.load %arg16[%c11_119, %c0_120] : memref<16x512xf32, #tpu.memory_space<vmem>>, vector<1x512xf32>
    tpu.vector_store %arg16[%c11_119, %c0_120], %131 {strides = array<i32>} : memref<16x512xf32, #tpu.memory_space<vmem>>, vector<1x512xf32>,
    %133 = vector.extract_strided_slice %1 {offsets = [1, 42], sizes = [1, 512], strides = [1, 1]} : vector<4x576xf32> to vector<1x512xf32>
    %c12_121 = arith.constant 12 : index
    %c0_122 = arith.constant 0 : index
    %134 = vector.load %arg16[%c12_121, %c0_122] : memref<16x512xf32, #tpu.memory_space<vmem>>, vector<1x512xf32>
    tpu.vector_store %arg16[%c12_121, %c0_122], %133 {strides = array<i32>} : memref<16x512xf32, #tpu.memory_space<vmem>>, vector<1x512xf32>,
    %135 = vector.extract_strided_slice %1 {offsets = [0, 43], sizes = [1, 512], strides = [1, 1]} : vector<4x576xf32> to vector<1x512xf32>
    %c13_123 = arith.constant 13 : index
    %c0_124 = arith.constant 0 : index
    %136 = vector.load %arg16[%c13_123, %c0_124] : memref<16x512xf32, #tpu.memory_space<vmem>>, vector<1x512xf32>
    tpu.vector_store %arg16[%c13_123, %c0_124], %135 {strides = array<i32>} : memref<16x512xf32, #tpu.memory_space<vmem>>, vector<1x512xf32>,
    %137 = vector.extract_strided_slice %1 {offsets = [1, 43], sizes = [1, 512], strides = [1, 1]} : vector<4x576xf32> to vector<1x512xf32>
    %c14_125 = arith.constant 14 : index
    %c0_126 = arith.constant 0 : index
    %138 = vector.load %arg16[%c14_125, %c0_126] : memref<16x512xf32, #tpu.memory_space<vmem>>, vector<1x512xf32>
    tpu.vector_store %arg16[%c14_125, %c0_126], %137 {strides = array<i32>} : memref<16x512xf32, #tpu.memory_space<vmem>>, vector<1x512xf32>,
    %139 = vector.extract_strided_slice %1 {offsets = [0, 44], sizes = [1, 512], strides = [1, 1]} : vector<4x576xf32> to vector<1x512xf32>
    %c15_127 = arith.constant 15 : index
    %c0_128 = arith.constant 0 : index
    %140 = vector.load %arg16[%c15_127, %c0_128] : memref<16x512xf32, #tpu.memory_space<vmem>>, vector<1x512xf32>
    tpu.vector_store %arg16[%c15_127, %c0_128], %139 {strides = array<i32>} : memref<16x512xf32, #tpu.memory_space<vmem>>, vector<1x512xf32>,
    %c0_129 = arith.constant 0 : index
    %c0_130 = arith.constant 0 : index
    %141 = vector.load %arg4[%c0_129, %c0_130] : memref<32x16xf32, #tpu.memory_space<vmem>>, vector<32x16xf32>
    %c0_131 = arith.constant 0 : index
    %c0_132 = arith.constant 0 : index
    %142 = vector.load %arg16[%c0_131, %c0_132] : memref<16x512xf32, #tpu.memory_space<vmem>>, vector<16x512xf32>
    %cst_133 = arith.constant dense<0.000000e+00> : vector<32x512xf32>
    %143 = tpu.matmul %141, %142, %cst_133 {dimension_numbers = #tpu.dot_dimension_numbers<[1], [0], [0], [1], [0, 0, 1, 1], [], []>} : vector<32x16xf32>, vector<16x512xf32>, vector<32x512xf32> -> vector<32x512xf32>
    %144 = arith.maximumf %108, %143 : vector<32x512xf32>
    %c0_134 = arith.constant 0 : index
    %c0_135 = arith.constant 0 : index
    %145 = vector.load %arg5[%c0_134, %c0_135] : memref<32x1xf32, #tpu.memory_space<vmem>>, vector<32x1xf32>
    %146 = vector.broadcast %145 : vector<32x1xf32> to vector<32x512xf32>
    %147 = arith.addf %144, %146 : vector<32x512xf32>
    %cst_136 = arith.constant 0.000000e+00 : f32
    %148 = vector.broadcast %cst_136 : f32 to vector<32x512xf32>
    %149 = arith.maximumf %147, %148 : vector<32x512xf32>
    %cst_137 = arith.constant 0.000000e+00 : f32
    %150 = vector.broadcast %cst_137 : f32 to vector<32x640xf32>
    %c0_138 = arith.constant 0 : index
    %c0_139 = arith.constant 0 : index
    %151 = vector.load %arg17[%c0_138, %c0_139] : memref<32x640xf32, #tpu.memory_space<vmem>>, vector<32x640xf32>
    tpu.vector_store %arg17[%c0_138, %c0_139], %150 {strides = array<i32>} : memref<32x640xf32, #tpu.memory_space<vmem>>, vector<32x640xf32>,
    %c0_140 = arith.constant 0 : index
    %c0_141 = arith.constant 0 : index
    %152 = vector.load %arg3[%c0_140, %c0_141] : memref<1x512xf32, #tpu.memory_space<vmem>>, vector<1x512xf32>
    %153 = vector.broadcast %152 : vector<1x512xf32> to vector<32x512xf32>
    %154 = arith.mulf %149, %153 : vector<32x512xf32>
    %c0_142 = arith.constant 0 : index
    %c22 = arith.constant 22 : index
    %155 = vector.load %arg17[%c0_142, %c22] : memref<32x640xf32, #tpu.memory_space<vmem>>, vector<32x512xf32>
    tpu.vector_store %arg17[%c0_142, %c22], %154 {strides = array<i32>} : memref<32x640xf32, #tpu.memory_space<vmem>>, vector<32x512xf32>,
    %c0_143 = arith.constant 0 : index
    %c0_144 = arith.constant 0 : index
    %156 = vector.load %arg17[%c0_143, %c0_144] : memref<32x640xf32, #tpu.memory_space<vmem>>, vector<32x512xf32>
    %c0_145 = arith.constant 0 : index
    %c0_146 = arith.constant 0 : index
    %c0_147 = arith.constant 0 : index
    %157 = vector.load %arg6[%c0_145, %c0_146, %c0_147] : memref<16x32x32xf32, #tpu.memory_space<vmem>>, vector<1x32x32xf32>
    %158 = vector.shape_cast %157 : vector<1x32x32xf32> to vector<32x32xf32>
    %cst_148 = arith.constant dense<0.000000e+00> : vector<32x512xf32>
    %159 = tpu.matmul %158, %156, %cst_148 {dimension_numbers = #tpu.dot_dimension_numbers<[1], [0], [0], [1], [0, 0, 1, 1], [], []>} : vector<32x32xf32>, vector<32x512xf32>, vector<32x512xf32> -> vector<32x512xf32>
    %c0_149 = arith.constant 0 : index
    %c1_150 = arith.constant 1 : index
    %160 = vector.load %arg17[%c0_149, %c1_150] : memref<32x640xf32, #tpu.memory_space<vmem>>, vector<32x512xf32>
    %c1_151 = arith.constant 1 : index
    %c0_152 = arith.constant 0 : index
    %c0_153 = arith.constant 0 : index
    %161 = vector.load %arg6[%c1_151, %c0_152, %c0_153] : memref<16x32x32xf32, #tpu.memory_space<vmem>>, vector<1x32x32xf32>
    %162 = vector.shape_cast %161 : vector<1x32x32xf32> to vector<32x32xf32>
    %cst_154 = arith.constant dense<0.000000e+00> : vector<32x512xf32>
    %163 = tpu.matmul %162, %160, %cst_154 {dimension_numbers = #tpu.dot_dimension_numbers<[1], [0], [0], [1], [0, 0, 1, 1], [], []>} : vector<32x32xf32>, vector<32x512xf32>, vector<32x512xf32> -> vector<32x512xf32>
    %164 = arith.addf %159, %163 : vector<32x512xf32>
    %c0_155 = arith.constant 0 : index
    %c2_156 = arith.constant 2 : index
    %165 = vector.load %arg17[%c0_155, %c2_156] : memref<32x640xf32, #tpu.memory_space<vmem>>, vector<32x512xf32>
    %c2_157 = arith.constant 2 : index
    %c0_158 = arith.constant 0 : index
    %c0_159 = arith.constant 0 : index
    %166 = vector.load %arg6[%c2_157, %c0_158, %c0_159] : memref<16x32x32xf32, #tpu.memory_space<vmem>>, vector<1x32x32xf32>
    %167 = vector.shape_cast %166 : vector<1x32x32xf32> to vector<32x32xf32>
    %cst_160 = arith.constant dense<0.000000e+00> : vector<32x512xf32>
    %168 = tpu.matmul %167, %165, %cst_160 {dimension_numbers = #tpu.dot_dimension_numbers<[1], [0], [0], [1], [0, 0, 1, 1], [], []>} : vector<32x32xf32>, vector<32x512xf32>, vector<32x512xf32> -> vector<32x512xf32>
    %169 = arith.addf %164, %168 : vector<32x512xf32>
    %c0_161 = arith.constant 0 : index
    %c3_162 = arith.constant 3 : index
    %170 = vector.load %arg17[%c0_161, %c3_162] : memref<32x640xf32, #tpu.memory_space<vmem>>, vector<32x512xf32>
    %c3_163 = arith.constant 3 : index
    %c0_164 = arith.constant 0 : index
    %c0_165 = arith.constant 0 : index
    %171 = vector.load %arg6[%c3_163, %c0_164, %c0_165] : memref<16x32x32xf32, #tpu.memory_space<vmem>>, vector<1x32x32xf32>
    %172 = vector.shape_cast %171 : vector<1x32x32xf32> to vector<32x32xf32>
    %cst_166 = arith.constant dense<0.000000e+00> : vector<32x512xf32>
    %173 = tpu.matmul %172, %170, %cst_166 {dimension_numbers = #tpu.dot_dimension_numbers<[1], [0], [0], [1], [0, 0, 1, 1], [], []>} : vector<32x32xf32>, vector<32x512xf32>, vector<32x512xf32> -> vector<32x512xf32>
    %174 = arith.addf %169, %173 : vector<32x512xf32>
    %c0_167 = arith.constant 0 : index
    %c21 = arith.constant 21 : index
    %175 = vector.load %arg17[%c0_167, %c21] : memref<32x640xf32, #tpu.memory_space<vmem>>, vector<32x512xf32>
    %c4_168 = arith.constant 4 : index
    %c0_169 = arith.constant 0 : index
    %c0_170 = arith.constant 0 : index
    %176 = vector.load %arg6[%c4_168, %c0_169, %c0_170] : memref<16x32x32xf32, #tpu.memory_space<vmem>>, vector<1x32x32xf32>
    %177 = vector.shape_cast %176 : vector<1x32x32xf32> to vector<32x32xf32>
    %cst_171 = arith.constant dense<0.000000e+00> : vector<32x512xf32>
    %178 = tpu.matmul %177, %175, %cst_171 {dimension_numbers = #tpu.dot_dimension_numbers<[1], [0], [0], [1], [0, 0, 1, 1], [], []>} : vector<32x32xf32>, vector<32x512xf32>, vector<32x512xf32> -> vector<32x512xf32>
    %179 = arith.addf %174, %178 : vector<32x512xf32>
    %c0_172 = arith.constant 0 : index
    %c22_173 = arith.constant 22 : index
    %180 = vector.load %arg17[%c0_172, %c22_173] : memref<32x640xf32, #tpu.memory_space<vmem>>, vector<32x512xf32>
    %c5_174 = arith.constant 5 : index
    %c0_175 = arith.constant 0 : index
    %c0_176 = arith.constant 0 : index
    %181 = vector.load %arg6[%c5_174, %c0_175, %c0_176] : memref<16x32x32xf32, #tpu.memory_space<vmem>>, vector<1x32x32xf32>
    %182 = vector.shape_cast %181 : vector<1x32x32xf32> to vector<32x32xf32>
    %cst_177 = arith.constant dense<0.000000e+00> : vector<32x512xf32>
    %183 = tpu.matmul %182, %180, %cst_177 {dimension_numbers = #tpu.dot_dimension_numbers<[1], [0], [0], [1], [0, 0, 1, 1], [], []>} : vector<32x32xf32>, vector<32x512xf32>, vector<32x512xf32> -> vector<32x512xf32>
    %184 = arith.addf %179, %183 : vector<32x512xf32>
    %c0_178 = arith.constant 0 : index
    %c23 = arith.constant 23 : index
    %185 = vector.load %arg17[%c0_178, %c23] : memref<32x640xf32, #tpu.memory_space<vmem>>, vector<32x512xf32>
    %c6_179 = arith.constant 6 : index
    %c0_180 = arith.constant 0 : index
    %c0_181 = arith.constant 0 : index
    %186 = vector.load %arg6[%c6_179, %c0_180, %c0_181] : memref<16x32x32xf32, #tpu.memory_space<vmem>>, vector<1x32x32xf32>
    %187 = vector.shape_cast %186 : vector<1x32x32xf32> to vector<32x32xf32>
    %cst_182 = arith.constant dense<0.000000e+00> : vector<32x512xf32>
    %188 = tpu.matmul %187, %185, %cst_182 {dimension_numbers = #tpu.dot_dimension_numbers<[1], [0], [0], [1], [0, 0, 1, 1], [], []>} : vector<32x32xf32>, vector<32x512xf32>, vector<32x512xf32> -> vector<32x512xf32>
    %189 = arith.addf %184, %188 : vector<32x512xf32>
    %c0_183 = arith.constant 0 : index
    %c24 = arith.constant 24 : index
    %190 = vector.load %arg17[%c0_183, %c24] : memref<32x640xf32, #tpu.memory_space<vmem>>, vector<32x512xf32>
    %c7_184 = arith.constant 7 : index
    %c0_185 = arith.constant 0 : index
    %c0_186 = arith.constant 0 : index
    %191 = vector.load %arg6[%c7_184, %c0_185, %c0_186] : memref<16x32x32xf32, #tpu.memory_space<vmem>>, vector<1x32x32xf32>
    %192 = vector.shape_cast %191 : vector<1x32x32xf32> to vector<32x32xf32>
    %cst_187 = arith.constant dense<0.000000e+00> : vector<32x512xf32>
    %193 = tpu.matmul %192, %190, %cst_187 {dimension_numbers = #tpu.dot_dimension_numbers<[1], [0], [0], [1], [0, 0, 1, 1], [], []>} : vector<32x32xf32>, vector<32x512xf32>, vector<32x512xf32> -> vector<32x512xf32>
    %194 = arith.addf %189, %193 : vector<32x512xf32>
    %c0_188 = arith.constant 0 : index
    %c42 = arith.constant 42 : index
    %195 = vector.load %arg17[%c0_188, %c42] : memref<32x640xf32, #tpu.memory_space<vmem>>, vector<32x512xf32>
    %c8_189 = arith.constant 8 : index
    %c0_190 = arith.constant 0 : index
    %c0_191 = arith.constant 0 : index
    %196 = vector.load %arg6[%c8_189, %c0_190, %c0_191] : memref<16x32x32xf32, #tpu.memory_space<vmem>>, vector<1x32x32xf32>
    %197 = vector.shape_cast %196 : vector<1x32x32xf32> to vector<32x32xf32>
    %cst_192 = arith.constant dense<0.000000e+00> : vector<32x512xf32>
    %198 = tpu.matmul %197, %195, %cst_192 {dimension_numbers = #tpu.dot_dimension_numbers<[1], [0], [0], [1], [0, 0, 1, 1], [], []>} : vector<32x32xf32>, vector<32x512xf32>, vector<32x512xf32> -> vector<32x512xf32>
    %199 = arith.addf %194, %198 : vector<32x512xf32>
    %c0_193 = arith.constant 0 : index
    %c43 = arith.constant 43 : index
    %200 = vector.load %arg17[%c0_193, %c43] : memref<32x640xf32, #tpu.memory_space<vmem>>, vector<32x512xf32>
    %c9_194 = arith.constant 9 : index
    %c0_195 = arith.constant 0 : index
    %c0_196 = arith.constant 0 : index
    %201 = vector.load %arg6[%c9_194, %c0_195, %c0_196] : memref<16x32x32xf32, #tpu.memory_space<vmem>>, vector<1x32x32xf32>
    %202 = vector.shape_cast %201 : vector<1x32x32xf32> to vector<32x32xf32>
    %cst_197 = arith.constant dense<0.000000e+00> : vector<32x512xf32>
    %203 = tpu.matmul %202, %200, %cst_197 {dimension_numbers = #tpu.dot_dimension_numbers<[1], [0], [0], [1], [0, 0, 1, 1], [], []>} : vector<32x32xf32>, vector<32x512xf32>, vector<32x512xf32> -> vector<32x512xf32>
    %204 = arith.addf %199, %203 : vector<32x512xf32>
    %c0_198 = arith.constant 0 : index
    %c44 = arith.constant 44 : index
    %205 = vector.load %arg17[%c0_198, %c44] : memref<32x640xf32, #tpu.memory_space<vmem>>, vector<32x512xf32>
    %c10_199 = arith.constant 10 : index
    %c0_200 = arith.constant 0 : index
    %c0_201 = arith.constant 0 : index
    %206 = vector.load %arg6[%c10_199, %c0_200, %c0_201] : memref<16x32x32xf32, #tpu.memory_space<vmem>>, vector<1x32x32xf32>
    %207 = vector.shape_cast %206 : vector<1x32x32xf32> to vector<32x32xf32>
    %cst_202 = arith.constant dense<0.000000e+00> : vector<32x512xf32>
    %208 = tpu.matmul %207, %205, %cst_202 {dimension_numbers = #tpu.dot_dimension_numbers<[1], [0], [0], [1], [0, 0, 1, 1], [], []>} : vector<32x32xf32>, vector<32x512xf32>, vector<32x512xf32> -> vector<32x512xf32>
    %209 = arith.addf %204, %208 : vector<32x512xf32>
    %c0_203 = arith.constant 0 : index
    %c45 = arith.constant 45 : index
    %210 = vector.load %arg17[%c0_203, %c45] : memref<32x640xf32, #tpu.memory_space<vmem>>, vector<32x512xf32>
    %c11_204 = arith.constant 11 : index
    %c0_205 = arith.constant 0 : index
    %c0_206 = arith.constant 0 : index
    %211 = vector.load %arg6[%c11_204, %c0_205, %c0_206] : memref<16x32x32xf32, #tpu.memory_space<vmem>>, vector<1x32x32xf32>
    %212 = vector.shape_cast %211 : vector<1x32x32xf32> to vector<32x32xf32>
    %cst_207 = arith.constant dense<0.000000e+00> : vector<32x512xf32>
    %213 = tpu.matmul %212, %210, %cst_207 {dimension_numbers = #tpu.dot_dimension_numbers<[1], [0], [0], [1], [0, 0, 1, 1], [], []>} : vector<32x32xf32>, vector<32x512xf32>, vector<32x512xf32> -> vector<32x512xf32>
    %214 = arith.addf %209, %213 : vector<32x512xf32>
    %c0_208 = arith.constant 0 : index
    %c63 = arith.constant 63 : index
    %215 = vector.load %arg17[%c0_208, %c63] : memref<32x640xf32, #tpu.memory_space<vmem>>, vector<32x512xf32>
    %c12_209 = arith.constant 12 : index
    %c0_210 = arith.constant 0 : index
    %c0_211 = arith.constant 0 : index
    %216 = vector.load %arg6[%c12_209, %c0_210, %c0_211] : memref<16x32x32xf32, #tpu.memory_space<vmem>>, vector<1x32x32xf32>
    %217 = vector.shape_cast %216 : vector<1x32x32xf32> to vector<32x32xf32>
    %cst_212 = arith.constant dense<0.000000e+00> : vector<32x512xf32>
    %218 = tpu.matmul %217, %215, %cst_212 {dimension_numbers = #tpu.dot_dimension_numbers<[1], [0], [0], [1], [0, 0, 1, 1], [], []>} : vector<32x32xf32>, vector<32x512xf32>, vector<32x512xf32> -> vector<32x512xf32>
    %219 = arith.addf %214, %218 : vector<32x512xf32>
    %c0_213 = arith.constant 0 : index
    %c64 = arith.constant 64 : index
    %220 = vector.load %arg17[%c0_213, %c64] : memref<32x640xf32, #tpu.memory_space<vmem>>, vector<32x512xf32>
    %c13_214 = arith.constant 13 : index
    %c0_215 = arith.constant 0 : index
    %c0_216 = arith.constant 0 : index
    %221 = vector.load %arg6[%c13_214, %c0_215, %c0_216] : memref<16x32x32xf32, #tpu.memory_space<vmem>>, vector<1x32x32xf32>
    %222 = vector.shape_cast %221 : vector<1x32x32xf32> to vector<32x32xf32>
    %cst_217 = arith.constant dense<0.000000e+00> : vector<32x512xf32>
    %223 = tpu.matmul %222, %220, %cst_217 {dimension_numbers = #tpu.dot_dimension_numbers<[1], [0], [0], [1], [0, 0, 1, 1], [], []>} : vector<32x32xf32>, vector<32x512xf32>, vector<32x512xf32> -> vector<32x512xf32>
    %224 = arith.addf %219, %223 : vector<32x512xf32>
    %c0_218 = arith.constant 0 : index
    %c65 = arith.constant 65 : index
    %225 = vector.load %arg17[%c0_218, %c65] : memref<32x640xf32, #tpu.memory_space<vmem>>, vector<32x512xf32>
    %c14_219 = arith.constant 14 : index
    %c0_220 = arith.constant 0 : index
    %c0_221 = arith.constant 0 : index
    %226 = vector.load %arg6[%c14_219, %c0_220, %c0_221] : memref<16x32x32xf32, #tpu.memory_space<vmem>>, vector<1x32x32xf32>
    %227 = vector.shape_cast %226 : vector<1x32x32xf32> to vector<32x32xf32>
    %cst_222 = arith.constant dense<0.000000e+00> : vector<32x512xf32>
    %228 = tpu.matmul %227, %225, %cst_222 {dimension_numbers = #tpu.dot_dimension_numbers<[1], [0], [0], [1], [0, 0, 1, 1], [], []>} : vector<32x32xf32>, vector<32x512xf32>, vector<32x512xf32> -> vector<32x512xf32>
    %229 = arith.addf %224, %228 : vector<32x512xf32>
    %c0_223 = arith.constant 0 : index
    %c66 = arith.constant 66 : index
    %230 = vector.load %arg17[%c0_223, %c66] : memref<32x640xf32, #tpu.memory_space<vmem>>, vector<32x512xf32>
    %c15_224 = arith.constant 15 : index
    %c0_225 = arith.constant 0 : index
    %c0_226 = arith.constant 0 : index
    %231 = vector.load %arg6[%c15_224, %c0_225, %c0_226] : memref<16x32x32xf32, #tpu.memory_space<vmem>>, vector<1x32x32xf32>
    %232 = vector.shape_cast %231 : vector<1x32x32xf32> to vector<32x32xf32>
    %cst_227 = arith.constant dense<0.000000e+00> : vector<32x512xf32>
    %233 = tpu.matmul %232, %230, %cst_227 {dimension_numbers = #tpu.dot_dimension_numbers<[1], [0], [0], [1], [0, 0, 1, 1], [], []>} : vector<32x32xf32>, vector<32x512xf32>, vector<32x512xf32> -> vector<32x512xf32>
    %234 = arith.addf %229, %233 : vector<32x512xf32>
    %c0_228 = arith.constant 0 : index
    %c0_229 = arith.constant 0 : index
    %235 = vector.load %arg7[%c0_228, %c0_229] : memref<32x1xf32, #tpu.memory_space<vmem>>, vector<32x1xf32>
    %236 = vector.broadcast %235 : vector<32x1xf32> to vector<32x512xf32>
    %237 = arith.addf %234, %236 : vector<32x512xf32>
    %cst_230 = arith.constant 0.000000e+00 : f32
    %238 = vector.broadcast %cst_230 : f32 to vector<32x512xf32>
    %239 = arith.maximumf %237, %238 : vector<32x512xf32>
    %240 = vector.extract_strided_slice %239 {offsets = [0, 0], sizes = [16, 512], strides = [1, 1]} : vector<32x512xf32> to vector<16x512xf32>
    %241 = vector.extract_strided_slice %239 {offsets = [16, 0], sizes = [16, 512], strides = [1, 1]} : vector<32x512xf32> to vector<16x512xf32>
    %242 = arith.maximumf %240, %241 : vector<16x512xf32>
    %243 = vector.extract_strided_slice %242 {offsets = [0, 0], sizes = [8, 512], strides = [1, 1]} : vector<16x512xf32> to vector<8x512xf32>
    %244 = vector.extract_strided_slice %242 {offsets = [8, 0], sizes = [8, 512], strides = [1, 1]} : vector<16x512xf32> to vector<8x512xf32>
    %245 = arith.maximumf %243, %244 : vector<8x512xf32>
    %246 = vector.extract_strided_slice %245 {offsets = [0, 0], sizes = [4, 512], strides = [1, 1]} : vector<8x512xf32> to vector<4x512xf32>
    %247 = vector.extract_strided_slice %245 {offsets = [4, 0], sizes = [4, 512], strides = [1, 1]} : vector<8x512xf32> to vector<4x512xf32>
    %248 = arith.maximumf %246, %247 : vector<4x512xf32>
    %249 = vector.extract_strided_slice %248 {offsets = [0, 0], sizes = [2, 512], strides = [1, 1]} : vector<4x512xf32> to vector<2x512xf32>
    %250 = vector.extract_strided_slice %248 {offsets = [2, 0], sizes = [2, 512], strides = [1, 1]} : vector<4x512xf32> to vector<2x512xf32>
    %251 = arith.maximumf %249, %250 : vector<2x512xf32>
    %252 = vector.extract_strided_slice %251 {offsets = [0, 0], sizes = [1, 512], strides = [1, 1]} : vector<2x512xf32> to vector<1x512xf32>
    %253 = vector.extract_strided_slice %251 {offsets = [1, 0], sizes = [1, 512], strides = [1, 1]} : vector<2x512xf32> to vector<1x512xf32>
    %254 = arith.maximumf %252, %253 : vector<1x512xf32>
    %255 = vector.broadcast %254 : vector<1x512xf32> to vector<32x512xf32>
    %256 = arith.subf %239, %255 : vector<32x512xf32>
    %257 = math.exp %256 : vector<32x512xf32>
    %258 = vector.extract_strided_slice %257 {offsets = [0, 0], sizes = [16, 512], strides = [1, 1]} : vector<32x512xf32> to vector<16x512xf32>
    %259 = vector.extract_strided_slice %257 {offsets = [16, 0], sizes = [16, 512], strides = [1, 1]} : vector<32x512xf32> to vector<16x512xf32>
    %260 = arith.addf %258, %259 : vector<16x512xf32>
    %261 = vector.extract_strided_slice %260 {offsets = [0, 0], sizes = [8, 512], strides = [1, 1]} : vector<16x512xf32> to vector<8x512xf32>
    %262 = vector.extract_strided_slice %260 {offsets = [8, 0], sizes = [8, 512], strides = [1, 1]} : vector<16x512xf32> to vector<8x512xf32>
    %263 = arith.addf %261, %262 : vector<8x512xf32>
    %264 = vector.extract_strided_slice %263 {offsets = [0, 0], sizes = [4, 512], strides = [1, 1]} : vector<8x512xf32> to vector<4x512xf32>
    %265 = vector.extract_strided_slice %263 {offsets = [4, 0], sizes = [4, 512], strides = [1, 1]} : vector<8x512xf32> to vector<4x512xf32>
    %266 = arith.addf %264, %265 : vector<4x512xf32>
    %267 = vector.extract_strided_slice %266 {offsets = [0, 0], sizes = [2, 512], strides = [1, 1]} : vector<4x512xf32> to vector<2x512xf32>
    %268 = vector.extract_strided_slice %266 {offsets = [2, 0], sizes = [2, 512], strides = [1, 1]} : vector<4x512xf32> to vector<2x512xf32>
    %269 = arith.addf %267, %268 : vector<2x512xf32>
    %270 = vector.extract_strided_slice %269 {offsets = [0, 0], sizes = [1, 512], strides = [1, 1]} : vector<2x512xf32> to vector<1x512xf32>
    %271 = vector.extract_strided_slice %269 {offsets = [1, 0], sizes = [1, 512], strides = [1, 1]} : vector<2x512xf32> to vector<1x512xf32>
    %272 = arith.addf %270, %271 : vector<1x512xf32>
    %273 = tpu.reciprocal %272 : vector<1x512xf32> -> vector<1x512xf32>
    %274 = vector.broadcast %273 : vector<1x512xf32> to vector<32x512xf32>
    %275 = arith.mulf %257, %274 : vector<32x512xf32>
    %c0_231 = arith.constant 0 : index
    %c0_232 = arith.constant 0 : index
    %c0_233 = arith.constant 0 : index
    %276 = vector.load %arg18[%c0_231, %c0_232, %c0_233] : memref<32x1x512xf32, #tpu.memory_space<vmem>>, vector<32x1x512xf32>
    %277 = vector.shape_cast %276 : vector<32x1x512xf32> to vector<32x512xf32>
    %278 = vector.shape_cast %275 : vector<32x512xf32> to vector<32x1x512xf32>
    tpu.vector_store %arg18[%c0_231, %c0_232, %c0_233], %278 {strides = array<i32>} : memref<32x1x512xf32, #tpu.memory_space<vmem>>, vector<32x1x512xf32>,
    %cst_234 = arith.constant 0.000000e+00 : f32
    %279 = vector.broadcast %cst_234 : f32 to vector<1x12xf32>
    %c0_235 = arith.constant 0 : index
    %c0_236 = arith.constant 0 : index
    %c0_237 = arith.constant 0 : index
    %280 = vector.load %arg18[%c0_235, %c0_236, %c0_237] : memref<32x1x512xf32, #tpu.memory_space<vmem>>, vector<1x1x512xf32>
    %281 = vector.shape_cast %280 : vector<1x1x512xf32> to vector<1x512xf32>
    %c0_238 = arith.constant 0 : index
    %c0_239 = arith.constant 0 : index
    %c0_240 = arith.constant 0 : index
    %282 = vector.load %arg8[%c0_238, %c0_239, %c0_240] : memref<32x12x512xf32, #tpu.memory_space<vmem>>, vector<1x12x512xf32>
    %283 = vector.shape_cast %282 : vector<1x12x512xf32> to vector<12x512xf32>
    %cst_241 = arith.constant dense<0.000000e+00> : vector<1x12xf32>
    %284 = tpu.matmul %281, %283, %cst_241 {dimension_numbers = #tpu.dot_dimension_numbers<[1], [1], [0], [0], [0, 0, 1, 0], [], []>} : vector<1x512xf32>, vector<12x512xf32>, vector<1x12xf32> -> vector<1x12xf32>
    %285 = arith.addf %279, %284 : vector<1x12xf32>
    %c1_242 = arith.constant 1 : index
    %c0_243 = arith.constant 0 : index
    %c0_244 = arith.constant 0 : index
    %286 = vector.load %arg18[%c1_242, %c0_243, %c0_244] : memref<32x1x512xf32, #tpu.memory_space<vmem>>, vector<1x1x512xf32>
    %287 = vector.shape_cast %286 : vector<1x1x512xf32> to vector<1x512xf32>
    %c1_245 = arith.constant 1 : index
    %c0_246 = arith.constant 0 : index
    %c0_247 = arith.constant 0 : index
    %288 = vector.load %arg8[%c1_245, %c0_246, %c0_247] : memref<32x12x512xf32, #tpu.memory_space<vmem>>, vector<1x12x512xf32>
    %289 = vector.shape_cast %288 : vector<1x12x512xf32> to vector<12x512xf32>
    %cst_248 = arith.constant dense<0.000000e+00> : vector<1x12xf32>
    %290 = tpu.matmul %287, %289, %cst_248 {dimension_numbers = #tpu.dot_dimension_numbers<[1], [1], [0], [0], [0, 0, 1, 0], [], []>} : vector<1x512xf32>, vector<12x512xf32>, vector<1x12xf32> -> vector<1x12xf32>
    %291 = arith.addf %285, %290 : vector<1x12xf32>
    %c2_249 = arith.constant 2 : index
    %c0_250 = arith.constant 0 : index
    %c0_251 = arith.constant 0 : index
    %292 = vector.load %arg18[%c2_249, %c0_250, %c0_251] : memref<32x1x512xf32, #tpu.memory_space<vmem>>, vector<1x1x512xf32>
    %293 = vector.shape_cast %292 : vector<1x1x512xf32> to vector<1x512xf32>
    %c2_252 = arith.constant 2 : index
    %c0_253 = arith.constant 0 : index
    %c0_254 = arith.constant 0 : index
    %294 = vector.load %arg8[%c2_252, %c0_253, %c0_254] : memref<32x12x512xf32, #tpu.memory_space<vmem>>, vector<1x12x512xf32>
    %295 = vector.shape_cast %294 : vector<1x12x512xf32> to vector<12x512xf32>
    %cst_255 = arith.constant dense<0.000000e+00> : vector<1x12xf32>
    %296 = tpu.matmul %293, %295, %cst_255 {dimension_numbers = #tpu.dot_dimension_numbers<[1], [1], [0], [0], [0, 0, 1, 0], [], []>} : vector<1x512xf32>, vector<12x512xf32>, vector<1x12xf32> -> vector<1x12xf32>
    %297 = arith.addf %291, %296 : vector<1x12xf32>
    %c3_256 = arith.constant 3 : index
    %c0_257 = arith.constant 0 : index
    %c0_258 = arith.constant 0 : index
    %298 = vector.load %arg18[%c3_256, %c0_257, %c0_258] : memref<32x1x512xf32, #tpu.memory_space<vmem>>, vector<1x1x512xf32>
    %299 = vector.shape_cast %298 : vector<1x1x512xf32> to vector<1x512xf32>
    %c3_259 = arith.constant 3 : index
    %c0_260 = arith.constant 0 : index
    %c0_261 = arith.constant 0 : index
    %300 = vector.load %arg8[%c3_259, %c0_260, %c0_261] : memref<32x12x512xf32, #tpu.memory_space<vmem>>, vector<1x12x512xf32>
    %301 = vector.shape_cast %300 : vector<1x12x512xf32> to vector<12x512xf32>
    %cst_262 = arith.constant dense<0.000000e+00> : vector<1x12xf32>
    %302 = tpu.matmul %299, %301, %cst_262 {dimension_numbers = #tpu.dot_dimension_numbers<[1], [1], [0], [0], [0, 0, 1, 0], [], []>} : vector<1x512xf32>, vector<12x512xf32>, vector<1x12xf32> -> vector<1x12xf32>
    %303 = arith.addf %297, %302 : vector<1x12xf32>
    %c4_263 = arith.constant 4 : index
    %c0_264 = arith.constant 0 : index
    %c0_265 = arith.constant 0 : index
    %304 = vector.load %arg18[%c4_263, %c0_264, %c0_265] : memref<32x1x512xf32, #tpu.memory_space<vmem>>, vector<1x1x512xf32>
    %305 = vector.shape_cast %304 : vector<1x1x512xf32> to vector<1x512xf32>
    %c4_266 = arith.constant 4 : index
    %c0_267 = arith.constant 0 : index
    %c0_268 = arith.constant 0 : index
    %306 = vector.load %arg8[%c4_266, %c0_267, %c0_268] : memref<32x12x512xf32, #tpu.memory_space<vmem>>, vector<1x12x512xf32>
    %307 = vector.shape_cast %306 : vector<1x12x512xf32> to vector<12x512xf32>
    %cst_269 = arith.constant dense<0.000000e+00> : vector<1x12xf32>
    %308 = tpu.matmul %305, %307, %cst_269 {dimension_numbers = #tpu.dot_dimension_numbers<[1], [1], [0], [0], [0, 0, 1, 0], [], []>} : vector<1x512xf32>, vector<12x512xf32>, vector<1x12xf32> -> vector<1x12xf32>
    %309 = arith.addf %303, %308 : vector<1x12xf32>
    %c5_270 = arith.constant 5 : index
    %c0_271 = arith.constant 0 : index
    %c0_272 = arith.constant 0 : index
    %310 = vector.load %arg18[%c5_270, %c0_271, %c0_272] : memref<32x1x512xf32, #tpu.memory_space<vmem>>, vector<1x1x512xf32>
    %311 = vector.shape_cast %310 : vector<1x1x512xf32> to vector<1x512xf32>
    %c5_273 = arith.constant 5 : index
    %c0_274 = arith.constant 0 : index
    %c0_275 = arith.constant 0 : index
    %312 = vector.load %arg8[%c5_273, %c0_274, %c0_275] : memref<32x12x512xf32, #tpu.memory_space<vmem>>, vector<1x12x512xf32>
    %313 = vector.shape_cast %312 : vector<1x12x512xf32> to vector<12x512xf32>
    %cst_276 = arith.constant dense<0.000000e+00> : vector<1x12xf32>
    %314 = tpu.matmul %311, %313, %cst_276 {dimension_numbers = #tpu.dot_dimension_numbers<[1], [1], [0], [0], [0, 0, 1, 0], [], []>} : vector<1x512xf32>, vector<12x512xf32>, vector<1x12xf32> -> vector<1x12xf32>
    %315 = arith.addf %309, %314 : vector<1x12xf32>
    %c6_277 = arith.constant 6 : index
    %c0_278 = arith.constant 0 : index
    %c0_279 = arith.constant 0 : index
    %316 = vector.load %arg18[%c6_277, %c0_278, %c0_279] : memref<32x1x512xf32, #tpu.memory_space<vmem>>, vector<1x1x512xf32>
    %317 = vector.shape_cast %316 : vector<1x1x512xf32> to vector<1x512xf32>
    %c6_280 = arith.constant 6 : index
    %c0_281 = arith.constant 0 : index
    %c0_282 = arith.constant 0 : index
    %318 = vector.load %arg8[%c6_280, %c0_281, %c0_282] : memref<32x12x512xf32, #tpu.memory_space<vmem>>, vector<1x12x512xf32>
    %319 = vector.shape_cast %318 : vector<1x12x512xf32> to vector<12x512xf32>
    %cst_283 = arith.constant dense<0.000000e+00> : vector<1x12xf32>
    %320 = tpu.matmul %317, %319, %cst_283 {dimension_numbers = #tpu.dot_dimension_numbers<[1], [1], [0], [0], [0, 0, 1, 0], [], []>} : vector<1x512xf32>, vector<12x512xf32>, vector<1x12xf32> -> vector<1x12xf32>
    %321 = arith.addf %315, %320 : vector<1x12xf32>
    %c7_284 = arith.constant 7 : index
    %c0_285 = arith.constant 0 : index
    %c0_286 = arith.constant 0 : index
    %322 = vector.load %arg18[%c7_284, %c0_285, %c0_286] : memref<32x1x512xf32, #tpu.memory_space<vmem>>, vector<1x1x512xf32>
    %323 = vector.shape_cast %322 : vector<1x1x512xf32> to vector<1x512xf32>
    %c7_287 = arith.constant 7 : index
    %c0_288 = arith.constant 0 : index
    %c0_289 = arith.constant 0 : index
    %324 = vector.load %arg8[%c7_287, %c0_288, %c0_289] : memref<32x12x512xf32, #tpu.memory_space<vmem>>, vector<1x12x512xf32>
    %325 = vector.shape_cast %324 : vector<1x12x512xf32> to vector<12x512xf32>
    %cst_290 = arith.constant dense<0.000000e+00> : vector<1x12xf32>
    %326 = tpu.matmul %323, %325, %cst_290 {dimension_numbers = #tpu.dot_dimension_numbers<[1], [1], [0], [0], [0, 0, 1, 0], [], []>} : vector<1x512xf32>, vector<12x512xf32>, vector<1x12xf32> -> vector<1x12xf32>
    %327 = arith.addf %321, %326 : vector<1x12xf32>
    %c8_291 = arith.constant 8 : index
    %c0_292 = arith.constant 0 : index
    %c0_293 = arith.constant 0 : index
    %328 = vector.load %arg18[%c8_291, %c0_292, %c0_293] : memref<32x1x512xf32, #tpu.memory_space<vmem>>, vector<1x1x512xf32>
    %329 = vector.shape_cast %328 : vector<1x1x512xf32> to vector<1x512xf32>
    %c8_294 = arith.constant 8 : index
    %c0_295 = arith.constant 0 : index
    %c0_296 = arith.constant 0 : index
    %330 = vector.load %arg8[%c8_294, %c0_295, %c0_296] : memref<32x12x512xf32, #tpu.memory_space<vmem>>, vector<1x12x512xf32>
    %331 = vector.shape_cast %330 : vector<1x12x512xf32> to vector<12x512xf32>
    %cst_297 = arith.constant dense<0.000000e+00> : vector<1x12xf32>
    %332 = tpu.matmul %329, %331, %cst_297 {dimension_numbers = #tpu.dot_dimension_numbers<[1], [1], [0], [0], [0, 0, 1, 0], [], []>} : vector<1x512xf32>, vector<12x512xf32>, vector<1x12xf32> -> vector<1x12xf32>
    %333 = arith.addf %327, %332 : vector<1x12xf32>
    %c9_298 = arith.constant 9 : index
    %c0_299 = arith.constant 0 : index
    %c0_300 = arith.constant 0 : index
    %334 = vector.load %arg18[%c9_298, %c0_299, %c0_300] : memref<32x1x512xf32, #tpu.memory_space<vmem>>, vector<1x1x512xf32>
    %335 = vector.shape_cast %334 : vector<1x1x512xf32> to vector<1x512xf32>
    %c9_301 = arith.constant 9 : index
    %c0_302 = arith.constant 0 : index
    %c0_303 = arith.constant 0 : index
    %336 = vector.load %arg8[%c9_301, %c0_302, %c0_303] : memref<32x12x512xf32, #tpu.memory_space<vmem>>, vector<1x12x512xf32>
    %337 = vector.shape_cast %336 : vector<1x12x512xf32> to vector<12x512xf32>
    %cst_304 = arith.constant dense<0.000000e+00> : vector<1x12xf32>
    %338 = tpu.matmul %335, %337, %cst_304 {dimension_numbers = #tpu.dot_dimension_numbers<[1], [1], [0], [0], [0, 0, 1, 0], [], []>} : vector<1x512xf32>, vector<12x512xf32>, vector<1x12xf32> -> vector<1x12xf32>
    %339 = arith.addf %333, %338 : vector<1x12xf32>
    %c10_305 = arith.constant 10 : index
    %c0_306 = arith.constant 0 : index
    %c0_307 = arith.constant 0 : index
    %340 = vector.load %arg18[%c10_305, %c0_306, %c0_307] : memref<32x1x512xf32, #tpu.memory_space<vmem>>, vector<1x1x512xf32>
    %341 = vector.shape_cast %340 : vector<1x1x512xf32> to vector<1x512xf32>
    %c10_308 = arith.constant 10 : index
    %c0_309 = arith.constant 0 : index
    %c0_310 = arith.constant 0 : index
    %342 = vector.load %arg8[%c10_308, %c0_309, %c0_310] : memref<32x12x512xf32, #tpu.memory_space<vmem>>, vector<1x12x512xf32>
    %343 = vector.shape_cast %342 : vector<1x12x512xf32> to vector<12x512xf32>
    %cst_311 = arith.constant dense<0.000000e+00> : vector<1x12xf32>
    %344 = tpu.matmul %341, %343, %cst_311 {dimension_numbers = #tpu.dot_dimension_numbers<[1], [1], [0], [0], [0, 0, 1, 0], [], []>} : vector<1x512xf32>, vector<12x512xf32>, vector<1x12xf32> -> vector<1x12xf32>
    %345 = arith.addf %339, %344 : vector<1x12xf32>
    %c11_312 = arith.constant 11 : index
    %c0_313 = arith.constant 0 : index
    %c0_314 = arith.constant 0 : index
    %346 = vector.load %arg18[%c11_312, %c0_313, %c0_314] : memref<32x1x512xf32, #tpu.memory_space<vmem>>, vector<1x1x512xf32>
    %347 = vector.shape_cast %346 : vector<1x1x512xf32> to vector<1x512xf32>
    %c11_315 = arith.constant 11 : index
    %c0_316 = arith.constant 0 : index
    %c0_317 = arith.constant 0 : index
    %348 = vector.load %arg8[%c11_315, %c0_316, %c0_317] : memref<32x12x512xf32, #tpu.memory_space<vmem>>, vector<1x12x512xf32>
    %349 = vector.shape_cast %348 : vector<1x12x512xf32> to vector<12x512xf32>
    %cst_318 = arith.constant dense<0.000000e+00> : vector<1x12xf32>
    %350 = tpu.matmul %347, %349, %cst_318 {dimension_numbers = #tpu.dot_dimension_numbers<[1], [1], [0], [0], [0, 0, 1, 0], [], []>} : vector<1x512xf32>, vector<12x512xf32>, vector<1x12xf32> -> vector<1x12xf32>
    %351 = arith.addf %345, %350 : vector<1x12xf32>
    %c12_319 = arith.constant 12 : index
    %c0_320 = arith.constant 0 : index
    %c0_321 = arith.constant 0 : index
    %352 = vector.load %arg18[%c12_319, %c0_320, %c0_321] : memref<32x1x512xf32, #tpu.memory_space<vmem>>, vector<1x1x512xf32>
    %353 = vector.shape_cast %352 : vector<1x1x512xf32> to vector<1x512xf32>
    %c12_322 = arith.constant 12 : index
    %c0_323 = arith.constant 0 : index
    %c0_324 = arith.constant 0 : index
    %354 = vector.load %arg8[%c12_322, %c0_323, %c0_324] : memref<32x12x512xf32, #tpu.memory_space<vmem>>, vector<1x12x512xf32>
    %355 = vector.shape_cast %354 : vector<1x12x512xf32> to vector<12x512xf32>
    %cst_325 = arith.constant dense<0.000000e+00> : vector<1x12xf32>
    %356 = tpu.matmul %353, %355, %cst_325 {dimension_numbers = #tpu.dot_dimension_numbers<[1], [1], [0], [0], [0, 0, 1, 0], [], []>} : vector<1x512xf32>, vector<12x512xf32>, vector<1x12xf32> -> vector<1x12xf32>
    %357 = arith.addf %351, %356 : vector<1x12xf32>
    %c13_326 = arith.constant 13 : index
    %c0_327 = arith.constant 0 : index
    %c0_328 = arith.constant 0 : index
    %358 = vector.load %arg18[%c13_326, %c0_327, %c0_328] : memref<32x1x512xf32, #tpu.memory_space<vmem>>, vector<1x1x512xf32>
    %359 = vector.shape_cast %358 : vector<1x1x512xf32> to vector<1x512xf32>
    %c13_329 = arith.constant 13 : index
    %c0_330 = arith.constant 0 : index
    %c0_331 = arith.constant 0 : index
    %360 = vector.load %arg8[%c13_329, %c0_330, %c0_331] : memref<32x12x512xf32, #tpu.memory_space<vmem>>, vector<1x12x512xf32>
    %361 = vector.shape_cast %360 : vector<1x12x512xf32> to vector<12x512xf32>
    %cst_332 = arith.constant dense<0.000000e+00> : vector<1x12xf32>
    %362 = tpu.matmul %359, %361, %cst_332 {dimension_numbers = #tpu.dot_dimension_numbers<[1], [1], [0], [0], [0, 0, 1, 0], [], []>} : vector<1x512xf32>, vector<12x512xf32>, vector<1x12xf32> -> vector<1x12xf32>
    %363 = arith.addf %357, %362 : vector<1x12xf32>
    %c14_333 = arith.constant 14 : index
    %c0_334 = arith.constant 0 : index
    %c0_335 = arith.constant 0 : index
    %364 = vector.load %arg18[%c14_333, %c0_334, %c0_335] : memref<32x1x512xf32, #tpu.memory_space<vmem>>, vector<1x1x512xf32>
    %365 = vector.shape_cast %364 : vector<1x1x512xf32> to vector<1x512xf32>
    %c14_336 = arith.constant 14 : index
    %c0_337 = arith.constant 0 : index
    %c0_338 = arith.constant 0 : index
    %366 = vector.load %arg8[%c14_336, %c0_337, %c0_338] : memref<32x12x512xf32, #tpu.memory_space<vmem>>, vector<1x12x512xf32>
    %367 = vector.shape_cast %366 : vector<1x12x512xf32> to vector<12x512xf32>
    %cst_339 = arith.constant dense<0.000000e+00> : vector<1x12xf32>
    %368 = tpu.matmul %365, %367, %cst_339 {dimension_numbers = #tpu.dot_dimension_numbers<[1], [1], [0], [0], [0, 0, 1, 0], [], []>} : vector<1x512xf32>, vector<12x512xf32>, vector<1x12xf32> -> vector<1x12xf32>
    %369 = arith.addf %363, %368 : vector<1x12xf32>
    %c15_340 = arith.constant 15 : index
    %c0_341 = arith.constant 0 : index
    %c0_342 = arith.constant 0 : index
    %370 = vector.load %arg18[%c15_340, %c0_341, %c0_342] : memref<32x1x512xf32, #tpu.memory_space<vmem>>, vector<1x1x512xf32>
    %371 = vector.shape_cast %370 : vector<1x1x512xf32> to vector<1x512xf32>
    %c15_343 = arith.constant 15 : index
    %c0_344 = arith.constant 0 : index
    %c0_345 = arith.constant 0 : index
    %372 = vector.load %arg8[%c15_343, %c0_344, %c0_345] : memref<32x12x512xf32, #tpu.memory_space<vmem>>, vector<1x12x512xf32>
    %373 = vector.shape_cast %372 : vector<1x12x512xf32> to vector<12x512xf32>
    %cst_346 = arith.constant dense<0.000000e+00> : vector<1x12xf32>
    %374 = tpu.matmul %371, %373, %cst_346 {dimension_numbers = #tpu.dot_dimension_numbers<[1], [1], [0], [0], [0, 0, 1, 0], [], []>} : vector<1x512xf32>, vector<12x512xf32>, vector<1x12xf32> -> vector<1x12xf32>
    %375 = arith.addf %369, %374 : vector<1x12xf32>
    %c16 = arith.constant 16 : index
    %c0_347 = arith.constant 0 : index
    %c0_348 = arith.constant 0 : index
    %376 = vector.load %arg18[%c16, %c0_347, %c0_348] : memref<32x1x512xf32, #tpu.memory_space<vmem>>, vector<1x1x512xf32>
    %377 = vector.shape_cast %376 : vector<1x1x512xf32> to vector<1x512xf32>
    %c16_349 = arith.constant 16 : index
    %c0_350 = arith.constant 0 : index
    %c0_351 = arith.constant 0 : index
    %378 = vector.load %arg8[%c16_349, %c0_350, %c0_351] : memref<32x12x512xf32, #tpu.memory_space<vmem>>, vector<1x12x512xf32>
    %379 = vector.shape_cast %378 : vector<1x12x512xf32> to vector<12x512xf32>
    %cst_352 = arith.constant dense<0.000000e+00> : vector<1x12xf32>
    %380 = tpu.matmul %377, %379, %cst_352 {dimension_numbers = #tpu.dot_dimension_numbers<[1], [1], [0], [0], [0, 0, 1, 0], [], []>} : vector<1x512xf32>, vector<12x512xf32>, vector<1x12xf32> -> vector<1x12xf32>
    %381 = arith.addf %375, %380 : vector<1x12xf32>
    %c17 = arith.constant 17 : index
    %c0_353 = arith.constant 0 : index
    %c0_354 = arith.constant 0 : index
    %382 = vector.load %arg18[%c17, %c0_353, %c0_354] : memref<32x1x512xf32, #tpu.memory_space<vmem>>, vector<1x1x512xf32>
    %383 = vector.shape_cast %382 : vector<1x1x512xf32> to vector<1x512xf32>
    %c17_355 = arith.constant 17 : index
    %c0_356 = arith.constant 0 : index
    %c0_357 = arith.constant 0 : index
    %384 = vector.load %arg8[%c17_355, %c0_356, %c0_357] : memref<32x12x512xf32, #tpu.memory_space<vmem>>, vector<1x12x512xf32>
    %385 = vector.shape_cast %384 : vector<1x12x512xf32> to vector<12x512xf32>
    %cst_358 = arith.constant dense<0.000000e+00> : vector<1x12xf32>
    %386 = tpu.matmul %383, %385, %cst_358 {dimension_numbers = #tpu.dot_dimension_numbers<[1], [1], [0], [0], [0, 0, 1, 0], [], []>} : vector<1x512xf32>, vector<12x512xf32>, vector<1x12xf32> -> vector<1x12xf32>
    %387 = arith.addf %381, %386 : vector<1x12xf32>
    %c18 = arith.constant 18 : index
    %c0_359 = arith.constant 0 : index
    %c0_360 = arith.constant 0 : index
    %388 = vector.load %arg18[%c18, %c0_359, %c0_360] : memref<32x1x512xf32, #tpu.memory_space<vmem>>, vector<1x1x512xf32>
    %389 = vector.shape_cast %388 : vector<1x1x512xf32> to vector<1x512xf32>
    %c18_361 = arith.constant 18 : index
    %c0_362 = arith.constant 0 : index
    %c0_363 = arith.constant 0 : index
    %390 = vector.load %arg8[%c18_361, %c0_362, %c0_363] : memref<32x12x512xf32, #tpu.memory_space<vmem>>, vector<1x12x512xf32>
    %391 = vector.shape_cast %390 : vector<1x12x512xf32> to vector<12x512xf32>
    %cst_364 = arith.constant dense<0.000000e+00> : vector<1x12xf32>
    %392 = tpu.matmul %389, %391, %cst_364 {dimension_numbers = #tpu.dot_dimension_numbers<[1], [1], [0], [0], [0, 0, 1, 0], [], []>} : vector<1x512xf32>, vector<12x512xf32>, vector<1x12xf32> -> vector<1x12xf32>
    %393 = arith.addf %387, %392 : vector<1x12xf32>
    %c19 = arith.constant 19 : index
    %c0_365 = arith.constant 0 : index
    %c0_366 = arith.constant 0 : index
    %394 = vector.load %arg18[%c19, %c0_365, %c0_366] : memref<32x1x512xf32, #tpu.memory_space<vmem>>, vector<1x1x512xf32>
    %395 = vector.shape_cast %394 : vector<1x1x512xf32> to vector<1x512xf32>
    %c19_367 = arith.constant 19 : index
    %c0_368 = arith.constant 0 : index
    %c0_369 = arith.constant 0 : index
    %396 = vector.load %arg8[%c19_367, %c0_368, %c0_369] : memref<32x12x512xf32, #tpu.memory_space<vmem>>, vector<1x12x512xf32>
    %397 = vector.shape_cast %396 : vector<1x12x512xf32> to vector<12x512xf32>
    %cst_370 = arith.constant dense<0.000000e+00> : vector<1x12xf32>
    %398 = tpu.matmul %395, %397, %cst_370 {dimension_numbers = #tpu.dot_dimension_numbers<[1], [1], [0], [0], [0, 0, 1, 0], [], []>} : vector<1x512xf32>, vector<12x512xf32>, vector<1x12xf32> -> vector<1x12xf32>
    %399 = arith.addf %393, %398 : vector<1x12xf32>
    %c20 = arith.constant 20 : index
    %c0_371 = arith.constant 0 : index
    %c0_372 = arith.constant 0 : index
    %400 = vector.load %arg18[%c20, %c0_371, %c0_372] : memref<32x1x512xf32, #tpu.memory_space<vmem>>, vector<1x1x512xf32>
    %401 = vector.shape_cast %400 : vector<1x1x512xf32> to vector<1x512xf32>
    %c20_373 = arith.constant 20 : index
    %c0_374 = arith.constant 0 : index
    %c0_375 = arith.constant 0 : index
    %402 = vector.load %arg8[%c20_373, %c0_374, %c0_375] : memref<32x12x512xf32, #tpu.memory_space<vmem>>, vector<1x12x512xf32>
    %403 = vector.shape_cast %402 : vector<1x12x512xf32> to vector<12x512xf32>
    %cst_376 = arith.constant dense<0.000000e+00> : vector<1x12xf32>
    %404 = tpu.matmul %401, %403, %cst_376 {dimension_numbers = #tpu.dot_dimension_numbers<[1], [1], [0], [0], [0, 0, 1, 0], [], []>} : vector<1x512xf32>, vector<12x512xf32>, vector<1x12xf32> -> vector<1x12xf32>
    %405 = arith.addf %399, %404 : vector<1x12xf32>
    %c21_377 = arith.constant 21 : index
    %c0_378 = arith.constant 0 : index
    %c0_379 = arith.constant 0 : index
    %406 = vector.load %arg18[%c21_377, %c0_378, %c0_379] : memref<32x1x512xf32, #tpu.memory_space<vmem>>, vector<1x1x512xf32>
    %407 = vector.shape_cast %406 : vector<1x1x512xf32> to vector<1x512xf32>
    %c21_380 = arith.constant 21 : index
    %c0_381 = arith.constant 0 : index
    %c0_382 = arith.constant 0 : index
    %408 = vector.load %arg8[%c21_380, %c0_381, %c0_382] : memref<32x12x512xf32, #tpu.memory_space<vmem>>, vector<1x12x512xf32>
    %409 = vector.shape_cast %408 : vector<1x12x512xf32> to vector<12x512xf32>
    %cst_383 = arith.constant dense<0.000000e+00> : vector<1x12xf32>
    %410 = tpu.matmul %407, %409, %cst_383 {dimension_numbers = #tpu.dot_dimension_numbers<[1], [1], [0], [0], [0, 0, 1, 0], [], []>} : vector<1x512xf32>, vector<12x512xf32>, vector<1x12xf32> -> vector<1x12xf32>
    %411 = arith.addf %405, %410 : vector<1x12xf32>
    %c22_384 = arith.constant 22 : index
    %c0_385 = arith.constant 0 : index
    %c0_386 = arith.constant 0 : index
    %412 = vector.load %arg18[%c22_384, %c0_385, %c0_386] : memref<32x1x512xf32, #tpu.memory_space<vmem>>, vector<1x1x512xf32>
    %413 = vector.shape_cast %412 : vector<1x1x512xf32> to vector<1x512xf32>
    %c22_387 = arith.constant 22 : index
    %c0_388 = arith.constant 0 : index
    %c0_389 = arith.constant 0 : index
    %414 = vector.load %arg8[%c22_387, %c0_388, %c0_389] : memref<32x12x512xf32, #tpu.memory_space<vmem>>, vector<1x12x512xf32>
    %415 = vector.shape_cast %414 : vector<1x12x512xf32> to vector<12x512xf32>
    %cst_390 = arith.constant dense<0.000000e+00> : vector<1x12xf32>
    %416 = tpu.matmul %413, %415, %cst_390 {dimension_numbers = #tpu.dot_dimension_numbers<[1], [1], [0], [0], [0, 0, 1, 0], [], []>} : vector<1x512xf32>, vector<12x512xf32>, vector<1x12xf32> -> vector<1x12xf32>
    %417 = arith.addf %411, %416 : vector<1x12xf32>
    %c23_391 = arith.constant 23 : index
    %c0_392 = arith.constant 0 : index
    %c0_393 = arith.constant 0 : index
    %418 = vector.load %arg18[%c23_391, %c0_392, %c0_393] : memref<32x1x512xf32, #tpu.memory_space<vmem>>, vector<1x1x512xf32>
    %419 = vector.shape_cast %418 : vector<1x1x512xf32> to vector<1x512xf32>
    %c23_394 = arith.constant 23 : index
    %c0_395 = arith.constant 0 : index
    %c0_396 = arith.constant 0 : index
    %420 = vector.load %arg8[%c23_394, %c0_395, %c0_396] : memref<32x12x512xf32, #tpu.memory_space<vmem>>, vector<1x12x512xf32>
    %421 = vector.shape_cast %420 : vector<1x12x512xf32> to vector<12x512xf32>
    %cst_397 = arith.constant dense<0.000000e+00> : vector<1x12xf32>
    %422 = tpu.matmul %419, %421, %cst_397 {dimension_numbers = #tpu.dot_dimension_numbers<[1], [1], [0], [0], [0, 0, 1, 0], [], []>} : vector<1x512xf32>, vector<12x512xf32>, vector<1x12xf32> -> vector<1x12xf32>
    %423 = arith.addf %417, %422 : vector<1x12xf32>
    %c24_398 = arith.constant 24 : index
    %c0_399 = arith.constant 0 : index
    %c0_400 = arith.constant 0 : index
    %424 = vector.load %arg18[%c24_398, %c0_399, %c0_400] : memref<32x1x512xf32, #tpu.memory_space<vmem>>, vector<1x1x512xf32>
    %425 = vector.shape_cast %424 : vector<1x1x512xf32> to vector<1x512xf32>
    %c24_401 = arith.constant 24 : index
    %c0_402 = arith.constant 0 : index
    %c0_403 = arith.constant 0 : index
    %426 = vector.load %arg8[%c24_401, %c0_402, %c0_403] : memref<32x12x512xf32, #tpu.memory_space<vmem>>, vector<1x12x512xf32>
    %427 = vector.shape_cast %426 : vector<1x12x512xf32> to vector<12x512xf32>
    %cst_404 = arith.constant dense<0.000000e+00> : vector<1x12xf32>
    %428 = tpu.matmul %425, %427, %cst_404 {dimension_numbers = #tpu.dot_dimension_numbers<[1], [1], [0], [0], [0, 0, 1, 0], [], []>} : vector<1x512xf32>, vector<12x512xf32>, vector<1x12xf32> -> vector<1x12xf32>
    %429 = arith.addf %423, %428 : vector<1x12xf32>
    %c25 = arith.constant 25 : index
    %c0_405 = arith.constant 0 : index
    %c0_406 = arith.constant 0 : index
    %430 = vector.load %arg18[%c25, %c0_405, %c0_406] : memref<32x1x512xf32, #tpu.memory_space<vmem>>, vector<1x1x512xf32>
    %431 = vector.shape_cast %430 : vector<1x1x512xf32> to vector<1x512xf32>
    %c25_407 = arith.constant 25 : index
    %c0_408 = arith.constant 0 : index
    %c0_409 = arith.constant 0 : index
    %432 = vector.load %arg8[%c25_407, %c0_408, %c0_409] : memref<32x12x512xf32, #tpu.memory_space<vmem>>, vector<1x12x512xf32>
    %433 = vector.shape_cast %432 : vector<1x12x512xf32> to vector<12x512xf32>
    %cst_410 = arith.constant dense<0.000000e+00> : vector<1x12xf32>
    %434 = tpu.matmul %431, %433, %cst_410 {dimension_numbers = #tpu.dot_dimension_numbers<[1], [1], [0], [0], [0, 0, 1, 0], [], []>} : vector<1x512xf32>, vector<12x512xf32>, vector<1x12xf32> -> vector<1x12xf32>
    %435 = arith.addf %429, %434 : vector<1x12xf32>
    %c26 = arith.constant 26 : index
    %c0_411 = arith.constant 0 : index
    %c0_412 = arith.constant 0 : index
    %436 = vector.load %arg18[%c26, %c0_411, %c0_412] : memref<32x1x512xf32, #tpu.memory_space<vmem>>, vector<1x1x512xf32>
    %437 = vector.shape_cast %436 : vector<1x1x512xf32> to vector<1x512xf32>
    %c26_413 = arith.constant 26 : index
    %c0_414 = arith.constant 0 : index
    %c0_415 = arith.constant 0 : index
    %438 = vector.load %arg8[%c26_413, %c0_414, %c0_415] : memref<32x12x512xf32, #tpu.memory_space<vmem>>, vector<1x12x512xf32>
    %439 = vector.shape_cast %438 : vector<1x12x512xf32> to vector<12x512xf32>
    %cst_416 = arith.constant dense<0.000000e+00> : vector<1x12xf32>
    %440 = tpu.matmul %437, %439, %cst_416 {dimension_numbers = #tpu.dot_dimension_numbers<[1], [1], [0], [0], [0, 0, 1, 0], [], []>} : vector<1x512xf32>, vector<12x512xf32>, vector<1x12xf32> -> vector<1x12xf32>
    %441 = arith.addf %435, %440 : vector<1x12xf32>
    %c27 = arith.constant 27 : index
    %c0_417 = arith.constant 0 : index
    %c0_418 = arith.constant 0 : index
    %442 = vector.load %arg18[%c27, %c0_417, %c0_418] : memref<32x1x512xf32, #tpu.memory_space<vmem>>, vector<1x1x512xf32>
    %443 = vector.shape_cast %442 : vector<1x1x512xf32> to vector<1x512xf32>
    %c27_419 = arith.constant 27 : index
    %c0_420 = arith.constant 0 : index
    %c0_421 = arith.constant 0 : index
    %444 = vector.load %arg8[%c27_419, %c0_420, %c0_421] : memref<32x12x512xf32, #tpu.memory_space<vmem>>, vector<1x12x512xf32>
    %445 = vector.shape_cast %444 : vector<1x12x512xf32> to vector<12x512xf32>
    %cst_422 = arith.constant dense<0.000000e+00> : vector<1x12xf32>
    %446 = tpu.matmul %443, %445, %cst_422 {dimension_numbers = #tpu.dot_dimension_numbers<[1], [1], [0], [0], [0, 0, 1, 0], [], []>} : vector<1x512xf32>, vector<12x512xf32>, vector<1x12xf32> -> vector<1x12xf32>
    %447 = arith.addf %441, %446 : vector<1x12xf32>
    %c28 = arith.constant 28 : index
    %c0_423 = arith.constant 0 : index
    %c0_424 = arith.constant 0 : index
    %448 = vector.load %arg18[%c28, %c0_423, %c0_424] : memref<32x1x512xf32, #tpu.memory_space<vmem>>, vector<1x1x512xf32>
    %449 = vector.shape_cast %448 : vector<1x1x512xf32> to vector<1x512xf32>
    %c28_425 = arith.constant 28 : index
    %c0_426 = arith.constant 0 : index
    %c0_427 = arith.constant 0 : index
    %450 = vector.load %arg8[%c28_425, %c0_426, %c0_427] : memref<32x12x512xf32, #tpu.memory_space<vmem>>, vector<1x12x512xf32>
    %451 = vector.shape_cast %450 : vector<1x12x512xf32> to vector<12x512xf32>
    %cst_428 = arith.constant dense<0.000000e+00> : vector<1x12xf32>
    %452 = tpu.matmul %449, %451, %cst_428 {dimension_numbers = #tpu.dot_dimension_numbers<[1], [1], [0], [0], [0, 0, 1, 0], [], []>} : vector<1x512xf32>, vector<12x512xf32>, vector<1x12xf32> -> vector<1x12xf32>
    %453 = arith.addf %447, %452 : vector<1x12xf32>
    %c29 = arith.constant 29 : index
    %c0_429 = arith.constant 0 : index
    %c0_430 = arith.constant 0 : index
    %454 = vector.load %arg18[%c29, %c0_429, %c0_430] : memref<32x1x512xf32, #tpu.memory_space<vmem>>, vector<1x1x512xf32>
    %455 = vector.shape_cast %454 : vector<1x1x512xf32> to vector<1x512xf32>
    %c29_431 = arith.constant 29 : index
    %c0_432 = arith.constant 0 : index
    %c0_433 = arith.constant 0 : index
    %456 = vector.load %arg8[%c29_431, %c0_432, %c0_433] : memref<32x12x512xf32, #tpu.memory_space<vmem>>, vector<1x12x512xf32>
    %457 = vector.shape_cast %456 : vector<1x12x512xf32> to vector<12x512xf32>
    %cst_434 = arith.constant dense<0.000000e+00> : vector<1x12xf32>
    %458 = tpu.matmul %455, %457, %cst_434 {dimension_numbers = #tpu.dot_dimension_numbers<[1], [1], [0], [0], [0, 0, 1, 0], [], []>} : vector<1x512xf32>, vector<12x512xf32>, vector<1x12xf32> -> vector<1x12xf32>
    %459 = arith.addf %453, %458 : vector<1x12xf32>
    %c30 = arith.constant 30 : index
    %c0_435 = arith.constant 0 : index
    %c0_436 = arith.constant 0 : index
    %460 = vector.load %arg18[%c30, %c0_435, %c0_436] : memref<32x1x512xf32, #tpu.memory_space<vmem>>, vector<1x1x512xf32>
    %461 = vector.shape_cast %460 : vector<1x1x512xf32> to vector<1x512xf32>
    %c30_437 = arith.constant 30 : index
    %c0_438 = arith.constant 0 : index
    %c0_439 = arith.constant 0 : index
    %462 = vector.load %arg8[%c30_437, %c0_438, %c0_439] : memref<32x12x512xf32, #tpu.memory_space<vmem>>, vector<1x12x512xf32>
    %463 = vector.shape_cast %462 : vector<1x12x512xf32> to vector<12x512xf32>
    %cst_440 = arith.constant dense<0.000000e+00> : vector<1x12xf32>
    %464 = tpu.matmul %461, %463, %cst_440 {dimension_numbers = #tpu.dot_dimension_numbers<[1], [1], [0], [0], [0, 0, 1, 0], [], []>} : vector<1x512xf32>, vector<12x512xf32>, vector<1x12xf32> -> vector<1x12xf32>
    %465 = arith.addf %459, %464 : vector<1x12xf32>
    %c31 = arith.constant 31 : index
    %c0_441 = arith.constant 0 : index
    %c0_442 = arith.constant 0 : index
    %466 = vector.load %arg18[%c31, %c0_441, %c0_442] : memref<32x1x512xf32, #tpu.memory_space<vmem>>, vector<1x1x512xf32>
    %467 = vector.shape_cast %466 : vector<1x1x512xf32> to vector<1x512xf32>
    %c31_443 = arith.constant 31 : index
    %c0_444 = arith.constant 0 : index
    %c0_445 = arith.constant 0 : index
    %468 = vector.load %arg8[%c31_443, %c0_444, %c0_445] : memref<32x12x512xf32, #tpu.memory_space<vmem>>, vector<1x12x512xf32>
    %469 = vector.shape_cast %468 : vector<1x12x512xf32> to vector<12x512xf32>
    %cst_446 = arith.constant dense<0.000000e+00> : vector<1x12xf32>
    %470 = tpu.matmul %467, %469, %cst_446 {dimension_numbers = #tpu.dot_dimension_numbers<[1], [1], [0], [0], [0, 0, 1, 0], [], []>} : vector<1x512xf32>, vector<12x512xf32>, vector<1x12xf32> -> vector<1x12xf32>
    %471 = arith.addf %465, %470 : vector<1x12xf32>
    %c0_447 = arith.constant 0 : index
    %c0_448 = arith.constant 0 : index
    %472 = vector.load %arg9[%c0_447, %c0_448] : memref<1x12xf32, #tpu.memory_space<vmem>>, vector<1x12xf32>
    %473 = arith.addf %471, %472 : vector<1x12xf32>
    %c0_449 = arith.constant 0 : index
    %c0_450 = arith.constant 0 : index
    %c0_451 = arith.constant 0 : index
    %474 = vector.load %arg1[%c0_449, %c0_450, %c0_451] : memref<1x1x15xf32, #tpu.memory_space<vmem>>, vector<1x1x15xf32>
    %475 = vector.shape_cast %474 : vector<1x1x15xf32> to vector<1x15xf32>
    %c0_452 = arith.constant 0 : index
    %c0_453 = arith.constant 0 : index
    %476 = vector.load %arg10[%c0_452, %c0_453] : memref<15x256xf32, #tpu.memory_space<vmem>>, vector<15x256xf32>
    %cst_454 = arith.constant dense<0.000000e+00> : vector<1x256xf32>
    %477 = tpu.matmul %475, %476, %cst_454 {dimension_numbers = #tpu.dot_dimension_numbers<[1], [0], [0], [1], [0, 0, 1, 1], [], []>} : vector<1x15xf32>, vector<15x256xf32>, vector<1x256xf32> -> vector<1x256xf32>
    %c0_455 = arith.constant 0 : index
    %c0_456 = arith.constant 0 : index
    %478 = vector.load %arg11[%c0_455, %c0_456] : memref<12x256xf32, #tpu.memory_space<vmem>>, vector<12x256xf32>
    %cst_457 = arith.constant dense<0.000000e+00> : vector<1x256xf32>
    %479 = tpu.matmul %473, %478, %cst_457 {dimension_numbers = #tpu.dot_dimension_numbers<[1], [0], [0], [1], [0, 0, 1, 1], [], []>} : vector<1x12xf32>, vector<12x256xf32>, vector<1x256xf32> -> vector<1x256xf32>
    %480 = arith.addf %477, %479 : vector<1x256xf32>
    %c0_458 = arith.constant 0 : index
    %c0_459 = arith.constant 0 : index
    %481 = vector.load %arg12[%c0_458, %c0_459] : memref<1x256xf32, #tpu.memory_space<vmem>>, vector<1x256xf32>
    %482 = arith.addf %480, %481 : vector<1x256xf32>
    %cst_460 = arith.constant 0.000000e+00 : f32
    %483 = vector.broadcast %cst_460 : f32 to vector<1x256xf32>
    %484 = arith.maximumf %482, %483 : vector<1x256xf32>
    %c0_461 = arith.constant 0 : index
    %c0_462 = arith.constant 0 : index
    %485 = vector.load %arg13[%c0_461, %c0_462] : memref<256x256xf32, #tpu.memory_space<vmem>>, vector<256x256xf32>
    %cst_463 = arith.constant dense<0.000000e+00> : vector<1x256xf32>
    %486 = tpu.matmul %484, %485, %cst_463 {dimension_numbers = #tpu.dot_dimension_numbers<[1], [0], [0], [1], [0, 0, 1, 1], [], []>} : vector<1x256xf32>, vector<256x256xf32>, vector<1x256xf32> -> vector<1x256xf32>
    %c0_464 = arith.constant 0 : index
    %c0_465 = arith.constant 0 : index
    %487 = vector.load %arg14[%c0_464, %c0_465] : memref<1x256xf32, #tpu.memory_space<vmem>>, vector<1x256xf32>
    %488 = arith.addf %486, %487 : vector<1x256xf32>
    %cst_466 = arith.constant 0.000000e+00 : f32
    %489 = vector.broadcast %cst_466 : f32 to vector<1x256xf32>
    %490 = arith.maximumf %488, %489 : vector<1x256xf32>
    %c0_467 = arith.constant 0 : index
    %c0_468 = arith.constant 0 : index
    %c0_469 = arith.constant 0 : index
    %491 = vector.load %arg15[%c0_467, %c0_468, %c0_469] : memref<1x1x256xf32, #tpu.memory_space<vmem>>, vector<1x1x256xf32>
    %492 = vector.shape_cast %491 : vector<1x1x256xf32> to vector<1x256xf32>
    %493 = vector.shape_cast %490 : vector<1x256xf32> to vector<1x1x256xf32>
    tpu.vector_store %arg15[%c0_467, %c0_468, %c0_469], %493 {strides = array<i32>} : memref<1x1x256xf32, #tpu.memory_space<vmem>>, vector<1x1x256xf32>,
    return
  }
  func.func @transform_0(%arg0: i32) -> (i32, i32, i32) {
    %c0_i32 = arith.constant 0 : i32
    %c0_i32_0 = arith.constant 0 : i32
    %c0_i32_1 = arith.constant 0 : i32
    return %arg0, %c0_i32, %c0_i32_0 : i32, i32, i32
  }
  func.func @transform_1(%arg0: i32) -> (i32, i32, i32) {
    %c0_i32 = arith.constant 0 : i32
    %c0_i32_0 = arith.constant 0 : i32
    %c0_i32_1 = arith.constant 0 : i32
    return %arg0, %c0_i32, %c0_i32_0 : i32, i32, i32
  }
  func.func @transform_2(%arg0: i32) -> (i32, i32) {
    %c0_i32 = arith.constant 0 : i32
    %c0_i32_0 = arith.constant 0 : i32
    %c0_i32_1 = arith.constant 0 : i32
    return %c0_i32, %c0_i32_0 : i32, i32
  }
  func.func @transform_3(%arg0: i32) -> (i32, i32) {
    %c0_i32 = arith.constant 0 : i32
    %c0_i32_0 = arith.constant 0 : i32
    %c0_i32_1 = arith.constant 0 : i32
    return %c0_i32, %c0_i32_0 : i32, i32
  }
  func.func @transform_4(%arg0: i32) -> (i32, i32) {
    %c0_i32 = arith.constant 0 : i32
    %c0_i32_0 = arith.constant 0 : i32
    %c0_i32_1 = arith.constant 0 : i32
    return %c0_i32, %c0_i32_0 : i32, i32
  }
  func.func @transform_5(%arg0: i32) -> (i32, i32, i32) {
    %c0_i32 = arith.constant 0 : i32
    %c0_i32_0 = arith.constant 0 : i32
    %c0_i32_1 = arith.constant 0 : i32
    %c0_i32_2 = arith.constant 0 : i32
    return %c0_i32, %c0_i32_0, %c0_i32_1 : i32, i32, i32
  }
  func.func @transform_6(%arg0: i32) -> (i32, i32) {
    %c0_i32 = arith.constant 0 : i32
    %c0_i32_0 = arith.constant 0 : i32
    %c0_i32_1 = arith.constant 0 : i32
    return %c0_i32, %c0_i32_0 : i32, i32
  }
  func.func @transform_7(%arg0: i32) -> (i32, i32, i32) {
    %c0_i32 = arith.constant 0 : i32
    %c0_i32_0 = arith.constant 0 : i32
    %c0_i32_1 = arith.constant 0 : i32
    %c0_i32_2 = arith.constant 0 : i32
    return %c0_i32, %c0_i32_0, %c0_i32_1 : i32, i32, i32
  }
  func.func @transform_8(%arg0: i32) -> (i32, i32) {
    %c0_i32 = arith.constant 0 : i32
    %c0_i32_0 = arith.constant 0 : i32
    %c0_i32_1 = arith.constant 0 : i32
    return %c0_i32, %c0_i32_0 : i32, i32
  }
  func.func @transform_9(%arg0: i32) -> (i32, i32) {
    %c0_i32 = arith.constant 0 : i32
    %c0_i32_0 = arith.constant 0 : i32
    %c0_i32_1 = arith.constant 0 : i32
    return %c0_i32, %c0_i32_0 : i32, i32
  }
  func.func @transform_10(%arg0: i32) -> (i32, i32) {
    %c0_i32 = arith.constant 0 : i32
    %c0_i32_0 = arith.constant 0 : i32
    %c0_i32_1 = arith.constant 0 : i32
    return %c0_i32, %c0_i32_0 : i32, i32
  }
  func.func @transform_11(%arg0: i32) -> (i32, i32) {
    %c0_i32 = arith.constant 0 : i32
    %c0_i32_0 = arith.constant 0 : i32
    %c0_i32_1 = arith.constant 0 : i32
    return %c0_i32, %c0_i32_0 : i32, i32
  }
  func.func @transform_12(%arg0: i32) -> (i32, i32) {
    %c0_i32 = arith.constant 0 : i32
    %c0_i32_0 = arith.constant 0 : i32
    %c0_i32_1 = arith.constant 0 : i32
    return %c0_i32, %c0_i32_0 : i32, i32
  }
  func.func @transform_13(%arg0: i32) -> (i32, i32) {
    %c0_i32 = arith.constant 0 : i32
    %c0_i32_0 = arith.constant 0 : i32
    %c0_i32_1 = arith.constant 0 : i32
    return %c0_i32, %c0_i32_0 : i32, i32
  }
  func.func @transform_14(%arg0: i32) -> (i32, i32, i32) {
    %c0_i32 = arith.constant 0 : i32
    %c0_i32_0 = arith.constant 0 : i32
    %c0_i32_1 = arith.constant 0 : i32
    return %arg0, %c0_i32, %c0_i32_0 : i32, i32, i32
  }
}

</mosaic_0001>

<bundles_post_ra>
// kernel: cnn_mlp_forward.1
= control target key start
LH: loop header
LB: loop body
LE: loop exit
PB: predicated region body
PF: predicated region fallthrough
CT: control target
= control target key end

     0   :  { %s11137_s29 = smov 0   ;;  %s16105_s0 = inlined_call_operand.vmem [shape: f32[2,1,15], index: 0, kind: input, shape index: {}]   ;;  %s16106_s1 = inlined_call_operand.vmem [shape: f32[2,4,576], index: 1, kind: input, shape index: {}]   ;;  %s16107_s2 = inlined_call_operand.vmem [shape: f32[1,512], index: 2, kind: input, shape index: {}]   ;;  %s16108_s3 = inlined_call_operand.vmem [shape: f32[32,16], index: 3, kind: input, shape index: {}]   ;;  %s16109_s4 = inlined_call_operand.vmem [shape: f32[32,1], index: 4, kind: input, shape index: {}]   ;;  %s16110_s5 = inlined_call_operand.vmem [shape: f32[16,32,32], index: 5, kind: input, shape index: {}]   ;;  %s16111_s6 = inlined_call_operand.vmem [shape: f32[32,1], index: 6, kind: input, shape index: {}]   ;;  %s16112_s7 = inlined_call_operand.vmem [shape: f32[32,12,512], index: 7, kind: input, shape index: {}]   ;;  %s16113_s8 = inlined_call_operand.vmem [shape: f32[1,12], index: 8, kind: input, shape index: {}]   ;;  %s16114_s9 = inlined_call_operand.vmem [shape: f32[15,256], index: 9, kind: input, shape index: {}]   ;;  %s16115_s10 = inlined_call_operand.vmem [shape: f32[12,256], index: 10, kind: input, shape index: {}]   ;;  %s16116_s11 = inlined_call_operand.vmem [shape: f32[1,256], index: 11, kind: input, shape index: {}]   ;;  %s16117_s12 = inlined_call_operand.vmem [shape: f32[256,256], index: 12, kind: input, shape index: {}]   ;;  %s16118_s13 = inlined_call_operand.vmem [shape: f32[1,256], index: 13, kind: input, shape index: {}]   ;;  %s16119_s14 = inlined_call_operand.vmem [shape: f32[2,1,256], index: 14, kind: output, shape index: {}]  }
   0x1 LB: > { %s9551_s30 = sadd.s32 4294967295, %s11042_s29   ;;  %p9555_p0 = scmp.ge.s32.totalorder %s11042_s29, 1  ;;  %s11042_s29 = sphi %s11137_s29, %s24_s29  }
   0x2   : > { %p420_p1 = scmp.lt.s32.totalorder %s11042_s29, 3 }
   0x4   : > { %p421_p2 = pnand %p9555_p0, %p420_p1 }
   0x6   : > { %424 = sbr.rel (%p421_p2) target bundleno = 2446 (0x98e), region = 76 }
   0xb   : > { %p468_p3 = scmp.lt.s32.totalorder %s9551_s30, 1  ;;  %vm488_vm0 = vcmask 1040384   ;;  %vm490_vm1 = vcmask 1042434   ;;  %vm16137_vm2 = vcmask 1041408   ;;  %v16120_v3 = vlaneseq  ;;  %s11044_s19 = smov 106  }
   0xc   : > { %vm513_vm3 = vcmask 1043459   ;;  %vm16136_vm4 = vcmask 1044483   ;;  %vm517_vm5 = vcmask 1042432   ;;  %v16138_v12 = vmov 0  ;;  %s11045_s20 = smov 107   ;;  %s11046_s21 = smov 127  }
   0xd   : > { %s16408_s30 = smov (!%p468_p3, %s9551_s30), 1  ;;  %vm11169_vm6 = vcmp.lt.s32.totalorder %v16120_v3, 512  ;;  %s11047_s22 = smov 105   ;;  %vm522_vm7 = vcmask 1039360   ;;  %vm608_vm8 = vcmask 867328   ;;  %vm586_vm9 = vcmask 875520  }
   0xe   : > { %s10196_s15 = smul.u32 20, %s16408_s30  ;;  %v16139_v12 = vsel %vm11169_vm6, 4294967295, %v16138_v12  ;;  %s11048_s23 = smov 126   ;;  %vm921_vm10 = vcmask 859136   ;;  %vm844_vm11 = vcmask 1031168   ;;  %vm691_vm12 = vcmask 130048  }
   0xf   : > { %16140 = vst [vmem:[#allocation5_spill] sm:$0xff] %v16139_v12  ;;  %s11049_s24 = smov 86   ;;  %s11050_s25 = smov 85   ;;  %vm1247_vm13 = vcmask 703488   ;;  %vm1267_vm14 = vcmask 695296   ;;  %vm1588_vm15 = vcmask 687104  }
  0x10   : > { %s475_s18 = scalar_lea.vmem %s16106_s1, %s10196_s15  ;;  %s11051_s26 = smov 84  }
  0x11   : > { %v11151_v0 = vld [vmem:[%s475_s18] sm:$0xff]  ;;  %v11153_v1 = vld [vmem:[%s475_s18 + $0x8] sm:$0xff]  ;;  %v11155_v2 = vld [vmem:[%s475_s18 + $0x10] sm:$0xf]  ;;  %s11053_s27 = smov 22   ;;  %s11058_s18 = smov 65  }
  0x12   : > { %v485_v4 = vrot.slane %v11151_v0, 3  ;;  %v486_v5 = vrot.slane %v11153_v1, 6  ;;  %v487_v6 = vrot.slane %v11153_v1, 1  ;;  %v510_v7 = vrot.slane %v11155_v2, 4  ;;  %501 = vst [vmem:[#allocation1] sm:$0xff] %v11151_v0  ;;  %s11061_s15 = smov 62  }
  0x13   : > { %v511_v8 = vrot.slane %v11155_v2, 7  ;;  %502 = vst [vmem:[#allocation1 + $0x8] sm:$0xff] %v11153_v1 }
  0x14   : > { %v489_v9 = vsel %vm488_vm0, %v11151_v0, %v485_v4  ;;  %v491_v10 = vsel %vm490_vm1, %v486_v5, %v487_v6  ;;  %v514_v11 = vsel %vm513_vm3, %v487_v6, %v510_v7 }
  0x15   : > { %v512_v13 = vsel %vm16137_vm2, %v489_v9, %v486_v5  ;;  %v516_v14 = vsel %vm16136_vm4, %v514_v11, %v511_v8  ;;  %v493_v15 = vsel %vm16137_vm2, %v489_v9, %v491_v10 }
  0x16   : > { %v11176_v16 = vsel %vm517_vm5, %v512_v13, %v516_v14  ;;  %499 = vst.msk [vmem:[#allocation2] ss:$8 sm:$0xf] %vm11169_vm6, %v493_v15  ;;  %vm1899_vm5 = vcmask 179200  }
  0x17   : > { %605 = vrot.lane.b32.xlu1 %v11176_v16, %s11044_s19  ;;  %583 = vrot.lane.b32.xlu0 %v11176_v16, %s11045_s20 }
  0x18   : > { %519 = vrot.lane.b32.xlu2 %v11176_v16, %s11046_s21 }
  0x1a   : > { %v504_v17 = vld [vmem:[#allocation1 + $0x1] ss:$4 sm:$0xff] }
  0x1b   : > { %528 = vst [vmem:[#allocation1] sm:$0xff] %v11151_v0 }
  0x1c   : > { %529 = vst [vmem:[#allocation1 + $0x8] sm:$0xff] %v11153_v1 }
  0x1d   : > { %530 = vst [vmem:[#allocation1 + $0x10] sm:$0xff] %v11155_v2 }
  0x1e   : > { %507 = vst.msk [vmem:[#allocation2 + $0x1] ss:$8 sm:$0xf] %vm11169_vm6, %v504_v17 }
  0x24   : > { %v532_v18 = vld [vmem:[#allocation1 + $0x1] ss:$4 sm:$0xff] }
  0x25   : > { %541 = vst [vmem:[#allocation1] sm:$0xff] %v11151_v0 }
  0x26   : > { %542 = vst [vmem:[#allocation1 + $0x8] sm:$0xff] %v11153_v1 }
  0x2d   : > { %v544_v19 = vld [vmem:[#allocation1 + $0x2] ss:$4 sm:$0xff] }
  0x2e   : > { %549 = vst [vmem:[#allocation1] sm:$0xff] %v11151_v0 }
  0x2f   : > { %550 = vst [vmem:[#allocation1 + $0x8] sm:$0xff] %v11153_v1 }
  0x30   : > { %547 = vst.msk [vmem:[#allocation2 + $0x4] ss:$8 sm:$0xf] %vm11169_vm6, %v544_v19 }
  0x36   : > { %v552_v20 = vld [vmem:[#allocation1 + $0x3] ss:$4 sm:$0xff] }
  0x37   : > { %557 = vst [vmem:[#allocation1] sm:$0xff] %v11151_v0 }
  0x38   : > { %558 = vst [vmem:[#allocation1 + $0x8] sm:$0xff] %v11153_v1 }
  0x39   : > { %559 = vst [vmem:[#allocation1 + $0x10] sm:$0xff] %v11155_v2 }
  0x3a   : > { %555 = vst.msk [vmem:[#allocation2 + $0x5] ss:$8 sm:$0xf] %vm11169_vm6, %v552_v20 }
  0x40   : > { %v561_v21 = vld [vmem:[#allocation1 + $0x2] ss:$4 sm:$0xff] }
  0x41   : > { %570 = vst [vmem:[#allocation1] sm:$0xff] %v11151_v0 }
  0x42   : > { %571 = vst [vmem:[#allocation1 + $0x8] sm:$0xff] %v11153_v1 }
  0x43   : > { %572 = vst [vmem:[#allocation1 + $0x10] sm:$0xff] %v11155_v2 }
  0x4a   : > { %v574_v22 = vld [vmem:[#allocation1 + $0x3] ss:$4 sm:$0xff] }
  0x4b   : > { %592 = vst [vmem:[#allocation1] sm:$0xff] %v11151_v0 }
  0x4c   : > { %593 = vst [vmem:[#allocation1 + $0x8] sm:$0xff] %v11153_v1 }
  0x4d   : > { %594 = vst [vmem:[#allocation1 + $0x10] sm:$0xff] %v11155_v2 }
  0x54   : > { %v596_v23 = vld [vmem:[#allocation1 + $0x1] ss:$4 sm:$0xff] }
  0x55   : > { %614 = vst [vmem:[#allocation1] sm:$0xff] %v11151_v0  ;;  %597 = vrot.lane.b32.xlu0 %v596_v23, %s11045_s20 }
  0x56   : > { %615 = vst [vmem:[#allocation1 + $0x8] sm:$0xff] %v11153_v1 }
  0x57   : > { %616 = vst [vmem:[#allocation1 + $0x10] sm:$0xff] %v11155_v2 }
  0x5e   : > { %v618_v24 = vld [vmem:[#allocation1 + $0x1] ss:$4 sm:$0xff] }
  0x5f   : > { %619 = vrot.lane.b32.xlu1 %v618_v24, %s11044_s19  ;;  %627 = vst [vmem:[#allocation1] sm:$0xff] %v11151_v0 }
  0x60   : > { %628 = vst [vmem:[#allocation1 + $0x8] sm:$0xff] %v11153_v1 }
  0x61   : > { %629 = vst [vmem:[#allocation1 + $0x10] sm:$0xff] %v11155_v2 }
  0x68   : > { %v631_v25 = vld [vmem:[#allocation1 + $0x2] ss:$4 sm:$0xff] }
  0x69   : > { %640 = vst [vmem:[#allocation1] sm:$0xff] %v11151_v0  ;;  %632 = vrot.lane.b32.xlu2 %v631_v25, %s11045_s20 }
  0x6a   : > { %641 = vst [vmem:[#allocation1 + $0x8] sm:$0xff] %v11153_v1 }
  0x6b   : > { %642 = vst [vmem:[#allocation1 + $0x10] sm:$0xff] %v11155_v2 }
  0x72   : > { %v644_v26 = vld [vmem:[#allocation1 + $0x3] ss:$4 sm:$0xff]  ;;  %v520_v51 = vpop.permute.xlu2 %519 }
  0x73   : > { %653 = vst [vmem:[#allocation1] sm:$0xff] %v11151_v0  ;;  %645 = vrot.lane.b32.xlu2 %v644_v26, %s11045_s20  ;;  %v521_v53 = vrot.slane %v520_v51, 1 }
  0x74   : > { %654 = vst [vmem:[#allocation1 + $0x8] sm:$0xff] %v11153_v1 }
  0x75   : > { %655 = vst [vmem:[#allocation1 + $0x10] sm:$0xff] %v11155_v2  ;;  %v11333_v57 = vsel %vm522_vm7, %v520_v51, %v521_v53 }
  0x76   : > { %526 = vst.msk [vmem:[#allocation2 + $0x2] ss:$8 sm:$0xf] %vm11169_vm6, %v11333_v57 }
  0x7b   : > { %575 = vrot.lane.b32.xlu2 %v574_v22, %s11046_s21 }
  0x7c   : > { %v657_v27 = vld [vmem:[#allocation1 + $0x2] ss:$4 sm:$0xff] }
  0x7d   : > { %666 = vst [vmem:[#allocation1] sm:$0xff] %v11151_v0  ;;  %658 = vrot.lane.b32.xlu0 %v657_v27, %s11044_s19 }
  0x7e   : > { %667 = vst [vmem:[#allocation1 + $0x8] sm:$0xff] %v11153_v1 }
  0x7f   : > { %668 = vst [vmem:[#allocation1 + $0x10] sm:$0xff] %v11155_v2 }
  0x83   : > { %918 = vrot.lane.b32.xlu2 %v11176_v16, %s11047_s22 }
  0x85   : > { %533 = vrot.lane.b32.xlu0 %v532_v18, %s11046_s21 }
  0x86   : > { %v670_v28 = vld [vmem:[#allocation1 + $0x3] ss:$4 sm:$0xff] }
  0x87   : > { %671 = vrot.lane.b32.xlu1 %v670_v28, %s11044_s19  ;;  %820 = vst [vmem:[#allocation1] sm:$0xff] %v11151_v0 }
  0x88   : > { %821 = vst [vmem:[#allocation1 + $0x8] sm:$0xff] %v11153_v1 }
  0x89   : > { %v606_v52 = vpop.permute.xlu1 %605  ;;  %v584_v55 = vpop.permute.xlu0 %583 }
  0x8a   : > { %v607_v54 = vrot.slane %v606_v52, 1  ;;  %v585_v56 = vrot.slane %v584_v55, 1 }
  0x8b   : > { %841 = vrot.lane.b32.xlu2 %v11176_v16, %s11048_s23 }
  0x8c   : > { %v11336_v58 = vsel %vm608_vm8, %v606_v52, %v607_v54  ;;  %v11342_v59 = vsel %vm586_vm9, %v584_v55, %v585_v56 }
  0x8d   : > { %612 = vst.msk [vmem:[#allocation2 + $0x22] ss:$8 sm:$0xf] %vm11169_vm6, %v11336_v58 }
  0x8e   : > { %590 = vst.msk [vmem:[#allocation2 + $0x20] ss:$8 sm:$0xf] %vm11169_vm6, %v11342_v59 }
  0x8f   : > { %562 = vrot.lane.b32.xlu1 %v561_v21, %s11046_s21  ;;  %v11236_v29 = vld [vmem:[#allocation1 + $0x1] ss:$4 sm:$0xff] }
  0x90   : > { %829 = vst [vmem:[#allocation1] sm:$0xff] %v11151_v0 }
  0x91   : > { %830 = vst [vmem:[#allocation1 + $0x8] sm:$0xff] %v11153_v1 }
  0x92   : > { %831 = vst [vmem:[#allocation1 + $0x10] sm:$0xff] %v11155_v2 }
  0x99   : > { %v833_v30 = vld [vmem:[#allocation1 + $0x1] ss:$4 sm:$0xff] }
  0x9a   : > { %834 = vrot.lane.b32.xlu1 %v833_v30, %s11046_s21  ;;  %849 = vst [vmem:[#allocation1] sm:$0xff] %v11151_v0 }
  0x9b   : > { %850 = vst [vmem:[#allocation1 + $0x8] sm:$0xff] %v11153_v1 }
  0xa2   : > { %v11246_v31 = vld [vmem:[#allocation1 + $0x3] ss:$4 sm:$0xff] }
  0xa3   : > { %856 = vst [vmem:[#allocation1] sm:$0xff] %v11151_v0 }
  0xa4   : > { %857 = vst [vmem:[#allocation1 + $0x8] sm:$0xff] %v11153_v1 }
  0xa5   : > { %858 = vst [vmem:[#allocation1 + $0x10] sm:$0xff] %v11155_v2 }
  0xac   : > { %v860_v32 = vld [vmem:[#allocation1 + $0x2] ss:$4 sm:$0xff] }
  0xad   : > { %868 = vst [vmem:[#allocation1] sm:$0xff] %v11151_v0 }
  0xae   : > { %869 = vst [vmem:[#allocation1 + $0x8] sm:$0xff] %v11153_v1 }
  0xaf   : > { %870 = vst [vmem:[#allocation1 + $0x10] sm:$0xff] %v11155_v2 }
  0xb6   : > { %v872_v33 = vld [vmem:[#allocation1 + $0x3] ss:$4 sm:$0xff] }
  0xb7   : > { %880 = vst [vmem:[#allocation1] sm:$0xff] %v11151_v0 }
  0xb8   : > { %881 = vst [vmem:[#allocation1 + $0x8] sm:$0xff] %v11153_v1 }
  0xb9   : > { %882 = vst [vmem:[#allocation1 + $0x10] sm:$0xff] %v11155_v2 }
  0xc0   : > { %v884_v34 = vld [vmem:[#allocation1 + $0x2] ss:$4 sm:$0xff] }
  0xc1   : > { %892 = vst [vmem:[#allocation1] sm:$0xff] %v11151_v0 }
  0xc2   : > { %893 = vst [vmem:[#allocation1 + $0x8] sm:$0xff] %v11153_v1 }
  0xc3   : > { %894 = vst [vmem:[#allocation1 + $0x10] sm:$0xff] %v11155_v2  ;;  %v633_v60 = vpop.permute.xlu2 %632 }
  0xc4   : > { %v634_v62 = vrot.slane %v633_v60, 1 }
  0xc6   : > { %v635_v7 = vsel %vm586_vm9, %v633_v60, %v634_v62 }
  0xc7   : > { %v598_v4 = vpop.permute.xlu0 %597  ;;  %638 = vst.msk [vmem:[#allocation2 + $0x24] ss:$8 sm:$0xf] %vm11169_vm6, %v635_v7 }
  0xc8   : > { %v599_v6 = vrot.slane %v598_v4, 1 }
  0xca   : > { %v896_v35 = vld [vmem:[#allocation1 + $0x1] ss:$4 sm:$0xff]  ;;  %v600_v9 = vsel %vm586_vm9, %v598_v4, %v599_v6 }
  0xcb   : > { %897 = vrot.lane.b32.xlu0 %v896_v35, %s11045_s20  ;;  %906 = vst [vmem:[#allocation1] sm:$0xff] %v11151_v0 }
  0xcc   : > { %907 = vst [vmem:[#allocation1 + $0x8] sm:$0xff] %v11153_v1 }
  0xcd   : > { %908 = vst [vmem:[#allocation1 + $0x10] sm:$0xff] %v11155_v2  ;;  %v646_v10 = vpop.permute.xlu2 %645 }
  0xce   : > { %603 = vst.msk [vmem:[#allocation2 + $0x21] ss:$8 sm:$0xf] %vm11169_vm6, %v600_v9  ;;  %v647_v13 = vrot.slane %v646_v10, 1 }
  0xd0   : > { %v648_v18 = vsel %vm586_vm9, %v646_v10, %v647_v13 }
  0xd1   : > { %v620_v61 = vpop.permute.xlu1 %619  ;;  %651 = vst.msk [vmem:[#allocation2 + $0x25] ss:$8 sm:$0xf] %vm11169_vm6, %v648_v18 }
  0xd2   : > { %v621_v63 = vrot.slane %v620_v61, 1 }
  0xd4   : > { %v910_v36 = vld [vmem:[#allocation1 + $0x1] ss:$4 sm:$0xff]  ;;  %v622_v8 = vsel %vm608_vm8, %v620_v61, %v621_v63 }
  0xd5   : > { %911 = vrot.lane.b32.xlu1 %v910_v36, %s11044_s19  ;;  %926 = vst [vmem:[#allocation1] sm:$0xff] %v11151_v0 }
  0xd6   : > { %927 = vst [vmem:[#allocation1 + $0x8] sm:$0xff] %v11153_v1 }
  0xd7   : > { %928 = vst [vmem:[#allocation1 + $0x10] sm:$0xff] %v11155_v2 }
  0xd8   : > { %625 = vst.msk [vmem:[#allocation2 + $0x23] ss:$8 sm:$0xf] %vm11169_vm6, %v622_v8 }
  0xde   : > { %v930_v37 = vld [vmem:[#allocation1 + $0x3] ss:$4 sm:$0xff] }
  0xdf   : > { %931 = vrot.lane.b32.xlu0 %v930_v37, %s11045_s20  ;;  %938 = vst [vmem:[#allocation1] sm:$0xff] %v11151_v0 }
  0xe0   : > { %939 = vst [vmem:[#allocation1 + $0x8] sm:$0xff] %v11153_v1 }
  0xe1   : > { %940 = vst [vmem:[#allocation1 + $0x10] sm:$0xff] %v11155_v2 }
  0xe8   : > { %v942_v38 = vld [vmem:[#allocation1 + $0x2] ss:$4 sm:$0xff] }
  0xe9   : > { %943 = vrot.lane.b32.xlu1 %v942_v38, %s11044_s19  ;;  %950 = vst [vmem:[#allocation1] sm:$0xff] %v11151_v0 }
  0xea   : > { %951 = vst [vmem:[#allocation1 + $0x8] sm:$0xff] %v11153_v1 }
  0xeb   : > { %952 = vst [vmem:[#allocation1 + $0x10] sm:$0xff] %v11155_v2 }
  0xef   : > { %v659_v15 = vpop.permute.xlu0 %658 }
  0xf0   : > { %v660_v17 = vrot.slane %v659_v15, 1 }
  0xf1   : > { %873 = vrot.lane.b32.xlu1 %v872_v33, %s11046_s21 }
  0xf2   : > { %v954_v39 = vld [vmem:[#allocation1 + $0x3] ss:$4 sm:$0xff]  ;;  %v661_v21 = vsel %vm608_vm8, %v659_v15, %v660_v17 }
  0xf3   : > { %962 = vst [vmem:[#allocation1] sm:$0xff] %v11151_v0  ;;  %955 = vrot.lane.b32.xlu2 %v954_v39, %s11044_s19 }
  0xf4   : > { %963 = vst [vmem:[#allocation1 + $0x8] sm:$0xff] %v11153_v1 }
  0xf5   : > { %964 = vst [vmem:[#allocation1 + $0x10] sm:$0xff] %v11155_v2 }
  0xf6   : > { %664 = vst.msk [vmem:[#allocation2 + $0x26] ss:$8 sm:$0xf] %vm11169_vm6, %v661_v21  ;;  %v11470_v21 = vld [vmem:[%s16108_s3 + $0x8] sm:$0xff] }
  0xf7   : > { %v534_v25 = vpop.permute.xlu0 %533 }
  0xf8   : > { %v535_v28 = vrot.slane %v534_v25, 1 }
  0xf9   : > { %1244 = vrot.lane.b32.xlu1 %v11176_v16, %s11049_s24  ;;  %v672_v11 = vpop.permute.xlu1 %671 }
  0xfa   : > { %v673_v14 = vrot.slane %v672_v11, 1  ;;  %v536_v35 = vsel %vm522_vm7, %v534_v25, %v535_v28 }
  0xfb   : > { %885 = vrot.lane.b32.xlu2 %v884_v34, %s11048_s23  ;;  %539 = vst.msk [vmem:[#allocation2 + $0x3] ss:$8 sm:$0xf] %vm11169_vm6, %v536_v35 }
  0xfc   : > { %v966_v40 = vld [vmem:[#allocation1 + $0x2] ss:$4 sm:$0xff]  ;;  %v674_v20 = vsel %vm608_vm8, %v672_v11, %v673_v14 }
  0xfd   : > { %1130 = vst [vmem:[#allocation1] sm:$0xff] %v11151_v0  ;;  %967 = vrot.lane.b32.xlu0 %v966_v40, %s11047_s22 }
  0xfe   : > { %1131 = vst [vmem:[#allocation1 + $0x8] sm:$0xff] %v11153_v1 }
  0xff   : > { %677 = vst.msk [vmem:[#allocation2 + $0x27] ss:$8 sm:$0xf] %vm11169_vm6, %v674_v20 }
 0x101   : > { %v563_v22 = vpop.permute.xlu1 %562 }
 0x102   : > { %v564_v24 = vrot.slane %v563_v22, 1 }
 0x104   : > { %v565_v27 = vsel %vm522_vm7, %v563_v22, %v564_v24 }
 0x105   : > { %v11287_v41 = vld [vmem:[#allocation1 + $0x2] ss:$4 sm:$0xff]  ;;  %861 = vrot.lane.b32.xlu0 %v860_v32, %s11046_s21  ;;  %568 = vst.msk [vmem:[#allocation2 + $0x6] ss:$8 sm:$0xf] %vm11169_vm6, %v565_v27 }
 0x106   : > { %1137 = vst [vmem:[#allocation1] sm:$0xff] %v11151_v0  ;;  %v687_v32 = vld [vmem:[#allocation2 + $0x20] sm:$0xff]  ;;  %v688_v33 = vld [vmem:[#allocation2 + $0x28] sm:$0xff]  ;;  %v689_v34 = vld [vmem:[#allocation2 + $0x30] sm:$0xff] }
 0x107   : > { %1138 = vst [vmem:[#allocation1 + $0x8] sm:$0xff] %v11153_v1  ;;  %v690_v36 = vld [vmem:[#allocation2 + $0x38] sm:$0xff]  ;;  %776 = vmatpush.msra.mxu2 %v689_v34  ;;  %718 = vmatpush.msra.mxu0 %v687_v32 }
 0x108   : > { %904 = vst.msk [vmem:[#allocation2 + $0x21] ss:$8 sm:$0xf] %vm11169_vm6, %v11336_v58  ;;  %805 = vmatpush.msra.mxu3 %v690_v36  ;;  %747 = vmatpush.msra.mxu1 %v688_v33 }
 0x10c   : > { %v835_v38 = vpop.permute.xlu1 %834 }
 0x10d   : > { %1264 = vrot.lane.b32.xlu0 %v11176_v16, %s11050_s25 }
 0x10e   : > { %v11294_v42 = vld [vmem:[#allocation1 + $0x3] ss:$4 sm:$0xff] }
 0x10f   : > { %1144 = vst [vmem:[#allocation1] sm:$0xff] %v11151_v0 }
 0x110   : > { %1145 = vst [vmem:[#allocation1 + $0x8] sm:$0xff] %v11153_v1 }
 0x111   : > { %1146 = vst [vmem:[#allocation1 + $0x10] sm:$0xff] %v11155_v2 }
 0x118   : > { %v1148_v43 = vld [vmem:[#allocation1 + $0x2] ss:$4 sm:$0xff] }
 0x119   : > { %1156 = vst [vmem:[#allocation1] sm:$0xff] %v11151_v0  ;;  %1149 = vrot.lane.b32.xlu2 %v1148_v43, %s11046_s21 }
 0x11a   : > { %1157 = vst [vmem:[#allocation1 + $0x8] sm:$0xff] %v11153_v1 }
 0x11b   : > { %1158 = vst [vmem:[#allocation1 + $0x10] sm:$0xff] %v11155_v2 }
 0x122   : > { %v1160_v44 = vld [vmem:[#allocation1 + $0x3] ss:$4 sm:$0xff] }
 0x123   : > { %1170 = vst [vmem:[#allocation1] sm:$0xff] %v11151_v0 }
 0x124   : > { %1171 = vst [vmem:[#allocation1 + $0x8] sm:$0xff] %v11153_v1 }
 0x125   : > { %1172 = vst [vmem:[#allocation1 + $0x10] sm:$0xff] %v11155_v2 }
 0x12c   : > { %v11306_v45 = vld [vmem:[#allocation1 + $0x1] ss:$4 sm:$0xff] }
 0x12d   : > { %1184 = vst [vmem:[#allocation1] sm:$0xff] %v11151_v0 }
 0x12e   : > { %1185 = vst [vmem:[#allocation1 + $0x8] sm:$0xff] %v11153_v1 }
 0x12f   : > { %1186 = vst [vmem:[#allocation1 + $0x10] sm:$0xff] %v11155_v2 }
 0x136   : > { %v11311_v46 = vld [vmem:[#allocation1 + $0x1] ss:$4 sm:$0xff] }
 0x137   : > { %1196 = vst [vmem:[#allocation1] sm:$0xff] %v11151_v0 }
 0x138   : > { %1197 = vst [vmem:[#allocation1 + $0x8] sm:$0xff] %v11153_v1 }
 0x139   : > { %1198 = vst [vmem:[#allocation1 + $0x10] sm:$0xff] %v11155_v2 }
 0x13d   : > { %v898_v40 = vpop.permute.xlu0 %897 }
 0x13e   : > { %v899_v43 = vrot.slane %v898_v40, 1 }
 0x140   : > { %v1200_v47 = vld [vmem:[#allocation1 + $0x2] ss:$4 sm:$0xff] }
 0x141   : > { %1208 = vst [vmem:[#allocation1] sm:$0xff] %v11151_v0  ;;  %1201 = vrot.lane.b32.xlu0 %v1200_v47, %s11045_s20 }
 0x142   : > { %1209 = vst [vmem:[#allocation1 + $0x8] sm:$0xff] %v11153_v1 }
 0x143   : > { %1210 = vst [vmem:[#allocation1 + $0x10] sm:$0xff] %v11155_v2 }
 0x14a   : > { %v1212_v48 = vld [vmem:[#allocation1 + $0x3] ss:$4 sm:$0xff] }
 0x14b   : > { %1213 = vrot.lane.b32.xlu1 %v1212_v48, %s11045_s20  ;;  %1220 = vst [vmem:[#allocation1] sm:$0xff] %v11151_v0 }
 0x14c   : > { %1221 = vst [vmem:[#allocation1 + $0x8] sm:$0xff] %v11153_v1 }
 0x14d   : > { %1222 = vst [vmem:[#allocation1 + $0x10] sm:$0xff] %v11155_v2 }
 0x151   : > { %v932_v56 = vpop.permute.xlu0 %931 }
 0x152   : > { %v933_v61 = vrot.slane %v932_v56, 1 }
 0x154   : > { %v1224_v49 = vld [vmem:[#allocation1 + $0x2] ss:$4 sm:$0xff] }
 0x155   : > { %1232 = vst [vmem:[#allocation1] sm:$0xff] %v11151_v0  ;;  %1225 = vrot.lane.b32.xlu2 %v1224_v49, %s11044_s19  ;;  %v912_v49 = vpop.permute.xlu1 %911 }
 0x156   : > { %1233 = vst [vmem:[#allocation1 + $0x8] sm:$0xff] %v11153_v1  ;;  %v913_v55 = vrot.slane %v912_v49, 1 }
 0x157   : > { %1234 = vst [vmem:[#allocation1 + $0x10] sm:$0xff] %v11155_v2 }
 0x15e   : > { %v1236_v50 = vld [vmem:[#allocation1 + $0x3] ss:$4 sm:$0xff] }
 0x15f   : > { %1252 = vst [vmem:[#allocation1] sm:$0xff] %v11151_v0  ;;  %1237 = vrot.lane.b32.xlu0 %v1236_v50, %s11044_s19  ;;  %v11413_v50 = vld [vmem:[%s16108_s3] sm:$0xff] }
 0x160   : > { %1253 = vst [vmem:[#allocation1 + $0x8] sm:$0xff] %v11153_v1 }
 0x161   : > { %1254 = vst [vmem:[#allocation1 + $0x10] sm:$0xff] %v11155_v2 }
 0x167   : > { %1161 = vrot.lane.b32.xlu0 %v1160_v44, %s11046_s21 }
 0x168   : > { %v1256_v5 = vld [vmem:[#allocation1 + $0x1] ss:$4 sm:$0xff] }
 0x169   : > { %1272 = vst [vmem:[#allocation1] sm:$0xff] %v11151_v0  ;;  %1257 = vrot.lane.b32.xlu2 %v1256_v5, %s11049_s24  ;;  %v944_v5 = vpop.permute.xlu1 %943 }
 0x16a   : > { %1273 = vst [vmem:[#allocation1 + $0x8] sm:$0xff] %v11153_v1  ;;  %v945_v6 = vrot.slane %v944_v5, 1 }
 0x16b   : > { %1274 = vst [vmem:[#allocation1 + $0x10] sm:$0xff] %v11155_v2 }
 0x16c   : > { %v946_v11 = vsel %vm608_vm8, %v944_v5, %v945_v6 }
 0x16d   : > { %948 = vst.msk [vmem:[#allocation2 + $0x25] ss:$8 sm:$0xf] %vm11169_vm6, %v946_v11 }
 0x16f   : > { %1585 = vrot.lane.b32.xlu0 %v11176_v16, %s11051_s26  ;;  %v576_v16 = vpop.permute.xlu2 %575  ;;  %v968_v7 = vpop.permute.xlu0 %967 }
 0x170   : > { %v577_v23 = vrot.slane %v576_v16, 1  ;;  %v969_v8 = vrot.slane %v968_v7, 1 }
 0x171   : > { %1189 = vrot.lane.b32.xlu2 %v11311_v46, %s11044_s19  ;;  %v836_v46 = vrot.slane %v835_v38, 1  ;;  %v874_v22 = vpop.permute.xlu1 %873 }
 0x172   : > { %v1276_v19 = vld [vmem:[#allocation1 + $0x1] ss:$4 sm:$0xff]  ;;  %v578_v26 = vsel %vm522_vm7, %v576_v16, %v577_v23  ;;  %v970_v13 = vsel %vm921_vm10, %v968_v7, %v969_v8  ;;  %v875_v24 = vrot.slane %v874_v22, 1 }
 0x173   : > { %1440 = vst [vmem:[#allocation1] sm:$0xff] %v11151_v0  ;;  %1277 = vrot.lane.b32.xlu1 %v1276_v19, %s11050_s25  ;;  %v837_v62 = vsel %vm522_vm7, %v835_v38, %v836_v46 }
 0x174   : > { %1441 = vst [vmem:[#allocation1 + $0x8] sm:$0xff] %v11153_v1  ;;  %v876_v28 = vsel %vm522_vm7, %v874_v22, %v875_v24 }
 0x175   : > { %581 = vst.msk [vmem:[#allocation2 + $0x7] ss:$8 sm:$0xf] %vm11169_vm6, %v578_v26 }
 0x176   : > { %972 = vst.msk [vmem:[#allocation2 + $0x27] ss:$8 sm:$0xf] %vm11169_vm6, %v970_v13 }
 0x177   : > { %v919_v37 = vpop.permute.xlu2 %918  ;;  %v862_v25 = vpop.permute.xlu0 %861 }
 0x178   : > { %v920_v39 = vrot.slane %v919_v37, 1  ;;  %v863_v26 = vrot.slane %v862_v25, 1 }
 0x17a   : > { %v11400_v44 = vsel %vm921_vm10, %v919_v37, %v920_v39  ;;  %v864_v32 = vsel %vm522_vm7, %v862_v25, %v863_v26 }
 0x17b   : > { %v11384_v30 = vld [vmem:[#allocation1 + $0x3] ss:$4 sm:$0xff]  ;;  %1175 = vrot.lane.b32.xlu1 %v11306_v45, %s11045_s20  ;;  %924 = vst.msk [vmem:[#allocation2 + $0x23] ss:$8 sm:$0xf] %vm11169_vm6, %v11400_v44  ;;  %v900_v45 = vsel %vm586_vm9, %v898_v40, %v899_v43  ;;  %v1245_v40 = vpop.permute.xlu1 %1244 }
 0x17c   : > { %1447 = vst [vmem:[#allocation1] sm:$0xff] %v11151_v0  ;;  %v683_v51 = vld [vmem:[#allocation2] sm:$0xff]  ;;  %v684_v52 = vld [vmem:[#allocation2 + $0x8] sm:$0xff]  ;;  %v685_v53 = vld [vmem:[#allocation2 + $0x10] sm:$0xff] }
 0x17d   : > { %1448 = vst [vmem:[#allocation1 + $0x8] sm:$0xff] %v11153_v1  ;;  %v686_v60 = vld [vmem:[#allocation2 + $0x18] sm:$0xff]  ;;  %777 = vmatpush.msra.mxu2 %v685_v53  ;;  %719 = vmatpush.msra.mxu0 %v683_v51 }
 0x17e   : > { %1449 = vst [vmem:[#allocation1 + $0x10] sm:$0xff] %v11155_v2  ;;  %806 = vmatpush.msra.mxu3 %v686_v60  ;;  %9566 = vmatmul.msk.f32.vlgmr.msra.gmra.mxu2 %vm691_vm12, %v11413_v50 }
 0x17f   : > { %902 = vst.msk [vmem:[#allocation2 + $0x20] ss:$8 sm:$0xf] %vm11169_vm6, %v900_v45  ;;  %v842_v48 = vpop.permute.xlu2 %841  ;;  %9570 = vmatmul.msk.f32.vlgmr.msra.gmra.mxu3 %vm691_vm12, %v11413_v50  ;;  %9558 = vmatmul.msk.f32.vlgmr.msra.gmra.mxu0 %vm691_vm12, %v11413_v50  ;;  %v1246_v45 = vrot.slane %v1245_v40, 1  ;;  %v1265_v46 = vpop.permute.xlu0 %1264 }
 0x180   : > { %v843_v54 = vrot.slane %v842_v48, 1  ;;  %825 = vst.msk [vmem:[#allocation2] ss:$8 sm:$0xf] %vm11169_vm6, %v11236_v29  ;;  %v914_v29 = vsel %vm608_vm8, %v912_v49, %v913_v55  ;;  %748 = vmatpush.msra.mxu1 %v684_v52 }
 0x181   : > { %827 = vst.msk [vmem:[#allocation2 + $0x1] ss:$8 sm:$0xf] %vm11169_vm6, %v11333_v57  ;;  %v934_v57 = vsel %vm586_vm9, %v932_v56, %v933_v61  ;;  %9562 = vmatmul.msk.f32.vlgmr.msra.gmra.mxu1 %vm691_vm12, %v11413_v50  ;;  %v1248_v51 = vsel %vm1247_vm13, %v1245_v40, %v1246_v45 }
 0x182   : > { %v845_v63 = vsel %vm844_vm11, %v842_v48, %v843_v54  ;;  %854 = vst.msk [vmem:[#allocation2 + $0x4] ss:$8 sm:$0xf] %vm11169_vm6, %v11246_v31 }
 0x183   : > { %839 = vst.msk [vmem:[#allocation2 + $0x2] ss:$8 sm:$0xf] %vm11169_vm6, %v837_v62 }
 0x184   : > { %847 = vst.msk [vmem:[#allocation2 + $0x3] ss:$8 sm:$0xf] %vm11169_vm6, %v845_v63 }
 0x185   : > { %v1451_v47 = vld [vmem:[#allocation1 + $0x2] ss:$4 sm:$0xff]  ;;  %916 = vst.msk [vmem:[#allocation2 + $0x22] ss:$8 sm:$0xf] %vm11169_vm6, %v914_v29 }
 0x186   : > { %1452 = vrot.lane.b32.xlu1 %v1451_v47, %s11046_s21  ;;  %1459 = vst [vmem:[#allocation1] sm:$0xff] %v11151_v0  ;;  %9567 = vmatmul.msk.f32.gmra.mxu2 %vm691_vm12, %v11470_v21  ;;  %v1266_v47 = vrot.slane %v1265_v46, 1 }
 0x187   : > { %1460 = vst [vmem:[#allocation1 + $0x8] sm:$0xff] %v11153_v1  ;;  %v956_v4 = vpop.permute.xlu2 %955  ;;  %9571 = vmatmul.msk.f32.gmra.mxu3 %vm691_vm12, %v11470_v21  ;;  %9559 = vmatmul.msk.f32.gmra.mxu0 %vm691_vm12, %v11470_v21 }
 0x188   : > { %1461 = vst [vmem:[#allocation1 + $0x10] sm:$0xff] %v11155_v2  ;;  %v957_v31 = vrot.slane %v956_v4, 1  ;;  %v11557_v52 = vsel %vm1267_vm14, %v1265_v46, %v1266_v47 }
 0x189   : > { %936 = vst.msk [vmem:[#allocation2 + $0x24] ss:$8 sm:$0xf] %vm11169_vm6, %v934_v57  ;;  %9563 = vmatmul.msk.f32.gmra.mxu1 %vm691_vm12, %v11470_v21 }
 0x18a   : > { %v958_v10 = vsel %vm608_vm8, %v956_v4, %v957_v31  ;;  %878 = vst.msk [vmem:[#allocation2 + $0x6] ss:$8 sm:$0xf] %vm11169_vm6, %v876_v28 }
 0x18b   : > { %960 = vst.msk [vmem:[#allocation2 + $0x26] ss:$8 sm:$0xf] %vm11169_vm6, %v958_v10 }
 0x18c   : > { %866 = vst.msk [vmem:[#allocation2 + $0x5] ss:$8 sm:$0xf] %vm11169_vm6, %v864_v32 }
 0x18f   : > { %v1463_v9 = vld [vmem:[#allocation1 + $0x3] ss:$4 sm:$0xff]  ;;  %v886_v16 = vpop.permute.xlu2 %885 }
 0x190   : > { %1471 = vst [vmem:[#allocation1] sm:$0xff] %v11151_v0  ;;  %1464 = vrot.lane.b32.xlu2 %v1463_v9, %s11046_s21  ;;  %v887_v23 = vrot.slane %v886_v16, 1 }
 0x191   : > { %1472 = vst [vmem:[#allocation1 + $0x8] sm:$0xff] %v11153_v1 }
 0x192   : > { %1473 = vst [vmem:[#allocation1 + $0x10] sm:$0xff] %v11155_v2  ;;  %v982_v14 = vld [vmem:[#allocation2 + $0x20] sm:$0xff]  ;;  %v983_v15 = vld [vmem:[#allocation2 + $0x28] sm:$0xff]  ;;  %v984_v17 = vld [vmem:[#allocation2 + $0x30] sm:$0xff]  ;;  %v888_v27 = vsel %vm844_vm11, %v886_v16, %v887_v23 }
 0x193   : > { %v985_v18 = vld [vmem:[#allocation2 + $0x38] sm:$0xff]  ;;  %1012 = vmatpush.msrb.mxu0 %v982_v14  ;;  %1041 = vmatpush.msrb.mxu1 %v983_v15  ;;  %890 = vst.msk [vmem:[#allocation2 + $0x7] ss:$8 sm:$0xf] %vm11169_vm6, %v888_v27 }
 0x194   : > { %1070 = vmatpush.msrb.mxu2 %v984_v17  ;;  %1099 = vmatpush.msrb.mxu3 %v985_v18  ;;  %1250 = vst.msk [vmem:[#allocation2 + $0x24] ss:$8 sm:$0xf] %vm11169_vm6, %v1248_v51 }
 0x195   : > { %1270 = vst.msk [vmem:[#allocation2 + $0x26] ss:$8 sm:$0xf] %vm11169_vm6, %v11557_v52 }
 0x197   : > { %v1150_v39 = vpop.permute.xlu2 %1149 }
 0x198   : > { %v1151_v43 = vrot.slane %v1150_v39, 1 }
 0x199   : > { %v11459_v19 = vld [vmem:[#allocation1 + $0x2] ss:$4 sm:$0xff] }
 0x19a   : > { %1483 = vst [vmem:[#allocation1] sm:$0xff] %v11151_v0  ;;  %v978_v34 = vld [vmem:[#allocation2] sm:$0xff]  ;;  %v979_v35 = vld [vmem:[#allocation2 + $0x8] sm:$0xff]  ;;  %v980_v36 = vld [vmem:[#allocation2 + $0x10] sm:$0xff]  ;;  %v1152_v49 = vsel %vm522_vm7, %v1150_v39, %v1151_v43 }
 0x19b   : > { %1484 = vst [vmem:[#allocation1 + $0x8] sm:$0xff] %v11153_v1  ;;  %v981_v37 = vld [vmem:[#allocation2 + $0x18] sm:$0xff]  ;;  %1013 = vmatpush.msrb.mxu0 %v978_v34  ;;  %1042 = vmatpush.msrb.mxu1 %v979_v35 }
 0x19c   : > { %1485 = vst [vmem:[#allocation1 + $0x10] sm:$0xff] %v11155_v2  ;;  %1071 = vmatpush.msrb.mxu2 %v980_v36  ;;  %1100 = vmatpush.msrb.mxu3 %v981_v37 }
 0x19d   : > { %1135 = vst.msk [vmem:[#allocation2] ss:$8 sm:$0xf] %vm11169_vm6, %v11287_v41  ;;  %v11513_v41 = vld [vmem:[%s16108_s3 + $0x10] sm:$0xff] }
 0x19e   : > { %1142 = vst.msk [vmem:[#allocation2 + $0x1] ss:$8 sm:$0xf] %vm11169_vm6, %v11294_v42  ;;  %9568 = vmatmul.msk.f32.gmra.mxu2 %vm691_vm12, %v11513_v41  ;;  %9572 = vmatmul.msk.f32.gmra.mxu3 %vm691_vm12, %v11513_v41 }
 0x19f   : > { %1168 = vst.msk [vmem:[#allocation2 + $0x4] ss:$8 sm:$0xf] %vm11169_vm6, %v11342_v59  ;;  %9560 = vmatmul.msk.f32.gmra.mxu0 %vm691_vm12, %v11513_v41  ;;  %9564 = vmatmul.msk.f32.gmra.mxu1 %vm691_vm12, %v11513_v41  ;;  %v11530_v59 = vld [vmem:[%s16108_s3 + $0x18] sm:$0xff] }
 0x1a0   : > { %1182 = vst.msk [vmem:[#allocation2 + $0x6] ss:$8 sm:$0xf] %vm11169_vm6, %v11336_v58 }
 0x1a1   : > { %1154 = vst.msk [vmem:[#allocation2 + $0x2] ss:$8 sm:$0xf] %vm11169_vm6, %v1152_v49 }
 0x1a3   : > { %v11464_v20 = vld [vmem:[#allocation1 + $0x1] ss:$4 sm:$0xff] }
 0x1a4   : > { %1497 = vst [vmem:[#allocation1] sm:$0xff] %v11151_v0 }
 0x1a5   : > { %1498 = vst [vmem:[#allocation1 + $0x8] sm:$0xff] %v11153_v1 }
 0x1a6   : > { %1499 = vst [vmem:[#allocation1 + $0x10] sm:$0xff] %v11155_v2  ;;  %9569 = vmatmul.msk.f32.gmra.mxu2 %vm691_vm12, %v11530_v59  ;;  %9573 = vmatmul.msk.f32.gmra.mxu3 %vm691_vm12, %v11530_v59 }
 0x1a7   : > { %9561 = vmatmul.msk.f32.gmra.mxu0 %vm691_vm12, %v11530_v59  ;;  %9565 = vmatmul.msk.f32.gmra.mxu1 %vm691_vm12, %v11530_v59 }
 0x1ad   : > { %v11491_v33 = vld [vmem:[#allocation1 + $0x1] ss:$4 sm:$0xff] }
 0x1ae   : > { %1511 = vst [vmem:[#allocation1] sm:$0xff] %v11151_v0  ;;  %9582 = vmatmul.msk.f32.vlgmr.msrb.gmra.mxu2 %vm691_vm12, %v11413_v50  ;;  %9586 = vmatmul.msk.f32.vlgmr.msrb.gmra.mxu3 %vm691_vm12, %v11413_v50 }
 0x1af   : > { %1512 = vst [vmem:[#allocation1 + $0x8] sm:$0xff] %v11153_v1  ;;  %9574 = vmatmul.msk.f32.vlgmr.msrb.gmra.mxu0 %vm691_vm12, %v11413_v50  ;;  %9578 = vmatmul.msk.f32.vlgmr.msrb.gmra.mxu1 %vm691_vm12, %v11413_v50  ;;  %v1226_v53 = vpop.permute.xlu2 %1225 }
 0x1b0   : > { %1513 = vst [vmem:[#allocation1 + $0x10] sm:$0xff] %v11155_v2  ;;  %v1227_v55 = vrot.slane %v1226_v53, 1 }
 0x1b2   : > { %v1228_v62 = vsel %vm608_vm8, %v1226_v53, %v1227_v55 }
 0x1b3   : > { %v1202_v60 = vpop.permute.xlu0 %1201  ;;  %1230 = vst.msk [vmem:[#allocation2 + $0x22] ss:$8 sm:$0xf] %vm11169_vm6, %v1228_v62 }
 0x1b4   : > { %v1203_v61 = vrot.slane %v1202_v60, 1 }
 0x1b6   : > { %9583 = vmatmul.msk.f32.gmra.mxu2 %vm691_vm12, %v11470_v21  ;;  %9587 = vmatmul.msk.f32.gmra.mxu3 %vm691_vm12, %v11470_v21  ;;  %v1204_v57 = vsel %vm586_vm9, %v1202_v60, %v1203_v61  ;;  %v11052_v60 = vmov 0  }
 0x1b7   : > { %v1515_v38 = vld [vmem:[#allocation1 + $0x3] ss:$4 sm:$0xff]  ;;  %9575 = vmatmul.msk.f32.gmra.mxu0 %vm691_vm12, %v11470_v21  ;;  %9579 = vmatmul.msk.f32.gmra.mxu1 %vm691_vm12, %v11470_v21  ;;  %1206 = vst.msk [vmem:[#allocation2 + $0x20] ss:$8 sm:$0xf] %vm11169_vm6, %v1204_v57 }
 0x1b8   : > { %1523 = vst [vmem:[#allocation1] sm:$0xff] %v11151_v0  ;;  %1516 = vrot.lane.b32.xlu0 %v1515_v38, %s11045_s20  ;;  %10224 = vset.pattern.permute.xlu1 %v11052_v60 }
 0x1b9   : > { %1524 = vst [vmem:[#allocation1 + $0x8] sm:$0xff] %v11153_v1  ;;  %10223 = vset.pattern.permute.xlu0 %v11052_v60  ;;  %10225 = vset.pattern.permute.xlu2 %v11052_v60 }
 0x1ba   : > { %1525 = vst [vmem:[#allocation1 + $0x10] sm:$0xff] %v11155_v2 }
 0x1bd   : > { %v1214_v54 = vpop.permute.xlu1 %1213 }
 0x1be   : > { %v1215_v56 = vrot.slane %v1214_v54, 1  ;;  %9584 = vmatmul.msk.f32.gmra.mxu2 %vm691_vm12, %v11513_v41  ;;  %9588 = vmatmul.msk.f32.gmra.mxu3 %vm691_vm12, %v11513_v41 }
 0x1bf   : > { %9576 = vmatmul.msk.f32.gmra.mxu0 %vm691_vm12, %v11513_v41  ;;  %9580 = vmatmul.msk.f32.gmra.mxu1 %vm691_vm12, %v11513_v41 }
 0x1c0   : > { %v1216_v63 = vsel %vm586_vm9, %v1214_v54, %v1215_v56  ;;  %v1751_v56 = vld [vmem:[%s16109_s4 + $0x10] sm:$0xff] }
 0x1c1   : > { %v1527_v42 = vld [vmem:[#allocation1 + $0x2] ss:$4 sm:$0xff]  ;;  %1218 = vst.msk [vmem:[#allocation2 + $0x21] ss:$8 sm:$0xf] %vm11169_vm6, %v1216_v63 }
 0x1c2   : > { %1535 = vst [vmem:[#allocation1] sm:$0xff] %v11151_v0  ;;  %1528 = vrot.lane.b32.xlu1 %v1527_v42, %s11044_s19 }
 0x1c3   : > { %1536 = vst [vmem:[#allocation1 + $0x8] sm:$0xff] %v11153_v1  ;;  %v1258_v4 = vpop.permute.xlu2 %1257 }
 0x1c4   : > { %1537 = vst [vmem:[#allocation1 + $0x10] sm:$0xff] %v11155_v2  ;;  %v1259_v5 = vrot.slane %v1258_v4, 1 }
 0x1c6   : > { %v1260_v7 = vsel %vm1247_vm13, %v1258_v4, %v1259_v5  ;;  %9585 = vmatmul.msk.f32.gmra.mxu2 %vm691_vm12, %v11530_v59  ;;  %9589 = vmatmul.msk.f32.gmra.mxu3 %vm691_vm12, %v11530_v59  ;;  %v1749_v5 = vld [vmem:[%s16109_s4] sm:$0xff] }
 0x1c7   : > { %1262 = vst.msk [vmem:[#allocation2 + $0x25] ss:$8 sm:$0xf] %vm11169_vm6, %v1260_v7  ;;  %9577 = vmatmul.msk.f32.gmra.mxu0 %vm691_vm12, %v11530_v59  ;;  %9581 = vmatmul.msk.f32.gmra.mxu1 %vm691_vm12, %v11530_v59 }
 0x1cb   : > { %v1539_v48 = vld [vmem:[#allocation1 + $0x3] ss:$4 sm:$0xff]  ;;  %v1190_v10 = vpop.permute.xlu2 %1189 }
 0x1cc   : > { %1547 = vst [vmem:[#allocation1] sm:$0xff] %v11151_v0  ;;  %1540 = vrot.lane.b32.xlu2 %v1539_v48, %s11044_s19  ;;  %v1191_v13 = vrot.slane %v1190_v10, 1 }
 0x1cd   : > { %1548 = vst [vmem:[#allocation1 + $0x8] sm:$0xff] %v11153_v1 }
 0x1ce   : > { %1549 = vst [vmem:[#allocation1 + $0x10] sm:$0xff] %v11155_v2  ;;  %v1192_v18 = vsel %vm608_vm8, %v1190_v10, %v1191_v13 }
 0x1cf   : > { %1194 = vst.msk [vmem:[#allocation2 + $0x7] ss:$8 sm:$0xf] %vm11169_vm6, %v1192_v18  ;;  %v1752_v18 = vld [vmem:[%s16109_s4 + $0x18] sm:$0xff] }
 0x1d1   : > { %v1238_v31 = vpop.permute.xlu0 %1237 }
 0x1d2   : > { %v1239_v6 = vrot.slane %v1238_v31, 1 }
 0x1d4   : > { %v1240_v8 = vsel %vm608_vm8, %v1238_v31, %v1239_v6 }
 0x1d5   : > { %v1551_v29 = vld [vmem:[#allocation1 + $0x2] ss:$4 sm:$0xff]  ;;  %1242 = vst.msk [vmem:[#allocation2 + $0x23] ss:$8 sm:$0xf] %vm11169_vm6, %v1240_v8 }
 0x1d6   : > { %1552 = vrot.lane.b32.xlu0 %v1551_v29, %s11047_s22  ;;  %1559 = vst [vmem:[#allocation1] sm:$0xff] %v11151_v0 }
 0x1d7   : > { %1560 = vst [vmem:[#allocation1 + $0x8] sm:$0xff] %v11153_v1 }
 0x1d8   : > { %1561 = vst [vmem:[#allocation1 + $0x10] sm:$0xff] %v11155_v2 }
 0x1d9   : > { %v1162_v14 = vpop.permute.xlu0 %1161 }
 0x1da   : > { %v1163_v17 = vrot.slane %v1162_v14, 1 }
 0x1de   : > { %1476 = vrot.lane.b32.xlu0 %v11459_v19, %s11048_s23 }
 0x1df   : > { %v1563_v9 = vld [vmem:[#allocation1 + $0x1] ss:$4 sm:$0xff] }
 0x1e0   : > { %1564 = vrot.lane.b32.xlu1 %v1563_v9, %s11049_s24  ;;  %1573 = vst [vmem:[#allocation1] sm:$0xff] %v11151_v0 }
 0x1e1   : > { %1574 = vst [vmem:[#allocation1 + $0x8] sm:$0xff] %v11153_v1  ;;  %v1164_v1 = vsel %vm522_vm7, %v1162_v14, %v1163_v17  ;;  %v1586_v27 = vpop.permute.xlu0 %1585 }
 0x1e2   : > { %1575 = vst [vmem:[#allocation1 + $0x10] sm:$0xff] %v11155_v2  ;;  %v1587_v28 = vrot.slane %v1586_v27, 1 }
 0x1e3   : > { %1166 = vst.msk [vmem:[#allocation2 + $0x3] ss:$8 sm:$0xf] %vm11169_vm6, %v1164_v1 }
 0x1e4   : > { %v1589_v34 = vsel %vm1588_vm15, %v1586_v27, %v1587_v28 }
 0x1e5   : > { %v1278_v11 = vpop.permute.xlu1 %1277 }
 0x1e6   : > { %v1279_v15 = vrot.slane %v1278_v11, 1  ;;  %1770 = vperm.xlu0 %10223, %v1752_v18  }
 0x1e8   : > { %v1280_v0 = vsel %vm1267_vm14, %v1278_v11, %v1279_v15  ;;  %1488 = vrot.lane.b32.xlu1 %v11464_v20, %s11045_s20 }
 0x1e9   : > { %1282 = vst.msk [vmem:[#allocation2 + $0x27] ss:$8 sm:$0xf] %vm11169_vm6, %v1280_v0  ;;  %v1577_v2 = vld [vmem:[#allocation1 + $0x1] ss:$4 sm:$0xff] }
 0x1ea   : > { %1578 = vrot.lane.b32.xlu2 %v1577_v2, %s11050_s25  ;;  %v1465_v20 = vpop.permute.xlu2 %1464  ;;  %v1750_v0 = vld [vmem:[%s16109_s4 + $0x8] sm:$0xff] }
 0x1eb   : > { %v1466_v32 = vrot.slane %v1465_v20, 1 }
 0x1ed   : > { %v1176_v19 = vpop.permute.xlu1 %1175 }
 0x1ee   : > { %v1177_v16 = vrot.slane %v1176_v19, 1 }
 0x1f0   : > { %v1178_v22 = vsel %vm586_vm9, %v1176_v19, %v1177_v16  ;;  %v1292_v23 = vld [vmem:[#allocation2 + $0x20] sm:$0xff]  ;;  %v1293_v24 = vld [vmem:[#allocation2 + $0x28] sm:$0xff]  ;;  %v1294_v25 = vld [vmem:[#allocation2 + $0x30] sm:$0xff]  ;;  %1765 = vperm.xlu1 %10224, %v1751_v56  }
 0x1f1   : > { %1180 = vst.msk [vmem:[#allocation2 + $0x5] ss:$8 sm:$0xf] %vm11169_vm6, %v1178_v22  ;;  %1322 = vmatpush.msra.mxu0 %v1292_v23  ;;  %1351 = vmatpush.msra.mxu1 %v1293_v24  ;;  %v1295_v26 = vld [vmem:[#allocation2 + $0x38] sm:$0xff] }
 0x1f2   : > { %1380 = vmatpush.msra.mxu2 %v1294_v25  ;;  %1409 = vmatpush.msra.mxu3 %v1295_v26  ;;  %1571 = vst.msk [vmem:[#allocation2 + $0x25] ss:$8 sm:$0xf] %vm11169_vm6, %v11557_v52 }
 0x1f3   : > { %1502 = vrot.lane.b32.xlu2 %v11491_v33, %s11044_s19  ;;  %1591 = vst.msk [vmem:[#allocation2 + $0x27] ss:$8 sm:$0xf] %vm11169_vm6, %v1589_v34  ;;  %v1467_v33 = vsel %vm522_vm7, %v1465_v20, %v1466_v32 }
 0x1f8   : > { %v1288_v35 = vld [vmem:[#allocation2] sm:$0xff]  ;;  %v1289_v36 = vld [vmem:[#allocation2 + $0x8] sm:$0xff]  ;;  %v1290_v37 = vld [vmem:[#allocation2 + $0x10] sm:$0xff]  ;;  %v1453_v38 = vpop.permute.xlu1 %1452  ;;  %1755 = vperm.xlu1 %10224, %v1749_v5  }
 0x1f9   : > { %1323 = vmatpush.msra.mxu0 %v1288_v35  ;;  %1352 = vmatpush.msra.mxu1 %v1289_v36  ;;  %v1291_v42 = vld [vmem:[#allocation2 + $0x18] sm:$0xff]  ;;  %v1454_v39 = vrot.slane %v1453_v38, 1 }
 0x1fa   : > { %1381 = vmatpush.msra.mxu2 %v1290_v37  ;;  %1410 = vmatpush.msra.mxu3 %v1291_v42  ;;  %1445 = vst.msk [vmem:[#allocation2] ss:$8 sm:$0xf] %vm11169_vm6, %v11384_v30 }
 0x1fb   : > { %1495 = vst.msk [vmem:[#allocation2 + $0x5] ss:$8 sm:$0xf] %vm11169_vm6, %v11336_v58  ;;  %9598 = vmatmul.msk.f32.vlgmr.msra.gmra.mxu2 %vm691_vm12, %v11413_v50  ;;  %9602 = vmatmul.msk.f32.vlgmr.msra.gmra.mxu3 %vm691_vm12, %v11413_v50  ;;  %v1455_v40 = vsel %vm522_vm7, %v1453_v38, %v1454_v39 }
 0x1fc   : > { %1509 = vst.msk [vmem:[#allocation2 + $0x7] ss:$8 sm:$0xf] %vm11169_vm6, %v11400_v44  ;;  %9590 = vmatmul.msk.f32.vlgmr.msra.gmra.mxu0 %vm691_vm12, %v11413_v50  ;;  %9594 = vmatmul.msk.f32.vlgmr.msra.gmra.mxu1 %vm691_vm12, %v11413_v50  ;;  %v11732_v22 = vpop.f32.mrf.mxu0 }
 0x1fd   : > { %1469 = vst.msk [vmem:[#allocation2 + $0x2] ss:$8 sm:$0xf] %vm11169_vm6, %v1467_v33  ;;  %1760 = vperm.xlu2 %10225, %v1750_v0  }
 0x1fe   : > { %1457 = vst.msk [vmem:[#allocation2 + $0x1] ss:$8 sm:$0xf] %vm11169_vm6, %v1455_v40  ;;  %v750_v23 = vpop.f32.mrf.mxu1 }
 0x201   : > { %v11742_v24 = vpop.f32.mrf.mxu2 }
 0x202   : > { %v11744_v25 = vpop.f32.mrf.mxu3 }
 0x203   : > { %9599 = vmatmul.msk.f32.gmra.mxu2 %vm691_vm12, %v11470_v21  ;;  %9603 = vmatmul.msk.f32.gmra.mxu3 %vm691_vm12, %v11470_v21 }
 0x204   : > { %9591 = vmatmul.msk.f32.gmra.mxu0 %vm691_vm12, %v11470_v21  ;;  %9595 = vmatmul.msk.f32.gmra.mxu1 %vm691_vm12, %v11470_v21 }
 0x206   : > { %v11752_v26 = vpop.f32.mrf.mxu1 }
 0x20a   : > { %v11760_v20 = vpop.f32.mrf.mxu3 }
 0x20b   : > { %9600 = vmatmul.msk.f32.gmra.mxu2 %vm691_vm12, %v11513_v41  ;;  %9604 = vmatmul.msk.f32.gmra.mxu3 %vm691_vm12, %v11513_v41 }
 0x20c   : > { %9592 = vmatmul.msk.f32.gmra.mxu0 %vm691_vm12, %v11513_v41  ;;  %9596 = vmatmul.msk.f32.gmra.mxu1 %vm691_vm12, %v11513_v41 }
 0x213   : > { %9601 = vmatmul.msk.f32.gmra.mxu2 %vm691_vm12, %v11530_v59  ;;  %9605 = vmatmul.msk.f32.gmra.mxu3 %vm691_vm12, %v11530_v59 }
 0x214   : > { %9593 = vmatmul.msk.f32.gmra.mxu0 %vm691_vm12, %v11530_v59  ;;  %9597 = vmatmul.msk.f32.gmra.mxu1 %vm691_vm12, %v11530_v59 }
 0x21c   : > { %v11772_v28 = vpop.f32.mrf.mxu1 }
 0x221   : > { %v11776_v32 = vpop.f32.mrf.mxu3 }
 0x224   : > { %v11780_v35 = vpop.f32.mrf.mxu1 }
 0x226   : > { %v1541_v58 = vpop.permute.xlu2 %1540 }
 0x227   : > { %v1542_v30 = vrot.slane %v1541_v58, 1 }
 0x229   : > { %v1543_v44 = vsel %vm608_vm8, %v1541_v58, %v1542_v30  ;;  %v11784_v37 = vpop.f32.mrf.mxu3 }
 0x22a   : > { %1545 = vst.msk [vmem:[#allocation2 + $0x22] ss:$8 sm:$0xf] %vm11169_vm6, %v1543_v44  ;;  %v1517_v43 = vpop.permute.xlu0 %1516 }
 0x22b   : > { %v1518_v45 = vrot.slane %v1517_v43, 1 }
 0x22c   : > { %v1044_v42 = vpop.f32.mrf.mxu1 }
 0x22d   : > { %v1519_v46 = vsel %vm586_vm9, %v1517_v43, %v1518_v45 }
 0x22e   : > { %1521 = vst.msk [vmem:[#allocation2 + $0x20] ss:$8 sm:$0xf] %vm11169_vm6, %v1519_v46 }
 0x231   : > { %v11788_v39 = vpop.f32.mrf.mxu3 }
 0x234   : > { %v1529_v47 = vpop.permute.xlu1 %1528  ;;  %v1047_v40 = vpop.f32.mrf.mxu1 }
 0x235   : > { %v1530_v48 = vrot.slane %v1529_v47, 1  ;;  %v1119_v0 = vmax.f32 %v11752_v26, %v1047_v40 }
 0x237   : > { %v1531_v49 = vsel %vm608_vm8, %v1529_v47, %v1530_v48 }
 0x238   : > { %1533 = vst.msk [vmem:[#allocation2 + $0x21] ss:$8 sm:$0xf] %vm11169_vm6, %v1531_v49 }
 0x239   : > { %v1105_v30 = vpop.f32.mrf.mxu3 }
 0x23c   : > { %v1050_v43 = vpop.f32.mrf.mxu1 }
 0x241   : > { %v11796_v46 = vpop.f32.mrf.mxu3 }
 0x244   : > { %v1579_v51 = vpop.permute.xlu2 %1578  ;;  %v11800_v48 = vpop.f32.mrf.mxu1 }
 0x245   : > { %v1580_v52 = vrot.slane %v1579_v51, 1 }
 0x247   : > { %v1581_v53 = vsel %vm1267_vm14, %v1579_v51, %v1580_v52 }
 0x248   : > { %1583 = vst.msk [vmem:[#allocation2 + $0x26] ss:$8 sm:$0xf] %vm11169_vm6, %v1581_v53  ;;  %v1553_v54 = vpop.permute.xlu0 %1552 }
 0x249   : > { %v1554_v55 = vrot.slane %v1553_v54, 1  ;;  %v11804_v51 = vpop.f32.mrf.mxu3 }
 0x24b   : > { %v1555_v61 = vsel %vm921_vm10, %v1553_v54, %v1554_v55 }
 0x24c   : > { %1557 = vst.msk [vmem:[#allocation2 + $0x23] ss:$8 sm:$0xf] %vm11169_vm6, %v1555_v61 }
 0x24d   : > { %v1503_v62 = vpop.permute.xlu2 %1502 }
 0x24e   : > { %v1504_v63 = vrot.slane %v1503_v62, 1 }
 0x250   : > { %v1505_v29 = vsel %vm608_vm8, %v1503_v62, %v1504_v63  ;;  %v1477_v57 = vpop.permute.xlu0 %1476 }
 0x251   : > { %1507 = vst.msk [vmem:[#allocation2 + $0x6] ss:$8 sm:$0xf] %vm11169_vm6, %v1505_v29  ;;  %v1478_v4 = vrot.slane %v1477_v57, 1 }
 0x252   : > { %v1565_v31 = vpop.permute.xlu1 %1564 }
 0x253   : > { %v1566_v6 = vrot.slane %v1565_v31, 1  ;;  %v1479_v7 = vsel %vm844_vm11, %v1477_v57, %v1478_v4 }
 0x254   : > { %1481 = vst.msk [vmem:[#allocation2 + $0x3] ss:$8 sm:$0xf] %vm11169_vm6, %v1479_v7  ;;  %v1115_v7 = vmax.f32 %v750_v23, %v1044_v42 }
 0x255   : > { %v1567_v8 = vsel %vm1247_vm13, %v1565_v31, %v1566_v6 }
 0x256   : > { %1569 = vst.msk [vmem:[#allocation2 + $0x24] ss:$8 sm:$0xf] %vm11169_vm6, %v1567_v8 }
 0x257   : > { %v11843_v23 = vpop.permute.xlu2 %1760 }
 0x25a   : > { %v1489_v9 = vpop.permute.xlu1 %1488 }
 0x25b   : > { %v1490_v10 = vrot.slane %v1489_v9, 1 }
 0x25d   : > { %v1491_v11 = vsel %vm586_vm9, %v1489_v9, %v1490_v10  ;;  %v1601_v13 = vld [vmem:[#allocation2 + $0x20] sm:$0xff]  ;;  %v1602_v14 = vld [vmem:[#allocation2 + $0x28] sm:$0xff]  ;;  %v1603_v15 = vld [vmem:[#allocation2 + $0x30] sm:$0xff] }
 0x25e   : > { %1493 = vst.msk [vmem:[#allocation2 + $0x4] ss:$8 sm:$0xf] %vm11169_vm6, %v1491_v11  ;;  %1631 = vmatpush.msrb.mxu0 %v1601_v13  ;;  %1660 = vmatpush.msrb.mxu1 %v1602_v14  ;;  %v1604_v17 = vld [vmem:[#allocation2 + $0x38] sm:$0xff] }
 0x25f   : > { %1689 = vmatpush.msrb.mxu2 %v1603_v15  ;;  %1718 = vmatpush.msrb.mxu3 %v1604_v17  ;;  %v11835_v15 = vld [vmem:[%s16107_s2] sm:$0xf] }
 0x262   : > { %v11818_v5 = vpop.permute.xlu1 %1765 }
 0x265   : > { %v1597_v1 = vld [vmem:[#allocation2] sm:$0xff]  ;;  %v1598_v2 = vld [vmem:[#allocation2 + $0x8] sm:$0xff]  ;;  %v1599_v19 = vld [vmem:[#allocation2 + $0x10] sm:$0xff] }
 0x266   : > { %1632 = vmatpush.msrb.mxu0 %v1597_v1  ;;  %1661 = vmatpush.msrb.mxu1 %v1598_v2  ;;  %v1600_v16 = vld [vmem:[#allocation2 + $0x18] sm:$0xff]  ;;  %v11841_v2 = vperm.slane %v11835_v15, 1 }
 0x267   : > { %1690 = vmatpush.msrb.mxu2 %v1599_v19  ;;  %1719 = vmatpush.msrb.mxu3 %v1600_v16 }
 0x268   : > { %9606 = vmatmul.msk.f32.vlgmr.msrb.gmra.mxu0 %vm691_vm12, %v11413_v50  ;;  %9610 = vmatmul.msk.f32.vlgmr.msrb.gmra.mxu1 %vm691_vm12, %v11413_v50 }
 0x269   : > { %9614 = vmatmul.msk.f32.vlgmr.msrb.gmra.mxu2 %vm691_vm12, %v11413_v50  ;;  %9618 = vmatmul.msk.f32.vlgmr.msrb.gmra.mxu3 %vm691_vm12, %v11413_v50  ;;  %v11750_v50 = vpop.f32.mrf.mxu0 }
 0x26a   : > { %v11828_v11 = vpop.permute.xlu1 %1755 }
 0x270   : > { %9607 = vmatmul.msk.f32.gmra.mxu0 %vm691_vm12, %v11470_v21  ;;  %9611 = vmatmul.msk.f32.gmra.mxu1 %vm691_vm12, %v11470_v21 }
 0x271   : > { %9615 = vmatmul.msk.f32.gmra.mxu2 %vm691_vm12, %v11470_v21  ;;  %9619 = vmatmul.msk.f32.gmra.mxu3 %vm691_vm12, %v11470_v21  ;;  %v11758_v21 = vpop.f32.mrf.mxu2  ;;  %v11770_v27 = vpop.f32.mrf.mxu0 }
 0x278   : > { %9608 = vmatmul.msk.f32.gmra.mxu0 %vm691_vm12, %v11513_v41  ;;  %9612 = vmatmul.msk.f32.gmra.mxu1 %vm691_vm12, %v11513_v41 }
 0x279   : > { %9616 = vmatmul.msk.f32.gmra.mxu2 %vm691_vm12, %v11513_v41  ;;  %9620 = vmatmul.msk.f32.gmra.mxu3 %vm691_vm12, %v11513_v41  ;;  %v11774_v41 = vpop.f32.mrf.mxu2  ;;  %v11778_v34 = vpop.f32.mrf.mxu0 }
 0x27a   : > { %v1354_v53 = vpop.f32.mrf.mxu1 }
 0x27b   : > { %v1425_v9 = vmax.f32 %v1115_v7, %v1354_v53 }
 0x27e   : > { %v11808_v55 = vpop.f32.mrf.mxu3 }
 0x280   : > { %9609 = vmatmul.msk.f32.gmra.mxu0 %vm691_vm12, %v11530_v59  ;;  %9613 = vmatmul.msk.f32.gmra.mxu1 %vm691_vm12, %v11530_v59 }
 0x281   : > { %9617 = vmatmul.msk.f32.gmra.mxu2 %vm691_vm12, %v11530_v59  ;;  %9621 = vmatmul.msk.f32.gmra.mxu3 %vm691_vm12, %v11530_v59  ;;  %v11782_v36 = vpop.f32.mrf.mxu2  ;;  %v11786_v38 = vpop.f32.mrf.mxu0  ;;  %vm1932_vm12 = vcmask 1047728  }
 0x282   : > { %v1357_v60 = vpop.f32.mrf.mxu1 }
 0x283   : > { %v1429_v42 = vmax.f32 %v1119_v0, %v1357_v60  ;;  %v1123_v60 = vmax.f32 %v11772_v28, %v1050_v43 }
 0x286   : > { %v1415_v62 = vpop.f32.mrf.mxu3 }
 0x289   : > { %v1073_v59 = vpop.f32.mrf.mxu2  ;;  %v11790_v33 = vpop.f32.mrf.mxu0 }
 0x28a   : > { %v1360_v29 = vpop.f32.mrf.mxu1  ;;  %v1116_v18 = vmax.f32 %v11742_v24, %v1073_v59 }
 0x28e   : > { %v11816_v4 = vpop.f32.mrf.mxu3 }
 0x291   : > { %v1076_v58 = vpop.f32.mrf.mxu2  ;;  %v11792_v44 = vpop.f32.mrf.mxu0 }
 0x292   : > { %v11822_v6 = vpop.f32.mrf.mxu1  ;;  %v1120_v59 = vmax.f32 %v11758_v21, %v1076_v58 }
 0x296   : > { %v11826_v10 = vpop.f32.mrf.mxu3 }
 0x299   : > { %v11794_v45 = vpop.f32.mrf.mxu2  ;;  %v11798_v47 = vpop.f32.mrf.mxu0 }
 0x2a1   : > { %v11802_v49 = vpop.f32.mrf.mxu2  ;;  %v11806_v52 = vpop.f32.mrf.mxu0 }
 0x2a9   : > { %v1383_v54 = vpop.f32.mrf.mxu2  ;;  %v11810_v56 = vpop.f32.mrf.mxu0 }
 0x2aa   : > { %v1426_v16 = vmax.f32 %v1116_v18, %v1383_v54  ;;  %v11854_v54 = vperm.slane %v11835_v15, 2  ;;  %v1121_v18 = vmax.f32 %v11760_v20, %v1105_v30  ;;  %v1124_v20 = vmax.f32 %v11774_v41, %v11794_v45 }
 0x2ab   : > { %v1126_v41 = vmax.f32 %v11778_v34, %v11798_v47 }
 0x2b1   : > { %v1386_v61 = vpop.f32.mrf.mxu2  ;;  %v11812_v63 = vpop.f32.mrf.mxu0 }
 0x2b9   : > { %v11814_v57 = vpop.f32.mrf.mxu2  ;;  %v11820_v31 = vpop.f32.mrf.mxu0 }
 0x2c1   : > { %v11824_v8 = vpop.f32.mrf.mxu2 }
 0x2e5   : > { %v11830_v13 = vpop.f32.mrf.mxu0  ;;  %v1663_v14 = vpop.f32.mrf.mxu1 }
 0x2e6   : > { %v1734_v17 = vmax.f32 %v1425_v9, %v1663_v14 }
 0x2e8   : > { %v1774_v1 = vadd.f32 %v11828_v11, %v1734_v17 }
 0x2ea   : > { %v1790_v19 = vmax.f32 %v1774_v1, 0.0 }
 0x2ec   : > { %v1692_v53 = vpop.f32.mrf.mxu2  ;;  %v11845_v7 = vpop.f32.mrf.mxu3  ;;  %v1836_v3 = vmul.f32 %v11841_v2, %v1790_v19  ;;  %v1430_v19 = vmax.f32 %v1120_v59, %v1386_v61  ;;  %v1125_v59 = vmax.f32 %v11776_v32, %v11796_v46 }
 0x2ed   : > { %v1735_v9 = vmax.f32 %v1426_v16, %v1692_v53  ;;  %v11848_v14 = vpop.f32.mrf.mxu0  ;;  %v1666_v24 = vpop.f32.mrf.mxu1  ;;  %v1431_v16 = vmax.f32 %v1121_v18, %v1415_v62  ;;  %v1127_v62 = vmax.f32 %v11780_v35, %v11800_v48  ;;  %v1434_v18 = vmax.f32 %v1124_v20, %v11814_v57 }
 0x2ee   : > { %v1738_v26 = vmax.f32 %v1429_v42, %v1666_v24  ;;  %1869 = vrot.lane.b32.xlu2 %v1836_v3, %s11053_s27  ;;  %v1433_v3 = vmax.f32 %v1123_v60, %v1360_v29  ;;  %v1436_v57 = vmax.f32 %v1126_v41, %v11820_v31  ;;  %v1117_v20 = vmax.f32 %v11744_v25, %v11788_v39 }
 0x2ef   : > { %v1775_v40 = vadd.f32 %v11828_v11, %v1735_v9  ;;  %v1437_v32 = vmax.f32 %v1127_v62, %v11822_v6  ;;  %v1128_v6 = vmax.f32 %v11782_v36, %v11802_v49  ;;  %v1114_v36 = vmax.f32 %v11732_v22, %v11786_v38 }
 0x2f0   : > { %v1778_v17 = vadd.f32 %v11843_v23, %v1738_v26 }
 0x2f1   : > { %v1791_v0 = vmax.f32 %v1775_v40, 0.0  ;;  %v1424_v38 = vmax.f32 %v1114_v36, %v11806_v52 }
 0x2f2   : > { %v1794_v1 = vmax.f32 %v1778_v17, 0.0  ;;  %v11875_v17 = vperm.slane %v11835_v15, 3 }
 0x2f3   : > { %v1837_v42 = vmul.f32 %v11854_v54, %v1791_v0  ;;  %v1435_v0 = vmax.f32 %v1125_v59, %v11816_v4 }
 0x2f4   : > { %v1695_v53 = vpop.f32.mrf.mxu2  ;;  %v1724_v21 = vpop.f32.mrf.mxu3  ;;  %v1840_v58 = vmul.f32 %v11841_v2, %v1794_v1 }
 0x2f5   : > { %v1739_v9 = vmax.f32 %v1430_v19, %v1695_v53  ;;  %v1740_v24 = vmax.f32 %v1431_v16, %v1724_v21  ;;  %1871 = vrot.lane.b32.xlu0 %v1837_v42, %s11053_s27  ;;  %v11862_v28 = vpop.f32.mrf.mxu0  ;;  %v1669_v43 = vpop.f32.mrf.mxu1 }
 0x2f6   : > { %v1742_v26 = vmax.f32 %v1433_v3, %v1669_v43  ;;  %1877 = vrot.lane.b32.xlu2 %v1840_v58, %s11053_s27  ;;  %v1771_v1 = vpop.permute.xlu0 %1770  ;;  %v1122_v43 = vmax.f32 %v11770_v27, %v11792_v44 }
 0x2f7   : > { %v1779_v30 = vadd.f32 %v11843_v23, %v1739_v9  ;;  %v1780_v61 = vadd.f32 %v11843_v23, %v1740_v24  ;;  %v1129_v24 = vmax.f32 %v11784_v37, %v11804_v51  ;;  %v1427_v51 = vmax.f32 %v1117_v20, %v11808_v55 }
 0x2f8   : > { %v1782_v29 = vadd.f32 %v11818_v5, %v1742_v26  ;;  %v1432_v25 = vmax.f32 %v1122_v43, %v11812_v63  ;;  %v1118_v63 = vmax.f32 %v11750_v50, %v11790_v33 }
 0x2f9   : > { %v1795_v40 = vmax.f32 %v1779_v30, 0.0  ;;  %v1796_v60 = vmax.f32 %v1780_v61, 0.0  ;;  %v1438_v30 = vmax.f32 %v1128_v6, %v11824_v8  ;;  %v1439_v61 = vmax.f32 %v1129_v24, %v11826_v10 }
 0x2fa   : > { %v1798_v45 = vmax.f32 %v1782_v29, 0.0  ;;  %v1736_v8 = vmax.f32 %v1427_v51, %v11845_v7  ;;  %v1741_v55 = vmax.f32 %v1432_v25, %v11862_v28 }
 0x2fb   : > { %v1842_v35 = vmul.f32 %v11875_v17, %v1796_v60  ;;  %v1841_v48 = vmul.f32 %v11854_v54, %v1795_v40 }
 0x2fc   : > { %v1698_v46 = vpop.f32.mrf.mxu2  ;;  %v1727_v19 = vpop.f32.mrf.mxu3  ;;  %v1844_v16 = vmul.f32 %v11841_v2, %v1798_v45  ;;  %v1776_v52 = vadd.f32 %v11828_v11, %v1736_v8 }
 0x2fd   : > { %v1743_v42 = vmax.f32 %v1434_v18, %v1698_v46  ;;  %v1744_v3 = vmax.f32 %v1435_v0, %v1727_v19  ;;  %1881 = vrot.lane.b32.xlu1 %v1842_v35, %s11053_s27  ;;  %1879 = vrot.lane.b32.xlu0 %v1841_v48, %s11053_s27  ;;  %v1643_v34 = vpop.f32.mrf.mxu0  ;;  %v1672_v47 = vpop.f32.mrf.mxu1  ;;  %v1827_v18 = vperm.slane %v11835_v15, 0  ;;  %v1781_v0 = vadd.f32 %v11818_v5, %v1741_v55 }
 0x2fe   : > { %v1746_v4 = vmax.f32 %v1437_v32, %v1672_v47  ;;  %1885 = vrot.lane.b32.xlu2 %v1844_v16, %s11053_s27  ;;  %v1745_v58 = vmax.f32 %v1436_v57, %v1643_v34  ;;  %v1792_v50 = vmax.f32 %v1776_v52, 0.0  ;;  %v11054_v19 = vmov 0.0  }
 0x2ff   : > { %v1783_v53 = vadd.f32 %v11818_v5, %v1743_v42  ;;  %v1784_v21 = vadd.f32 %v11818_v5, %v1744_v3  ;;  %v1797_v15 = vmax.f32 %v1781_v0, 0.0  ;;  %1805 = vst [vmem:[#allocation3] sm:$0xff] %v11054_v19 }
 0x300   : > { %v1786_v9 = vadd.f32 %v1771_v1, %v1746_v4  ;;  %v1785_v59 = vadd.f32 %v1771_v1, %v1745_v58  ;;  %1809 = vst [vmem:[#allocation3 + $0x20] sm:$0xff] %v11054_v19 }
 0x301   : > { %v1799_v26 = vmax.f32 %v1783_v53, 0.0  ;;  %v1800_v31 = vmax.f32 %v1784_v21, 0.0  ;;  %v1843_v32 = vmul.f32 %v1827_v18, %v1797_v15  ;;  %1810 = vst [vmem:[#allocation3 + $0x28] sm:$0xff] %v11054_v19 }
 0x302   : > { %v1802_v49 = vmax.f32 %v1786_v9, 0.0  ;;  %v1801_v60 = vmax.f32 %v1785_v59, 0.0  ;;  %1814 = vst [vmem:[#allocation3 + $0x48] sm:$0xff] %v11054_v19 }
 0x303   : > { %v1846_v62 = vmul.f32 %v11875_v17, %v1800_v31  ;;  %v1845_v37 = vmul.f32 %v11854_v54, %v1799_v26  ;;  %1815 = vst [vmem:[#allocation3 + $0x50] sm:$0xff] %v11054_v19 }
 0x304   : > { %v1701_v27 = vpop.f32.mrf.mxu2  ;;  %v1730_v44 = vpop.f32.mrf.mxu3  ;;  %v1848_v29 = vmul.f32 %v11841_v2, %v1802_v49  ;;  %v1733_v2 = vmax.f32 %v1424_v38, %v11830_v13  ;;  %v1847_v35 = vmul.f32 %v1827_v18, %v1801_v60  ;;  %v1428_v13 = vmax.f32 %v1118_v63, %v11810_v56  ;;  %1819 = vst [vmem:[#allocation3 + $0x70] sm:$0xff] %v11054_v19 }
 0x305   : > { %v1747_v39 = vmax.f32 %v1438_v30, %v1701_v27  ;;  %v1748_v22 = vmax.f32 %v1439_v61, %v1730_v44  ;;  %1889 = vrot.lane.b32.xlu1 %v1846_v62, %s11053_s27  ;;  %1887 = vrot.lane.b32.xlu0 %v1845_v37, %s11053_s27  ;;  %1820 = vst [vmem:[#allocation3 + $0x78] sm:$0xff] %v11054_v19 }
 0x306   : > { %1893 = vrot.lane.b32.xlu2 %v1848_v29, %s11053_s27  ;;  %v1773_v48 = vadd.f32 %v11828_v11, %v1733_v2  ;;  %v1737_v33 = vmax.f32 %v1428_v13, %v11848_v14  ;;  %1824 = vst [vmem:[#allocation3 + $0x98] sm:$0xff] %v11054_v19 }
 0x307   : > { %v1787_v10 = vadd.f32 %v1771_v1, %v1747_v39  ;;  %v1788_v40 = vadd.f32 %v1771_v1, %v1748_v22  ;;  %v1838_v1 = vmul.f32 %v11875_v17, %v1792_v50 }
 0x308   : > { %v1789_v5 = vmax.f32 %v1773_v48, 0.0 }
 0x309   : > { %v1803_v41 = vmax.f32 %v1787_v10, 0.0  ;;  %v1804_v45 = vmax.f32 %v1788_v40, 0.0 }
 0x30a   : > { %v1835_v46 = vmul.f32 %v1827_v18, %v1789_v5 }
 0x30b   : > { %v1850_v7 = vmul.f32 %v11875_v17, %v1804_v45  ;;  %v1849_v28 = vmul.f32 %v11854_v54, %v1803_v41  ;;  %v1777_v54 = vadd.f32 %v11843_v23, %v1737_v33 }
 0x30d   : > { %1897 = vrot.lane.b32.xlu1 %v1850_v7, %s11053_s27  ;;  %1895 = vrot.lane.b32.xlu0 %v1849_v28, %s11053_s27  ;;  %v1793_v56 = vmax.f32 %v1777_v54, 0.0 }
 0x30e   : > { %1891 = vrot.lane.b32.xlu2 %v1847_v35, %s11053_s27 }
 0x30f   : > { %v1839_v11 = vmul.f32 %v1827_v18, %v1793_v56 }
 0x315   : > { %1873 = vrot.lane.b32.xlu1 %v1838_v1, %s11053_s27  ;;  %1883 = vrot.lane.b32.xlu0 %v1843_v32, %s11053_s27 }
 0x316   : > { %1867 = vrot.lane.b32.xlu2 %v1835_v46, %s11053_s27 }
 0x31d   : > { %1875 = vrot.lane.b32.xlu1 %v1839_v11, %s11053_s27  ;;  %s11056_s27 = smov 104  }
 0x348   : > { %v1870_v23 = vpop.permute.xlu2 %1869 }
 0x350   : > { %v1878_v14 = vpop.permute.xlu2 %1877 }
 0x358   : > { %v1886_v17 = vpop.permute.xlu2 %1885 }
 0x360   : > { %v1894_v16 = vpop.permute.xlu2 %1893 }
 0x367   : > { %v1872_v42 = vpop.permute.xlu0 %1871 }
 0x368   : > { %v11935_v3 = vsel %vm1899_vm5, %v1870_v23, %v1872_v42  ;;  %v1892_v34 = vpop.permute.xlu2 %1891 }
 0x369   : > { %1935 = vst [vmem:[#allocation3 + $0x10] sm:$0xff] %v11935_v3  ;;  %v11939_v47 = vsel %vm1899_vm5, %v1892_v34, %v1894_v16 }
 0x36a   : > { %1948 = vst.msk [vmem:[#allocation3 + $0x78] sm:$0xff] %vm1932_vm12, %v1892_v34 }
 0x36b   : > { %1949 = vst [vmem:[#allocation3 + $0x80] sm:$0xff] %v11939_v47 }
 0x36f   : > { %v1882_v57 = vpop.permute.xlu1 %1881  ;;  %v1880_v4 = vpop.permute.xlu0 %1879 }
 0x370   : > { %1942 = vst.msk [vmem:[#allocation3 + $0x48] sm:$0xff] %vm1899_vm5, %v1882_v57  ;;  %v11945_v6 = vsel %vm1899_vm5, %v1878_v14, %v1880_v4  ;;  %v11948_v53 = vsel %vm1899_vm5, %v1880_v4, %v1882_v57  ;;  %v1868_v21 = vpop.permute.xlu2 %1867 }
 0x371   : > { %1940 = vst [vmem:[#allocation3 + $0x38] sm:$0xff] %v11945_v6  ;;  %v11952_v58 = vsel %vm1899_vm5, %v1868_v21, %v1870_v23  ;;  %v11956_v9 = vpack.i.bf16 %v11948_v53, %v11945_v6  ;;  %v12016_v8 = vld [vmem:[#allocation3 + $0x78] sm:$0xff] }
 0x372   : > { %1941 = vst [vmem:[#allocation3 + $0x40] sm:$0xff] %v11948_v53 }
 0x373   : > { %1933 = vst.msk [vmem:[#allocation3] sm:$0xff] %vm1932_vm12, %v1868_v21  ;;  %10237 = vrot.lane.b32.xlu0 %v11956_v9, %s11046_s21 }
 0x374   : > { %1934 = vst [vmem:[#allocation3 + $0x8] sm:$0xff] %v11952_v58 }
 0x377   : > { %v1982_v24 = vld [vmem:[#allocation3 + $0x48] sm:$0xff]  ;;  %v1890_v43 = vpop.permute.xlu1 %1889  ;;  %v1888_v26 = vpop.permute.xlu0 %1887 }
 0x378   : > { %1947 = vst.msk [vmem:[#allocation3 + $0x70] sm:$0xff] %vm1899_vm5, %v1890_v43  ;;  %v11965_v31 = vsel %vm1899_vm5, %v1886_v17, %v1888_v26  ;;  %v11968_v20 = vsel %vm1899_vm5, %v1888_v26, %v1890_v43  ;;  %v11971_v36 = vpack.i.bf16 %v11935_v3, %v1982_v24  ;;  %v9622_v26 = vld [vmem:[%s16110_s5 + $0x20] sm:$0xff] }
 0x379   : > { %1945 = vst [vmem:[#allocation3 + $0x60] sm:$0xff] %v11965_v31 }
 0x37a   : > { %1946 = vst [vmem:[#allocation3 + $0x68] sm:$0xff] %v11968_v20  ;;  %10232 = vrot.lane.b32.xlu1 %v11971_v36, %s11046_s21  ;;  %v12034_v60 = vld [vmem:[#allocation3] sm:$0xff] }
 0x37f   : > { %v1898_v49 = vpop.permute.xlu1 %1897  ;;  %v1896_v30 = vpop.permute.xlu0 %1895  ;;  %v1987_v2 = vld [vmem:[#allocation3 + $0x70] sm:$0xff] }
 0x380   : > { %1952 = vst.msk [vmem:[#allocation3 + $0x98] sm:$0xff] %vm1899_vm5, %v1898_v49  ;;  %v11979_v61 = vsel %vm1899_vm5, %v1894_v16, %v1896_v30  ;;  %v11982_v62 = vsel %vm1899_vm5, %v1896_v30, %v1898_v49  ;;  %v12039_v41 = vpack.i.bf16 %v1987_v2, %v11968_v20 }
 0x381   : > { %1950 = vst [vmem:[#allocation3 + $0x88] sm:$0xff] %v11979_v61  ;;  %v11987_v37 = vpack.i.bf16 %v11982_v62, %v11979_v61 }
 0x382   : > { %1951 = vst [vmem:[#allocation3 + $0x90] sm:$0xff] %v11982_v62 }
 0x383   : > { %10252 = vrot.lane.b32.xlu0 %v11987_v37, %s11046_s21 }
 0x387   : > { %v11992_v51 = vld [vmem:[#allocation3 + $0x98] sm:$0xff]  ;;  %v1874_v27 = vpop.permute.xlu1 %1873  ;;  %v1884_v44 = vpop.permute.xlu0 %1883 }
 0x388   : > { %v11995_v29 = vsel %vm1899_vm5, %v1872_v42, %v1874_v27  ;;  %1937 = vst.msk [vmem:[#allocation3 + $0x20] sm:$0xff] %vm1899_vm5, %v1874_v27  ;;  %v11999_v59 = vsel %vm1899_vm5, %v1884_v44, %v1886_v17  ;;  %v12003_v25 = vpack.i.bf16 %v11965_v31, %v11992_v51 }
 0x389   : > { %1936 = vst [vmem:[#allocation3 + $0x18] sm:$0xff] %v11995_v29  ;;  %v12008_v39 = vpack.i.bf16 %v11999_v59, %v11939_v47 }
 0x38a   : > { %1943 = vst.msk [vmem:[#allocation3 + $0x50] sm:$0xff] %vm1932_vm12, %v1884_v44  ;;  %10247 = vrot.lane.b32.xlu1 %v12003_v25, %s11046_s21 }
 0x38b   : > { %1944 = vst [vmem:[#allocation3 + $0x58] sm:$0xff] %v11999_v59  ;;  %10257 = vrot.lane.b32.xlu0 %v12008_v39, %s11046_s21 }
 0x38f   : > { %v1977_v22 = vld [vmem:[#allocation3 + $0x20] sm:$0xff]  ;;  %v1876_v38 = vpop.permute.xlu1 %1875 }
 0x390   : > { %v12019_v55 = vsel %vm1899_vm5, %v1876_v38, %v1878_v14  ;;  %1938 = vst.msk [vmem:[#allocation3 + $0x28] sm:$0xff] %vm1932_vm12, %v1876_v38  ;;  %v12023_v10 = vpack.i.bf16 %v1977_v22, %v11995_v29  ;;  %vm2090_vm5 = vcmask 261120  }
 0x391   : > { %1939 = vst [vmem:[#allocation3 + $0x30] sm:$0xff] %v12019_v55  ;;  %v12028_v40 = vpack.i.bf16 %v12019_v55, %v12016_v8  ;;  %v12051_v18 = vld [vmem:[#allocation3 + $0x50] sm:$0xff] }
 0x392   : > { %10227 = vrot.lane.b32.xlu2 %v12023_v10, %s11046_s21  ;;  %v12055_v52 = vpack.i.bf16 %v11952_v58, %v12051_v18 }
 0x393   : > { %10262 = vrot.lane.b32.xlu1 %v12028_v40, %s11046_s21 }
 0x397   : > { %v12036_v63 = vld [vmem:[#allocation3 + $0x28] sm:$0xff] }
 0x398   : > { %v12043_v45 = vpack.i.bf16 %v12034_v60, %v12036_v63 }
 0x39a   : > { %10242 = vrot.lane.b32.xlu2 %v12039_v41, %s11046_s21  ;;  %10272 = vrot.lane.b32.xlu0 %v12043_v45, %s11046_s21 }
 0x39b   : > { %10287 = vrot.lane.b32.xlu1 %v11956_v9, %s11048_s23 }
 0x3a2   : > { %10282 = vrot.lane.b32.xlu0 %v12039_v41, %s11048_s23  ;;  %10267 = vrot.lane.b32.xlu2 %v12055_v52, %s11046_s21  ;;  %s11055_s21 = smov 125  }
 0x3a3   : > { %10302 = vrot.lane.b32.xlu1 %v11987_v37, %s11048_s23 }
 0x3aa   : > { %10297 = vrot.lane.b32.xlu0 %v12023_v10, %s11048_s23  ;;  %10277 = vrot.lane.b32.xlu2 %v12003_v25, %s11048_s23 }
 0x3ab   : > { %10307 = vrot.lane.b32.xlu1 %v12008_v39, %s11048_s23 }
 0x3b2   : > { %10317 = vrot.lane.b32.xlu0 %v12055_v52, %s11048_s23  ;;  %10292 = vrot.lane.b32.xlu2 %v11971_v36, %s11048_s23 }
 0x3b3   : > { %10322 = vrot.lane.b32.xlu1 %v12043_v45, %s11048_s23 }
 0x3ba   : > { %10327 = vrot.lane.b32.xlu0 %v12003_v25, %s11055_s21  ;;  %10312 = vrot.lane.b32.xlu2 %v12028_v40, %s11048_s23 }
 0x3bb   : > { %10332 = vrot.lane.b32.xlu1 %v12039_v41, %s11055_s21 }
 0x3c2   : > { %10342 = vrot.lane.b32.xlu0 %v11971_v36, %s11055_s21  ;;  %10337 = vrot.lane.b32.xlu2 %v11956_v9, %s11055_s21 }
 0x3c3   : > { %10347 = vrot.lane.b32.xlu1 %v12023_v10, %s11055_s21 }
 0x3ca   : > { %10362 = vrot.lane.b32.xlu0 %v12028_v40, %s11055_s21  ;;  %10352 = vrot.lane.b32.xlu2 %v11987_v37, %s11055_s21 }
 0x3cb   : > { %10367 = vrot.lane.b32.xlu1 %v12055_v52, %s11055_s21 }
 0x3d2   : > { %10387 = vrot.lane.b32.xlu0 %v11956_v9, %s11045_s20  ;;  %10357 = vrot.lane.b32.xlu2 %v12008_v39, %s11055_s21 }
 0x3d3   : > { %10377 = vrot.lane.b32.xlu1 %v12003_v25, %s11045_s20 }
 0x3da   : > { %10402 = vrot.lane.b32.xlu0 %v11987_v37, %s11045_s20  ;;  %10372 = vrot.lane.b32.xlu2 %v12043_v45, %s11055_s21  ;;  %s11060_s21 = smov 63  }
 0x3db   : > { %10392 = vrot.lane.b32.xlu1 %v11971_v36, %s11045_s20 }
 0x3e2   : > { %10407 = vrot.lane.b32.xlu0 %v12008_v39, %s11045_s20  ;;  %10382 = vrot.lane.b32.xlu2 %v12039_v41, %s11045_s20 }
 0x3e3   : > { %10412 = vrot.lane.b32.xlu1 %v12028_v40, %s11045_s20 }
 0x3e5   : > { %v12107_v7 = vpop.permute.xlu0 %10237 }
 0x3e6   : > { %v10240_v56 = vunpack.i.h.bf16 %v12107_v7  ;;  %v10239_v11 = vunpack.i.l.bf16 %v12107_v7 }
 0x3e8   : > { %v2064_v43 = vsel %vm522_vm7, %v10239_v11, %v10240_v56 }
 0x3ea   : > { %10422 = vrot.lane.b32.xlu0 %v12043_v45, %s11045_s20  ;;  %10397 = vrot.lane.b32.xlu2 %v12023_v10, %s11045_s20 }
 0x3eb   : > { %10437 = vrot.lane.b32.xlu1 %v11956_v9, %s11044_s19 }
 0x3ec   : > { %v10228_v0 = vpop.permute.xlu2 %10227  ;;  %v12115_v28 = vpop.permute.xlu1 %10232 }
 0x3ed   : > { %v10235_v42 = vunpack.i.h.bf16 %v12115_v28  ;;  %v10234_v34 = vunpack.i.l.bf16 %v12115_v28  ;;  %v10229_v57 = vunpack.i.l.bf16 %v10228_v0  ;;  %v10230_v21 = vunpack.i.h.bf16 %v10228_v0 }
 0x3ef   : > { %v2065_v27 = vsel %vm522_vm7, %v10240_v56, %v10234_v34  ;;  %v2060_v44 = vsel %vm522_vm7, %v10235_v42, %v10229_v57  ;;  %v2061_v38 = vsel %vm522_vm7, %v10229_v57, %v10230_v21 }
 0x3f2   : > { %10432 = vrot.lane.b32.xlu0 %v12039_v41, %s11044_s19  ;;  %10417 = vrot.lane.b32.xlu2 %v12055_v52, %s11045_s20 }
 0x3f3   : > { %10452 = vrot.lane.b32.xlu1 %v11987_v37, %s11044_s19 }
 0x3f4   : > { %v10243_v35 = vpop.permute.xlu2 %10242 }
 0x3f5   : > { %v10253_v48 = vpop.permute.xlu0 %10252  ;;  %v10244_v1 = vunpack.i.l.bf16 %v10243_v35  ;;  %v10245_v19 = vunpack.i.h.bf16 %v10243_v35 }
 0x3f6   : > { %v10255_v13 = vunpack.i.h.bf16 %v10253_v48  ;;  %v10254_v50 = vunpack.i.l.bf16 %v10253_v48 }
 0x3f7   : > { %v2069_v24 = vsel %vm522_vm7, %v10244_v1, %v10245_v19 }
 0x3f8   : > { %v2072_v33 = vsel %vm522_vm7, %v10254_v50, %v10255_v13 }
 0x3f9   : > { %2173 = vmatpush.msra.mxu2 %v2072_v33 }
 0x3fa   : > { %10447 = vrot.lane.b32.xlu0 %v12023_v10, %s11044_s19  ;;  %10427 = vrot.lane.b32.xlu2 %v12003_v25, %s11044_s19 }
 0x3fb   : > { %10457 = vrot.lane.b32.xlu1 %v12008_v39, %s11044_s19 }
 0x3fc   : > { %v10248_v15 = vpop.permute.xlu1 %10247  ;;  %v12124_v5 = vpop.permute.xlu2 %10267 }
 0x3fd   : > { %v10250_v32 = vunpack.i.h.bf16 %v10248_v15  ;;  %v10249_v54 = vunpack.i.l.bf16 %v10248_v15  ;;  %v12126_v46 = vpop.permute.xlu0 %10257  ;;  %v10269_v35 = vunpack.i.l.bf16 %v12124_v5 }
 0x3fe   : > { %v10259_v23 = vunpack.i.l.bf16 %v12126_v46  ;;  %v10260_v16 = vunpack.i.h.bf16 %v12126_v46 }
 0x3ff   : > { %v2073_v14 = vsel %vm522_vm7, %v10255_v13, %v10249_v54  ;;  %v2068_v17 = vsel %vm522_vm7, %v10250_v32, %v10244_v1 }
 0x400   : > { %2202 = vmatpush.msra.mxu3 %v2073_v14  ;;  %2174 = vmatpush.msra.mxu2 %v2068_v17  ;;  %v2071_v4 = vsel %vm522_vm7, %v10259_v23, %v10254_v50  ;;  %v2067_v49 = vsel %vm522_vm7, %v10260_v16, %v10250_v32 }
 0x401   : > { %2144 = vmatpush.msra.mxu1 %v2071_v4 }
 0x402   : > { %10467 = vrot.lane.b32.xlu0 %v12055_v52, %s11044_s19  ;;  %10442 = vrot.lane.b32.xlu2 %v11971_v36, %s11044_s19 }
 0x403   : > { %2203 = vmatpush.msra.mxu3 %v2069_v24  ;;  %2175 = vmatpush.msra.mxu2 %v2064_v43 }
 0x404   : > { %v12147_v30 = vpop.permute.xlu2 %10277  ;;  %2145 = vmatpush.msra.mxu1 %v2067_v49  ;;  %10472 = vrot.lane.b32.xlu1 %v12043_v45, %s11044_s19 }
 0x405   : > { %2204 = vmatpush.msra.mxu3 %v2065_v27  ;;  %2176 = vmatpush.msra.mxu2 %v2060_v44  ;;  %v10263_v22 = vpop.permute.xlu1 %10262  ;;  %v10279_v54 = vunpack.i.l.bf16 %v12147_v30 }
 0x406   : > { %9634 = vmatmul.msk.f32.vlgmr.msra.gmra.mxu2 %vm2090_vm5, %v9622_v26  ;;  %v10265_v2 = vunpack.i.h.bf16 %v10263_v22  ;;  %v10264_v0 = vunpack.i.l.bf16 %v10263_v22  ;;  %v12259_v22 = vld [vmem:[%s16110_s5] sm:$0xff] }
 0x407   : > { %2205 = vmatpush.msra.mxu3 %v2061_v38  ;;  %2301 = vmatpush.msrb.mxu2 %v11979_v61  ;;  %v10270_v61 = vunpack.i.h.bf16 %v12124_v5 }
 0x408   : > { %9638 = vmatmul.msk.f32.vlgmr.msra.gmra.mxu3 %vm2090_vm5, %v9622_v26  ;;  %v2070_v7 = vsel %vm522_vm7, %v10264_v0, %v10259_v23  ;;  %v2063_v28 = vsel %vm522_vm7, %v10265_v2, %v10239_v11 }
 0x409   : > { %2330 = vmatpush.msrb.mxu3 %v11982_v62  ;;  %2302 = vmatpush.msrb.mxu2 %v11965_v31  ;;  %v9623_v31 = vld [vmem:[%s16110_s5 + $0x28] sm:$0xff] }
 0x40a   : > { %10477 = vrot.lane.b32.xlu0 %v12003_v25, %s11047_s22  ;;  %10462 = vrot.lane.b32.xlu2 %v12028_v40, %s11044_s19  ;;  %s470_s19 = scalar_lea.vmem %s16105_s0, %s16408_s30 }
 0x40b   : > { %2331 = vmatpush.msrb.mxu3 %v11968_v20  ;;  %2303 = vmatpush.msrb.mxu2 %v11945_v6  ;;  %v2066_v6 = vsel %vm522_vm7, %v10269_v35, %v10260_v16  ;;  %v2059_v20 = vsel %vm522_vm7, %v10270_v61, %v10235_v42 }
 0x40c   : > { %v10273_v62 = vpop.permute.xlu0 %10272  ;;  %v12172_v48 = vpop.permute.xlu2 %10292  ;;  %2115 = vmatpush.msra.mxu0 %v2070_v7  ;;  %2146 = vmatpush.msra.mxu1 %v2063_v28 }
 0x40d   : > { %2332 = vmatpush.msrb.mxu3 %v11948_v53  ;;  %v10274_v13 = vunpack.i.l.bf16 %v10273_v62  ;;  %2304 = vmatpush.msrb.mxu2 %v11935_v3  ;;  %v12176_v50 = vpop.permute.xlu1 %10287  ;;  %v10275_v33 = vunpack.i.h.bf16 %v10273_v62  ;;  %v10295_v42 = vunpack.i.h.bf16 %v12172_v48 }
 0x40e   : > { %9635 = vmatmul.msk.f32.gmra.mxu2 %vm2090_vm5, %v9623_v31  ;;  %10482 = vrot.lane.b32.xlu1 %v12039_v41, %s11047_s22  ;;  %v10290_v11 = vunpack.i.h.bf16 %v12176_v50  ;;  %v10289_v19 = vunpack.i.l.bf16 %v12176_v50 }
 0x40f   : > { %2333 = vmatpush.msrb.mxu3 %v11995_v29  ;;  %2116 = vmatpush.msra.mxu0 %v2066_v6  ;;  %v2062_v53 = vsel %vm522_vm7, %v10274_v13, %v10265_v2  ;;  %v2058_v3 = vsel %vm522_vm7, %v10275_v33, %v10270_v61  ;;  %v12196_v29 = vld [vmem:[%s16110_s5 + $0x30] sm:$0xff]  ;;  %vm2613_vm7 = vcmask 1022976  }
 0x410   : > { %9639 = vmatmul.msk.f32.gmra.mxu3 %vm2090_vm5, %v9623_v31  ;;  %2147 = vmatpush.msra.mxu1 %v2059_v20  ;;  %v2398_v24 = vsel %vm844_vm11, %v10289_v19, %v10290_v11 }
 0x411   : > { %9630 = vmatmul.msk.f32.vlgmr.msra.gmra.mxu1 %vm2090_vm5, %v9622_v26  ;;  %2117 = vmatpush.msra.mxu0 %v2062_v53 }
 0x412   : > { %10492 = vrot.lane.b32.xlu0 %v11971_v36, %s11047_s22  ;;  %10487 = vrot.lane.b32.xlu2 %v11956_v9, %s11047_s22 }
 0x413   : > { %2272 = vmatpush.msrb.mxu1 %v11939_v47  ;;  %2118 = vmatpush.msra.mxu0 %v2058_v3  ;;  %v1970_v3 = vld [vmem:[%s16110_s5 + $0x8] sm:$0xff] }
 0x414   : > { %v10283_v15 = vpop.permute.xlu0 %10282  ;;  %v12198_v5 = vpop.permute.xlu2 %10312  ;;  %9626 = vmatmul.msk.f32.vlgmr.msra.gmra.mxu0 %vm2090_vm5, %v9622_v26 }
 0x415   : > { %2273 = vmatpush.msrb.mxu1 %v11999_v59  ;;  %2243 = vmatpush.msrb.mxu0 %v12016_v8  ;;  %v10303_v1 = vpop.permute.xlu1 %10302  ;;  %v10285_v46 = vunpack.i.h.bf16 %v10283_v15  ;;  %v10284_v56 = vunpack.i.l.bf16 %v10283_v15  ;;  %v10314_v21 = vunpack.i.l.bf16 %v12198_v5  ;;  %v10315_v38 = vunpack.i.h.bf16 %v12198_v5 }
 0x416   : > { %9636 = vmatmul.msk.f32.gmra.mxu2 %vm2090_vm5, %v12196_v29  ;;  %10497 = vrot.lane.b32.xlu1 %v12023_v10, %s11047_s22  ;;  %v10305_v47 = vunpack.i.h.bf16 %v10303_v1  ;;  %v10304_v32 = vunpack.i.l.bf16 %v10303_v1 }
 0x417   : > { %2274 = vmatpush.msrb.mxu1 %v12019_v55  ;;  %2244 = vmatpush.msrb.mxu0 %v12051_v18  ;;  %v10294_v18 = vunpack.i.l.bf16 %v12172_v48  ;;  %v2403_v57 = vsel %vm844_vm11, %v10284_v56, %v10285_v46  ;;  %v2397_v6 = vsel %vm844_vm11, %v10315_v38, %v10289_v19 }
 0x418   : > { %9640 = vmatmul.msk.f32.gmra.mxu3 %vm2090_vm5, %v12196_v29  ;;  %v2406_v8 = vsel %vm844_vm11, %v10304_v32, %v10305_v47  ;;  %v2407_v55 = vsel %vm844_vm11, %v10305_v47, %v10279_v54 }
 0x419   : > { %2275 = vmatpush.msrb.mxu1 %v11952_v58  ;;  %2245 = vmatpush.msrb.mxu0 %v12036_v63  ;;  %v12225_v58 = vld [vmem:[%s16110_s5 + $0x38] sm:$0xff]  ;;  %v10280_v63 = vunpack.i.h.bf16 %v12147_v30  ;;  %v2399_v43 = vsel %vm844_vm11, %v10290_v11, %v10294_v18 }
 0x41a   : > { %10512 = vrot.lane.b32.xlu0 %v12028_v40, %s11047_s22  ;;  %10502 = vrot.lane.b32.xlu2 %v11987_v37, %s11047_s22 }
 0x41b   : > { %9631 = vmatmul.msk.f32.gmra.mxu1 %vm2090_vm5, %v9623_v31  ;;  %2246 = vmatpush.msrb.mxu0 %v12034_v60  ;;  %v2402_v34 = vsel %vm844_vm11, %v10280_v63, %v10284_v56 }
 0x41c   : > { %v10298_v23 = vpop.permute.xlu0 %10297  ;;  %v12231_v14 = vpop.permute.xlu2 %10337  ;;  %9627 = vmatmul.msk.f32.gmra.mxu0 %vm2090_vm5, %v9623_v31  ;;  %2506 = vmatpush.msra.mxu2 %v2406_v8 }
 0x41d   : > { %v10300_v60 = vunpack.i.h.bf16 %v10298_v23  ;;  %v10299_v17 = vunpack.i.l.bf16 %v10298_v23  ;;  %2535 = vmatpush.msra.mxu3 %v2407_v55  ;;  %v10308_v16 = vpop.permute.xlu1 %10307  ;;  %v10340_v55 = vunpack.i.h.bf16 %v12231_v14  ;;  %v1971_v23 = vld [vmem:[%s16110_s5 + $0x10] sm:$0xff] }
 0x41e   : > { %9637 = vmatmul.msk.f32.gmra.mxu2 %vm2090_vm5, %v12225_v58  ;;  %10517 = vrot.lane.b32.xlu1 %v12055_v52, %s11047_s22  ;;  %v10309_v4 = vunpack.i.l.bf16 %v10308_v16  ;;  %v10310_v30 = vunpack.i.h.bf16 %v10308_v16 }
 0x41f   : > { %2507 = vmatpush.msra.mxu2 %v2402_v34  ;;  %2536 = vmatpush.msra.mxu3 %v2403_v57  ;;  %v2394_v26 = vsel %vm844_vm11, %v10295_v42, %v10299_v17  ;;  %v2395_v49 = vsel %vm844_vm11, %v10299_v17, %v10300_v60 }
 0x420   : > { %9641 = vmatmul.msk.f32.gmra.mxu3 %vm2090_vm5, %v12225_v58  ;;  %v2404_v27 = vsel %vm844_vm11, %v10314_v21, %v10309_v4  ;;  %v2405_v44 = vsel %vm844_vm11, %v10309_v4, %v10304_v32  ;;  %v2401_v62 = vsel %vm844_vm11, %v10310_v30, %v10280_v63 }
 0x421   : > { %2508 = vmatpush.msra.mxu2 %v2398_v24  ;;  %2537 = vmatpush.msra.mxu3 %v2399_v43 }
 0x422   : > { %10537 = vrot.lane.b32.xlu0 %v11956_v9, %s11056_s27  ;;  %10507 = vrot.lane.b32.xlu2 %v12008_v39, %s11047_s22 }
 0x423   : > { %9632 = vmatmul.msk.f32.gmra.mxu1 %vm2090_vm5, %v12196_v29  ;;  %2509 = vmatpush.msra.mxu2 %v2394_v26 }
 0x424   : > { %v10318_v2 = vpop.permute.xlu0 %10317  ;;  %v10353_v0 = vpop.permute.xlu2 %10352  ;;  %2538 = vmatpush.msra.mxu3 %v2395_v49  ;;  %9628 = vmatmul.msk.f32.gmra.mxu0 %vm2090_vm5, %v12196_v29  ;;  %v1972_v49 = vld [vmem:[%s16110_s5 + $0x18] sm:$0xff] }
 0x425   : > { %v10320_v7 = vunpack.i.h.bf16 %v10318_v2  ;;  %v10319_v28 = vunpack.i.l.bf16 %v10318_v2  ;;  %v10355_v35 = vunpack.i.h.bf16 %v10353_v0  ;;  %v10354_v61 = vunpack.i.l.bf16 %v10353_v0  ;;  %2448 = vmatpush.msra.mxu0 %v2404_v27  ;;  %2477 = vmatpush.msra.mxu1 %v2405_v44  ;;  %v10323_v31 = vpop.permute.xlu1 %10322 }
 0x426   : > { %9650 = vmatmul.msk.f32.vlgmr.msrb.gmra.mxu2 %vm2090_vm5, %v12259_v22  ;;  %10527 = vrot.lane.b32.xlu1 %v12003_v25, %s11056_s27  ;;  %v10324_v48 = vunpack.i.l.bf16 %v10323_v31  ;;  %v10325_v33 = vunpack.i.h.bf16 %v10323_v31 }
 0x427   : > { %v2628_v13 = vsel %vm2613_vm7, %v10354_v61, %v10355_v35  ;;  %v2400_v50 = vsel %vm844_vm11, %v10319_v28, %v10310_v30  ;;  %2478 = vmatpush.msra.mxu1 %v2401_v62  ;;  %v2393_v53 = vsel %vm844_vm11, %v10320_v7, %v10295_v42  ;;  %v9658_v62 = vld [vmem:[%s16110_s5 + $0x40] sm:$0xff] }
 0x428   : > { %9654 = vmatmul.msk.f32.vlgmr.msrb.gmra.mxu3 %vm2090_vm5, %v12259_v22  ;;  %2728 = vmatpush.msrb.mxu2 %v2628_v13  ;;  %v2396_v20 = vsel %vm844_vm11, %v10324_v48, %v10315_v38  ;;  %v2392_v5 = vsel %vm844_vm11, %v10325_v33, %v10320_v7  ;;  %vm4827_vm11 = vcmask 523264  }
 0x429   : > { %2449 = vmatpush.msra.mxu0 %v2400_v50  ;;  %2479 = vmatpush.msra.mxu1 %v2397_v6 }
 0x42a   : > { %10552 = vrot.lane.b32.xlu0 %v11987_v37, %s11056_s27  ;;  %10522 = vrot.lane.b32.xlu2 %v12043_v45, %s11047_s22  ;;  %s11057_s22 = smov 83  }
 0x42b   : > { %9633 = vmatmul.msk.f32.gmra.mxu1 %vm2090_vm5, %v12225_v58  ;;  %2450 = vmatpush.msra.mxu0 %v2396_v20 }
 0x42c   : > { %v10328_v29 = vpop.permute.xlu0 %10327  ;;  %v12285_v15 = vpop.permute.xlu2 %10357  ;;  %2480 = vmatpush.msra.mxu1 %v2393_v53  ;;  %9629 = vmatmul.msk.f32.gmra.mxu0 %vm2090_vm5, %v12225_v58  ;;  %v10339_v58 = vunpack.i.l.bf16 %v12231_v14  ;;  %v12370_v53 = vld [vmem:[%s16110_s5 + $0x48] sm:$0xff] }
 0x42d   : > { %v10330_v1 = vunpack.i.h.bf16 %v10328_v29  ;;  %v10329_v47 = vunpack.i.l.bf16 %v10328_v29  ;;  %v10359_v32 = vunpack.i.l.bf16 %v12285_v15  ;;  %2451 = vmatpush.msra.mxu0 %v2392_v5  ;;  %v10333_v54 = vpop.permute.xlu1 %10332  ;;  %v10360_v11 = vunpack.i.h.bf16 %v12285_v15 }
 0x42e   : > { %9651 = vmatmul.msk.f32.gmra.mxu2 %vm2090_vm5, %v1970_v3  ;;  %10542 = vrot.lane.b32.xlu1 %v11971_v36, %s11056_s27  ;;  %v10335_v8 = vunpack.i.h.bf16 %v10333_v54  ;;  %v10334_v46 = vunpack.i.l.bf16 %v10333_v54  ;;  %v2620_v17 = vsel %vm2613_vm7, %v10339_v58, %v10340_v55 }
 0x42f   : > { %v2629_v56 = vsel %vm2613_vm7, %v10355_v35, %v10329_v47  ;;  %v2627_v19 = vsel %vm2613_vm7, %v10359_v32, %v10354_v61  ;;  %v2623_v34 = vsel %vm2613_vm7, %v10360_v11, %v10330_v1 }
 0x430   : > { %9655 = vmatmul.msk.f32.gmra.mxu3 %vm2090_vm5, %v1970_v3  ;;  %v2624_v63 = vsel %vm2613_vm7, %v10330_v1, %v10334_v46  ;;  %v2625_v18 = vsel %vm2613_vm7, %v10334_v46, %v10335_v8 }
 0x431   : > { %2757 = vmatpush.msrb.mxu3 %v2629_v56  ;;  %2729 = vmatpush.msrb.mxu2 %v2624_v63 }
 0x432   : > { %10557 = vrot.lane.b32.xlu0 %v12008_v39, %s11056_s27  ;;  %10532 = vrot.lane.b32.xlu2 %v12039_v41, %s11056_s27 }
 0x433   : > { %9646 = vmatmul.msk.f32.vlgmr.msrb.gmra.mxu1 %vm2090_vm5, %v12259_v22  ;;  %2758 = vmatpush.msrb.mxu3 %v2625_v18 }
 0x434   : > { %2699 = vmatpush.msrb.mxu1 %v2627_v19  ;;  %v10343_v14 = vpop.permute.xlu0 %10342  ;;  %v10373_v60 = vpop.permute.xlu2 %10372  ;;  %9642 = vmatmul.msk.f32.vlgmr.msrb.gmra.mxu0 %vm2090_vm5, %v12259_v22  ;;  %v9660_v19 = vld [vmem:[%s16110_s5 + $0x50] sm:$0xff] }
 0x435   : > { %v10345_v16 = vunpack.i.h.bf16 %v10343_v14  ;;  %v10344_v42 = vunpack.i.l.bf16 %v10343_v14  ;;  %2730 = vmatpush.msrb.mxu2 %v2620_v17  ;;  %v10348_v57 = vpop.permute.xlu1 %10347  ;;  %v10374_v31 = vunpack.i.l.bf16 %v10373_v60  ;;  %v10375_v48 = vunpack.i.h.bf16 %v10373_v60 }
 0x436   : > { %2700 = vmatpush.msrb.mxu1 %v2623_v34  ;;  %9652 = vmatmul.msk.f32.gmra.mxu2 %vm2090_vm5, %v1971_v23  ;;  %v10350_v4 = vunpack.i.h.bf16 %v10348_v57  ;;  %v10349_v21 = vunpack.i.l.bf16 %v10348_v57 }
 0x437   : > { %10562 = vrot.lane.b32.xlu1 %v12028_v40, %s11056_s27  ;;  %v2621_v24 = vsel %vm2613_vm7, %v10340_v55, %v10344_v42 }
 0x438   : > { %9656 = vmatmul.msk.f32.gmra.mxu3 %vm2090_vm5, %v1971_v23  ;;  %v2616_v43 = vsel %vm2613_vm7, %v10345_v16, %v10349_v21  ;;  %v2617_v26 = vsel %vm2613_vm7, %v10349_v21, %v10350_v4 }
 0x439   : > { %2759 = vmatpush.msrb.mxu3 %v2621_v24  ;;  %2731 = vmatpush.msrb.mxu2 %v2616_v43 }
 0x43a   : > { %10572 = vrot.lane.b32.xlu0 %v12043_v45, %s11056_s27  ;;  %10547 = vrot.lane.b32.xlu2 %v12023_v10, %s11056_s27 }
 0x43b   : > { %9647 = vmatmul.msk.f32.gmra.mxu1 %vm2090_vm5, %v1970_v3  ;;  %2760 = vmatpush.msrb.mxu3 %v2617_v26 }
 0x43c   : > { %v10363_v30 = vpop.permute.xlu0 %10362  ;;  %v12330_v27 = vpop.permute.xlu2 %10382  ;;  %9643 = vmatmul.msk.f32.gmra.mxu0 %vm2090_vm5, %v1970_v3 }
 0x43d   : > { %v10365_v44 = vunpack.i.h.bf16 %v10363_v30  ;;  %v10364_v22 = vunpack.i.l.bf16 %v10363_v30  ;;  %v10368_v38 = vpop.permute.xlu1 %10367  ;;  %v10384_v54 = vunpack.i.l.bf16 %v12330_v27 }
 0x43e   : > { %9653 = vmatmul.msk.f32.gmra.mxu2 %vm2090_vm5, %v1972_v49  ;;  %v10370_v2 = vunpack.i.h.bf16 %v10368_v38  ;;  %v10369_v0 = vunpack.i.l.bf16 %v10368_v38 }
 0x43f   : > { %v2626_v7 = vsel %vm2613_vm7, %v10364_v22, %v10359_v32  ;;  %v2619_v28 = vsel %vm2613_vm7, %v10365_v44, %v10339_v58  ;;  %10587 = vrot.lane.b32.xlu1 %v11956_v9, %s11049_s24  ;;  %v2618_v33 = vsel %vm2613_vm7, %v10374_v31, %v10365_v44  ;;  %v10385_v32 = vunpack.i.h.bf16 %v12330_v27 }
 0x440   : > { %9657 = vmatmul.msk.f32.gmra.mxu3 %vm2090_vm5, %v1972_v49  ;;  %2670 = vmatpush.msrb.mxu0 %v2626_v7  ;;  %v2622_v35 = vsel %vm2613_vm7, %v10369_v0, %v10360_v11  ;;  %v2615_v61 = vsel %vm2613_vm7, %v10370_v2, %v10345_v16  ;;  %v2614_v20 = vsel %vm2613_vm7, %v10375_v48, %v10370_v2  ;;  %v9661_v2 = vld [vmem:[%s16110_s5 + $0x58] sm:$0xff] }
 0x441   : > { %2701 = vmatpush.msrb.mxu1 %v2619_v28 }
 0x442   : > { %10582 = vrot.lane.b32.xlu0 %v12039_v41, %s11049_s24  ;;  %10567 = vrot.lane.b32.xlu2 %v12055_v52, %s11056_s27 }
 0x443   : > { %9648 = vmatmul.msk.f32.gmra.mxu1 %vm2090_vm5, %v1971_v23  ;;  %2671 = vmatpush.msrb.mxu0 %v2622_v35 }
 0x444   : > { %v12349_v13 = vpop.permute.xlu0 %10387  ;;  %v12351_v50 = vpop.permute.xlu2 %10397  ;;  %9644 = vmatmul.msk.f32.gmra.mxu0 %vm2090_vm5, %v1971_v23  ;;  %2702 = vmatpush.msrb.mxu1 %v2615_v61 }
 0x445   : > { %2672 = vmatpush.msrb.mxu0 %v2618_v33  ;;  %v12355_v6 = vpop.permute.xlu1 %10377  ;;  %v10390_v55 = vunpack.i.h.bf16 %v12349_v13  ;;  %v10389_v58 = vunpack.i.l.bf16 %v12349_v13  ;;  %v10400_v23 = vunpack.i.h.bf16 %v12351_v50  ;;  %v10399_v14 = vunpack.i.l.bf16 %v12351_v50  ;;  %v9678_v13 = vld [vmem:[%s16110_s5 + $0x60] sm:$0xff] }
 0x446   : > { %9670 = vmatmul.msk.f32.vlgmr.msra.gmra.mxu2 %vm2090_vm5, %v9658_v62  ;;  %v10379_v15 = vunpack.i.l.bf16 %v12355_v6  ;;  %v10380_v8 = vunpack.i.h.bf16 %v12355_v6 }
 0x447   : > { %10602 = vrot.lane.b32.xlu1 %v11987_v37, %s11049_s24  ;;  %2673 = vmatpush.msrb.mxu0 %v2614_v20  ;;  %v2841_v16 = vsel %vm586_vm9, %v10389_v58, %v10390_v55 }
 0x448   : > { %9674 = vmatmul.msk.f32.vlgmr.msra.gmra.mxu3 %vm2090_vm5, %v9658_v62  ;;  %v2845_v18 = vsel %vm586_vm9, %v10380_v8, %v10384_v54 }
 0x44a   : > { %10597 = vrot.lane.b32.xlu0 %v12023_v10, %s11049_s24  ;;  %10577 = vrot.lane.b32.xlu2 %v12003_v25, %s11049_s24 }
 0x44b   : > { %9649 = vmatmul.msk.f32.gmra.mxu1 %vm2090_vm5, %v1972_v49 }
 0x44c   : > { %v10403_v3 = vpop.permute.xlu0 %10402  ;;  %v12372_v29 = vpop.permute.xlu2 %10417  ;;  %9645 = vmatmul.msk.f32.gmra.mxu0 %vm2090_vm5, %v1972_v49  ;;  %v2838_v49 = vsel %vm586_vm9, %v10399_v14, %v10400_v23 }
 0x44d   : > { %v10405_v5 = vunpack.i.h.bf16 %v10403_v3  ;;  %v10404_v1 = vunpack.i.l.bf16 %v10403_v3  ;;  %v12376_v47 = vpop.permute.xlu1 %10392  ;;  %v10419_v26 = vunpack.i.l.bf16 %v12372_v29  ;;  %v10420_v44 = vunpack.i.h.bf16 %v12372_v29 }
 0x44e   : > { %9671 = vmatmul.msk.f32.gmra.mxu2 %vm2090_vm5, %v12370_v53  ;;  %v10394_v63 = vunpack.i.l.bf16 %v12376_v47  ;;  %v10395_v11 = vunpack.i.h.bf16 %v12376_v47 }
 0x44f   : > { %v2849_v46 = vsel %vm586_vm9, %v10404_v1, %v10405_v5  ;;  %v2850_v56 = vsel %vm586_vm9, %v10405_v5, %v10379_v15  ;;  %10607 = vrot.lane.b32.xlu1 %v12008_v39, %s11049_s24  ;;  %v2846_v39 = vsel %vm586_vm9, %v10384_v54, %v10385_v32 }
 0x450   : > { %9675 = vmatmul.msk.f32.gmra.mxu3 %vm2090_vm5, %v12370_v53  ;;  %2949 = vmatpush.msra.mxu2 %v2849_v46  ;;  %v2842_v42 = vsel %vm586_vm9, %v10390_v55, %v10394_v63  ;;  %v2837_v21 = vsel %vm586_vm9, %v10395_v11, %v10399_v14  ;;  %v2836_v31 = vsel %vm586_vm9, %v10420_v44, %v10395_v11 }
 0x451   : > { %2978 = vmatpush.msra.mxu3 %v2850_v56  ;;  %v12476_v56 = vld [vmem:[%s16110_s5 + $0x68] sm:$0xff] }
 0x452   : > { %10617 = vrot.lane.b32.xlu0 %v12055_v52, %s11049_s24  ;;  %10592 = vrot.lane.b32.xlu2 %v11971_v36, %s11049_s24 }
 0x453   : > { %2950 = vmatpush.msra.mxu2 %v2845_v18  ;;  %2979 = vmatpush.msra.mxu3 %v2846_v39 }
 0x454   : > { %9666 = vmatmul.msk.f32.vlgmr.msra.gmra.mxu1 %vm2090_vm5, %v9658_v62  ;;  %v10408_v60 = vpop.permute.xlu0 %10407  ;;  %v12405_v17 = vpop.permute.xlu2 %10427  ;;  %9662 = vmatmul.msk.f32.vlgmr.msra.gmra.mxu0 %vm2090_vm5, %v9658_v62 }
 0x455   : > { %v10409_v34 = vunpack.i.l.bf16 %v10408_v60  ;;  %2951 = vmatpush.msra.mxu2 %v2841_v16  ;;  %2980 = vmatpush.msra.mxu3 %v2842_v42  ;;  %v10413_v57 = vpop.permute.xlu1 %10412  ;;  %v10410_v4 = vunpack.i.h.bf16 %v10408_v60  ;;  %v10429_v33 = vunpack.i.l.bf16 %v12405_v17  ;;  %v10430_v15 = vunpack.i.h.bf16 %v12405_v17  ;;  %v12495_v16 = vld [vmem:[#allocation3 + $0x80] sm:$0xff] }
 0x456   : > { %9672 = vmatmul.msk.f32.gmra.mxu2 %vm2090_vm5, %v9660_v19  ;;  %v10414_v24 = vunpack.i.l.bf16 %v10413_v57  ;;  %v10415_v30 = vunpack.i.h.bf16 %v10413_v57  ;;  %v12499_v42 = vpack.i.bf16 %v11999_v59, %v12495_v16 }
 0x457   : > { %v2848_v43 = vsel %vm586_vm9, %v10409_v34, %v10404_v1  ;;  %2952 = vmatpush.msra.mxu2 %v2837_v21  ;;  %10622 = vrot.lane.b32.xlu1 %v12043_v45, %s11049_s24  ;;  %v2844_v22 = vsel %vm586_vm9, %v10410_v4, %v10380_v8  ;;  %v2843_v38 = vsel %vm586_vm9, %v10419_v26, %v10410_v4  ;;  %v9680_v21 = vld [vmem:[%s16110_s5 + $0x70] sm:$0xff] }
 0x458   : > { %9676 = vmatmul.msk.f32.gmra.mxu3 %vm2090_vm5, %v9660_v19  ;;  %2920 = vmatpush.msra.mxu1 %v2848_v43  ;;  %v2847_v27 = vsel %vm586_vm9, %v10414_v24, %v10409_v34 }
 0x459   : > { %2981 = vmatpush.msra.mxu3 %v2838_v49  ;;  %2891 = vmatpush.msra.mxu0 %v2847_v27  ;;  %v12516_v27 = vld [vmem:[#allocation3 + $0x60] sm:$0xff] }
 0x45a   : > { %10627 = vrot.lane.b32.xlu0 %v12003_v25, %s11050_s25  ;;  %10612 = vrot.lane.b32.xlu2 %v12028_v40, %s11049_s24  ;;  %v2840_v25 = vsel %vm586_vm9, %v10415_v30, %v10389_v58 }
 0x45b   : > { %2921 = vmatpush.msra.mxu1 %v2844_v22  ;;  %2892 = vmatpush.msra.mxu0 %v2843_v38 }
 0x45c   : > { %9667 = vmatmul.msk.f32.gmra.mxu1 %vm2090_vm5, %v12370_v53  ;;  %v10423_v0 = vpop.permute.xlu0 %10422  ;;  %v12431_v7 = vpop.permute.xlu2 %10442  ;;  %9663 = vmatmul.msk.f32.gmra.mxu0 %vm2090_vm5, %v12370_v53 }
 0x45d   : > { %v10424_v28 = vunpack.i.l.bf16 %v10423_v0  ;;  %2922 = vmatpush.msra.mxu1 %v2840_v25  ;;  %v12436_v35 = vpop.permute.xlu1 %10437  ;;  %v10425_v61 = vunpack.i.h.bf16 %v10423_v0  ;;  %v10444_v5 = vunpack.i.l.bf16 %v12431_v7  ;;  %v10445_v39 = vunpack.i.h.bf16 %v12431_v7 }
 0x45e   : > { %9673 = vmatmul.msk.f32.gmra.mxu2 %vm2090_vm5, %v9661_v2  ;;  %v10440_v1 = vunpack.i.h.bf16 %v12436_v35  ;;  %v10439_v47 = vunpack.i.l.bf16 %v12436_v35 }
 0x45f   : > { %10632 = vrot.lane.b32.xlu1 %v12039_v41, %s11050_s25  ;;  %2923 = vmatpush.msra.mxu1 %v2836_v31  ;;  %v2839_v62 = vsel %vm586_vm9, %v10424_v28, %v10415_v30  ;;  %v2835_v48 = vsel %vm586_vm9, %v10425_v61, %v10420_v44  ;;  %v12520_v44 = vpack.i.bf16 %v12516_v27, %v11992_v51  ;;  %v9681_v61 = vld [vmem:[%s16110_s5 + $0x78] sm:$0xff]  ;;  %vm4383_vm9 = vcmask 678912  }
 0x460   : > { %9677 = vmatmul.msk.f32.gmra.mxu3 %vm2090_vm5, %v9661_v2  ;;  %2893 = vmatpush.msra.mxu0 %v2839_v62  ;;  %v3062_v63 = vsel %vm608_vm8, %v10439_v47, %v10440_v1  ;;  %v3063_v18 = vsel %vm608_vm8, %v10440_v1, %v10444_v5 }
 0x462   : > { %10642 = vrot.lane.b32.xlu0 %v11971_v36, %s11050_s25  ;;  %10637 = vrot.lane.b32.xlu2 %v11956_v9, %s11050_s25 }
 0x463   : > { %2894 = vmatpush.msra.mxu0 %v2835_v48  ;;  %v11018_v48 = vld [vmem:[#allocation3 + $0x68] sm:$0xff] }
 0x464   : > { %9668 = vmatmul.msk.f32.gmra.mxu1 %vm2090_vm5, %v9660_v19  ;;  %v10433_v41 = vpop.permute.xlu0 %10432  ;;  %v12453_v50 = vpop.permute.xlu2 %10462  ;;  %9664 = vmatmul.msk.f32.gmra.mxu0 %vm2090_vm5, %v9660_v19 }
 0x465   : > { %v10453_v6 = vpop.permute.xlu1 %10452  ;;  %v10435_v20 = vunpack.i.h.bf16 %v10433_v41  ;;  %v10434_v53 = vunpack.i.l.bf16 %v10433_v41  ;;  %v10464_v34 = vunpack.i.l.bf16 %v12453_v50  ;;  %v10465_v59 = vunpack.i.h.bf16 %v12453_v50 }
 0x466   : > { %9690 = vmatmul.msk.f32.vlgmr.msrb.gmra.mxu2 %vm2090_vm5, %v9678_v13  ;;  %v10455_v3 = vunpack.i.h.bf16 %v10453_v6  ;;  %v10454_v29 = vunpack.i.l.bf16 %v10453_v6 }
 0x467   : > { %10647 = vrot.lane.b32.xlu1 %v12023_v10, %s11050_s25  ;;  %v3066_v8 = vsel %vm608_vm8, %v10430_v15, %v10434_v53  ;;  %v3067_v46 = vsel %vm608_vm8, %v10434_v53, %v10435_v20  ;;  %v3061_v51 = vsel %vm608_vm8, %v10465_v59, %v10439_v47  ;;  %v12564_v20 = vld [vmem:[%s16110_s5 + $0x80] sm:$0xff] }
 0x468   : > { %9694 = vmatmul.msk.f32.vlgmr.msrb.gmra.mxu3 %vm2090_vm5, %v9678_v13  ;;  %v3070_v32 = vsel %vm608_vm8, %v10454_v29, %v10455_v3  ;;  %v3071_v54 = vsel %vm608_vm8, %v10455_v3, %v10429_v33 }
 0x469   : > { %3170 = vmatpush.msrb.mxu2 %v3070_v32  ;;  %3199 = vmatpush.msrb.mxu3 %v3071_v54 }
 0x46a   : > { %10662 = vrot.lane.b32.xlu0 %v12028_v40, %s11050_s25  ;;  %10652 = vrot.lane.b32.xlu2 %v11987_v37, %s11050_s25 }
 0x46b   : > { %3171 = vmatpush.msrb.mxu2 %v3066_v8  ;;  %3200 = vmatpush.msrb.mxu3 %v3067_v46 }
 0x46c   : > { %9669 = vmatmul.msk.f32.gmra.mxu1 %vm2090_vm5, %v9661_v2  ;;  %v10448_v55 = vpop.permute.xlu0 %10447  ;;  %v12479_v58 = vpop.permute.xlu2 %10487  ;;  %9665 = vmatmul.msk.f32.gmra.mxu0 %vm2090_vm5, %v9661_v2 }
 0x46d   : > { %v10450_v11 = vunpack.i.h.bf16 %v10448_v55  ;;  %v10449_v19 = vunpack.i.l.bf16 %v10448_v55  ;;  %v10458_v23 = vpop.permute.xlu1 %10457  ;;  %3172 = vmatpush.msrb.mxu2 %v3062_v63  ;;  %3201 = vmatpush.msrb.mxu3 %v3063_v18  ;;  %v10490_v5 = vunpack.i.h.bf16 %v12479_v58  ;;  %v10489_v1 = vunpack.i.l.bf16 %v12479_v58 }
 0x46e   : > { %9691 = vmatmul.msk.f32.gmra.mxu2 %vm2090_vm5, %v12476_v56  ;;  %v10459_v14 = vunpack.i.l.bf16 %v10458_v23  ;;  %v10460_v57 = vunpack.i.h.bf16 %v10458_v23 }
 0x46f   : > { %10667 = vrot.lane.b32.xlu1 %v12055_v52, %s11050_s25  ;;  %v3058_v60 = vsel %vm608_vm8, %v10445_v39, %v10449_v19  ;;  %v3059_v17 = vsel %vm608_vm8, %v10449_v19, %v10450_v11  ;;  %v3283_v19 = vsel %vm921_vm10, %v10489_v1, %v10490_v5 }
 0x470   : > { %9695 = vmatmul.msk.f32.gmra.mxu3 %vm2090_vm5, %v12476_v56  ;;  %3173 = vmatpush.msrb.mxu2 %v3058_v60  ;;  %v3069_v4 = vsel %vm608_vm8, %v10459_v14, %v10454_v29  ;;  %v3068_v26 = vsel %vm608_vm8, %v10464_v34, %v10459_v14  ;;  %v3065_v22 = vsel %vm608_vm8, %v10460_v57, %v10430_v15  ;;  %v12606_v60 = vld [vmem:[%s16110_s5 + $0x88] sm:$0xff] }
 0x471   : > { %3202 = vmatpush.msrb.mxu3 %v3059_v17 }
 0x472   : > { %10687 = vrot.lane.b32.xlu0 %v11956_v9, %s11051_s26  ;;  %10657 = vrot.lane.b32.xlu2 %v12499_v42, %s11050_s25 }
 0x474   : > { %9686 = vmatmul.msk.f32.vlgmr.msrb.gmra.mxu1 %vm2090_vm5, %v9678_v13  ;;  %v10468_v24 = vpop.permute.xlu0 %10467  ;;  %v12512_v43 = vpop.permute.xlu2 %10502  ;;  %9682 = vmatmul.msk.f32.vlgmr.msrb.gmra.mxu0 %vm2090_vm5, %v9678_v13  ;;  %v11019_v13 = vld [vmem:[#allocation3 + $0x70] sm:$0xff] }
 0x475   : > { %v10470_v49 = vunpack.i.h.bf16 %v10468_v24  ;;  %v10469_v30 = vunpack.i.l.bf16 %v10468_v24  ;;  %3112 = vmatpush.msrb.mxu0 %v3068_v26  ;;  %3141 = vmatpush.msrb.mxu1 %v3069_v4  ;;  %v12553_v41 = vpack.i.bf16 %v11019_v13, %v11018_v48  ;;  %v10505_v33 = vunpack.i.h.bf16 %v12512_v43 }
 0x476   : > { %9692 = vmatmul.msk.f32.gmra.mxu2 %vm2090_vm5, %v9680_v21  ;;  %v10473_v38 = vpop.permute.xlu1 %10472  ;;  %v10504_v6 = vunpack.i.l.bf16 %v12512_v43 }
 0x477   : > { %10677 = vrot.lane.b32.xlu1 %v12520_v44, %s11051_s26  ;;  %v3064_v2 = vsel %vm608_vm8, %v10469_v30, %v10460_v57  ;;  %3142 = vmatpush.msrb.mxu1 %v3065_v22  ;;  %v10474_v0 = vunpack.i.l.bf16 %v10473_v38  ;;  %v10475_v7 = vunpack.i.h.bf16 %v10473_v38  ;;  %v3057_v25 = vsel %vm608_vm8, %v10470_v49, %v10445_v39 }
 0x478   : > { %9696 = vmatmul.msk.f32.gmra.mxu3 %vm2090_vm5, %v9680_v21  ;;  %3113 = vmatpush.msrb.mxu0 %v3064_v2  ;;  %v3291_v54 = vsel %vm921_vm10, %v10504_v6, %v10505_v33 }
 0x479   : > { %3143 = vmatpush.msrb.mxu1 %v3061_v51  ;;  %v3060_v28 = vsel %vm608_vm8, %v10474_v0, %v10465_v59  ;;  %v3056_v62 = vsel %vm608_vm8, %v10475_v7, %v10470_v49  ;;  %v9700_v51 = vld [vmem:[%s16110_s5 + $0x90] sm:$0xff]  ;;  %vm3498_vm8 = vcmask 850944  }
 0x47a   : > { %10702 = vrot.lane.b32.xlu0 %v11987_v37, %s11051_s26  ;;  %10672 = vrot.lane.b32.xlu2 %v12043_v45, %s11050_s25 }
 0x47b   : > { %3144 = vmatpush.msrb.mxu1 %v3057_v25  ;;  %3114 = vmatpush.msrb.mxu0 %v3060_v28 }
 0x47c   : > { %9687 = vmatmul.msk.f32.gmra.mxu1 %vm2090_vm5, %v12476_v56  ;;  %v12542_v35 = vpop.permute.xlu0 %10477  ;;  %v12544_v31 = vpop.permute.xlu2 %10507  ;;  %9683 = vmatmul.msk.f32.gmra.mxu0 %vm2090_vm5, %v12476_v56 }
 0x47d   : > { %3115 = vmatpush.msrb.mxu0 %v3056_v62  ;;  %v10480_v53 = vunpack.i.h.bf16 %v12542_v35  ;;  %v10479_v3 = vunpack.i.l.bf16 %v12542_v35  ;;  %v10509_v59 = vunpack.i.l.bf16 %v12544_v31  ;;  %v10510_v38 = vunpack.i.h.bf16 %v12544_v31 }
 0x47e   : > { %9693 = vmatmul.msk.f32.gmra.mxu2 %vm2090_vm5, %v9681_v61 }
 0x47f   : > { %10692 = vrot.lane.b32.xlu1 %v11971_v36, %s11051_s26  ;;  %v3292_v56 = vsel %vm921_vm10, %v10505_v33, %v10479_v3  ;;  %v3290_v25 = vsel %vm921_vm10, %v10509_v59, %v10504_v6  ;;  %v3286_v48 = vsel %vm921_vm10, %v10510_v38, %v10480_v53 }
 0x480   : > { %9697 = vmatmul.msk.f32.gmra.mxu3 %vm2090_vm5, %v9681_v61  ;;  %v10483_v50 = vpop.permute.xlu1 %10482 }
 0x481   : > { %v10484_v29 = vunpack.i.l.bf16 %v10483_v50  ;;  %v10485_v47 = vunpack.i.h.bf16 %v10483_v50 }
 0x482   : > { %10707 = vrot.lane.b32.xlu0 %v12499_v42, %s11051_s26  ;;  %10682 = vrot.lane.b32.xlu2 %v12553_v41, %s11051_s26 }
 0x483   : > { %v3287_v55 = vsel %vm921_vm10, %v10480_v53, %v10484_v29  ;;  %v3288_v11 = vsel %vm921_vm10, %v10484_v29, %v10485_v47 }
 0x484   : > { %9688 = vmatmul.msk.f32.gmra.mxu1 %vm2090_vm5, %v9680_v21  ;;  %v12569_v15 = vpop.permute.xlu0 %10492  ;;  %9684 = vmatmul.msk.f32.gmra.mxu0 %vm2090_vm5, %v9680_v21  ;;  %v12574_v32 = vpop.permute.xlu2 %10522 }
 0x485   : > { %v10495_v8 = vunpack.i.h.bf16 %v12569_v15  ;;  %v10494_v46 = vunpack.i.l.bf16 %v12569_v15  ;;  %v10524_v62 = vunpack.i.l.bf16 %v12574_v32  ;;  %v10525_v50 = vunpack.i.h.bf16 %v12574_v32 }
 0x486   : > { %9710 = vmatmul.msk.f32.vlgmr.msra.gmra.mxu2 %vm2090_vm5, %v12564_v20 }
 0x487   : > { %3391 = vmatpush.msra.mxu2 %v3291_v54  ;;  %10712 = vrot.lane.b32.xlu1 %v12028_v40, %s11051_s26  ;;  %v3284_v17 = vsel %vm921_vm10, %v10490_v5, %v10494_v46  ;;  %v9701_v5 = vld [vmem:[%s16110_s5 + $0x98] sm:$0xff] }
 0x488   : > { %9714 = vmatmul.msk.f32.vlgmr.msra.gmra.mxu3 %vm2090_vm5, %v12564_v20  ;;  %v10498_v63 = vpop.permute.xlu1 %10497 }
 0x489   : > { %3420 = vmatpush.msra.mxu3 %v3292_v56  ;;  %3392 = vmatpush.msra.mxu2 %v3287_v55  ;;  %v12591_v18 = vpop.f32.mrf.mxu2  ;;  %v10499_v39 = vunpack.i.l.bf16 %v10498_v63  ;;  %v10500_v23 = vunpack.i.h.bf16 %v10498_v63  ;;  %v12716_v63 = vld [vmem:[%s16110_s5 + $0xa0] sm:$0xff] }
 0x48a   : > { %10722 = vrot.lane.b32.xlu0 %v12043_v45, %s11051_s26  ;;  %10697 = vrot.lane.b32.xlu2 %v12023_v10, %s11051_s26 }
 0x48b   : > { %3421 = vmatpush.msra.mxu3 %v3288_v11  ;;  %v12601_v14 = vpop.f32.mrf.mxu3  ;;  %3393 = vmatpush.msra.mxu2 %v3283_v19  ;;  %v3279_v57 = vsel %vm921_vm10, %v10495_v8, %v10499_v39  ;;  %v3280_v21 = vsel %vm921_vm10, %v10499_v39, %v10500_v23 }
 0x48c   : > { %9689 = vmatmul.msk.f32.gmra.mxu1 %vm2090_vm5, %v9681_v61  ;;  %v10513_v34 = vpop.permute.xlu0 %10512  ;;  %9685 = vmatmul.msk.f32.gmra.mxu0 %vm2090_vm5, %v9681_v61  ;;  %v12622_v26 = vpop.permute.xlu2 %10532 }
 0x48d   : > { %3422 = vmatpush.msra.mxu3 %v3284_v17  ;;  %3394 = vmatpush.msra.mxu2 %v3279_v57  ;;  %v10514_v24 = vunpack.i.l.bf16 %v10513_v34  ;;  %v10515_v2 = vunpack.i.h.bf16 %v10513_v34  ;;  %v10535_v23 = vunpack.i.h.bf16 %v12622_v26 }
 0x48e   : > { %9711 = vmatmul.msk.f32.gmra.mxu2 %vm2090_vm5, %v12606_v60  ;;  %v12616_v4 = vpop.f32.mrf.mxu1 }
 0x48f   : > { %3423 = vmatpush.msra.mxu3 %v3280_v21  ;;  %10737 = vrot.lane.b32.xlu1 %v11956_v9, %s11057_s22  ;;  %v3289_v31 = vsel %vm921_vm10, %v10514_v24, %v10509_v59  ;;  %v3282_v43 = vsel %vm921_vm10, %v10515_v2, %v10489_v1  ;;  %v3281_v58 = vsel %vm921_vm10, %v10524_v62, %v10515_v2 }
 0x490   : > { %9715 = vmatmul.msk.f32.gmra.mxu3 %vm2090_vm5, %v12606_v60  ;;  %v10518_v49 = vpop.permute.xlu1 %10517 }
 0x491   : > { %v12626_v30 = vpop.f32.mrf.mxu2  ;;  %v12628_v22 = vpop.f32.mrf.mxu0  ;;  %v10519_v0 = vunpack.i.l.bf16 %v10518_v49  ;;  %v10520_v28 = vunpack.i.h.bf16 %v10518_v49 }
 0x492   : > { %10732 = vrot.lane.b32.xlu0 %v12553_v41, %s11057_s22  ;;  %10717 = vrot.lane.b32.xlu2 %v12055_v52, %s11051_s26 }
 0x493   : > { %v12635_v7 = vpop.f32.mrf.mxu3  ;;  %v3285_v13 = vsel %vm921_vm10, %v10519_v0, %v10510_v38  ;;  %v3278_v35 = vsel %vm921_vm10, %v10520_v28, %v10495_v8  ;;  %v3277_v29 = vsel %vm921_vm10, %v10525_v50, %v10520_v28  ;;  %vm4605_vm10 = vcmask 531456  }
 0x494   : > { %9706 = vmatmul.msk.f32.vlgmr.msra.gmra.mxu1 %vm2090_vm5, %v12564_v20  ;;  %v12645_v61 = vpop.permute.xlu0 %10537  ;;  %9702 = vmatmul.msk.f32.vlgmr.msra.gmra.mxu0 %vm2090_vm5, %v12564_v20  ;;  %v12675_v3 = vpop.permute.xlu2 %10547 }
 0x495   : > { %3362 = vmatpush.msra.mxu1 %v3290_v25  ;;  %3333 = vmatpush.msra.mxu0 %v3289_v31  ;;  %v10540_v17 = vunpack.i.h.bf16 %v12645_v61  ;;  %v10539_v34 = vunpack.i.l.bf16 %v12645_v61  ;;  %v10550_v25 = vunpack.i.h.bf16 %v12675_v3  ;;  %v10549_v28 = vunpack.i.l.bf16 %v12675_v3 }
 0x496   : > { %9712 = vmatmul.msk.f32.gmra.mxu2 %vm2090_vm5, %v9700_v51 }
 0x497   : > { %3363 = vmatpush.msra.mxu1 %v3286_v48  ;;  %3334 = vmatpush.msra.mxu0 %v3285_v13  ;;  %v3505_v62 = vsel %vm3498_vm8, %v10539_v34, %v10540_v17  ;;  %v12767_v13 = vld [vmem:[%s16110_s5 + $0xa8] sm:$0xff] }
 0x498   : > { %9716 = vmatmul.msk.f32.gmra.mxu3 %vm2090_vm5, %v9700_v51  ;;  %v12661_v33 = vpop.f32.mrf.mxu1  ;;  %10752 = vrot.lane.b32.xlu1 %v11987_v37, %s11057_s22  ;;  %v12669_v6 = vpop.permute.xlu1 %10527 }
 0x499   : > { %3364 = vmatpush.msra.mxu1 %v3282_v43  ;;  %v12671_v20 = vpop.f32.mrf.mxu2  ;;  %3335 = vmatpush.msra.mxu0 %v3281_v58  ;;  %v12673_v53 = vpop.f32.mrf.mxu0  ;;  %v10530_v39 = vunpack.i.h.bf16 %v12669_v6  ;;  %v10529_v57 = vunpack.i.l.bf16 %v12669_v6 }
 0x49a   : > { %10747 = vrot.lane.b32.xlu0 %v12023_v10, %s11057_s22  ;;  %10727 = vrot.lane.b32.xlu2 %v12520_v44, %s11057_s22 }
 0x49b   : > { %3365 = vmatpush.msra.mxu1 %v3278_v35  ;;  %v12682_v15 = vpop.f32.mrf.mxu3  ;;  %3336 = vmatpush.msra.mxu0 %v3277_v29  ;;  %v3502_v29 = vsel %vm3498_vm8, %v10549_v28, %v10550_v25 }
 0x49c   : > { %9707 = vmatmul.msk.f32.gmra.mxu1 %vm2090_vm5, %v12606_v60  ;;  %v12689_v1 = vpop.permute.xlu0 %10552  ;;  %9703 = vmatmul.msk.f32.gmra.mxu0 %vm2090_vm5, %v12606_v60  ;;  %v12719_v11 = vpop.permute.xlu2 %10567  ;;  %v10534_v60 = vunpack.i.l.bf16 %v12622_v26 }
 0x49d   : > { %v10555_v46 = vunpack.i.h.bf16 %v12689_v1  ;;  %v10554_v56 = vunpack.i.l.bf16 %v12689_v1 }
 0x49e   : > { %9713 = vmatmul.msk.f32.gmra.mxu2 %vm2090_vm5, %v9701_v5  ;;  %v3509_v38 = vsel %vm3498_vm8, %v10530_v39, %v10534_v60  ;;  %v3510_v2 = vsel %vm3498_vm8, %v10534_v60, %v10535_v23 }
 0x49f   : > { %v3513_v21 = vsel %vm3498_vm8, %v10554_v56, %v10555_v46  ;;  %v3514_v26 = vsel %vm3498_vm8, %v10555_v46, %v10529_v57 }
 0x4a0   : > { %9717 = vmatmul.msk.f32.gmra.mxu3 %vm2090_vm5, %v9701_v5  ;;  %v12695_v47 = vpop.f32.mrf.mxu1  ;;  %10757 = vrot.lane.b32.xlu1 %v12499_v42, %s11057_s22  ;;  %v12699_v32 = vpop.permute.xlu1 %10542 }
 0x4a1   : > { %v12701_v54 = vpop.f32.mrf.mxu2  ;;  %v12703_v8 = vpop.f32.mrf.mxu0  ;;  %v10545_v59 = vunpack.i.h.bf16 %v12699_v32  ;;  %v10544_v24 = vunpack.i.l.bf16 %v12699_v32  ;;  %v12856_v32 = vld [vmem:[%s16110_s5 + $0xb8] sm:$0xff] }
 0x4a2   : > { %10767 = vrot.lane.b32.xlu0 %v12055_v52, %s11057_s22  ;;  %10742 = vrot.lane.b32.xlu2 %v11971_v36, %s11057_s22 }
 0x4a3   : > { %v12711_v55 = vpop.f32.mrf.mxu3  ;;  %v3501_v58 = vsel %vm3498_vm8, %v10545_v59, %v10549_v28 }
 0x4a4   : > { %9708 = vmatmul.msk.f32.gmra.mxu1 %vm2090_vm5, %v9700_v51  ;;  %v12722_v19 = vpop.permute.xlu0 %10557  ;;  %9704 = vmatmul.msk.f32.gmra.mxu0 %vm2090_vm5, %v9700_v51  ;;  %v12778_v3 = vpop.permute.xlu2 %10577 }
 0x4a6   : > { %9730 = vmatmul.msk.f32.vlgmr.msrb.gmra.mxu2 %vm2090_vm5, %v12716_v63 }
 0x4a7   : > { %3613 = vmatpush.msrb.mxu2 %v3513_v21 }
 0x4a8   : > { %9734 = vmatmul.msk.f32.vlgmr.msrb.gmra.mxu3 %vm2090_vm5, %v12716_v63  ;;  %v12740_v49 = vpop.f32.mrf.mxu1  ;;  %10772 = vrot.lane.b32.xlu1 %v12043_v45, %s11057_s22 }
 0x4a9   : > { %3642 = vmatpush.msrb.mxu3 %v3514_v26  ;;  %3614 = vmatpush.msrb.mxu2 %v3509_v38  ;;  %v2306_v0 = vpop.f32.mrf.mxu2  ;;  %v12748_v51 = vpop.permute.xlu1 %10562 }
 0x4aa   : > { %10777 = vrot.lane.b32.xlu0 %v12520_v44, %s11058_s18  ;;  %10762 = vrot.lane.b32.xlu2 %v12028_v40, %s11057_s22  ;;  %v12757_v31 = vadd.f32 %v2306_v0, %v12591_v18  ;;  %v12762_v48 = vpop.f32.mrf.mxu0  ;;  %v3506_v18 = vsel %vm3498_vm8, %v10540_v17, %v10544_v24  ;;  %v10564_v46 = vunpack.i.l.bf16 %v12748_v51  ;;  %v10560_v17 = vunpack.i.h.bf16 %v12722_v19  ;;  %s11059_s22 = smov 64  }
 0x4ab   : > { %3643 = vmatpush.msrb.mxu3 %v3510_v2  ;;  %v2335_v43 = vpop.f32.mrf.mxu3  ;;  %3615 = vmatpush.msrb.mxu2 %v3505_v62  ;;  %v10569_v24 = vunpack.i.l.bf16 %v12719_v11  ;;  %v10565_v2 = vunpack.i.h.bf16 %v12748_v51 }
 0x4ac   : > { %v12770_v50 = vadd.f32 %v2335_v43, %v12601_v14  ;;  %9709 = vmatmul.msk.f32.gmra.mxu1 %vm2090_vm5, %v9701_v5  ;;  %v10573_v35 = vpop.permute.xlu0 %10572  ;;  %9705 = vmatmul.msk.f32.gmra.mxu0 %vm2090_vm5, %v9701_v5  ;;  %v10559_v14 = vunpack.i.l.bf16 %v12722_v19  ;;  %v9720_v19 = vld [vmem:[%s16110_s5 + $0xb0] sm:$0xff]  ;;  %v12827_v62 = vpop.permute.xlu2 %10592 }
 0x4ad   : > { %3644 = vmatpush.msrb.mxu3 %v3506_v18  ;;  %3616 = vmatpush.msrb.mxu2 %v3501_v58  ;;  %v10574_v0 = vunpack.i.l.bf16 %v10573_v35  ;;  %v10575_v28 = vunpack.i.h.bf16 %v10573_v35  ;;  %v3507_v51 = vsel %vm3498_vm8, %v10569_v24, %v10560_v17 }
 0x4ae   : > { %9731 = vmatmul.msk.f32.gmra.mxu2 %vm2090_vm5, %v12767_v13  ;;  %v3512_v38 = vsel %vm3498_vm8, %v10559_v14, %v10554_v56  ;;  %v3511_v1 = vsel %vm3498_vm8, %v10564_v46, %v10559_v14  ;;  %v10570_v56 = vunpack.i.h.bf16 %v12719_v11 }
 0x4af   : > { %3645 = vmatpush.msrb.mxu3 %v3502_v29  ;;  %v3503_v6 = vsel %vm3498_vm8, %v10574_v0, %v10565_v2 }
 0x4b0   : > { %9735 = vmatmul.msk.f32.gmra.mxu3 %vm2090_vm5, %v12767_v13  ;;  %v12787_v23 = vpop.f32.mrf.mxu1  ;;  %10782 = vrot.lane.b32.xlu1 %v12553_v41, %s11058_s18  ;;  %v3500_v18 = vsel %vm3498_vm8, %v10570_v56, %v10545_v59  ;;  %v3499_v35 = vsel %vm3498_vm8, %v10575_v28, %v10570_v56 }
 0x4b1   : > { %v2309_v5 = vpop.f32.mrf.mxu2  ;;  %v12791_v60 = vpop.permute.xlu1 %10587 }
 0x4b2   : > { %10792 = vrot.lane.b32.xlu0 %v11971_v36, %s11058_s18  ;;  %10787 = vrot.lane.b32.xlu2 %v11956_v9, %s11058_s18  ;;  %v12799_v57 = vadd.f32 %v2309_v5, %v12626_v30  ;;  %v12801_v21 = vpop.f32.mrf.mxu0  ;;  %v10589_v56 = vunpack.i.l.bf16 %v12791_v60 }
 0x4b3   : > { %v2338_v26 = vpop.f32.mrf.mxu3 }
 0x4b4   : > { %v12812_v25 = vadd.f32 %v2338_v26, %v12635_v7  ;;  %9726 = vmatmul.msk.f32.vlgmr.msrb.gmra.mxu1 %vm2090_vm5, %v12716_v63  ;;  %v12816_v30 = vpop.permute.xlu0 %10582  ;;  %9722 = vmatmul.msk.f32.vlgmr.msrb.gmra.mxu0 %vm2090_vm5, %v12716_v63  ;;  %v3508_v7 = vsel %vm3498_vm8, %v10560_v17, %v10530_v39  ;;  %v3504_v63 = vsel %vm3498_vm8, %v10565_v2, %v10539_v34  ;;  %v12877_v46 = vpop.permute.xlu2 %10612 }
 0x4b5   : > { %3584 = vmatpush.msrb.mxu1 %v3512_v38  ;;  %3555 = vmatpush.msrb.mxu0 %v3511_v1  ;;  %v12893_v38 = vld [vmem:[%s16110_s5 + $0xc0] sm:$0xff]  ;;  %v10584_v2 = vunpack.i.l.bf16 %v12816_v30  ;;  %v10590_v1 = vunpack.i.h.bf16 %v12791_v60  ;;  %v10585_v28 = vunpack.i.h.bf16 %v12816_v30 }
 0x4b6   : > { %9732 = vmatmul.msk.f32.gmra.mxu2 %vm2090_vm5, %v9720_v19 }
 0x4b7   : > { %3585 = vmatpush.msrb.mxu1 %v3508_v7  ;;  %3556 = vmatpush.msrb.mxu0 %v3507_v51 }
 0x4b8   : > { %9736 = vmatmul.msk.f32.gmra.mxu3 %vm2090_vm5, %v9720_v19  ;;  %v12833_v11 = vpop.f32.mrf.mxu1  ;;  %10797 = vrot.lane.b32.xlu1 %v12023_v10, %s11058_s18 }
 0x4b9   : > { %3586 = vmatpush.msrb.mxu1 %v3504_v63  ;;  %v2312_v39 = vpop.f32.mrf.mxu2  ;;  %3557 = vmatpush.msrb.mxu0 %v3503_v6  ;;  %v12838_v43 = vpop.permute.xlu1 %10602 }
 0x4ba   : > { %10812 = vrot.lane.b32.xlu0 %v12028_v40, %s11058_s18  ;;  %10802 = vrot.lane.b32.xlu2 %v11987_v37, %s11058_s18  ;;  %v12848_v61 = vadd.f32 %v2312_v39, %v12671_v20  ;;  %v12850_v34 = vpop.f32.mrf.mxu0  ;;  %v10605_v5 = vunpack.i.h.bf16 %v12838_v43  ;;  %v10595_v39 = vunpack.i.h.bf16 %v12827_v62 }
 0x4bb   : > { %3587 = vmatpush.msrb.mxu1 %v3500_v18  ;;  %v2341_v58 = vpop.f32.mrf.mxu3  ;;  %3558 = vmatpush.msrb.mxu0 %v3499_v35 }
 0x4bc   : > { %v12859_v59 = vadd.f32 %v2341_v58, %v12682_v15  ;;  %9727 = vmatmul.msk.f32.gmra.mxu1 %vm2090_vm5, %v12767_v13  ;;  %v12863_v20 = vpop.permute.xlu0 %10597  ;;  %9723 = vmatmul.msk.f32.gmra.mxu0 %vm2090_vm5, %v12767_v13  ;;  %v10604_v13 = vunpack.i.l.bf16 %v12838_v43 }
 0x4bd   : > { %v10599_v51 = vunpack.i.l.bf16 %v12863_v20  ;;  %v10600_v58 = vunpack.i.h.bf16 %v12863_v20  ;;  %v12945_v20 = vld [vmem:[%s16110_s5 + $0xc8] sm:$0xff] }
 0x4be   : > { %9733 = vmatmul.msk.f32.gmra.mxu2 %vm2090_vm5, %v12856_v32 }
 0x4c0   : > { %9737 = vmatmul.msk.f32.gmra.mxu3 %vm2090_vm5, %v12856_v32  ;;  %v12871_v29 = vpop.f32.mrf.mxu1  ;;  %10817 = vrot.lane.b32.xlu1 %v12055_v52, %s11058_s18 }
 0x4c1   : > { %v2315_v15 = vpop.f32.mrf.mxu2  ;;  %v12875_v14 = vpop.permute.xlu1 %10607 }
 0x4c2   : > { %10837 = vrot.lane.b32.xlu0 %v11956_v9, %s11059_s22  ;;  %10807 = vrot.lane.b32.xlu2 %v12499_v42, %s11058_s18  ;;  %v12886_v17 = vadd.f32 %v2315_v15, %v12701_v54  ;;  %v12888_v24 = vpop.f32.mrf.mxu0  ;;  %v10580_v9 = vunpack.i.h.bf16 %v12778_v3  ;;  %v10579_v54 = vunpack.i.l.bf16 %v12778_v3  ;;  %v3731_v15 = vsel %vm1247_vm13, %v10584_v2, %v10585_v28 }
 0x4c3   : > { %v2344_v26 = vpop.f32.mrf.mxu3  ;;  %v3722_v28 = vsel %vm1247_vm13, %v10595_v39, %v10599_v51 }
 0x4c4   : > { %v12897_v0 = vadd.f32 %v2344_v26, %v12711_v55  ;;  %9728 = vmatmul.msk.f32.gmra.mxu1 %vm2090_vm5, %v9720_v19  ;;  %9724 = vmatmul.msk.f32.gmra.mxu0 %vm2090_vm5, %v9720_v19  ;;  %v12906_v7 = vpop.permute.xlu0 %10617  ;;  %v3734_v55 = vsel %vm1247_vm13, %v10604_v13, %v10605_v5  ;;  %v10594_v19 = vunpack.i.l.bf16 %v12827_v62  ;;  %v3735_v63 = vsel %vm1247_vm13, %v10605_v5, %v10579_v54  ;;  %v13042_v62 = vld [vmem:[%s16110_s5 + $0xd8] sm:$0xff] }
 0x4c5   : > { %v3730_v6 = vsel %vm1247_vm13, %v10580_v9, %v10584_v2  ;;  %v3726_v26 = vsel %vm1247_vm13, %v10589_v56, %v10590_v1 }
 0x4c6   : > { %9750 = vmatmul.msk.f32.vlgmr.msra.gmra.mxu2 %vm2090_vm5, %v12893_v38 }
 0x4c7   : > { %3834 = vmatpush.msra.mxu2 %v3734_v55 }
 0x4c8   : > { %9754 = vmatmul.msk.f32.vlgmr.msra.gmra.mxu3 %vm2090_vm5, %v12893_v38  ;;  %v12918_v30 = vpop.f32.mrf.mxu1  ;;  %10827 = vrot.lane.b32.xlu1 %v12520_v44, %s11059_s22 }
 0x4c9   : > { %3863 = vmatpush.msra.mxu3 %v3735_v63  ;;  %3835 = vmatpush.msra.mxu2 %v3730_v6  ;;  %v2511_v18 = vpop.f32.mrf.mxu2  ;;  %v12926_v35 = vpop.permute.xlu1 %10622  ;;  %v3723_v63 = vsel %vm1247_vm13, %v10599_v51, %v10600_v58  ;;  %v10610_v51 = vunpack.i.h.bf16 %v12875_v14 }
 0x4ca   : > { %10852 = vrot.lane.b32.xlu0 %v11987_v37, %s11059_s22  ;;  %10822 = vrot.lane.b32.xlu2 %v12043_v45, %s11058_s18  ;;  %v12935_v5 = vadd.f32 %v2511_v18, %v12757_v31  ;;  %v12940_v54 = vpop.f32.mrf.mxu0  ;;  %v12947_v37 = vpop.permute.xlu2 %10637  ;;  %v3727_v31 = vsel %vm1247_vm13, %v10590_v1, %v10594_v19  ;;  %v10614_v19 = vunpack.i.l.bf16 %v12877_v46  ;;  %v10619_v18 = vunpack.i.l.bf16 %v12906_v7 }
 0x4cb   : > { %3864 = vmatpush.msra.mxu3 %v3731_v15  ;;  %v2540_v55 = vpop.f32.mrf.mxu3  ;;  %3836 = vmatpush.msra.mxu2 %v3726_v26  ;;  %v10615_v26 = vunpack.i.h.bf16 %v12877_v46 }
 0x4cc   : > { %v12950_v2 = vadd.f32 %v2540_v55, %v12770_v50  ;;  %9729 = vmatmul.msk.f32.gmra.mxu1 %vm2090_vm5, %v12856_v32  ;;  %9725 = vmatmul.msk.f32.gmra.mxu0 %vm2090_vm5, %v12856_v32  ;;  %v10609_v50 = vunpack.i.l.bf16 %v12875_v14  ;;  %v12964_v6 = vpop.permute.xlu0 %10627  ;;  %v12990_v14 = vld [vmem:[%s16110_s5 + $0xd0] sm:$0xff]  ;;  %v3728_v43 = vsel %vm1247_vm13, %v10619_v18, %v10610_v51 }
 0x4cd   : > { %3865 = vmatpush.msra.mxu3 %v3727_v31  ;;  %3837 = vmatpush.msra.mxu2 %v3722_v28  ;;  %v10620_v28 = vunpack.i.h.bf16 %v12906_v7 }
 0x4ce   : > { %9751 = vmatmul.msk.f32.gmra.mxu2 %vm2090_vm5, %v12945_v20  ;;  %v3732_v46 = vsel %vm1247_vm13, %v10614_v19, %v10609_v50 }
 0x4cf   : > { %3866 = vmatpush.msra.mxu3 %v3723_v63 }
 0x4d0   : > { %9755 = vmatmul.msk.f32.gmra.mxu3 %vm2090_vm5, %v12945_v20  ;;  %10842 = vrot.lane.b32.xlu1 %v11971_v36, %s11059_s22 }
 0x4d1   : > { %v12970_v1 = vpop.f32.mrf.mxu1  ;;  %v2514_v32 = vpop.f32.mrf.mxu2 }
 0x4d2   : > { %10857 = vrot.lane.b32.xlu0 %v12499_v42, %s11059_s22  ;;  %10832 = vrot.lane.b32.xlu2 %v12553_v41, %s11059_s22  ;;  %v12980_v58 = vadd.f32 %v2514_v32, %v12799_v57  ;;  %v12982_v15 = vpop.permute.xlu1 %10632  ;;  %v12984_v36 = vpop.f32.mrf.mxu0  ;;  %v10624_v42 = vunpack.i.l.bf16 %v12926_v35  ;;  %v3733_v57 = vsel %vm1247_vm13, %v10609_v50, %v10604_v13  ;;  %v3729_v32 = vsel %vm1247_vm13, %v10610_v51, %v10580_v9 }
 0x4d3   : > { %v2543_v55 = vpop.f32.mrf.mxu3  ;;  %v13005_v63 = vpop.permute.xlu2 %10652  ;;  %v3725_v13 = vsel %vm1247_vm13, %v10615_v26, %v10589_v56 }
 0x4d4   : > { %v12994_v31 = vadd.f32 %v2543_v55, %v12812_v25  ;;  %9746 = vmatmul.msk.f32.vlgmr.msra.gmra.mxu1 %vm2090_vm5, %v12893_v38  ;;  %9742 = vmatmul.msk.f32.vlgmr.msra.gmra.mxu0 %vm2090_vm5, %v12893_v38  ;;  %v10625_v25 = vunpack.i.h.bf16 %v12926_v35  ;;  %v3724_v3 = vsel %vm1247_vm13, %v10624_v42, %v10615_v26  ;;  %v13024_v7 = vpop.permute.xlu0 %10642  ;;  %v3721_v35 = vsel %vm1247_vm13, %v10620_v28, %v10595_v39  ;;  %v11021_v39 = vld [vmem:[#allocation3 + $0x40] sm:$0xff] }
 0x4d5   : > { %3805 = vmatpush.msra.mxu1 %v3733_v57  ;;  %3776 = vmatpush.msra.mxu0 %v3732_v46  ;;  %v16122_v26 = vunpack.i.l.bf16 %v13005_v63  ;;  %v10629_v57 = vunpack.i.l.bf16 %v12964_v6 }
 0x4d6   : > { %9752 = vmatmul.msk.f32.gmra.mxu2 %vm2090_vm5, %v12990_v14  ;;  %v3720_v56 = vsel %vm1247_vm13, %v10625_v25, %v10620_v28  ;;  %v13080_v28 = vld [vmem:[%s16110_s5 + $0xe0] sm:$0xff]  ;;  %v16121_v25 = vunpack.i.h.bf16 %v12964_v6  ;;  %vm5049_vm13 = vcmask 515072  }
 0x4d7   : > { %3806 = vmatpush.msra.mxu1 %v3729_v32  ;;  %3777 = vmatpush.msra.mxu0 %v3728_v43  ;;  %v10634_v32 = vunpack.i.l.bf16 %v12982_v15 }
 0x4d8   : > { %9756 = vmatmul.msk.f32.gmra.mxu3 %vm2090_vm5, %v12990_v14  ;;  %10862 = vrot.lane.b32.xlu1 %v12028_v40, %s11059_s22 }
 0x4d9   : > { %3807 = vmatpush.msra.mxu1 %v3725_v13  ;;  %v13022_v38 = vpop.f32.mrf.mxu1  ;;  %v2517_v9 = vpop.f32.mrf.mxu2  ;;  %3778 = vmatpush.msra.mxu0 %v3724_v3  ;;  %v11023_v13 = vld [vmem:[#allocation3 + $0x90] sm:$0xff] }
 0x4da   : > { %10872 = vrot.lane.b32.xlu0 %v12043_v45, %s11059_s22  ;;  %10847 = vrot.lane.b32.xlu2 %v12023_v10, %s11059_s22  ;;  %v13034_v40 = vadd.f32 %v2517_v9, %v12848_v61  ;;  %v13036_v60 = vpop.f32.mrf.mxu0  ;;  %v13049_v10 = vpop.permute.xlu1 %10647  ;;  %v11020_v61 = vld [vmem:[#allocation3 + $0x38] sm:$0xff]  ;;  %v10640_v9 = vunpack.i.h.bf16 %v12947_v37 }
 0x4db   : > { %3808 = vmatpush.msra.mxu1 %v3721_v35  ;;  %v2546_v50 = vpop.f32.mrf.mxu3  ;;  %3779 = vmatpush.msra.mxu0 %v3720_v56  ;;  %v13055_v19 = vpack.i.bf16 %v11021_v39, %v11020_v61  ;;  %v13057_v51 = vpop.permute.xlu2 %10657  ;;  %v16124_v35 = vunpack.i.l.bf16 %v12947_v37  ;;  %v10635_v56 = vunpack.i.h.bf16 %v12982_v15  ;;  %v11024_v61 = vld [vmem:[#allocation3 + $0x18] sm:$0xff]  ;;  %v11025_v39 = vld [vmem:[#allocation3 + $0x20] sm:$0xff]  ;;  %v10644_v15 = vunpack.i.l.bf16 %v13024_v7 }
 0x4dc   : > { %v13045_v45 = vadd.f32 %v2546_v50, %v12859_v59  ;;  %9747 = vmatmul.msk.f32.gmra.mxu1 %vm2090_vm5, %v12945_v20  ;;  %9743 = vmatmul.msk.f32.gmra.mxu0 %vm2090_vm5, %v12945_v20  ;;  %v10655_v20 = vunpack.i.h.bf16 %v13005_v63  ;;  %v13084_v43 = vpop.permute.xlu0 %10662 }
 0x4de   : > { %9753 = vmatmul.msk.f32.gmra.mxu2 %vm2090_vm5, %v13042_v62 }
 0x4e0   : > { %9757 = vmatmul.msk.f32.gmra.mxu3 %vm2090_vm5, %v13042_v62  ;;  %10887 = vrot.lane.b32.xlu1 %v13055_v19, %s11060_s21 }
 0x4e1   : > { %v13063_v59 = vpop.f32.mrf.mxu1  ;;  %v2520_v18 = vpop.f32.mrf.mxu2 }
 0x4e2   : > { %10882 = vrot.lane.b32.xlu0 %v12553_v41, %s11060_s21  ;;  %10867 = vrot.lane.b32.xlu2 %v12055_v52, %s11059_s22  ;;  %v13072_v55 = vadd.f32 %v2520_v18, %v12886_v17  ;;  %v13074_v42 = vpop.f32.mrf.mxu0  ;;  %v11022_v17 = vld [vmem:[#allocation3 + $0x88] sm:$0xff]  ;;  %v13098_v50 = vpop.permute.xlu1 %10667  ;;  %v13106_v18 = vpack.i.bf16 %v11025_v39, %v11024_v61  ;;  %v10650_v61 = vunpack.i.h.bf16 %v13049_v10  ;;  %v3952_v39 = vsel %vm1267_vm14, %v10634_v32, %v10635_v56  ;;  %s9557_s22 = sshll.u32 %s16408_s30, 1 }
 0x4e3   : > { %v2549_v46 = vpop.f32.mrf.mxu3  ;;  %v13093_v3 = vpack.i.bf16 %v11023_v13, %v11022_v17  ;;  %v10649_v17 = vunpack.i.l.bf16 %v13049_v10  ;;  %v3951_v13 = vsel %vm1267_vm14, %v16121_v25, %v10634_v32  ;;  %v13139_v10 = vld [vmem:[%s16110_s5 + $0xe8] sm:$0xff]  ;;  %s479_s16 = scalar_lea.vmem %s16119_s14, %s9557_s22 }
 0x4e4   : > { %v13087_v52 = vadd.f32 %v2549_v46, %v12897_v0  ;;  %9748 = vmatmul.msk.f32.gmra.mxu1 %vm2090_vm5, %v12990_v14  ;;  %9744 = vmatmul.msk.f32.gmra.mxu0 %vm2090_vm5, %v12990_v14  ;;  %v3955_v0 = vsel %vm1267_vm14, %v16122_v26, %v10655_v20  ;;  %v3956_v14 = vsel %vm1267_vm14, %v10655_v20, %v10629_v57  ;;  %v16123_v46 = vunpack.i.h.bf16 %v13024_v7  ;;  %v13152_v56 = vpop.permute.xlu0 %10687 }
 0x4e6   : > { %9770 = vmatmul.msk.f32.vlgmr.msrb.gmra.mxu2 %vm2090_vm5, %v13080_v28 }
 0x4e7   : > { %4055 = vmatpush.msrb.mxu2 %v3955_v0  ;;  %v13120_v0 = vpop.permute.xlu2 %10672 }
 0x4e8   : > { %9774 = vmatmul.msk.f32.vlgmr.msrb.gmra.mxu3 %vm2090_vm5, %v13080_v28  ;;  %10902 = vrot.lane.b32.xlu1 %v13093_v3, %s11060_s21 }
 0x4e9   : > { %4084 = vmatpush.msrb.mxu3 %v3956_v14  ;;  %v13118_v20 = vpop.f32.mrf.mxu1  ;;  %4056 = vmatpush.msrb.mxu2 %v3951_v13  ;;  %v2733_v57 = vpop.f32.mrf.mxu2  ;;  %v3947_v14 = vsel %vm1267_vm14, %v16124_v35, %v10640_v9 }
 0x4ea   : > { %16141 = vst [vmem:[#allocation6_spill] sm:$0xff] %v13118_v20  ;;  %10897 = vrot.lane.b32.xlu0 %v13106_v18, %s11060_s21  ;;  %10877 = vrot.lane.b32.xlu2 %v12520_v44, %s11060_s21  ;;  %v13129_v25 = vadd.f32 %v2733_v57, %v12935_v5  ;;  %v13134_v13 = vpop.f32.mrf.mxu0  ;;  %v3948_v44 = vsel %vm1267_vm14, %v10640_v9, %v10644_v15  ;;  %v10659_v9 = vunpack.i.l.bf16 %v13057_v51  ;;  %v10664_v15 = vunpack.i.l.bf16 %v13084_v43 }
 0x4eb   : > { %16142 = vst [vmem:[#allocation7_spill] sm:$0xff] %v13134_v13  ;;  %4085 = vmatpush.msrb.mxu3 %v3952_v39  ;;  %v2762_v26 = vpop.f32.mrf.mxu3  ;;  %4057 = vmatpush.msrb.mxu2 %v3947_v14  ;;  %v3943_v5 = vsel %vm1267_vm14, %v16123_v46, %v10649_v17  ;;  %v3944_v57 = vsel %vm1267_vm14, %v10649_v17, %v10650_v61  ;;  %v13162_v39 = vpop.permute.xlu1 %10677  ;;  %v11028_v17 = vld [vmem:[#allocation3 + $0x50] sm:$0xff]  ;;  %v10669_v46 = vunpack.i.l.bf16 %v13098_v50  ;;  %v16146_v20 = vunpack.i.h.bf16 %v12964_v6 }
 0x4ec   : > { %v13142_v32 = vadd.f32 %v2762_v26, %v12950_v2  ;;  %9749 = vmatmul.msk.f32.gmra.mxu1 %vm2090_vm5, %v13042_v62  ;;  %9745 = vmatmul.msk.f32.gmra.mxu0 %vm2090_vm5, %v13042_v62  ;;  %v11026_v2 = vld [vmem:[#allocation3 + $0x58] sm:$0xff]  ;;  %v11027_v62 = vld [vmem:[#allocation3 + $0x8] sm:$0xff]  ;;  %v11029_v14 = vld [vmem:[#allocation3 + $0x10] sm:$0xff]  ;;  %v16147_v6 = vunpack.i.l.bf16 %v12947_v37 }
 0x4ed   : > { %4086 = vmatpush.msrb.mxu3 %v3948_v44  ;;  %4058 = vmatpush.msrb.mxu2 %v3943_v5  ;;  %v13158_v26 = vpack.i.bf16 %v11026_v2, %v12495_v16  ;;  %v13168_v61 = vpack.i.bf16 %v11027_v62, %v11028_v17  ;;  %v11030_v16 = vld [vmem:[#allocation3 + $0x48] sm:$0xff]  ;;  %v10660_v2 = vunpack.i.h.bf16 %v13057_v51  ;;  %v10665_v51 = vunpack.i.h.bf16 %v13084_v43  ;;  %v11031_v43 = vld [vmem:[#allocation3] sm:$0xff] }
 0x4ee   : > { %9771 = vmatmul.msk.f32.gmra.mxu2 %vm2090_vm5, %v13139_v10  ;;  %v13170_v44 = vpack.i.bf16 %v11029_v14, %v11030_v16  ;;  %v13188_v16 = vld [vmem:[%s16110_s5 + $0xf0] sm:$0xff] }
 0x4ef   : > { %4087 = vmatpush.msrb.mxu3 %v3944_v57  ;;  %v13191_v35 = vpop.permute.xlu2 %10682 }
 0x4f0   : > { %9775 = vmatmul.msk.f32.gmra.mxu3 %vm2090_vm5, %v13139_v10  ;;  %10907 = vrot.lane.b32.xlu1 %v13158_v26, %s11060_s21 }
 0x4f1   : > { %v13172_v5 = vpop.f32.mrf.mxu1  ;;  %v2736_v57 = vpop.f32.mrf.mxu2 }
 0x4f2   : > { %16143 = vst [vmem:[#allocation8_spill] sm:$0xff] %v13172_v5  ;;  %10917 = vrot.lane.b32.xlu0 %v13168_v61, %s11060_s21  ;;  %10892 = vrot.lane.b32.xlu2 %v13170_v44, %s11060_s21  ;;  %v13181_v62 = vadd.f32 %v2736_v57, %v12980_v58  ;;  %v13183_v17 = vpop.f32.mrf.mxu0  ;;  %v16145_v58 = vunpack.i.l.bf16 %v13005_v63  ;;  %v11032_v5 = vld [vmem:[#allocation3 + $0x28] sm:$0xff]  ;;  %v3950_v63 = vsel %vm1267_vm14, %v10660_v2, %v16146_v20  ;;  %v11035_v20 = vld [vmem:[#allocation3 + $0x30] sm:$0xff] }
 0x4f3   : > { %16144 = vst [vmem:[#allocation9_spill] sm:$0xff] %v13183_v17  ;;  %v2765_v14 = vpop.f32.mrf.mxu3  ;;  %v3953_v17 = vsel %vm1267_vm14, %v10664_v15, %v10659_v9  ;;  %v13204_v13 = vpack.i.bf16 %v11031_v43, %v11032_v5  ;;  %v10675_v5 = vunpack.i.h.bf16 %v13120_v0  ;;  %v16148_v43 = vunpack.i.h.bf16 %v13024_v7  ;;  %v9761_v7 = vld [vmem:[%s16110_s5 + $0xf8] sm:$0xff] }
 0x4f4   : > { %v13194_v12 = vadd.f32 %v2765_v14, %v12994_v31  ;;  %9766 = vmatmul.msk.f32.vlgmr.msrb.gmra.mxu1 %vm2090_vm5, %v13080_v28  ;;  %v3954_v57 = vsel %vm1267_vm14, %v10659_v9, %v16145_v58  ;;  %9762 = vmatmul.msk.f32.vlgmr.msrb.gmra.mxu0 %vm2090_vm5, %v13080_v28  ;;  %v10674_v31 = vunpack.i.l.bf16 %v13120_v0  ;;  %v10670_v14 = vunpack.i.h.bf16 %v13098_v50  ;;  %v11033_v9 = vld [vmem:[#allocation3 + $0x98] sm:$0xff] }
 0x4f5   : > { %4026 = vmatpush.msrb.mxu1 %v3954_v57  ;;  %3997 = vmatpush.msrb.mxu0 %v3953_v17  ;;  %v3949_v28 = vsel %vm1267_vm14, %v10669_v46, %v10660_v2  ;;  %v10926_v15 = vpack.i.bf16 %v12516_v27, %v11033_v9  ;;  %v13216_v17 = vpop.permute.xlu0 %10702  ;;  %v3946_v50 = vsel %vm1267_vm14, %v10665_v51, %v16147_v6  ;;  %v11034_v46 = vld [vmem:[#allocation3 + $0x78] sm:$0xff]  ;;  %v13228_v57 = vpop.permute.xlu1 %10692 }
 0x4f6   : > { %9772 = vmatmul.msk.f32.gmra.mxu2 %vm2090_vm5, %v13188_v16  ;;  %v10911_v2 = vpack.i.bf16 %v11035_v20, %v11034_v46  ;;  %v3945_v58 = vsel %vm1267_vm14, %v10674_v31, %v10665_v51  ;;  %v3942_v37 = vsel %vm1267_vm14, %v10670_v14, %v16148_v43  ;;  %v3941_v31 = vsel %vm1267_vm14, %v10675_v5, %v10670_v14  ;;  %v13273_v46 = vld [vmem:[%s16110_s5 + $0x100] sm:$0xff] }
 0x4f7   : > { %4027 = vmatpush.msrb.mxu1 %v3950_v63  ;;  %3998 = vmatpush.msrb.mxu0 %v3949_v28  ;;  %v16127_v5 = vunpack.i.l.bf16 %v13216_v17  ;;  %v10680_v20 = vunpack.i.h.bf16 %v13162_v39  ;;  %vm5271_vm14 = vcmask 506880  }
 0x4f8   : > { %9776 = vmatmul.msk.f32.gmra.mxu3 %vm2090_vm5, %v13188_v16  ;;  %10922 = vrot.lane.b32.xlu1 %v13204_v13, %s11060_s21 }
 0x4f9   : > { %4028 = vmatpush.msrb.mxu1 %v3946_v50  ;;  %v13226_v27 = vpop.f32.mrf.mxu1  ;;  %v2739_v0 = vpop.f32.mrf.mxu2  ;;  %3999 = vmatpush.msrb.mxu0 %v3945_v58 }
 0x4fa   : > { %10927 = vrot.lane.b32.xlu0 %v10926_v15, %s11061_s15  ;;  %10912 = vrot.lane.b32.xlu2 %v10911_v2, %s11060_s21  ;;  %v13236_v63 = vadd.f32 %v2739_v0, %v13034_v40  ;;  %v13238_v51 = vpop.f32.mrf.mxu0  ;;  %v10698_v40 = vpop.permute.xlu2 %10697  ;;  %v10690_v0 = vunpack.i.h.bf16 %v13152_v56 }
 0x4fb   : > { %4029 = vmatpush.msrb.mxu1 %v3942_v37  ;;  %v2768_v28 = vpop.f32.mrf.mxu3  ;;  %4000 = vmatpush.msrb.mxu0 %v3941_v31  ;;  %v10679_v37 = vunpack.i.l.bf16 %v13162_v39  ;;  %v10699_v43 = vunpack.i.l.bf16 %v10698_v40 }
 0x4fc   : > { %v13245_v9 = vadd.f32 %v2768_v28, %v13045_v45  ;;  %9767 = vmatmul.msk.f32.gmra.mxu1 %vm2090_vm5, %v13139_v10  ;;  %9763 = vmatmul.msk.f32.gmra.mxu0 %vm2090_vm5, %v13139_v10  ;;  %v10705_v45 = vunpack.i.h.bf16 %v13216_v17 }
 0x4fd   : > { %v13259_v6 = vpop.permute.xlu0 %10707  ;;  %v13276_v58 = vpop.permute.xlu1 %10712 }
 0x4fe   : > { %9773 = vmatmul.msk.f32.gmra.mxu2 %vm2090_vm5, %v9761_v7  ;;  %v4177_v28 = vsel %vm1588_vm15, %v10705_v45, %v10679_v37  ;;  %v16149_v37 = vunpack.i.l.bf16 %v13152_v56 }
 0x500   : > { %9777 = vmatmul.msk.f32.gmra.mxu3 %vm2090_vm5, %v9761_v7  ;;  %10932 = vrot.lane.b32.xlu1 %v12553_v41, %s11061_s15 }
 0x501   : > { %v13255_v14 = vpop.f32.mrf.mxu1  ;;  %v2742_v15 = vpop.f32.mrf.mxu2 }
 0x502   : > { %10942 = vrot.lane.b32.xlu0 %v13170_v44, %s11061_s15  ;;  %10937 = vrot.lane.b32.xlu2 %v13055_v19, %s11061_s15  ;;  %v13266_v10 = vadd.f32 %v2742_v15, %v13072_v55  ;;  %v13268_v50 = vpop.f32.mrf.mxu0  ;;  %v10685_v19 = vunpack.i.h.bf16 %v13191_v35  ;;  %v10684_v55 = vunpack.i.l.bf16 %v13191_v35  ;;  %v13295_v31 = vpop.permute.xlu2 %10717  ;;  %v10694_v35 = vunpack.i.l.bf16 %v13228_v57 }
 0x503   : > { %v2771_v41 = vpop.f32.mrf.mxu3 }
 0x504   : > { %v13279_v44 = vadd.f32 %v2771_v41, %v13087_v52  ;;  %9768 = vmatmul.msk.f32.gmra.mxu1 %vm2090_vm5, %v13188_v16  ;;  %9764 = vmatmul.msk.f32.gmra.mxu0 %vm2090_vm5, %v13188_v16  ;;  %v4176_v52 = vsel %vm1588_vm15, %v16127_v5, %v10705_v45  ;;  %v4172_v15 = vsel %vm1588_vm15, %v10680_v20, %v10684_v55  ;;  %v10700_v16 = vunpack.i.h.bf16 %v10698_v40  ;;  %v13324_v40 = vld [vmem:[%s16110_s5 + $0x108] sm:$0xff] }
 0x506   : > { %9790 = vmatmul.msk.f32.vlgmr.msra.gmra.mxu2 %vm2090_vm5, %v13273_v46 }
 0x507   : > { %4276 = vmatpush.msra.mxu2 %v4176_v52  ;;  %v4173_v52 = vsel %vm1588_vm15, %v10684_v55, %v10685_v19  ;;  %v13337_v55 = vpop.permute.xlu1 %10737 }
 0x508   : > { %9794 = vmatmul.msk.f32.vlgmr.msra.gmra.mxu3 %vm2090_vm5, %v13273_v46  ;;  %10947 = vrot.lane.b32.xlu1 %v13106_v18, %s11061_s15  ;;  %v4168_v18 = vsel %vm1588_vm15, %v16149_v37, %v10690_v0 }
 0x509   : > { %4305 = vmatpush.msra.mxu3 %v4177_v28  ;;  %v13307_v41 = vpop.f32.mrf.mxu1  ;;  %4277 = vmatpush.msra.mxu2 %v4172_v15  ;;  %v2954_v5 = vpop.f32.mrf.mxu2 }
 0x50a   : > { %10962 = vrot.lane.b32.xlu0 %v10911_v2, %s11061_s15  ;;  %10952 = vrot.lane.b32.xlu2 %v13093_v3, %s11061_s15  ;;  %v13314_v45 = vadd.f32 %v2954_v5, %v13129_v25  ;;  %v13319_v28 = vpop.f32.mrf.mxu0  ;;  %v13326_v2 = vpop.permute.xlu0 %10722  ;;  %v4169_v25 = vsel %vm1588_vm15, %v10690_v0, %v10694_v35  ;;  %v16150_v5 = vunpack.i.h.bf16 %v13228_v57  ;;  %v5448_v0 = vld [vmem:[%s16111_s6] sm:$0xff]  ;;  %v10714_v35 = vunpack.i.l.bf16 %v13276_v58 }
 0x50b   : > { %4306 = vmatpush.msra.mxu3 %v4173_v52  ;;  %v2983_v15 = vpop.f32.mrf.mxu3  ;;  %4278 = vmatpush.msra.mxu2 %v4168_v18  ;;  %v4165_v52 = vsel %vm1588_vm15, %v10699_v43, %v10700_v16  ;;  %v10710_v16 = vunpack.i.h.bf16 %v13259_v6  ;;  %v13354_v37 = vpop.permute.xlu2 %10727 }
 0x50c   : > { %v13329_v3 = vadd.f32 %v2983_v15, %v13142_v32  ;;  %9769 = vmatmul.msk.f32.gmra.mxu1 %vm2090_vm5, %v9761_v7  ;;  %v4164_v19 = vsel %vm1588_vm15, %v16150_v5, %v10699_v43  ;;  %9765 = vmatmul.msk.f32.gmra.mxu0 %vm2090_vm5, %v9761_v7  ;;  %v10709_v32 = vunpack.i.l.bf16 %v13259_v6  ;;  %v9780_v6 = vld [vmem:[%s16110_s5 + $0x110] sm:$0xff] }
 0x50d   : > { %4307 = vmatpush.msra.mxu3 %v4169_v25  ;;  %4279 = vmatpush.msra.mxu2 %v4164_v19  ;;  %v10719_v25 = vunpack.i.l.bf16 %v13295_v31 }
 0x50e   : > { %9791 = vmatmul.msk.f32.gmra.mxu2 %vm2090_vm5, %v13324_v40 }
 0x50f   : > { %4308 = vmatpush.msra.mxu3 %v4165_v52  ;;  %v10715_v52 = vunpack.i.h.bf16 %v13276_v58  ;;  %v10720_v58 = vunpack.i.h.bf16 %v13295_v31  ;;  %v16152_v31 = vunpack.i.l.bf16 %v13152_v56 }
 0x510   : > { %9795 = vmatmul.msk.f32.gmra.mxu3 %vm2090_vm5, %v13324_v40  ;;  %10967 = vrot.lane.b32.xlu1 %v13168_v61, %s11061_s15  ;;  %v16151_v61 = vunpack.i.l.bf16 %v13216_v17  ;;  %v4174_v17 = vsel %vm1588_vm15, %v10714_v35, %v10709_v32  ;;  %v13395_v35 = vpop.permute.xlu1 %10752 }
 0x511   : > { %v13351_v7 = vpop.f32.mrf.mxu1  ;;  %v2957_v43 = vpop.f32.mrf.mxu2  ;;  %v4167_v39 = vsel %vm1588_vm15, %v10715_v52, %v16152_v31 }
 0x512   : > { %5454 = vperm.xlu0 %10223, %v5448_v0   ;;  %10957 = vrot.lane.b32.xlu2 %v13158_v26, %s11061_s15  ;;  %v13359_v18 = vadd.f32 %v2957_v43, %v13181_v62  ;;  %v13361_v15 = vpop.f32.mrf.mxu0  ;;  %v4175_v19 = vsel %vm1588_vm15, %v10709_v32, %v16151_v61  ;;  %v10724_v26 = vunpack.i.l.bf16 %v13326_v2  ;;  %v5449_v0 = vld [vmem:[%s16111_s6 + $0x8] sm:$0xff]  ;;  %v10725_v43 = vunpack.i.h.bf16 %v13326_v2  ;;  %v5451_v32 = vld [vmem:[%s16111_s6 + $0x18] sm:$0xff] }
 0x513   : > { %v2986_v5 = vpop.f32.mrf.mxu3 }
 0x514   : > { %v13373_v62 = vadd.f32 %v2986_v5, %v13194_v12  ;;  %9786 = vmatmul.msk.f32.vlgmr.msra.gmra.mxu1 %vm2090_vm5, %v13273_v46  ;;  %9782 = vmatmul.msk.f32.vlgmr.msra.gmra.mxu0 %vm2090_vm5, %v13273_v46  ;;  %v13385_v12 = vpop.permute.xlu0 %10732  ;;  %v4171_v5 = vsel %vm1588_vm15, %v10710_v16, %v10680_v20  ;;  %v4170_v46 = vsel %vm1588_vm15, %v10719_v25, %v10710_v16  ;;  %v16154_v25 = vunpack.i.h.bf16 %v13228_v57  ;;  %v9781_v57 = vld [vmem:[%s16110_s5 + $0x118] sm:$0xff] }
 0x515   : > { %4247 = vmatpush.msra.mxu1 %v4175_v19  ;;  %4218 = vmatpush.msra.mxu0 %v4174_v17  ;;  %v4166_v20 = vsel %vm1588_vm15, %v10724_v26, %v10715_v52  ;;  %v4162_v52 = vsel %vm1588_vm15, %v10725_v43, %v10720_v58  ;;  %v13418_v17 = vpop.permute.xlu2 %10742 }
 0x516   : > { %9792 = vmatmul.msk.f32.gmra.mxu2 %vm2090_vm5, %v9780_v6  ;;  %v4163_v61 = vsel %vm1588_vm15, %v10720_v58, %v16154_v25  ;;  %v10729_v25 = vunpack.i.l.bf16 %v13354_v37 }
 0x517   : > { %4248 = vmatpush.msra.mxu1 %v4171_v5  ;;  %4219 = vmatpush.msra.mxu0 %v4170_v46  ;;  %v16128_v5 = vunpack.i.l.bf16 %v13395_v35 }
 0x518   : > { %9796 = vmatmul.msk.f32.gmra.mxu3 %vm2090_vm5, %v9780_v6  ;;  %5459 = vperm.xlu1 %10224, %v5449_v0   ;;  %v13436_v46 = vpop.permute.xlu1 %10757 }
 0x519   : > { %4249 = vmatpush.msra.mxu1 %v4167_v39  ;;  %v13402_v2 = vpop.f32.mrf.mxu1  ;;  %v2960_v16 = vpop.f32.mrf.mxu2  ;;  %4220 = vmatpush.msra.mxu0 %v4166_v20  ;;  %v13446_v39 = vld [vmem:[%s16110_s5 + $0x120] sm:$0xff]  ;;  %v10734_v20 = vunpack.i.l.bf16 %v13385_v12 }
 0x51a   : > { %16153 = vst [vmem:[#allocation10_spill] sm:$0xff] %v13402_v2  ;;  %5469 = vperm.xlu0 %10223, %v5451_v32   ;;  %10972 = vrot.lane.b32.xlu2 %v13204_v13, %s11061_s15  ;;  %v13410_v56 = vadd.f32 %v2960_v16, %v13236_v63  ;;  %v13412_v19 = vpop.f32.mrf.mxu0  ;;  %v5450_v13 = vld [vmem:[%s16111_s6 + $0x10] sm:$0xff] }
 0x51b   : > { %16155 = vst [vmem:[#allocation11_spill] sm:$0xff] %v13412_v19  ;;  %4250 = vmatpush.msra.mxu1 %v4163_v61  ;;  %v2989_v26 = vpop.f32.mrf.mxu3  ;;  %4221 = vmatpush.msra.mxu0 %v4162_v52  ;;  %v10740_v61 = vunpack.i.h.bf16 %v13337_v55 }
 0x51c   : > { %v13421_v0 = vadd.f32 %v2989_v26, %v13245_v9  ;;  %9787 = vmatmul.msk.f32.gmra.mxu1 %vm2090_vm5, %v13324_v40  ;;  %9783 = vmatmul.msk.f32.gmra.mxu0 %vm2090_vm5, %v13324_v40  ;;  %v10748_v63 = vpop.permute.xlu0 %10747  ;;  %v10755_v9 = vunpack.i.h.bf16 %v13395_v35  ;;  %v10735_v26 = vunpack.i.h.bf16 %v13385_v12 }
 0x51e   : > { %9793 = vmatmul.msk.f32.gmra.mxu2 %vm2090_vm5, %v9781_v57  ;;  %v4395_v19 = vsel %vm4383_vm9, %v10734_v20, %v10735_v26 }
 0x520   : > { %9797 = vmatmul.msk.f32.gmra.mxu3 %vm2090_vm5, %v9781_v57 }
 0x521   : > { %v13432_v58 = vpop.f32.mrf.mxu1  ;;  %v2963_v43 = vpop.f32.mrf.mxu2 }
 0x522   : > { %16156 = vst [vmem:[#allocation12_spill] sm:$0xff] %v13432_v58  ;;  %5464 = vperm.xlu2 %10225, %v5450_v13   ;;  %v13439_v40 = vadd.f32 %v2963_v43, %v13266_v10  ;;  %v13441_v32 = vpop.f32.mrf.mxu0  ;;  %v16129_v10 = vunpack.i.h.bf16 %v13354_v37  ;;  %v13459_v13 = vpop.permute.xlu2 %10762  ;;  %v10749_v43 = vunpack.i.l.bf16 %v10748_v63 }
 0x523   : > { %16157 = vst [vmem:[#allocation13_spill] sm:$0xff] %v13441_v32  ;;  %v2992_v31 = vpop.f32.mrf.mxu3 }
 0x524   : > { %v13450_v16 = vadd.f32 %v2992_v31, %v13279_v44  ;;  %9788 = vmatmul.msk.f32.gmra.mxu1 %vm2090_vm5, %v9780_v6  ;;  %9784 = vmatmul.msk.f32.gmra.mxu0 %vm2090_vm5, %v9780_v6  ;;  %v4398_v44 = vsel %vm4383_vm9, %v16128_v5, %v10755_v9  ;;  %v10744_v6 = vunpack.i.l.bf16 %v13418_v17  ;;  %v4399_v31 = vsel %vm4383_vm9, %v10755_v9, %v10729_v25  ;;  %v13476_v58 = vpop.permute.xlu0 %10767 }
 0x525   : > { %v4394_v12 = vsel %vm4383_vm9, %v16129_v10, %v10734_v20  ;;  %v16159_v9 = vunpack.i.l.bf16 %v13337_v55 }
 0x526   : > { %9810 = vmatmul.msk.f32.vlgmr.msrb.gmra.mxu2 %vm2090_vm5, %v13446_v39 }
 0x527   : > { %4498 = vmatpush.msrb.mxu2 %v4398_v44  ;;  %v10750_v44 = vunpack.i.h.bf16 %v10748_v63  ;;  %v4390_v25 = vsel %vm4383_vm9, %v16159_v9, %v10740_v61  ;;  %v9799_v63 = vld [vmem:[%s16110_s5 + $0x128] sm:$0xff]  ;;  %v10764_v9 = vunpack.i.l.bf16 %v13459_v13 }
 0x528   : > { %9814 = vmatmul.msk.f32.vlgmr.msrb.gmra.mxu3 %vm2090_vm5, %v13446_v39 }
 0x529   : > { %4527 = vmatpush.msrb.mxu3 %v4399_v31  ;;  %v13474_v32 = vpop.f32.mrf.mxu1  ;;  %4499 = vmatpush.msrb.mxu2 %v4394_v12  ;;  %v3175_v5 = vpop.f32.mrf.mxu2 }
 0x52a   : > { %16158 = vst [vmem:[#allocation14_spill] sm:$0xff] %v13474_v32  ;;  %v13480_v2 = vadd.f32 %v3175_v5, %v13314_v45  ;;  %v13485_v10 = vpop.f32.mrf.mxu0  ;;  %v10773_v12 = vpop.permute.xlu1 %10772  ;;  %v4391_v45 = vsel %vm4383_vm9, %v10740_v61, %v10744_v6  ;;  %v16161_v5 = vunpack.i.h.bf16 %v13418_v17 }
 0x52b   : > { %16160 = vst [vmem:[#allocation15_spill] sm:$0xff] %v13485_v10  ;;  %4528 = vmatpush.msrb.mxu3 %v4395_v19  ;;  %v3204_v31 = vpop.f32.mrf.mxu3  ;;  %4500 = vmatpush.msrb.mxu2 %v4390_v25  ;;  %v4387_v19 = vsel %vm4383_vm9, %v10749_v43, %v10750_v44  ;;  %v13501_v26 = vpop.permute.xlu2 %10787  ;;  %v10769_v25 = vunpack.i.l.bf16 %v13476_v58 }
 0x52c   : > { %v13491_v52 = vadd.f32 %v3204_v31, %v13329_v3  ;;  %9789 = vmatmul.msk.f32.gmra.mxu1 %vm2090_vm5, %v9781_v57  ;;  %v4386_v20 = vsel %vm4383_vm9, %v16161_v5, %v10749_v43  ;;  %9785 = vmatmul.msk.f32.gmra.mxu0 %vm2090_vm5, %v9781_v57  ;;  %v10759_v3 = vunpack.i.l.bf16 %v13436_v46  ;;  %v10760_v57 = vunpack.i.h.bf16 %v13436_v46  ;;  %v9800_v5 = vld [vmem:[%s16110_s5 + $0x130] sm:$0xff] }
 0x52d   : > { %4529 = vmatpush.msrb.mxu3 %v4391_v45  ;;  %4501 = vmatpush.msrb.mxu2 %v4386_v20  ;;  %v10765_v31 = vunpack.i.h.bf16 %v13459_v13  ;;  %v10774_v20 = vunpack.i.l.bf16 %v10773_v12 }
 0x52e   : > { %9811 = vmatmul.msk.f32.gmra.mxu2 %vm2090_vm5, %v9799_v63  ;;  %v4396_v13 = vsel %vm4383_vm9, %v10764_v9, %v10759_v3 }
 0x52f   : > { %4530 = vmatpush.msrb.mxu3 %v4387_v19  ;;  %v13519_v19 = vpop.permute.xlu0 %10777 }
 0x530   : > { %9815 = vmatmul.msk.f32.gmra.mxu3 %vm2090_vm5, %v9799_v63 }
 0x531   : > { %v13505_v61 = vpop.f32.mrf.mxu1  ;;  %v3178_v6 = vpop.f32.mrf.mxu2 }
 0x532   : > { %16162 = vst [vmem:[#allocation16_spill] sm:$0xff] %v13505_v61  ;;  %v13511_v43 = vadd.f32 %v3178_v6, %v13359_v18  ;;  %v13513_v44 = vpop.f32.mrf.mxu0  ;;  %v16164_v18 = vunpack.i.l.bf16 %v13395_v35  ;;  %v10770_v6 = vunpack.i.h.bf16 %v13476_v58  ;;  %v13533_v10 = vpop.permute.xlu1 %10782  ;;  %v4392_v35 = vsel %vm4383_vm9, %v10769_v25, %v10760_v57 }
 0x533   : > { %16163 = vst [vmem:[#allocation17_spill] sm:$0xff] %v13513_v44  ;;  %v3207_v45 = vpop.f32.mrf.mxu3  ;;  %v10775_v44 = vunpack.i.h.bf16 %v10773_v12  ;;  %v4388_v58 = vsel %vm4383_vm9, %v10774_v20, %v10765_v31  ;;  %v13547_v9 = vpop.permute.xlu2 %10802  ;;  %v9801_v20 = vld [vmem:[%s16110_s5 + $0x138] sm:$0xff] }
 0x534   : > { %v13522_v61 = vadd.f32 %v3207_v45, %v13373_v62  ;;  %9806 = vmatmul.msk.f32.vlgmr.msrb.gmra.mxu1 %vm2090_vm5, %v13446_v39  ;;  %v4397_v46 = vsel %vm4383_vm9, %v10759_v3, %v16164_v18  ;;  %9802 = vmatmul.msk.f32.vlgmr.msrb.gmra.mxu0 %vm2090_vm5, %v13446_v39  ;;  %v16165_v62 = vunpack.i.h.bf16 %v13354_v37  ;;  %v16166_v39 = vunpack.i.l.bf16 %v13337_v55 }
 0x535   : > { %4469 = vmatpush.msrb.mxu1 %v4397_v46  ;;  %4440 = vmatpush.msrb.mxu0 %v4396_v13  ;;  %v16168_v18 = vunpack.i.h.bf16 %v13418_v17  ;;  %v4384_v55 = vsel %vm4383_vm9, %v10775_v44, %v10770_v6 }
 0x536   : > { %v4393_v45 = vsel %vm4383_vm9, %v10760_v57, %v16165_v62  ;;  %9812 = vmatmul.msk.f32.gmra.mxu2 %vm2090_vm5, %v9800_v5  ;;  %v4389_v3 = vsel %vm4383_vm9, %v10765_v31, %v16166_v39  ;;  %v10805_v62 = vunpack.i.h.bf16 %v13547_v9 }
 0x537   : > { %4470 = vmatpush.msrb.mxu1 %v4393_v45  ;;  %4441 = vmatpush.msrb.mxu0 %v4392_v35  ;;  %v4385_v57 = vsel %vm4383_vm9, %v10770_v6, %v16168_v18  ;;  %v16130_v45 = vunpack.i.l.bf16 %v13547_v9  ;;  %v10784_v18 = vunpack.i.l.bf16 %v13533_v10 }
 0x538   : > { %9816 = vmatmul.msk.f32.gmra.mxu3 %vm2090_vm5, %v9800_v5 }
 0x539   : > { %4471 = vmatpush.msrb.mxu1 %v4389_v3  ;;  %v13545_v12 = vpop.f32.mrf.mxu1  ;;  %v3181_v37 = vpop.f32.mrf.mxu2  ;;  %4442 = vmatpush.msrb.mxu0 %v4388_v58  ;;  %v13583_v3 = vld [vmem:[%s16110_s5 + $0x140] sm:$0xff] }
 0x53a   : > { %16167 = vst [vmem:[#allocation18_spill] sm:$0xff] %v13545_v12  ;;  %v13553_v25 = vadd.f32 %v3181_v37, %v13410_v56  ;;  %v13555_v46 = vpop.f32.mrf.mxu0  ;;  %v13566_v56 = vpop.permute.xlu0 %10792 }
 0x53b   : > { %16169 = vst [vmem:[#allocation19_spill] sm:$0xff] %v13555_v46  ;;  %4472 = vmatpush.msrb.mxu1 %v4385_v57  ;;  %v3210_v31 = vpop.f32.mrf.mxu3  ;;  %4443 = vmatpush.msrb.mxu0 %v4384_v55  ;;  %v10798_v17 = vpop.permute.xlu1 %10797  ;;  %v16174_v46 = vunpack.i.l.bf16 %v13501_v26 }
 0x53c   : > { %v13562_v13 = vadd.f32 %v3210_v31, %v13421_v0  ;;  %9807 = vmatmul.msk.f32.gmra.mxu1 %vm2090_vm5, %v9799_v63  ;;  %9803 = vmatmul.msk.f32.gmra.mxu0 %vm2090_vm5, %v9799_v63  ;;  %v10779_v63 = vunpack.i.l.bf16 %v13519_v19  ;;  %v13586_v37 = vpop.permute.xlu2 %10807  ;;  %v10785_v31 = vunpack.i.h.bf16 %v13533_v10  ;;  %v10799_v58 = vunpack.i.l.bf16 %v10798_v17 }
 0x53d   : > { %v16172_v10 = vunpack.i.h.bf16 %v13519_v19 }
 0x53e   : > { %9813 = vmatmul.msk.f32.gmra.mxu2 %vm2090_vm5, %v9801_v20 }
 0x53f   : > { %v4616_v55 = vsel %vm4605_vm10, %v16172_v10, %v10784_v18 }
 0x540   : > { %9817 = vmatmul.msk.f32.gmra.mxu3 %vm2090_vm5, %v9801_v20 }
 0x541   : > { %v13570_v44 = vpop.f32.mrf.mxu1  ;;  %v3184_v6 = vpop.f32.mrf.mxu2 }
 0x542   : > { %16170 = vst [vmem:[#allocation20_spill] sm:$0xff] %v13570_v44  ;;  %v13575_v0 = vadd.f32 %v3184_v6, %v13439_v40  ;;  %v13577_v35 = vpop.f32.mrf.mxu0  ;;  %v10790_v40 = vunpack.i.h.bf16 %v13501_v26  ;;  %v4620_v6 = vsel %vm4605_vm10, %v16130_v45, %v10805_v62  ;;  %v10800_v45 = vunpack.i.h.bf16 %v10798_v17 }
 0x543   : > { %16171 = vst [vmem:[#allocation21_spill] sm:$0xff] %v13577_v35  ;;  %v3213_v39 = vpop.f32.mrf.mxu3  ;;  %v10813_v35 = vpop.permute.xlu0 %10812 }
 0x544   : > { %v13590_v57 = vadd.f32 %v3213_v39, %v13450_v16  ;;  %9808 = vmatmul.msk.f32.gmra.mxu1 %vm2090_vm5, %v9800_v5  ;;  %9804 = vmatmul.msk.f32.gmra.mxu0 %vm2090_vm5, %v9800_v5  ;;  %v4621_v16 = vsel %vm4605_vm10, %v10805_v62, %v10779_v63  ;;  %v10794_v5 = vunpack.i.l.bf16 %v13566_v56  ;;  %v10818_v62 = vpop.permute.xlu1 %10817  ;;  %v4617_v63 = vsel %vm4605_vm10, %v10784_v18, %v10785_v31 }
 0x545   : > { %v4612_v12 = vsel %vm4605_vm10, %v16174_v46, %v10790_v40  ;;  %v16176_v18 = vunpack.i.h.bf16 %v13566_v56  ;;  %v4609_v31 = vsel %vm4605_vm10, %v10799_v58, %v10800_v45 }
 0x546   : > { %9830 = vmatmul.msk.f32.vlgmr.msra.gmra.mxu2 %vm2090_vm5, %v13583_v3 }
 0x547   : > { %4720 = vmatpush.msra.mxu2 %v4620_v6  ;;  %v4608_v46 = vsel %vm4605_vm10, %v16176_v18, %v10799_v58  ;;  %v10815_v18 = vunpack.i.h.bf16 %v10813_v35 }
 0x548   : > { %9834 = vmatmul.msk.f32.vlgmr.msra.gmra.mxu3 %vm2090_vm5, %v13583_v3 }
 0x549   : > { %4749 = vmatpush.msra.mxu3 %v4621_v16  ;;  %v13610_v44 = vpop.f32.mrf.mxu1  ;;  %4721 = vmatpush.msra.mxu2 %v4616_v55  ;;  %v3396_v6 = vpop.f32.mrf.mxu2  ;;  %v9819_v55 = vld [vmem:[%s16110_s5 + $0x148] sm:$0xff]  ;;  %v10814_v16 = vunpack.i.l.bf16 %v10813_v35 }
 0x54a   : > { %16173 = vst [vmem:[#allocation22_spill] sm:$0xff] %v13610_v44  ;;  %v13614_v39 = vadd.f32 %v3396_v6, %v13480_v2  ;;  %v13619_v32 = vpop.f32.mrf.mxu0  ;;  %v4613_v2 = vsel %vm4605_vm10, %v10790_v40, %v10794_v5  ;;  %v10810_v6 = vunpack.i.h.bf16 %v13586_v37 }
 0x54b   : > { %16175 = vst [vmem:[#allocation23_spill] sm:$0xff] %v13619_v32  ;;  %4750 = vmatpush.msra.mxu3 %v4617_v63  ;;  %v3425_v10 = vpop.f32.mrf.mxu3  ;;  %4722 = vmatpush.msra.mxu2 %v4612_v12  ;;  %v10823_v12 = vpop.permute.xlu2 %10822  ;;  %v10819_v63 = vunpack.i.l.bf16 %v10818_v62 }
 0x54c   : > { %v13625_v17 = vadd.f32 %v3425_v10, %v13491_v52  ;;  %9809 = vmatmul.msk.f32.gmra.mxu1 %vm2090_vm5, %v9801_v20  ;;  %9805 = vmatmul.msk.f32.gmra.mxu0 %vm2090_vm5, %v9801_v20  ;;  %v10809_v52 = vunpack.i.l.bf16 %v13586_v37  ;;  %v13640_v20 = vpop.permute.xlu0 %10837  ;;  %v16179_v37 = vunpack.i.l.bf16 %v13547_v9  ;;  %v10824_v35 = vunpack.i.l.bf16 %v10823_v12 }
 0x54d   : > { %4751 = vmatpush.msra.mxu3 %v4613_v2  ;;  %4723 = vmatpush.msra.mxu2 %v4608_v46  ;;  %v9820_v2 = vld [vmem:[%s16110_s5 + $0x150] sm:$0xff]  ;;  %v13650_v46 = vpop.permute.xlu1 %10827  ;;  %v10825_v9 = vunpack.i.h.bf16 %v10823_v12  ;;  %v16188_v32 = vunpack.i.l.bf16 %v13640_v20 }
 0x54e   : > { %9831 = vmatmul.msk.f32.gmra.mxu2 %vm2090_vm5, %v9819_v55 }
 0x54f   : > { %4752 = vmatpush.msra.mxu3 %v4609_v31 }
 0x550   : > { %9835 = vmatmul.msk.f32.gmra.mxu3 %vm2090_vm5, %v9819_v55 }
 0x551   : > { %v13637_v40 = vpop.f32.mrf.mxu1  ;;  %v3399_v5 = vpop.f32.mrf.mxu2 }
 0x552   : > { %16177 = vst [vmem:[#allocation24_spill] sm:$0xff] %v13637_v40  ;;  %v13643_v10 = vadd.f32 %v3399_v5, %v13511_v43  ;;  %v13645_v45 = vpop.f32.mrf.mxu0  ;;  %v4619_v43 = vsel %vm4605_vm10, %v10809_v52, %v16179_v37  ;;  %v4618_v5 = vsel %vm4605_vm10, %v10814_v16, %v10809_v52  ;;  %v16180_v40 = vunpack.i.h.bf16 %v13519_v19 }
 0x553   : > { %16178 = vst [vmem:[#allocation25_spill] sm:$0xff] %v13645_v45  ;;  %v3428_v58 = vpop.f32.mrf.mxu3  ;;  %v10820_v45 = vunpack.i.h.bf16 %v10818_v62  ;;  %v10833_v37 = vpop.permute.xlu2 %10832  ;;  %v4610_v62 = vsel %vm4605_vm10, %v10824_v35, %v10815_v18 }
 0x554   : > { %v13653_v31 = vadd.f32 %v3428_v58, %v13522_v61  ;;  %9826 = vmatmul.msk.f32.vlgmr.msra.gmra.mxu1 %vm2090_vm5, %v13583_v3  ;;  %9822 = vmatmul.msk.f32.vlgmr.msra.gmra.mxu0 %vm2090_vm5, %v13583_v3  ;;  %v4615_v61 = vsel %vm4605_vm10, %v10810_v6, %v16180_v40  ;;  %v4614_v58 = vsel %vm4605_vm10, %v10819_v63, %v10810_v6  ;;  %v16181_v3 = vunpack.i.l.bf16 %v13501_v26 }
 0x555   : > { %4691 = vmatpush.msra.mxu1 %v4619_v43  ;;  %4662 = vmatpush.msra.mxu0 %v4618_v5  ;;  %v16183_v40 = vunpack.i.h.bf16 %v13566_v56  ;;  %v4606_v26 = vsel %vm4605_vm10, %v10825_v9, %v10820_v45  ;;  %v13687_v5 = vpop.permute.xlu0 %10852 }
 0x556   : > { %9832 = vmatmul.msk.f32.gmra.mxu2 %vm2090_vm5, %v9820_v2  ;;  %v4611_v52 = vsel %vm4605_vm10, %v10815_v18, %v16181_v3  ;;  %v9821_v18 = vld [vmem:[%s16110_s5 + $0x158] sm:$0xff]  ;;  %v16131_v9 = vunpack.i.l.bf16 %v13687_v5 }
 0x557   : > { %4692 = vmatpush.msra.mxu1 %v4615_v61  ;;  %4663 = vmatpush.msra.mxu0 %v4614_v58  ;;  %v4607_v6 = vsel %vm4605_vm10, %v10820_v45, %v16183_v40  ;;  %v10855_v58 = vunpack.i.h.bf16 %v13687_v5  ;;  %v10835_v40 = vunpack.i.h.bf16 %v10833_v37 }
 0x558   : > { %9836 = vmatmul.msk.f32.gmra.mxu3 %vm2090_vm5, %v9820_v2 }
 0x559   : > { %4693 = vmatpush.msra.mxu1 %v4611_v52  ;;  %v13673_v19 = vpop.f32.mrf.mxu1  ;;  %v3402_v16 = vpop.f32.mrf.mxu2  ;;  %4664 = vmatpush.msra.mxu0 %v4610_v62  ;;  %v13710_v52 = vld [vmem:[%s16110_s5 + $0x160] sm:$0xff]  ;;  %v16132_v62 = vunpack.i.h.bf16 %v13650_v46 }
 0x55a   : > { %16182 = vst [vmem:[#allocation26_spill] sm:$0xff] %v13673_v19  ;;  %v13679_v12 = vadd.f32 %v3402_v16, %v13553_v25  ;;  %v13681_v63 = vpop.f32.mrf.mxu0  ;;  %v13694_v25 = vpop.permute.xlu1 %10842 }
 0x55b   : > { %16184 = vst [vmem:[#allocation27_spill] sm:$0xff] %v13681_v63  ;;  %4694 = vmatpush.msra.mxu1 %v4607_v6  ;;  %v3431_v43 = vpop.f32.mrf.mxu3  ;;  %4665 = vmatpush.msra.mxu0 %v4606_v26  ;;  %v10848_v61 = vpop.permute.xlu2 %10847  ;;  %v10840_v6 = vunpack.i.h.bf16 %v13640_v20 }
 0x55c   : > { %v13690_v56 = vadd.f32 %v3431_v43, %v13562_v13  ;;  %9827 = vmatmul.msk.f32.gmra.mxu1 %vm2090_vm5, %v9819_v55  ;;  %9823 = vmatmul.msk.f32.gmra.mxu0 %vm2090_vm5, %v9819_v55  ;;  %v10829_v43 = vunpack.i.l.bf16 %v13650_v46  ;;  %v10849_v63 = vunpack.i.l.bf16 %v10848_v61 }
 0x55e   : > { %9833 = vmatmul.msk.f32.gmra.mxu2 %vm2090_vm5, %v9821_v18  ;;  %v4843_v26 = vsel %vm4827_vm11, %v10855_v58, %v10829_v43 }
 0x560   : > { %9837 = vmatmul.msk.f32.gmra.mxu3 %vm2090_vm5, %v9821_v18 }
 0x561   : > { %v13698_v45 = vpop.f32.mrf.mxu1  ;;  %v3405_v35 = vpop.f32.mrf.mxu2 }
 0x562   : > { %16185 = vst [vmem:[#allocation28_spill] sm:$0xff] %v13698_v45  ;;  %v13703_v13 = vadd.f32 %v3405_v35, %v13575_v0  ;;  %v13705_v3 = vpop.f32.mrf.mxu0  ;;  %v10834_v0 = vunpack.i.l.bf16 %v10833_v37  ;;  %v13721_v35 = vpop.permute.xlu0 %10857  ;;  %v10844_v37 = vunpack.i.l.bf16 %v13694_v25 }
 0x563   : > { %16186 = vst [vmem:[#allocation29_spill] sm:$0xff] %v13705_v3  ;;  %v3434_v55 = vpop.f32.mrf.mxu3 }
 0x564   : > { %v13714_v16 = vadd.f32 %v3434_v55, %v13590_v57  ;;  %9828 = vmatmul.msk.f32.gmra.mxu1 %vm2090_vm5, %v9820_v2  ;;  %9824 = vmatmul.msk.f32.gmra.mxu0 %vm2090_vm5, %v9820_v2  ;;  %v4842_v57 = vsel %vm4827_vm11, %v16131_v9, %v10855_v58  ;;  %v13730_v55 = vpop.permute.xlu1 %10862  ;;  %v4838_v3 = vsel %vm4827_vm11, %v16132_v62, %v10834_v0  ;;  %v10850_v2 = vunpack.i.h.bf16 %v10848_v61 }
 0x565   : > { %v4834_v58 = vsel %vm4827_vm11, %v16188_v32, %v10840_v6  ;;  %v16190_v61 = vunpack.i.h.bf16 %v13694_v25 }
 0x566   : > { %9850 = vmatmul.msk.f32.vlgmr.msrb.gmra.mxu2 %vm2090_vm5, %v13710_v52 }
 0x567   : > { %4942 = vmatpush.msrb.mxu2 %v4842_v57  ;;  %v4839_v57 = vsel %vm4827_vm11, %v10834_v0, %v10835_v40  ;;  %v10868_v40 = vpop.permute.xlu2 %10867  ;;  %v4830_v32 = vsel %vm4827_vm11, %v16190_v61, %v10849_v63  ;;  %v16193_v61 = vunpack.i.l.bf16 %v13687_v5 }
 0x568   : > { %9854 = vmatmul.msk.f32.vlgmr.msrb.gmra.mxu3 %vm2090_vm5, %v13710_v52  ;;  %v10870_v5 = vunpack.i.h.bf16 %v10868_v40 }
 0x569   : > { %4971 = vmatpush.msrb.mxu3 %v4843_v26  ;;  %v13738_v45 = vpop.f32.mrf.mxu1  ;;  %4943 = vmatpush.msrb.mxu2 %v4838_v3  ;;  %v3618_v9 = vpop.f32.mrf.mxu2  ;;  %v9839_v3 = vld [vmem:[%s16110_s5 + $0x168] sm:$0xff]  ;;  %v10859_v26 = vunpack.i.l.bf16 %v13721_v35 }
 0x56a   : > { %16187 = vst [vmem:[#allocation30_spill] sm:$0xff] %v13738_v45  ;;  %v13742_v19 = vadd.f32 %v3618_v9, %v13614_v39  ;;  %v13747_v43 = vpop.f32.mrf.mxu0  ;;  %v4835_v39 = vsel %vm4827_vm11, %v10840_v6, %v10844_v37  ;;  %v4831_v9 = vsel %vm4827_vm11, %v10849_v63, %v10850_v2  ;;  %v10869_v2 = vunpack.i.l.bf16 %v10868_v40 }
 0x56b   : > { %16189 = vst [vmem:[#allocation31_spill] sm:$0xff] %v13747_v43  ;;  %4972 = vmatpush.msrb.mxu3 %v4839_v57  ;;  %v3647_v62 = vpop.f32.mrf.mxu3  ;;  %4944 = vmatpush.msrb.mxu2 %v4834_v58  ;;  %v10860_v57 = vunpack.i.h.bf16 %v13721_v35 }
 0x56c   : > { %v13753_v0 = vadd.f32 %v3647_v62, %v13625_v17  ;;  %9829 = vmatmul.msk.f32.gmra.mxu1 %vm2090_vm5, %v9821_v18  ;;  %9825 = vmatmul.msk.f32.gmra.mxu0 %vm2090_vm5, %v9821_v18  ;;  %v10864_v17 = vunpack.i.l.bf16 %v13730_v55  ;;  %v10873_v62 = vpop.permute.xlu0 %10872  ;;  %v13769_v18 = vpop.permute.xlu1 %10887 }
 0x56d   : > { %4973 = vmatpush.msrb.mxu3 %v4835_v39  ;;  %4945 = vmatpush.msrb.mxu2 %v4830_v32  ;;  %v4841_v32 = vsel %vm4827_vm11, %v10859_v26, %v16193_v61  ;;  %v10874_v35 = vunpack.i.l.bf16 %v10873_v62  ;;  %v10875_v61 = vunpack.i.h.bf16 %v10873_v62 }
 0x56e   : > { %9851 = vmatmul.msk.f32.gmra.mxu2 %vm2090_vm5, %v9839_v3 }
 0x56f   : > { %4974 = vmatpush.msrb.mxu3 %v4831_v9  ;;  %v9840_v9 = vld [vmem:[%s16110_s5 + $0x170] sm:$0xff] }
 0x570   : > { %9855 = vmatmul.msk.f32.gmra.mxu3 %vm2090_vm5, %v9839_v3 }
 0x571   : > { %v13766_v6 = vpop.f32.mrf.mxu1  ;;  %v3621_v37 = vpop.f32.mrf.mxu2 }
 0x572   : > { %16191 = vst [vmem:[#allocation32_spill] sm:$0xff] %v13766_v6  ;;  %v13772_v58 = vadd.f32 %v3621_v37, %v13643_v10  ;;  %v13774_v63 = vpop.f32.mrf.mxu0  ;;  %v10865_v6 = vunpack.i.h.bf16 %v13730_v55  ;;  %v4840_v10 = vsel %vm4827_vm11, %v10864_v17, %v10859_v26  ;;  %v13791_v37 = vpop.permute.xlu2 %10877  ;;  %v16194_v55 = vunpack.i.h.bf16 %v13650_v46 }
 0x573   : > { %16192 = vst [vmem:[#allocation33_spill] sm:$0xff] %v13774_v63  ;;  %v3650_v39 = vpop.f32.mrf.mxu3 }
 0x574   : > { %v13784_v43 = vadd.f32 %v3650_v39, %v13653_v31  ;;  %9846 = vmatmul.msk.f32.vlgmr.msrb.gmra.mxu1 %vm2090_vm5, %v13710_v52  ;;  %9842 = vmatmul.msk.f32.vlgmr.msrb.gmra.mxu0 %vm2090_vm5, %v13710_v52  ;;  %v4837_v63 = vsel %vm4827_vm11, %v10860_v57, %v16194_v55  ;;  %v4836_v31 = vsel %vm4827_vm11, %v10869_v2, %v10860_v57  ;;  %v16195_v52 = vunpack.i.l.bf16 %v13640_v20  ;;  %v10883_v62 = vpop.permute.xlu0 %10882 }
 0x575   : > { %4913 = vmatpush.msrb.mxu1 %v4841_v32  ;;  %4884 = vmatpush.msrb.mxu0 %v4840_v10  ;;  %v4832_v40 = vsel %vm4827_vm11, %v10874_v35, %v10865_v6  ;;  %v16197_v39 = vunpack.i.h.bf16 %v13694_v25  ;;  %v4828_v20 = vsel %vm4827_vm11, %v10875_v61, %v10870_v5  ;;  %v13817_v35 = vpop.permute.xlu1 %10902 }
 0x576   : > { %9852 = vmatmul.msk.f32.gmra.mxu2 %vm2090_vm5, %v9840_v9  ;;  %v4833_v26 = vsel %vm4827_vm11, %v10865_v6, %v16195_v52  ;;  %v9841_v6 = vld [vmem:[%s16110_s5 + $0x178] sm:$0xff]  ;;  %v10905_v61 = vunpack.i.h.bf16 %v13817_v35  ;;  %v16133_v55 = vunpack.i.l.bf16 %v13817_v35 }
 0x577   : > { %4914 = vmatpush.msrb.mxu1 %v4837_v63  ;;  %4885 = vmatpush.msrb.mxu0 %v4836_v31  ;;  %v4829_v57 = vsel %vm4827_vm11, %v10870_v5, %v16197_v39  ;;  %v10879_v39 = vunpack.i.l.bf16 %v13791_v37  ;;  %vm5783_vm11 = vcmask 1041409  }
 0x578   : > { %9856 = vmatmul.msk.f32.gmra.mxu3 %vm2090_vm5, %v9840_v9 }
 0x579   : > { %4915 = vmatpush.msrb.mxu1 %v4833_v26  ;;  %v13803_v17 = vpop.f32.mrf.mxu1  ;;  %v3624_v46 = vpop.f32.mrf.mxu2  ;;  %4886 = vmatpush.msrb.mxu0 %v4832_v40  ;;  %v10884_v26 = vunpack.i.l.bf16 %v10883_v62 }
 0x57a   : > { %16196 = vst [vmem:[#allocation34_spill] sm:$0xff] %v13803_v17  ;;  %v13809_v63 = vadd.f32 %v3624_v46, %v13679_v12  ;;  %v13811_v2 = vpop.f32.mrf.mxu0  ;;  %v13825_v12 = vpop.permute.xlu2 %10892 }
 0x57b   : > { %16198 = vst [vmem:[#allocation35_spill] sm:$0xff] %v13811_v2  ;;  %4916 = vmatpush.msrb.mxu1 %v4829_v57  ;;  %v3653_v32 = vpop.f32.mrf.mxu3  ;;  %4887 = vmatpush.msrb.mxu0 %v4828_v20  ;;  %v10890_v57 = vunpack.i.h.bf16 %v13769_v18 }
 0x57c   : > { %v13820_v25 = vadd.f32 %v3653_v32, %v13690_v56  ;;  %9847 = vmatmul.msk.f32.gmra.mxu1 %vm2090_vm5, %v9839_v3  ;;  %9843 = vmatmul.msk.f32.gmra.mxu0 %vm2090_vm5, %v9839_v3  ;;  %v13840_v3 = vld [vmem:[%s16110_s5 + $0x180] sm:$0xff]  ;;  %v10898_v40 = vpop.permute.xlu0 %10897  ;;  %v10885_v32 = vunpack.i.h.bf16 %v10883_v62  ;;  %v16201_v62 = vunpack.i.h.bf16 %v13791_v37 }
 0x57d   : > { %v10900_v2 = vunpack.i.h.bf16 %v10898_v40 }
 0x57e   : > { %9853 = vmatmul.msk.f32.gmra.mxu2 %vm2090_vm5, %v9841_v6  ;;  %v5060_v20 = vsel %vm5049_vm13, %v16201_v62, %v10884_v26  ;;  %v5061_v17 = vsel %vm5049_vm13, %v10884_v26, %v10885_v32 }
 0x580   : > { %9857 = vmatmul.msk.f32.gmra.mxu3 %vm2090_vm5, %v9841_v6 }
 0x581   : > { %v13828_v10 = vpop.f32.mrf.mxu1  ;;  %v3627_v5 = vpop.f32.mrf.mxu2 }
 0x582   : > { %16199 = vst [vmem:[#allocation36_spill] sm:$0xff] %v13828_v10  ;;  %v13833_v56 = vadd.f32 %v3627_v5, %v13703_v13  ;;  %v13835_v31 = vpop.f32.mrf.mxu0  ;;  %v13851_v5 = vpop.permute.xlu1 %10907  ;;  %v5065_v13 = vsel %vm5049_vm13, %v10905_v61, %v10879_v39 }
 0x583   : > { %16200 = vst [vmem:[#allocation37_spill] sm:$0xff] %v13835_v31  ;;  %v3656_v52 = vpop.f32.mrf.mxu3  ;;  %v16134_v31 = vunpack.i.h.bf16 %v13825_v12 }
 0x584   : > { %v13843_v46 = vadd.f32 %v3656_v52, %v13714_v16  ;;  %9848 = vmatmul.msk.f32.gmra.mxu1 %vm2090_vm5, %v9840_v9  ;;  %9844 = vmatmul.msk.f32.gmra.mxu0 %vm2090_vm5, %v9840_v9  ;;  %v5064_v16 = vsel %vm5049_vm13, %v16133_v55, %v10905_v61  ;;  %v10894_v9 = vunpack.i.l.bf16 %v13825_v12  ;;  %v10899_v52 = vunpack.i.l.bf16 %v10898_v40 }
 0x585   : > { %v16202_v61 = vunpack.i.l.bf16 %v13769_v18 }
 0x586   : > { %9870 = vmatmul.msk.f32.vlgmr.msra.gmra.mxu2 %vm2090_vm5, %v13840_v3  ;;  %v5053_v26 = vsel %vm5049_vm13, %v10899_v52, %v10900_v2 }
 0x587   : > { %5164 = vmatpush.msra.mxu2 %v5064_v16  ;;  %v10913_v16 = vpop.permute.xlu2 %10912  ;;  %v5056_v39 = vsel %vm5049_vm13, %v16202_v61, %v10890_v57  ;;  %v10910_v61 = vunpack.i.h.bf16 %v13851_v5 }
 0x588   : > { %9874 = vmatmul.msk.f32.vlgmr.msra.gmra.mxu3 %vm2090_vm5, %v13840_v3  ;;  %v10915_v2 = vunpack.i.h.bf16 %v10913_v16 }
 0x589   : > { %5193 = vmatpush.msra.mxu3 %v5065_v13  ;;  %v13866_v10 = vpop.f32.mrf.mxu1  ;;  %5165 = vmatpush.msra.mxu2 %v5060_v20  ;;  %v3839_v55 = vpop.f32.mrf.mxu2  ;;  %v9859_v13 = vld [vmem:[%s16110_s5 + $0x188] sm:$0xff] }
 0x58a   : > { %v13870_v45 = vadd.f32 %v3839_v55, %v13742_v19  ;;  %v13875_v44 = vpop.f32.mrf.mxu0  ;;  %v5057_v19 = vsel %vm5049_vm13, %v10890_v57, %v10894_v9  ;;  %v5052_v55 = vsel %vm5049_vm13, %v16134_v31, %v10899_v52  ;;  %v10923_v20 = vpop.permute.xlu1 %10922  ;;  %v10914_v9 = vunpack.i.l.bf16 %v10913_v16 }
 0x58b   : > { %16203 = vst [vmem:[#allocation38_spill] sm:$0xff] %v13875_v44  ;;  %5194 = vmatpush.msra.mxu3 %v5061_v17  ;;  %v3868_v62 = vpop.f32.mrf.mxu3  ;;  %5166 = vmatpush.msra.mxu2 %v5056_v39  ;;  %v10918_v17 = vpop.permute.xlu0 %10917 }
 0x58c   : > { %v13881_v40 = vadd.f32 %v3868_v62, %v13753_v0  ;;  %9849 = vmatmul.msk.f32.gmra.mxu1 %vm2090_vm5, %v9841_v6  ;;  %9845 = vmatmul.msk.f32.gmra.mxu0 %vm2090_vm5, %v9841_v6  ;;  %v10909_v0 = vunpack.i.l.bf16 %v13851_v5  ;;  %v10919_v6 = vunpack.i.l.bf16 %v10918_v17 }
 0x58d   : > { %5195 = vmatpush.msra.mxu3 %v5057_v19  ;;  %5167 = vmatpush.msra.mxu2 %v5052_v55  ;;  %v9860_v19 = vld [vmem:[%s16110_s5 + $0x190] sm:$0xff] }
 0x58e   : > { %9871 = vmatmul.msk.f32.gmra.mxu2 %vm2090_vm5, %v9859_v13  ;;  %v5062_v16 = vsel %vm5049_vm13, %v10914_v9, %v10909_v0 }
 0x58f   : > { %5196 = vmatpush.msra.mxu3 %v5053_v26  ;;  %v13904_v55 = vpop.permute.xlu2 %10937  ;;  %v10924_v26 = vunpack.i.l.bf16 %v10923_v20 }
 0x590   : > { %9875 = vmatmul.msk.f32.gmra.mxu3 %vm2090_vm5, %v9859_v13 }
 0x591   : > { %v13893_v57 = vpop.f32.mrf.mxu1  ;;  %v3842_v32 = vpop.f32.mrf.mxu2 }
 0x592   : > { %16204 = vst [vmem:[#allocation39_spill] sm:$0xff] %v13893_v57  ;;  %v13897_v39 = vadd.f32 %v3842_v32, %v13772_v58  ;;  %v13899_v62 = vpop.f32.mrf.mxu0  ;;  %v16206_v58 = vunpack.i.l.bf16 %v13817_v35  ;;  %v10920_v32 = vunpack.i.h.bf16 %v10918_v17  ;;  %v16207_v57 = vunpack.i.h.bf16 %v13791_v37 }
 0x593   : > { %16205 = vst [vmem:[#allocation40_spill] sm:$0xff] %v13899_v62  ;;  %v3871_v52 = vpop.f32.mrf.mxu3  ;;  %v10925_v62 = vunpack.i.h.bf16 %v10923_v20  ;;  %v13922_v35 = vpop.permute.xlu0 %10927  ;;  %v5054_v17 = vsel %vm5049_vm13, %v10924_v26, %v10915_v2 }
 0x594   : > { %v13907_v31 = vadd.f32 %v3871_v52, %v13784_v43  ;;  %9866 = vmatmul.msk.f32.vlgmr.msra.gmra.mxu1 %vm2090_vm5, %v13840_v3  ;;  %v5063_v5 = vsel %vm5049_vm13, %v10909_v0, %v16206_v58  ;;  %9862 = vmatmul.msk.f32.vlgmr.msra.gmra.mxu0 %vm2090_vm5, %v13840_v3  ;;  %v5059_v43 = vsel %vm5049_vm13, %v10910_v61, %v16207_v57  ;;  %v16208_v3 = vunpack.i.l.bf16 %v13769_v18  ;;  %v10933_v58 = vpop.permute.xlu1 %10932 }
 0x595   : > { %5135 = vmatpush.msra.mxu1 %v5063_v5  ;;  %5106 = vmatpush.msra.mxu0 %v5062_v16  ;;  %v5058_v52 = vsel %vm5049_vm13, %v10919_v6, %v10910_v61  ;;  %v16210_v57 = vunpack.i.h.bf16 %v13825_v12  ;;  %v5050_v18 = vsel %vm5049_vm13, %v10925_v62, %v10920_v32 }
 0x596   : > { %9872 = vmatmul.msk.f32.gmra.mxu2 %vm2090_vm5, %v9860_v19  ;;  %v5055_v0 = vsel %vm5049_vm13, %v10915_v2, %v16208_v3  ;;  %v9861_v2 = vld [vmem:[%s16110_s5 + $0x198] sm:$0xff] }
 0x597   : > { %5136 = vmatpush.msra.mxu1 %v5059_v43  ;;  %5107 = vmatpush.msra.mxu0 %v5058_v52  ;;  %v5051_v9 = vsel %vm5049_vm13, %v10920_v32, %v16210_v57  ;;  %vm5790_vm13 = vcmask 1044484  }
 0x598   : > { %9876 = vmatmul.msk.f32.gmra.mxu3 %vm2090_vm5, %v9860_v19 }
 0x599   : > { %5137 = vmatpush.msra.mxu1 %v5055_v0  ;;  %v13929_v37 = vpop.f32.mrf.mxu1  ;;  %v3845_v20 = vpop.f32.mrf.mxu2  ;;  %5108 = vmatpush.msra.mxu0 %v5054_v17  ;;  %v13967_v0 = vld [vmem:[%s16110_s5 + $0x1a0] sm:$0xff] }
 0x59a   : > { %16209 = vst [vmem:[#allocation41_spill] sm:$0xff] %v13929_v37  ;;  %v13935_v61 = vadd.f32 %v3845_v20, %v13809_v63  ;;  %v13937_v6 = vpop.f32.mrf.mxu0  ;;  %v13948_v63 = vpop.permute.xlu2 %10952  ;;  %v10934_v20 = vunpack.i.l.bf16 %v10933_v58 }
 0x59b   : > { %16211 = vst [vmem:[#allocation42_spill] sm:$0xff] %v13937_v6  ;;  %5138 = vmatpush.msra.mxu1 %v5051_v9  ;;  %v3874_v5 = vpop.f32.mrf.mxu3  ;;  %5109 = vmatpush.msra.mxu0 %v5050_v18  ;;  %v10955_v16 = vunpack.i.h.bf16 %v13948_v63  ;;  %v16135_v32 = vunpack.i.l.bf16 %v13948_v63  ;;  %v13962_v52 = vpop.permute.xlu0 %10942  ;;  %v10940_v9 = vunpack.i.h.bf16 %v13904_v55 }
 0x59c   : > { %v13944_v26 = vadd.f32 %v3874_v5, %v13820_v25  ;;  %9867 = vmatmul.msk.f32.gmra.mxu1 %vm2090_vm5, %v9859_v13  ;;  %9863 = vmatmul.msk.f32.gmra.mxu0 %vm2090_vm5, %v9859_v13  ;;  %v10929_v13 = vunpack.i.l.bf16 %v13922_v35  ;;  %v10935_v5 = vunpack.i.h.bf16 %v10933_v58  ;;  %v10944_v17 = vunpack.i.l.bf16 %v13962_v52 }
 0x59d   : > { %v16214_v58 = vunpack.i.h.bf16 %v13922_v35 }
 0x59e   : > { %9873 = vmatmul.msk.f32.gmra.mxu2 %vm2090_vm5, %v9861_v2 }
 0x59f   : > { %v5282_v18 = vsel %vm5271_vm14, %v16214_v58, %v10934_v20 }
 0x5a0   : > { %9877 = vmatmul.msk.f32.gmra.mxu3 %vm2090_vm5, %v9861_v2 }
 0x5a1   : > { %v13952_v12 = vpop.f32.mrf.mxu1  ;;  %v3848_v62 = vpop.f32.mrf.mxu2 }
 0x5a2   : > { %16212 = vst [vmem:[#allocation43_spill] sm:$0xff] %v13952_v12  ;;  %v13957_v25 = vadd.f32 %v3848_v62, %v13833_v56  ;;  %v13959_v43 = vpop.f32.mrf.mxu0  ;;  %v10948_v56 = vpop.permute.xlu1 %10947  ;;  %v5286_v62 = vsel %vm5271_vm14, %v16135_v32, %v10955_v16 }
 0x5a3   : > { %16213 = vst [vmem:[#allocation44_spill] sm:$0xff] %v13959_v43  ;;  %v3877_v3 = vpop.f32.mrf.mxu3  ;;  %v10949_v43 = vunpack.i.l.bf16 %v10948_v56  ;;  %v10950_v32 = vunpack.i.h.bf16 %v10948_v56 }
 0x5a4   : > { %v13971_v57 = vadd.f32 %v3877_v3, %v13843_v46  ;;  %9868 = vmatmul.msk.f32.gmra.mxu1 %vm2090_vm5, %v9860_v19  ;;  %9864 = vmatmul.msk.f32.gmra.mxu0 %vm2090_vm5, %v9860_v19  ;;  %v5287_v46 = vsel %vm5271_vm14, %v10955_v16, %v10929_v13  ;;  %v10958_v3 = vpop.permute.xlu2 %10957  ;;  %v5283_v16 = vsel %vm5271_vm14, %v10934_v20, %v10935_v5  ;;  %v16215_v19 = vunpack.i.l.bf16 %v13904_v55 }
 0x5a5   : > { %v16216_v20 = vunpack.i.h.bf16 %v13962_v52  ;;  %v10960_v58 = vunpack.i.h.bf16 %v10958_v3 }
 0x5a6   : > { %9890 = vmatmul.msk.f32.vlgmr.msrb.gmra.mxu2 %vm2090_vm5, %v13967_v0  ;;  %v5278_v6 = vsel %vm5271_vm14, %v16215_v19, %v10940_v9 }
 0x5a7   : > { %5386 = vmatpush.msrb.mxu2 %v5286_v62  ;;  %v5274_v5 = vsel %vm5271_vm14, %v16216_v20, %v10949_v43 }
 0x5a8   : > { %9894 = vmatmul.msk.f32.vlgmr.msrb.gmra.mxu3 %vm2090_vm5, %v13967_v0 }
 0x5a9   : > { %5415 = vmatpush.msrb.mxu3 %v5287_v46  ;;  %v13990_v12 = vpop.f32.mrf.mxu1  ;;  %5387 = vmatpush.msrb.mxu2 %v5282_v18  ;;  %v4060_v62 = vpop.f32.mrf.mxu2  ;;  %v9879_v18 = vld [vmem:[%s16110_s5 + $0x1a8] sm:$0xff] }
 0x5aa   : > { %v13994_v13 = vadd.f32 %v4060_v62, %v13870_v45  ;;  %v13999_v37 = vpop.f32.mrf.mxu0  ;;  %v5279_v45 = vsel %vm5271_vm14, %v10940_v9, %v10944_v17  ;;  %v10963_v46 = vpop.permute.xlu0 %10962 }
 0x5ab   : > { %5416 = vmatpush.msrb.mxu3 %v5283_v16  ;;  %v4089_v44 = vpop.f32.mrf.mxu3  ;;  %5388 = vmatpush.msrb.mxu2 %v5278_v6  ;;  %v5275_v6 = vsel %vm5271_vm14, %v10949_v43, %v10950_v32  ;;  %v10968_v19 = vpop.permute.xlu1 %10967  ;;  %v9880_v43 = vld [vmem:[%s16110_s5 + $0x1b0] sm:$0xff]  ;;  %v10965_v20 = vunpack.i.h.bf16 %v10963_v46 }
 0x5ac   : > { %v14005_v56 = vadd.f32 %v4089_v44, %v13881_v40  ;;  %9869 = vmatmul.msk.f32.gmra.mxu1 %vm2090_vm5, %v9861_v2  ;;  %9865 = vmatmul.msk.f32.gmra.mxu0 %vm2090_vm5, %v9861_v2  ;;  %v10959_v44 = vunpack.i.l.bf16 %v10958_v3  ;;  %v10964_v40 = vunpack.i.l.bf16 %v10963_v46  ;;  %v10969_v62 = vunpack.i.l.bf16 %v10968_v19 }
 0x5ad   : > { %5417 = vmatpush.msrb.mxu3 %v5279_v45  ;;  %5389 = vmatpush.msrb.mxu2 %v5274_v5  ;;  %v10973_v45 = vpop.permute.xlu2 %10972  ;;  %v16218_v3 = vunpack.i.l.bf16 %v13948_v63  ;;  %v16219_v46 = vunpack.i.h.bf16 %v13922_v35 }
 0x5ae   : > { %9891 = vmatmul.msk.f32.gmra.mxu2 %vm2090_vm5, %v9879_v18  ;;  %v10975_v63 = vunpack.i.h.bf16 %v10973_v45 }
 0x5af   : > { %5418 = vmatpush.msrb.mxu3 %v5275_v6  ;;  %v5284_v6 = vsel %vm5271_vm14, %v10964_v40, %v10959_v44 }
 0x5b0   : > { %9895 = vmatmul.msk.f32.gmra.mxu3 %vm2090_vm5, %v9879_v18 }
 0x5b1   : > { %v14016_v17 = vpop.f32.mrf.mxu1  ;;  %v4063_v9 = vpop.f32.mrf.mxu2 }
 0x5b2   : > { %v14019_v2 = vadd.f32 %v4063_v9, %v13897_v39  ;;  %v14021_v16 = vpop.f32.mrf.mxu0  ;;  %v5285_v39 = vsel %vm5271_vm14, %v10959_v44, %v16218_v3  ;;  %v10974_v9 = vunpack.i.l.bf16 %v10973_v45  ;;  %v16221_v3 = vunpack.i.h.bf16 %v13962_v52 }
 0x5b3   : > { %v4092_v32 = vpop.f32.mrf.mxu3 }
 0x5b4   : > { %16217 = vst [vmem:[#allocation45_spill] sm:$0xff] %v14019_v2  ;;  %v14027_v5 = vadd.f32 %v4092_v32, %v13907_v31  ;;  %9886 = vmatmul.msk.f32.vlgmr.msrb.gmra.mxu1 %vm2090_vm5, %v13967_v0  ;;  %9882 = vmatmul.msk.f32.vlgmr.msrb.gmra.mxu0 %vm2090_vm5, %v13967_v0  ;;  %v10970_v2 = vunpack.i.h.bf16 %v10968_v19  ;;  %v5281_v31 = vsel %vm5271_vm14, %v10960_v58, %v16219_v46  ;;  %v16220_v0 = vunpack.i.l.bf16 %v13904_v55 }
 0x5b5   : > { %5357 = vmatpush.msrb.mxu1 %v5285_v39  ;;  %5328 = vmatpush.msrb.mxu0 %v5284_v6  ;;  %v5280_v32 = vsel %vm5271_vm14, %v10969_v62, %v10960_v58  ;;  %v5276_v40 = vsel %vm5271_vm14, %v10974_v9, %v10965_v20 }
 0x5b6   : > { %9892 = vmatmul.msk.f32.gmra.mxu2 %vm2090_vm5, %v9880_v43  ;;  %v5277_v44 = vsel %vm5271_vm14, %v10965_v20, %v16220_v0  ;;  %v5273_v58 = vsel %vm5271_vm14, %v10970_v2, %v16221_v3  ;;  %v5272_v55 = vsel %vm5271_vm14, %v10975_v63, %v10970_v2  ;;  %v9881_v20 = vld [vmem:[%s16110_s5 + $0x1b8] sm:$0xff] }
 0x5b7   : > { %5358 = vmatpush.msrb.mxu1 %v5281_v31  ;;  %5329 = vmatpush.msrb.mxu0 %v5280_v32 }
 0x5b8   : > { %9896 = vmatmul.msk.f32.gmra.mxu3 %vm2090_vm5, %v9880_v43 }
 0x5b9   : > { %5359 = vmatpush.msrb.mxu1 %v5277_v44  ;;  %v14047_v19 = vpop.f32.mrf.mxu1  ;;  %v4066_v35 = vpop.f32.mrf.mxu2  ;;  %5330 = vmatpush.msrb.mxu0 %v5276_v40 }
 0x5ba   : > { %v14053_v62 = vadd.f32 %v4066_v35, %v13935_v61  ;;  %v14055_v45 = vpop.f32.mrf.mxu0  ;;  %v9900_v35 = vld [vmem:[%s16110_s5 + $0x1d0] sm:$0xff] }
 0x5bb   : > { %5360 = vmatpush.msrb.mxu1 %v5273_v58  ;;  %v4095_v39 = vpop.f32.mrf.mxu3  ;;  %5331 = vmatpush.msrb.mxu0 %v5272_v55 }
 0x5bc   : > { %v14062_v6 = vadd.f32 %v4095_v39, %v13944_v26  ;;  %9887 = vmatmul.msk.f32.gmra.mxu1 %vm2090_vm5, %v9879_v18  ;;  %9883 = vmatmul.msk.f32.gmra.mxu0 %vm2090_vm5, %v9879_v18  ;;  %v9898_v26 = vld [vmem:[%s16110_s5 + $0x1c0] sm:$0xff] }
 0x5be   : > { %16222 = vst [vmem:[#allocation46_spill] sm:$0xff] %v14062_v6  ;;  %9893 = vmatmul.msk.f32.gmra.mxu2 %vm2090_vm5, %v9881_v20 }
 0x5c0   : > { %9897 = vmatmul.msk.f32.gmra.mxu3 %vm2090_vm5, %v9881_v20 }
 0x5c1   : > { %v14068_v61 = vpop.f32.mrf.mxu1  ;;  %v4069_v52 = vpop.f32.mrf.mxu2 }
 0x5c2   : > { %v14071_v2 = vadd.f32 %v4069_v52, %v13957_v25  ;;  %v14073_v9 = vpop.f32.mrf.mxu0 }
 0x5c3   : > { %v4098_v46 = vpop.f32.mrf.mxu3 }
 0x5c4   : > { %16223 = vst [vmem:[#allocation47_spill] sm:$0xff] %v14071_v2  ;;  %v14079_v31 = vadd.f32 %v4098_v46, %v13971_v57  ;;  %9888 = vmatmul.msk.f32.gmra.mxu1 %vm2090_vm5, %v9880_v43  ;;  %9884 = vmatmul.msk.f32.gmra.mxu0 %vm2090_vm5, %v9880_v43  ;;  %v9899_v57 = vld [vmem:[%s16110_s5 + $0x1c8] sm:$0xff]  ;;  %v9918_v2 = vld [vmem:[%s16110_s5 + $0x1e0] sm:$0xff] }
 0x5c6   : > { %16224 = vst [vmem:[#allocation48_spill] sm:$0xff] %v14079_v31  ;;  %9910 = vmatmul.msk.f32.vlgmr.msra.gmra.mxu2 %vm2090_vm5, %v9898_v26 }
 0x5c8   : > { %9914 = vmatmul.msk.f32.vlgmr.msra.gmra.mxu3 %vm2090_vm5, %v9898_v26 }
 0x5c9   : > { %v14085_v25 = vpop.f32.mrf.mxu1  ;;  %v14087_v18 = vpop.f32.mrf.mxu2 }
 0x5ca   : > { %v14089_v32 = vpop.f32.mrf.mxu0 }
 0x5cb   : > { %v14091_v63 = vpop.f32.mrf.mxu3 }
 0x5cc   : > { %9889 = vmatmul.msk.f32.gmra.mxu1 %vm2090_vm5, %v9881_v20  ;;  %9885 = vmatmul.msk.f32.gmra.mxu0 %vm2090_vm5, %v9881_v20  ;;  %v9901_v20 = vld [vmem:[%s16110_s5 + $0x1d8] sm:$0xff] }
 0x5ce   : > { %9911 = vmatmul.msk.f32.gmra.mxu2 %vm2090_vm5, %v9899_v57 }
 0x5d0   : > { %9915 = vmatmul.msk.f32.gmra.mxu3 %vm2090_vm5, %v9899_v57 }
 0x5d1   : > { %v14100_v43 = vpop.f32.mrf.mxu1  ;;  %v14102_v0 = vpop.f32.mrf.mxu2 }
 0x5d2   : > { %v14104_v44 = vpop.f32.mrf.mxu0 }
 0x5d3   : > { %v14106_v40 = vpop.f32.mrf.mxu3 }
 0x5d4   : > { %9906 = vmatmul.msk.f32.vlgmr.msra.gmra.mxu1 %vm2090_vm5, %v9898_v26  ;;  %9902 = vmatmul.msk.f32.vlgmr.msra.gmra.mxu0 %vm2090_vm5, %v9898_v26 }
 0x5d6   : > { %9912 = vmatmul.msk.f32.gmra.mxu2 %vm2090_vm5, %v9900_v35 }
 0x5d8   : > { %9916 = vmatmul.msk.f32.gmra.mxu3 %vm2090_vm5, %v9900_v35 }
 0x5d9   : > { %v14115_v3 = vpop.f32.mrf.mxu1  ;;  %v14117_v58 = vpop.f32.mrf.mxu2 }
 0x5da   : > { %v14119_v55 = vpop.f32.mrf.mxu0 }
 0x5db   : > { %16225 = vst [vmem:[#allocation49_spill] sm:$0xff] %v14119_v55  ;;  %v14121_v39 = vpop.f32.mrf.mxu3 }
 0x5dc   : > { %16226 = vst [vmem:[#allocation50_spill] sm:$0xff] %v14121_v39  ;;  %9907 = vmatmul.msk.f32.gmra.mxu1 %vm2090_vm5, %v9899_v57  ;;  %9903 = vmatmul.msk.f32.gmra.mxu0 %vm2090_vm5, %v9899_v57 }
 0x5de   : > { %9913 = vmatmul.msk.f32.gmra.mxu2 %vm2090_vm5, %v9901_v20 }
 0x5e0   : > { %9917 = vmatmul.msk.f32.gmra.mxu3 %vm2090_vm5, %v9901_v20 }
 0x5e1   : > { %v14130_v52 = vpop.f32.mrf.mxu1  ;;  %v14132_v46 = vpop.f32.mrf.mxu2 }
 0x5e2   : > { %16227 = vst [vmem:[#allocation51_spill] sm:$0xff] %v14130_v52  ;;  %v14134_v26 = vpop.f32.mrf.mxu0 }
 0x5e3   : > { %16228 = vst [vmem:[#allocation52_spill] sm:$0xff] %v14132_v46  ;;  %v14136_v31 = vpop.f32.mrf.mxu3 }
 0x5e4   : > { %16229 = vst [vmem:[#allocation53_spill] sm:$0xff] %v14134_v26  ;;  %9908 = vmatmul.msk.f32.gmra.mxu1 %vm2090_vm5, %v9900_v35  ;;  %9904 = vmatmul.msk.f32.gmra.mxu0 %vm2090_vm5, %v9900_v35 }
 0x5e5   : > { %16230 = vst [vmem:[#allocation54_spill] sm:$0xff] %v14136_v31  ;;  %v9919_v31 = vld [vmem:[%s16110_s5 + $0x1e8] sm:$0xff] }
 0x5e6   : > { %9930 = vmatmul.msk.f32.vlgmr.msrb.gmra.mxu2 %vm2090_vm5, %v9918_v2 }
 0x5e8   : > { %9934 = vmatmul.msk.f32.vlgmr.msrb.gmra.mxu3 %vm2090_vm5, %v9918_v2 }
 0x5e9   : > { %v14145_v57 = vpop.f32.mrf.mxu1  ;;  %v14147_v52 = vpop.f32.mrf.mxu2 }
 0x5ea   : > { %16231 = vst [vmem:[#allocation55_spill] sm:$0xff] %v14145_v57  ;;  %v14149_v46 = vpop.f32.mrf.mxu0 }
 0x5eb   : > { %16232 = vst [vmem:[#allocation56_spill] sm:$0xff] %v14147_v52  ;;  %v14151_v26 = vpop.f32.mrf.mxu3 }
 0x5ec   : > { %16233 = vst [vmem:[#allocation57_spill] sm:$0xff] %v14149_v46  ;;  %9909 = vmatmul.msk.f32.gmra.mxu1 %vm2090_vm5, %v9901_v20  ;;  %9905 = vmatmul.msk.f32.gmra.mxu0 %vm2090_vm5, %v9901_v20 }
 0x5ed   : > { %16234 = vst [vmem:[#allocation58_spill] sm:$0xff] %v14151_v26  ;;  %v9920_v26 = vld [vmem:[%s16110_s5 + $0x1f0] sm:$0xff] }
 0x5ee   : > { %9931 = vmatmul.msk.f32.gmra.mxu2 %vm2090_vm5, %v9919_v31 }
 0x5f0   : > { %9935 = vmatmul.msk.f32.gmra.mxu3 %vm2090_vm5, %v9919_v31 }
 0x5f1   : > { %v14160_v35 = vpop.f32.mrf.mxu1  ;;  %v14162_v57 = vpop.f32.mrf.mxu2 }
 0x5f2   : > { %16235 = vst [vmem:[#allocation59_spill] sm:$0xff] %v14160_v35  ;;  %v14164_v52 = vpop.f32.mrf.mxu0 }
 0x5f3   : > { %16236 = vst [vmem:[#allocation60_spill] sm:$0xff] %v14162_v57  ;;  %v14166_v46 = vpop.f32.mrf.mxu3 }
 0x5f4   : > { %16237 = vst [vmem:[#allocation61_spill] sm:$0xff] %v14164_v52  ;;  %9926 = vmatmul.msk.f32.vlgmr.msrb.gmra.mxu1 %vm2090_vm5, %v9918_v2  ;;  %9922 = vmatmul.msk.f32.vlgmr.msrb.gmra.mxu0 %vm2090_vm5, %v9918_v2 }
 0x5f5   : > { %16238 = vst [vmem:[#allocation62_spill] sm:$0xff] %v14166_v46  ;;  %v9921_v46 = vld [vmem:[%s16110_s5 + $0x1f8] sm:$0xff] }
 0x5f6   : > { %9932 = vmatmul.msk.f32.gmra.mxu2 %vm2090_vm5, %v9920_v26 }
 0x5f8   : > { %9936 = vmatmul.msk.f32.gmra.mxu3 %vm2090_vm5, %v9920_v26 }
 0x5f9   : > { %v14175_v20 = vpop.f32.mrf.mxu1  ;;  %v14177_v35 = vpop.f32.mrf.mxu2 }
 0x5fa   : > { %16239 = vst [vmem:[#allocation63_spill] sm:$0xff] %v14175_v20  ;;  %v14179_v57 = vpop.f32.mrf.mxu0 }
 0x5fb   : > { %16240 = vst [vmem:[#allocation64_spill] sm:$0xff] %v14177_v35  ;;  %v14181_v52 = vpop.f32.mrf.mxu3 }
 0x5fc   : > { %16241 = vst [vmem:[#allocation65_spill] sm:$0xff] %v14179_v57  ;;  %9927 = vmatmul.msk.f32.gmra.mxu1 %vm2090_vm5, %v9919_v31  ;;  %9923 = vmatmul.msk.f32.gmra.mxu0 %vm2090_vm5, %v9919_v31 }
 0x5fd   : > { %16242 = vst [vmem:[#allocation66_spill] sm:$0xff] %v14181_v52 }
 0x5fe   : > { %9933 = vmatmul.msk.f32.gmra.mxu2 %vm2090_vm5, %v9921_v46 }
 0x600   : > { %9937 = vmatmul.msk.f32.gmra.mxu3 %vm2090_vm5, %v9921_v46 }
 0x601   : > { %v14190_v2 = vpop.f32.mrf.mxu1  ;;  %v14192_v20 = vpop.f32.mrf.mxu2 }
 0x602   : > { %16243 = vst [vmem:[#allocation67_spill] sm:$0xff] %v14190_v2  ;;  %v14194_v35 = vpop.f32.mrf.mxu0 }
 0x603   : > { %16244 = vst [vmem:[#allocation68_spill] sm:$0xff] %v14192_v20  ;;  %v14196_v57 = vpop.f32.mrf.mxu3 }
 0x604   : > { %16245 = vst [vmem:[#allocation69_spill] sm:$0xff] %v14194_v35  ;;  %9928 = vmatmul.msk.f32.gmra.mxu1 %vm2090_vm5, %v9920_v26  ;;  %9924 = vmatmul.msk.f32.gmra.mxu0 %vm2090_vm5, %v9920_v26 }
 0x605   : > { %16246 = vst [vmem:[#allocation70_spill] sm:$0xff] %v14196_v57 }
 0x609   : > { %v14200_v52 = vpop.f32.mrf.mxu1  ;;  %v14202_v39 = vpop.f32.mrf.mxu2 }
 0x60a   : > { %16247 = vst [vmem:[#allocation71_spill] sm:$0xff] %v14200_v52  ;;  %v14204_v31 = vpop.f32.mrf.mxu0 }
 0x60b   : > { %16248 = vst [vmem:[#allocation72_spill] sm:$0xff] %v14202_v39  ;;  %v14206_v6 = vpop.f32.mrf.mxu3 }
 0x60c   : > { %16249 = vst [vmem:[#allocation73_spill] sm:$0xff] %v14204_v31  ;;  %9929 = vmatmul.msk.f32.gmra.mxu1 %vm2090_vm5, %v9921_v46  ;;  %9925 = vmatmul.msk.f32.gmra.mxu0 %vm2090_vm5, %v9921_v46 }
 0x60d   : > { %16250 = vst [vmem:[#allocation74_spill] sm:$0xff] %v14206_v6 }
 0x611   : > { %v14210_v20 = vpop.f32.mrf.mxu1  ;;  %v14212_v35 = vpop.f32.mrf.mxu2 }
 0x612   : > { %16251 = vst [vmem:[#allocation75_spill] sm:$0xff] %v14210_v20  ;;  %v14214_v57 = vpop.f32.mrf.mxu0 }
 0x613   : > { %16252 = vst [vmem:[#allocation76_spill] sm:$0xff] %v14212_v35  ;;  %v14216_v2 = vpop.f32.mrf.mxu3 }
 0x614   : > { %16253 = vst [vmem:[#allocation77_spill] sm:$0xff] %v14214_v57 }
 0x615   : > { %16254 = vst [vmem:[#allocation78_spill] sm:$0xff] %v14216_v2 }
 0x619   : > { %v14218_v26 = vpop.f32.mrf.mxu1  ;;  %v14220_v52 = vpop.f32.mrf.mxu2 }
 0x61a   : > { %16255 = vst [vmem:[#allocation79_spill] sm:$0xff] %v14218_v26  ;;  %v14222_v39 = vpop.f32.mrf.mxu0 }
 0x61b   : > { %16256 = vst [vmem:[#allocation80_spill] sm:$0xff] %v14220_v52  ;;  %v14224_v31 = vpop.f32.mrf.mxu3 }
 0x61c   : > { %16257 = vst [vmem:[#allocation81_spill] sm:$0xff] %v14222_v39 }
 0x61d   : > { %16258 = vst [vmem:[#allocation82_spill] sm:$0xff] %v14224_v31 }
 0x621   : > { %v14226_v6 = vpop.f32.mrf.mxu1  ;;  %v14228_v55 = vpop.f32.mrf.mxu2 }
 0x622   : > { %16259 = vst [vmem:[#allocation83_spill] sm:$0xff] %v14226_v6  ;;  %v14230_v46 = vpop.f32.mrf.mxu0 }
 0x623   : > { %16260 = vst [vmem:[#allocation84_spill] sm:$0xff] %v14228_v55  ;;  %v14232_v20 = vpop.f32.mrf.mxu3 }
 0x624   : > { %16261 = vst [vmem:[#allocation85_spill] sm:$0xff] %v14230_v46 }
 0x625   : > { %16262 = vst [vmem:[#allocation86_spill] sm:$0xff] %v14232_v20 }
 0x629   : > { %v14234_v35 = vpop.f32.mrf.mxu1  ;;  %v14236_v57 = vpop.f32.mrf.mxu2 }
 0x62a   : > { %16263 = vst [vmem:[#allocation87_spill] sm:$0xff] %v14234_v35  ;;  %v14238_v2 = vpop.f32.mrf.mxu0 }
 0x62b   : > { %16264 = vst [vmem:[#allocation88_spill] sm:$0xff] %v14236_v57  ;;  %v14240_v26 = vpop.f32.mrf.mxu3 }
 0x62c   : > { %16265 = vst [vmem:[#allocation89_spill] sm:$0xff] %v14238_v2 }
 0x62d   : > { %16266 = vst [vmem:[#allocation90_spill] sm:$0xff] %v14240_v26 }
 0x631   : > { %v14242_v52 = vpop.f32.mrf.mxu1  ;;  %v14244_v39 = vpop.f32.mrf.mxu2 }
 0x632   : > { %16267 = vst [vmem:[#allocation91_spill] sm:$0xff] %v14242_v52  ;;  %v14246_v31 = vpop.f32.mrf.mxu0 }
 0x633   : > { %16268 = vst [vmem:[#allocation92_spill] sm:$0xff] %v14244_v39  ;;  %v14248_v6 = vpop.f32.mrf.mxu3 }
 0x634   : > { %16269 = vst [vmem:[#allocation93_spill] sm:$0xff] %v14246_v31 }
 0x635   : > { %16270 = vst [vmem:[#allocation94_spill] sm:$0xff] %v14248_v6 }
 0x639   : > { %v14250_v55 = vpop.f32.mrf.mxu1  ;;  %v14252_v46 = vpop.f32.mrf.mxu2 }
 0x63a   : > { %16271 = vst [vmem:[#allocation95_spill] sm:$0xff] %v14250_v55  ;;  %v14254_v20 = vpop.f32.mrf.mxu0 }
 0x63b   : > { %16272 = vst [vmem:[#allocation96_spill] sm:$0xff] %v14252_v46  ;;  %v14256_v35 = vpop.f32.mrf.mxu3 }
 0x63c   : > { %16273 = vst [vmem:[#allocation97_spill] sm:$0xff] %v14254_v20 }
 0x63d   : > { %16274 = vst [vmem:[#allocation98_spill] sm:$0xff] %v14256_v35 }
 0x641   : > { %v14258_v57 = vpop.f32.mrf.mxu1  ;;  %v14260_v2 = vpop.f32.mrf.mxu2 }
 0x642   : > { %16275 = vst [vmem:[#allocation99_spill] sm:$0xff] %v14258_v57  ;;  %v14262_v26 = vpop.f32.mrf.mxu0 }
 0x643   : > { %16276 = vst [vmem:[#allocation100_spill] sm:$0xff] %v14260_v2  ;;  %v14264_v52 = vpop.f32.mrf.mxu3  ;;  %v2284_v2 = vadd.f32 %v12871_v29, %v12695_v47 }
 0x644   : > { %16277 = vst [vmem:[#allocation101_spill] sm:$0xff] %v14262_v26  ;;  %v2278_v26 = vadd.f32 %v12787_v23, %v12616_v4  ;;  %v2287_v4 = vadd.f32 %v12918_v30, %v12740_v49  ;;  %v16284_v49 = vld [vmem:[#allocation6_spill] sm:$0xff]  ;;  %v16286_v30 = vld [vmem:[#allocation8_spill] sm:$0xff] }
 0x645   : > { %16278 = vst [vmem:[#allocation102_spill] sm:$0xff] %v14264_v52  ;;  %v2281_v52 = vadd.f32 %v12833_v11, %v12661_v33  ;;  %v2561_v11 = vadd.f32 %v13063_v59, %v2284_v2 }
 0x646   : > { %v2553_v33 = vadd.f32 %v12970_v1, %v2278_v26  ;;  %v2565_v29 = vadd.f32 %v16284_v49, %v2287_v4  ;;  %v16287_v1 = vld [vmem:[#allocation9_spill] sm:$0xff]  ;;  %v16289_v4 = vld [vmem:[#allocation11_spill] sm:$0xff]  ;;  %v16296_v49 = vld [vmem:[#allocation18_spill] sm:$0xff] }
 0x647   : > { %v2557_v47 = vadd.f32 %v13022_v38, %v2281_v52 }
 0x649   : > { %v14266_v39 = vpop.f32.mrf.mxu1  ;;  %v14268_v31 = vpop.f32.mrf.mxu2 }
 0x64a   : > { %16279 = vst [vmem:[#allocation103_spill] sm:$0xff] %v14266_v39  ;;  %v14270_v6 = vpop.f32.mrf.mxu0  ;;  %v2249_v39 = vadd.f32 %v12801_v21, %v12628_v22  ;;  %v2258_v22 = vadd.f32 %v12940_v54, %v12762_v48  ;;  %v2775_v54 = vadd.f32 %v16286_v30, %v2553_v33  ;;  %v16290_v33 = vld [vmem:[#allocation12_spill] sm:$0xff] }
 0x64b   : > { %16280 = vst [vmem:[#allocation104_spill] sm:$0xff] %v14270_v6  ;;  %v14272_v55 = vpop.f32.mrf.mxu3  ;;  %v2252_v6 = vadd.f32 %v12850_v34, %v12673_v53 }
 0x64c   : > { %v2552_v53 = vadd.f32 %v12984_v36, %v2249_v39  ;;  %v2779_v36 = vadd.f32 %v13226_v27, %v2557_v47  ;;  %v2996_v39 = vadd.f32 %v13351_v7, %v2775_v54  ;;  %v16292_v47 = vld [vmem:[#allocation14_spill] sm:$0xff] }
 0x64d   : > { %v2556_v21 = vadd.f32 %v13036_v60, %v2252_v6  ;;  %v2783_v60 = vadd.f32 %v13255_v14, %v2561_v11  ;;  %v2787_v6 = vadd.f32 %v13307_v41, %v2565_v29  ;;  %v16294_v11 = vld [vmem:[#allocation16_spill] sm:$0xff]  ;;  %v16297_v29 = vld [vmem:[#allocation19_spill] sm:$0xff] }
 0x64e   : > { %v2774_v26 = vadd.f32 %v16287_v1, %v2552_v53  ;;  %v16291_v53 = vld [vmem:[#allocation13_spill] sm:$0xff]  ;;  %v3217_v41 = vadd.f32 %v16294_v11, %v2996_v39  ;;  %v16308_v11 = vld [vmem:[#allocation30_spill] sm:$0xff] }
 0x64f   : > { %v2778_v38 = vadd.f32 %v13238_v51, %v2556_v21  ;;  %v3004_v27 = vadd.f32 %v16290_v33, %v2783_v60  ;;  %v3008_v14 = vadd.f32 %v16292_v47, %v2787_v6  ;;  %v16293_v21 = vld [vmem:[#allocation15_spill] sm:$0xff]  ;;  %v16299_v1 = vld [vmem:[#allocation21_spill] sm:$0xff]  ;;  %v16302_v6 = vld [vmem:[#allocation24_spill] sm:$0xff] }
 0x650   : > { %v2995_v52 = vadd.f32 %v13361_v15, %v2774_v26  ;;  %v16301_v60 = vld [vmem:[#allocation23_spill] sm:$0xff] }
 0x651   : > { %v14274_v46 = vpop.f32.mrf.mxu1  ;;  %v14276_v20 = vpop.f32.mrf.mxu2 }
 0x652   : > { %16281 = vst [vmem:[#allocation105_spill] sm:$0xff] %v14276_v20  ;;  %v14278_v35 = vpop.f32.mrf.mxu0 }
 0x653   : > { %16282 = vst [vmem:[#allocation106_spill] sm:$0xff] %v14278_v35  ;;  %v14280_v57 = vpop.f32.mrf.mxu3 }
 0x654   : > { %16283 = vst [vmem:[#allocation107_spill] sm:$0xff] %v14280_v57  ;;  %v2255_v57 = vadd.f32 %v12888_v24, %v12703_v8  ;;  %v16285_v24 = vld [vmem:[#allocation7_spill] sm:$0xff] }
 0x655   : > { %v2564_v48 = vadd.f32 %v16285_v24, %v2258_v22  ;;  %v2999_v22 = vadd.f32 %v16289_v4, %v2778_v38  ;;  %v16298_v24 = vld [vmem:[#allocation20_spill] sm:$0xff] }
 0x656   : > { %v2560_v8 = vadd.f32 %v13074_v42, %v2255_v57  ;;  %v16288_v57 = vld [vmem:[#allocation10_spill] sm:$0xff] }
 0x657   : > { %v2786_v42 = vadd.f32 %v13319_v28, %v2564_v48  ;;  %v3000_v2 = vadd.f32 %v16288_v57, %v2779_v36  ;;  %v3220_v15 = vadd.f32 %v16297_v29, %v2999_v22  ;;  %v3225_v48 = vadd.f32 %v16298_v24, %v3004_v27  ;;  %v16300_v36 = vld [vmem:[#allocation22_spill] sm:$0xff]  ;;  %v16305_v22 = vld [vmem:[#allocation27_spill] sm:$0xff]  ;;  %v16306_v27 = vld [vmem:[#allocation28_spill] sm:$0xff] }
 0x658   : > { %v2782_v59 = vadd.f32 %v13268_v50, %v2560_v8  ;;  %v16295_v8 = vld [vmem:[#allocation17_spill] sm:$0xff]  ;;  %v3229_v38 = vadd.f32 %v16300_v36, %v3008_v14  ;;  %v16313_v36 = vld [vmem:[#allocation35_spill] sm:$0xff] }
 0x659   : > { %v14292_v20 = vpop.f32.mrf.mxu1  ;;  %v14294_v35 = vpop.f32.mrf.mxu2  ;;  %v3007_v50 = vadd.f32 %v16293_v21, %v2786_v42  ;;  %v3216_v28 = vadd.f32 %v16295_v8, %v2995_v52  ;;  %v3221_v7 = vadd.f32 %v16296_v49, %v3000_v2  ;;  %v3438_v42 = vadd.f32 %v16302_v6, %v3217_v41  ;;  %v16303_v52 = vld [vmem:[#allocation25_spill] sm:$0xff]  ;;  %v16304_v2 = vld [vmem:[#allocation26_spill] sm:$0xff]  ;;  %v16309_v8 = vld [vmem:[#allocation31_spill] sm:$0xff] }
 0x65a   : > { %v14303_v23 = vpop.f32.mrf.mxu0  ;;  %v3003_v51 = vadd.f32 %v16291_v53, %v2782_v59  ;;  %v3441_v33 = vadd.f32 %v16305_v22, %v3220_v15  ;;  %v3446_v53 = vadd.f32 %v16306_v27, %v3225_v48  ;;  %v16307_v21 = vld [vmem:[#allocation29_spill] sm:$0xff]  ;;  %v3450_v14 = vadd.f32 %v16308_v11, %v3229_v38  ;;  %v16310_v49 = vld [vmem:[#allocation32_spill] sm:$0xff]  ;;  %v16317_v22 = vld [vmem:[#allocation39_spill] sm:$0xff] }
 0x65b   : > { %v14309_v34 = vpop.f32.mrf.mxu3  ;;  %v3228_v59 = vadd.f32 %v16301_v60, %v3007_v50  ;;  %v3437_v57 = vadd.f32 %v16303_v52, %v3216_v28  ;;  %v3442_v4 = vadd.f32 %v16304_v2, %v3221_v7  ;;  %v3660_v41 = vadd.f32 %v16310_v49, %v3438_v42  ;;  %v16311_v29 = vld [vmem:[#allocation33_spill] sm:$0xff]  ;;  %v16314_v60 = vld [vmem:[#allocation36_spill] sm:$0xff]  ;;  %v16316_v2 = vld [vmem:[#allocation38_spill] sm:$0xff] }
 0x65c   : > { %v3224_v26 = vadd.f32 %v16299_v1, %v3003_v51  ;;  %v16312_v1 = vld [vmem:[#allocation34_spill] sm:$0xff]  ;;  %v3663_v7 = vadd.f32 %v16313_v36, %v3441_v33  ;;  %v3668_v15 = vadd.f32 %v16314_v60, %v3446_v53  ;;  %v16315_v6 = vld [vmem:[#allocation37_spill] sm:$0xff]  ;;  %v3672_v52 = vadd.f32 %v13866_v10, %v3450_v14  ;;  %v16318_v27 = vld [vmem:[#allocation40_spill] sm:$0xff] }
 0x65d   : > { %v3449_v50 = vadd.f32 %v16309_v8, %v3228_v59  ;;  %v3659_v24 = vadd.f32 %v16311_v29, %v3437_v57  ;;  %v3664_v28 = vadd.f32 %v16312_v1, %v3442_v4  ;;  %v3881_v38 = vadd.f32 %v16317_v22, %v3660_v41  ;;  %v16320_v11 = vld [vmem:[#allocation42_spill] sm:$0xff]  ;;  %v16321_v8 = vld [vmem:[#allocation43_spill] sm:$0xff]  ;;  %v16322_v49 = vld [vmem:[#allocation44_spill] sm:$0xff] }
 0x65e   : > { %v3445_v51 = vadd.f32 %v16307_v21, %v3224_v26  ;;  %v16319_v21 = vld [vmem:[#allocation41_spill] sm:$0xff]  ;;  %v3884_v57 = vadd.f32 %v16320_v11, %v3663_v7  ;;  %v3889_v4 = vadd.f32 %v16321_v8, %v3668_v15  ;;  %v3893_v53 = vadd.f32 %v13990_v12, %v3672_v52  ;;  %v16325_v15 = vld [vmem:[#allocation46_spill] sm:$0xff] }
 0x65f   : > { %v3671_v26 = vadd.f32 %v16316_v2, %v3449_v50  ;;  %v3880_v59 = vadd.f32 %v16318_v27, %v3659_v24  ;;  %v3885_v42 = vadd.f32 %v16319_v21, %v3664_v28  ;;  %v4102_v10 = vadd.f32 %v14016_v17, %v3881_v38  ;;  %v16332_v22 = vld [vmem:[#allocation54_spill] sm:$0xff]  ;;  %v16334_v38 = vld [vmem:[#allocation56_spill] sm:$0xff] }
 0x660   : > { %v3667_v48 = vadd.f32 %v16315_v6, %v3445_v51  ;;  %v4105_v41 = vadd.f32 %v14055_v45, %v3884_v57  ;;  %v4110_v29 = vadd.f32 %v14068_v61, %v3889_v4  ;;  %v4114_v36 = vadd.f32 %v14085_v25, %v3893_v53  ;;  %v16323_v45 = vld [vmem:[#allocation45_spill] sm:$0xff]  ;;  %v16338_v57 = vld [vmem:[#allocation60_spill] sm:$0xff] }
 0x661   : > { %v14335_v30 = vpop.f32.mrf.mxu1  ;;  %v14337_v54 = vpop.f32.mrf.mxu2  ;;  %v3892_v51 = vadd.f32 %v13999_v37, %v3671_v26  ;;  %v4101_v14 = vadd.f32 %v14021_v16, %v3880_v59  ;;  %v4106_v50 = vadd.f32 %v14047_v19, %v3885_v42  ;;  %v4324_v37 = vadd.f32 %v14087_v18, %v13994_v13  ;;  %v16331_v26 = vld [vmem:[#allocation48_spill] sm:$0xff]  ;;  %v16336_v59 = vld [vmem:[#allocation58_spill] sm:$0xff]  ;;  %v16337_v42 = vld [vmem:[#allocation59_spill] sm:$0xff] }
 0x662   : > { %v14343_v39 = vpop.f32.mrf.mxu0  ;;  %v3888_v33 = vadd.f32 %v16322_v49, %v3667_v48  ;;  %v4325_v16 = vadd.f32 %v14091_v63, %v14005_v56  ;;  %v4323_v19 = vadd.f32 %v14100_v43, %v4102_v10  ;;  %v4328_v61 = vadd.f32 %v14102_v0, %v16323_v45  ;;  %v16326_v56 = vld [vmem:[#allocation50_spill] sm:$0xff]  ;;  %v16327_v43 = vld [vmem:[#allocation51_spill] sm:$0xff]  ;;  %v16329_v0 = vld [vmem:[#allocation52_spill] sm:$0xff] }
 0x663   : > { %v14349_v47 = vpop.f32.mrf.mxu3  ;;  %v4113_v12 = vadd.f32 %v14089_v32, %v3892_v51  ;;  %v4322_v7 = vadd.f32 %v14104_v44, %v4101_v14  ;;  %v4329_v25 = vadd.f32 %v14106_v40, %v14027_v5  ;;  %v4327_v13 = vadd.f32 %v14115_v3, %v4106_v50  ;;  %v16324_v32 = vld [vmem:[#allocation49_spill] sm:$0xff]  ;;  %v16328_v48 = vld [vmem:[#allocation47_spill] sm:$0xff]  ;;  %v16342_v14 = vld [vmem:[#allocation64_spill] sm:$0xff] }
 0x664   : > { %v4109_v28 = vadd.f32 %v14073_v9, %v3888_v33  ;;  %v4332_v18 = vadd.f32 %v14117_v58, %v14053_v62  ;;  %v4326_v60 = vadd.f32 %v16324_v32, %v4105_v41  ;;  %v4333_v63 = vadd.f32 %v16326_v56, %v16325_v15  ;;  %v16330_v44 = vld [vmem:[#allocation53_spill] sm:$0xff]  ;;  %v16333_v40 = vld [vmem:[#allocation55_spill] sm:$0xff]  ;;  %v16340_v33 = vld [vmem:[#allocation62_spill] sm:$0xff] }
 0x665   : > { %v4331_v6 = vadd.f32 %v16327_v43, %v4110_v29  ;;  %v4336_v52 = vadd.f32 %v16329_v0, %v16328_v48  ;;  %v4337_v5 = vadd.f32 %v16332_v22, %v16331_v26  ;;  %v4335_v3 = vadd.f32 %v16333_v40, %v4114_v36  ;;  %v16335_v62 = vld [vmem:[#allocation57_spill] sm:$0xff]  ;;  %v16341_v51 = vld [vmem:[#allocation63_spill] sm:$0xff]  ;;  %v16343_v41 = vld [vmem:[#allocation72_spill] sm:$0xff] }
 0x666   : > { %v4330_v2 = vadd.f32 %v16330_v44, %v4109_v28  ;;  %v4546_v27 = vadd.f32 %v16334_v38, %v4324_v37  ;;  %v4334_v58 = vadd.f32 %v16335_v62, %v4113_v12  ;;  %v4547_v21 = vadd.f32 %v16336_v59, %v4325_v16  ;;  %v16339_v4 = vld [vmem:[#allocation61_spill] sm:$0xff]  ;;  %v16344_v28 = vld [vmem:[#allocation66_spill] sm:$0xff]  ;;  %v16346_v45 = vld [vmem:[#allocation67_spill] sm:$0xff] }
 0x667   : > { %v4545_v11 = vadd.f32 %v16337_v42, %v4323_v19  ;;  %v4550_v8 = vadd.f32 %v16338_v57, %v4328_v61  ;;  %v4544_v49 = vadd.f32 %v16339_v4, %v4322_v7  ;;  %v4551_v53 = vadd.f32 %v16340_v33, %v4329_v25  ;;  %v16345_v37 = vld [vmem:[#allocation65_spill] sm:$0xff]  ;;  %v16347_v32 = vld [vmem:[#allocation68_spill] sm:$0xff]  ;;  %v16348_v56 = vld [vmem:[#allocation70_spill] sm:$0xff] }
 0x668   : > { %v4549_v10 = vadd.f32 %v16341_v51, %v4327_v13  ;;  %v4554_v50 = vadd.f32 %v16342_v14, %v4332_v18  ;;  %v4768_v29 = vadd.f32 %v16343_v41, %v4546_v27  ;;  %v4555_v36 = vadd.f32 %v16344_v28, %v4333_v63  ;;  %v16349_v43 = vld [vmem:[#allocation69_spill] sm:$0xff]  ;;  %v16350_v48 = vld [vmem:[#allocation74_spill] sm:$0xff]  ;;  %v16351_v0 = vld [vmem:[#allocation88_spill] sm:$0xff] }
 0x669   : > { %v14375_v24 = vpop.f32.mrf.mxu1  ;;  %v5391_v1 = vpop.f32.mrf.mxu2  ;;  %v4548_v12 = vadd.f32 %v16345_v37, %v4326_v60  ;;  %v4553_v16 = vadd.f32 %v16346_v45, %v4331_v6  ;;  %v4558_v19 = vadd.f32 %v16347_v32, %v4336_v52  ;;  %v4559_v7 = vadd.f32 %v16348_v56, %v4337_v5  ;;  %v16352_v26 = vld [vmem:[#allocation71_spill] sm:$0xff]  ;;  %v16353_v63 = vld [vmem:[#allocation73_spill] sm:$0xff]  ;;  %v16355_v6 = vld [vmem:[#allocation76_spill] sm:$0xff] }
 0x66a   : > { %v14382_v17 = vpop.f32.mrf.mxu0  ;;  %v4552_v25 = vadd.f32 %v16349_v43, %v4330_v2  ;;  %v4769_v13 = vadd.f32 %v16350_v48, %v4547_v21  ;;  %v4990_v18 = vadd.f32 %v16351_v0, %v4768_v29  ;;  %v4557_v22 = vadd.f32 %v16352_v26, %v4335_v3  ;;  %v16354_v60 = vld [vmem:[#allocation75_spill] sm:$0xff]  ;;  %v16356_v62 = vld [vmem:[#allocation77_spill] sm:$0xff]  ;;  %v16357_v42 = vld [vmem:[#allocation80_spill] sm:$0xff] }
 0x66b   : > { %v5420_v9 = vpop.f32.mrf.mxu3  ;;  %v4556_v40 = vadd.f32 %v16353_v63, %v4334_v58  ;;  %v4767_v38 = vadd.f32 %v16354_v60, %v4545_v11  ;;  %v4772_v27 = vadd.f32 %v16355_v6, %v4550_v8  ;;  %v4766_v59 = vadd.f32 %v16356_v62, %v4544_v49  ;;  %v16358_v57 = vld [vmem:[#allocation90_spill] sm:$0xff]  ;;  %v16360_v51 = vld [vmem:[#allocation79_spill] sm:$0xff]  ;;  %v16362_v58 = vld [vmem:[#allocation81_spill] sm:$0xff] }
 0x66c   : > { %v4776_v5 = vadd.f32 %v16357_v42, %v4554_v50  ;;  %v4991_v2 = vadd.f32 %v16358_v57, %v4769_v13  ;;  %v5212_v21 = vadd.f32 %v14268_v31, %v4990_v18  ;;  %v16359_v4 = vld [vmem:[#allocation78_spill] sm:$0xff]  ;;  %v4771_v14 = vadd.f32 %v16360_v51, %v4549_v10  ;;  %v16363_v11 = vld [vmem:[#allocation83_spill] sm:$0xff]  ;;  %v16364_v8 = vld [vmem:[#allocation96_spill] sm:$0xff]  ;;  %v5455_v10 = vpop.permute.xlu0 %5454 }
 0x66d   : > { %v4773_v33 = vadd.f32 %v16359_v4, %v4551_v53  ;;  %v16361_v3 = vld [vmem:[#allocation82_spill] sm:$0xff]  ;;  %v4770_v29 = vadd.f32 %v16362_v58, %v4548_v12  ;;  %v4775_v28 = vadd.f32 %v16363_v11, %v4553_v16  ;;  %v16365_v50 = vld [vmem:[#allocation84_spill] sm:$0xff]  ;;  %v16367_v31 = vld [vmem:[#allocation85_spill] sm:$0xff] }
 0x66e   : > { %v4777_v41 = vadd.f32 %v16361_v3, %v4555_v36  ;;  %v4998_v37 = vadd.f32 %v16364_v8, %v4776_v5  ;;  %v5213_v49 = vadd.f32 %v14272_v55, %v4991_v2  ;;  %v5434_v45 = vadd.f32 %v5391_v1, %v5212_v21  ;;  %v16366_v56 = vld [vmem:[#allocation86_spill] sm:$0xff]  ;;  %v16368_v53 = vld [vmem:[#allocation87_spill] sm:$0xff]  ;;  %v16369_v0 = vld [vmem:[#allocation89_spill] sm:$0xff] }
 0x66f   : > { %v4780_v32 = vadd.f32 %v16365_v50, %v4558_v19  ;;  %v4781_v43 = vadd.f32 %v16366_v56, %v4559_v7  ;;  %v4774_v48 = vadd.f32 %v16367_v31, %v4552_v25  ;;  %v4779_v13 = vadd.f32 %v16368_v53, %v4557_v22  ;;  %v16370_v18 = vld [vmem:[#allocation98_spill] sm:$0xff]  ;;  %v16371_v63 = vld [vmem:[#allocation91_spill] sm:$0xff]  ;;  %v16372_v55 = vld [vmem:[#allocation92_spill] sm:$0xff] }
 0x670   : > { %v4778_v36 = vadd.f32 %v16369_v0, %v4556_v40  ;;  %v4999_v12 = vadd.f32 %v16370_v18, %v4777_v41  ;;  %v5220_v16 = vadd.f32 %v14294_v35, %v4998_v37  ;;  %v5435_v26 = vadd.f32 %v5420_v9, %v5213_v49  ;;  %v16373_v6 = vld [vmem:[#allocation94_spill] sm:$0xff]  ;;  %v16374_v62 = vld [vmem:[#allocation93_spill] sm:$0xff]  ;;  %v16375_v5 = vld [vmem:[#allocation95_spill] sm:$0xff]  ;;  %v5465_v35 = vpop.permute.xlu2 %5464 }
 0x671   : > { %v5362_v15 = vpop.f32.mrf.mxu1  ;;  %v5394_v61 = vpop.f32.mrf.mxu2  ;;  %v4989_v60 = vadd.f32 %v16371_v63, %v4767_v38  ;;  %v4994_v1 = vadd.f32 %v16372_v55, %v4772_v27  ;;  %v4995_v19 = vadd.f32 %v16373_v6, %v4773_v33  ;;  %v4988_v7 = vadd.f32 %v16374_v62, %v4766_v59  ;;  %v16376_v9 = vld [vmem:[#allocation97_spill] sm:$0xff]  ;;  %v16377_v38 = vld [vmem:[#allocation99_spill] sm:$0xff]  ;;  %v16379_v41 = vld [vmem:[#allocation100_spill] sm:$0xff] }
 0x672   : > { %v5333_v44 = vpop.f32.mrf.mxu0  ;;  %v4993_v22 = vadd.f32 %v16375_v5, %v4771_v14  ;;  %v5221_v57 = vadd.f32 %v14309_v34, %v4999_v12  ;;  %v14451_v40 = vadd.f32 %v5455_v10, %v5434_v45  ;;  %v4992_v4 = vadd.f32 %v16376_v9, %v4770_v29  ;;  %v16378_v33 = vld [vmem:[#allocation105_spill] sm:$0xff]  ;;  %v16381_v49 = vld [vmem:[#allocation106_spill] sm:$0xff]  ;;  %v16382_v56 = vld [vmem:[#allocation107_spill] sm:$0xff] }
 0x673   : > { %v5423_v52 = vpop.f32.mrf.mxu3  ;;  %v4997_v51 = vadd.f32 %v16377_v38, %v4775_v28  ;;  %v5211_v27 = vadd.f32 %v14274_v46, %v4989_v60  ;;  %v5216_v3 = vadd.f32 %v16378_v33, %v4994_v1  ;;  %v5002_v58 = vadd.f32 %v16379_v41, %v4780_v32  ;;  %v16380_v8 = vld [vmem:[#allocation101_spill] sm:$0xff]  ;;  %v16383_v32 = vld [vmem:[#allocation102_spill] sm:$0xff]  ;;  %v16384_v60 = vld [vmem:[#allocation103_spill] sm:$0xff] }
 0x674   : > { %v14458_v11 = vadd.f32 %v5455_v10, %v5435_v26  ;;  %v4996_v37 = vadd.f32 %v16380_v8, %v4774_v48  ;;  %v5210_v45 = vadd.f32 %v16381_v49, %v4988_v7  ;;  %v5217_v28 = vadd.f32 %v16382_v56, %v4995_v19  ;;  %v5460_v48 = vpop.permute.xlu1 %5459 }
 0x675   : > { %v5433_v50 = vadd.f32 %v5362_v15, %v5211_v27  ;;  %v5438_v29 = vadd.f32 %v5394_v61, %v5216_v3  ;;  %v5490_v46 = vmax.f32 %v14451_v40, 0.0  ;;  %v5003_v0 = vadd.f32 %v16383_v32, %v4781_v43 }
 0x676   : > { %v5219_v18 = vadd.f32 %v14335_v30, %v4997_v51  ;;  %v5224_v12 = vadd.f32 %v14337_v54, %v5002_v58  ;;  %v5491_v26 = vmax.f32 %v14458_v11, 0.0  ;;  %v5439_v15 = vadd.f32 %v5423_v52, %v5217_v28 }
 0x677   : > { %v5001_v55 = vadd.f32 %v16384_v60, %v4779_v13  ;;  %v5218_v43 = vadd.f32 %v14343_v39, %v4996_v37  ;;  %v14480_v1 = vadd.f32 %v5455_v10, %v5433_v50  ;;  %v14482_v30 = vadd.f32 %v5460_v48, %v5438_v29  ;;  %v16385_v13 = vld [vmem:[#allocation104_spill] sm:$0xff] }
 0x678   : > { %v5225_v6 = vadd.f32 %v14349_v47, %v5003_v0  ;;  %v5000_v5 = vadd.f32 %v16385_v13, %v4778_v36  ;;  %v5215_v39 = vadd.f32 %v14292_v20, %v4993_v22  ;;  %v14493_v38 = vadd.f32 %v5460_v48, %v5439_v15 }
 0x679   : > { %v5365_v42 = vpop.f32.mrf.mxu1  ;;  %v5397_v25 = vpop.f32.mrf.mxu2  ;;  %v5214_v33 = vadd.f32 %v14303_v23, %v4992_v4  ;;  %v5489_v3 = vmax.f32 %v14480_v1, 0.0  ;;  %v5223_v58 = vadd.f32 %v14375_v24, %v5001_v55 }
 0x67a   : > { %v5442_v2 = vadd.f32 %v5397_v25, %v5220_v16  ;;  %v5336_v21 = vpop.f32.mrf.mxu0  ;;  %v5432_v16 = vadd.f32 %v5333_v44, %v5210_v45  ;;  %v5470_v25 = vpop.permute.xlu0 %5469  ;;  %v5437_v36 = vadd.f32 %v5365_v42, %v5215_v39  ;;  %v5495_v23 = vmax.f32 %v14493_v38, 0.0 }
 0x67b   : > { %v5426_v59 = vpop.f32.mrf.mxu3  ;;  %v5436_v8 = vadd.f32 %v5336_v21, %v5214_v33  ;;  %v5222_v49 = vadd.f32 %v14382_v17, %v5000_v5 }
 0x67c   : > { %v14460_v14 = vadd.f32 %v5465_v35, %v5442_v2  ;;  %v5443_v34 = vadd.f32 %v5426_v59, %v5221_v57  ;;  %v14491_v57 = vadd.f32 %v5455_v10, %v5432_v16  ;;  %v5494_v59 = vmax.f32 %v14482_v30, 0.0 }
 0x67d   : > { %v14519_v45 = vadd.f32 %v5460_v48, %v5437_v36  ;;  %v14521_v32 = vadd.f32 %v5460_v48, %v5436_v8 }
 0x67e   : > { %v5498_v31 = vmax.f32 %v14460_v14, 0.0  ;;  %v14467_v53 = vadd.f32 %v5465_v35, %v5443_v34  ;;  %v5488_v34 = vmax.f32 %v14491_v57, 0.0 }
 0x67f   : > { %v5493_v15 = vmax.f32 %v14519_v45, 0.0 }
 0x680   : > { %v5506_v61 = vmax.f32 %v5490_v46, %v5498_v31  ;;  %v5499_v63 = vmax.f32 %v14467_v53, 0.0 }
 0x681   : > { %v5368_v54 = vpop.f32.mrf.mxu1  ;;  %v5400_v44 = vpop.f32.mrf.mxu2 }
 0x682   : > { %v5507_v52 = vmax.f32 %v5491_v26, %v5499_v63  ;;  %v5441_v19 = vadd.f32 %v5368_v54, %v5219_v18  ;;  %v5446_v62 = vadd.f32 %v5400_v44, %v5224_v12  ;;  %v5339_v7 = vpop.f32.mrf.mxu0 }
 0x683   : > { %v5429_v2 = vpop.f32.mrf.mxu3  ;;  %v5440_v9 = vadd.f32 %v5339_v7, %v5218_v43 }
 0x684   : > { %v14495_v47 = vadd.f32 %v5465_v35, %v5441_v19  ;;  %v5486_v51 = vadd.f32 %v5470_v25, %v5446_v62  ;;  %v5447_v27 = vadd.f32 %v5429_v2, %v5225_v6 }
 0x685   : > { %v14500_v41 = vadd.f32 %v5465_v35, %v5440_v9 }
 0x686   : > { %v5497_v20 = vmax.f32 %v14495_v47, 0.0  ;;  %v5502_v10 = vmax.f32 %v5486_v51, 0.0  ;;  %v14503_v22 = vadd.f32 %v5470_v25, %v5447_v27 }
 0x687   : > { %v5496_v37 = vmax.f32 %v14500_v41, 0.0 }
 0x688   : > { %v5505_v35 = vmax.f32 %v5489_v3, %v5497_v20  ;;  %v5510_v42 = vmax.f32 %v5494_v59, %v5502_v10  ;;  %v5503_v4 = vmax.f32 %v14503_v22, 0.0 }
 0x689   : > { %v5504_v24 = vmax.f32 %v5488_v34, %v5496_v37  ;;  %v5371_v21 = vpop.f32.mrf.mxu1 }
 0x68a   : > { %v5514_v50 = vmax.f32 %v5506_v61, %v5510_v42  ;;  %v5511_v29 = vmax.f32 %v5495_v23, %v5503_v4  ;;  %v5445_v56 = vadd.f32 %v5371_v21, %v5223_v58  ;;  %v5342_v28 = vpop.f32.mrf.mxu0  ;;  %v5492_v61 = vmax.f32 %v14521_v32, 0.0 }
 0x68b   : > { %v5444_v0 = vadd.f32 %v5342_v28, %v5222_v49 }
 0x68c   : > { %v5522_v18 = vrot.slane %v5514_v50, 4  ;;  %v5515_v12 = vmax.f32 %v5507_v52, %v5511_v29  ;;  %v14523_v16 = vadd.f32 %v5470_v25, %v5445_v56 }
 0x68d   : > { %v14525_v17 = vadd.f32 %v5470_v25, %v5444_v0 }
 0x68e   : > { %v5530_v60 = vmax.f32 %v5514_v50, %v5522_v18  ;;  %v5523_v55 = vrot.slane %v5515_v12, 4  ;;  %v5501_v43 = vmax.f32 %v14523_v16, 0.0 }
 0x68f   : > { %v5500_v30 = vmax.f32 %v14525_v17, 0.0 }
 0x690   : > { %v5538_v54 = vrot.slane %v5530_v60, 2  ;;  %v5531_v48 = vmax.f32 %v5515_v12, %v5523_v55  ;;  %v5509_v44 = vmax.f32 %v5493_v15, %v5501_v43 }
 0x691   : > { %v5508_v6 = vmax.f32 %v5492_v61, %v5500_v30 }
 0x692   : > { %v5546_v52 = vmax.f32 %v5530_v60, %v5538_v54  ;;  %v5539_v19 = vrot.slane %v5531_v48, 2  ;;  %v5513_v62 = vmax.f32 %v5505_v35, %v5509_v44 }
 0x693   : > { %v5512_v7 = vmax.f32 %v5504_v24, %v5508_v6 }
 0x694   : > { %v5554_v25 = vrot.slane %v5546_v52, 1  ;;  %v5547_v13 = vmax.f32 %v5531_v48, %v5539_v19  ;;  %v5521_v5 = vrot.slane %v5513_v62, 4 }
 0x695   : > { %v5520_v39 = vrot.slane %v5512_v7, 4 }
 0x696   : > { %v5562_v2 = vmax.f32 %v5546_v52, %v5554_v25  ;;  %v5555_v9 = vrot.slane %v5547_v13, 1  ;;  %v5529_v38 = vmax.f32 %v5513_v62, %v5521_v5 }
 0x697   : > { %v5528_v51 = vmax.f32 %v5512_v7, %v5520_v39 }
 0x698   : > { %v5566_v27 = vperm.slane %v5562_v2, 0  ;;  %v5563_v33 = vmax.f32 %v5547_v13, %v5555_v9  ;;  %v5537_v36 = vrot.slane %v5529_v38, 2 }
 0x699   : > { %v5536_v22 = vrot.slane %v5528_v51, 2 }
 0x69a   : > { %v5570_v58 = vsub.f32 %v5490_v46, %v5566_v27  ;;  %v5574_v8 = vsub.f32 %v5494_v59, %v5566_v27  ;;  %v5578_v35 = vsub.f32 %v5498_v31, %v5566_v27  ;;  %v5582_v42 = vsub.f32 %v5502_v10, %v5566_v27 }
 0x69b   : > { %v5567_v49 = vperm.slane %v5563_v33, 0  ;;  %v5545_v24 = vmax.f32 %v5529_v38, %v5537_v36  ;;  %v5544_v21 = vmax.f32 %v5528_v51, %v5536_v22 }
 0x69c   : > { %v5588_v45 = vmul.f32 1.442695, %v5570_v58  ;;  %v5596_v50 = vmul.f32 1.442695, %v5574_v8  ;;  %v5604_v29 = vmul.f32 1.442695, %v5578_v35 }
 0x69d   : > { %v5612_v56 = vmul.f32 1.442695, %v5582_v42  ;;  %v5571_v28 = vsub.f32 %v5491_v26, %v5567_v49  ;;  %v5575_v32 = vsub.f32 %v5495_v23, %v5567_v49  ;;  %v5579_v40 = vsub.f32 %v5499_v63, %v5567_v49 }
 0x69e   : > { %10976 = vpow2.f32 %v5588_v45  ;;  %v5583_v46 = vsub.f32 %v5503_v4, %v5567_v49  ;;  %v5553_v59 = vrot.slane %v5545_v24, 1  ;;  %v5552_v14 = vrot.slane %v5544_v21, 1 }
 0x69f   : > { %10978 = vpow2.f32 %v5596_v50  ;;  %v5590_v31 = vmul.f32 1.442695, %v5571_v28  ;;  %v5598_v10 = vmul.f32 1.442695, %v5575_v32  ;;  %v5606_v0 = vmul.f32 1.442695, %v5579_v40 }
 0x6a0   : > { %10980 = vpow2.f32 %v5604_v29  ;;  %v5561_v18 = vmax.f32 %v5545_v24, %v5553_v59  ;;  %v5560_v12 = vmax.f32 %v5544_v21, %v5552_v14  ;;  %v5614_v16 = vmul.f32 1.442695, %v5583_v46 }
 0x6a1   : > { %10982 = vpow2.f32 %v5612_v56 }
 0x6a2   : > { %10984 = vpow2.f32 %v5590_v31  ;;  %v5565_v11 = vperm.slane %v5561_v18, 0  ;;  %v5564_v26 = vperm.slane %v5560_v12, 0 }
 0x6a3   : > { %10986 = vpow2.f32 %v5598_v10 }
 0x6a4   : > { %v14541_v23 = vpop.eup %10976  ;;  %10988 = vpow2.f32 %v5606_v0  ;;  %v5569_v53 = vsub.f32 %v5489_v3, %v5565_v11  ;;  %v5573_v63 = vsub.f32 %v5493_v15, %v5565_v11  ;;  %v5577_v4 = vsub.f32 %v5497_v20, %v5565_v11 }
 0x6a5   : > { %v14547_v60 = vpop.eup %10978  ;;  %10990 = vpow2.f32 %v5614_v16  ;;  %v5581_v55 = vsub.f32 %v5501_v43, %v5565_v11  ;;  %v5568_v54 = vsub.f32 %v5488_v34, %v5564_v26  ;;  %v5572_v48 = vsub.f32 %v5492_v61, %v5564_v26 }
 0x6a6   : > { %v14551_v44 = vpop.eup %10980  ;;  %v5586_v6 = vmul.f32 1.442695, %v5569_v53  ;;  %v5594_v52 = vmul.f32 1.442695, %v5573_v63  ;;  %v5602_v19 = vmul.f32 1.442695, %v5577_v4  ;;  %v5576_v1 = vsub.f32 %v5496_v37, %v5564_v26 }
 0x6a7   : > { %v14555_v3 = vpop.eup %10982  ;;  %v5618_v47 = vadd.f32 %v14551_v44, %v14541_v23  ;;  %v5610_v20 = vmul.f32 1.442695, %v5581_v55  ;;  %v5580_v15 = vsub.f32 %v5500_v30, %v5564_v26  ;;  %v5584_v43 = vmul.f32 1.442695, %v5568_v54 }
 0x6a8   : > { %v14561_v57 = vpop.eup %10984  ;;  %v5622_v34 = vadd.f32 %v14555_v3, %v14547_v60  ;;  %10992 = vpow2.f32 %v5586_v6  ;;  %v5592_v41 = vmul.f32 1.442695, %v5572_v48  ;;  %v5600_v7 = vmul.f32 1.442695, %v5576_v1 }
 0x6a9   : > { %v14565_v61 = vpop.eup %10986  ;;  %10994 = vpow2.f32 %v5594_v52  ;;  %v5608_v30 = vmul.f32 1.442695, %v5580_v15 }
 0x6aa   : > { %v14567_v37 = vpop.eup %10988  ;;  %v5626_v62 = vadd.f32 %v5622_v34, %v5618_v47  ;;  %10996 = vpow2.f32 %v5602_v19 }
 0x6ab   : > { %v14569_v25 = vpop.eup %10990  ;;  %v5619_v17 = vadd.f32 %v14567_v37, %v14561_v57  ;;  %10998 = vpow2.f32 %v5610_v20 }
 0x6ac   : > { %v5634_v13 = vrot.slane %v5626_v62, 4  ;;  %v5623_v5 = vadd.f32 %v14569_v25, %v14565_v61  ;;  %11000 = vpow2.f32 %v5584_v43 }
 0x6ad   : > { %11002 = vpow2.f32 %v5592_v41 }
 0x6ae   : > { %v14575_v39 = vpop.eup %10992  ;;  %v5642_v2 = vadd.f32 %v5634_v13, %v5626_v62  ;;  %v5627_v9 = vadd.f32 %v5623_v5, %v5619_v17  ;;  %11004 = vpow2.f32 %v5600_v7 }
 0x6af   : > { %v14577_v38 = vpop.eup %10994  ;;  %11006 = vpow2.f32 %v5608_v30 }
 0x6b0   : > { %v14579_v51 = vpop.eup %10996  ;;  %v5650_v27 = vrot.slane %v5642_v2, 2  ;;  %v5635_v33 = vrot.slane %v5627_v9, 4 }
 0x6b1   : > { %v14581_v36 = vpop.eup %10998  ;;  %v5617_v22 = vadd.f32 %v14579_v51, %v14575_v39 }
 0x6b2   : > { %v14585_v58 = vpop.eup %11000  ;;  %v5658_v8 = vadd.f32 %v5650_v27, %v5642_v2  ;;  %v5643_v35 = vadd.f32 %v5635_v33, %v5627_v9  ;;  %v5621_v42 = vadd.f32 %v14581_v36, %v14577_v38  ;;  %v5984_v9 = vld [vmem:[%s16112_s7 + $0x20] sm:$0xf] }
 0x6b3   : > { %v14589_v49 = vpop.eup %11002 }
 0x6b4   : > { %v14591_v24 = vpop.eup %11004  ;;  %v5666_v21 = vrot.slane %v5658_v8, 1  ;;  %v5651_v45 = vrot.slane %v5643_v35, 2  ;;  %v5625_v50 = vadd.f32 %v5621_v42, %v5617_v22 }
 0x6b5   : > { %v14593_v29 = vpop.eup %11006  ;;  %v5616_v56 = vadd.f32 %v14591_v24, %v14585_v58 }
 0x6b6   : > { %v5674_v28 = vadd.f32 %v5666_v21, %v5658_v8  ;;  %v5659_v32 = vadd.f32 %v5651_v45, %v5643_v35  ;;  %v5633_v40 = vrot.slane %v5625_v50, 4  ;;  %v5620_v46 = vadd.f32 %v14593_v29, %v14589_v49  ;;  %v9942_v21 = vld [vmem:[%s16112_s7 + $0x60] sm:$0xf]  ;;  %v9943_v45 = vld [vmem:[%s16112_s7 + $0x68] sm:$0xf] }
 0x6b7   : > { %6022 = vmatpush.xpose.msra.mxu0 %v9942_v21  ;;  %6042 = vmatpush.xpose.msra.mxu1 %v9943_v45  ;;  %v5987_v21 = vld [vmem:[%s16112_s7 + $0x38] sm:$0xf] }
 0x6b8   : > { %11008 = vrcp.f32 %v5674_v28  ;;  %v5667_v59 = vrot.slane %v5659_v32, 1  ;;  %v5641_v14 = vadd.f32 %v5633_v40, %v5625_v50  ;;  %v5624_v31 = vadd.f32 %v5620_v46, %v5616_v56  ;;  %v9945_v50 = vld [vmem:[%s16112_s7 + $0x78] sm:$0xf]  ;;  %v9938_v56 = vld [vmem:[%s16112_s7 + $0x40] sm:$0xff] }
 0x6b9   : > { %v5715_v55 = vand.u32 2147483648, %v5674_v28  ;;  %v5713_v19 = vand.u32 2147483647, %v5674_v28  ;;  %vm5709_vm12 = vweird.f32 %v5674_v28  ;;  %6082 = vmatpush.xpose.msra.mxu3 %v9945_v50  ;;  %v5981_v50 = vld [vmem:[%s16112_s7 + $0x8] sm:$0xff] }
 0x6ba   : > { %v5675_v10 = vadd.f32 %v5667_v59, %v5659_v32  ;;  %v5649_v0 = vrot.slane %v5641_v14, 2  ;;  %v5632_v18 = vrot.slane %v5624_v31, 4  ;;  %v9940_v59 = vld [vmem:[%s16112_s7 + $0x50] sm:$0xff] }
 0x6bb   : > { %v5716_v15 = vor.u32 1.1754944e-38, %v5715_v55  ;;  %vm5714_vm7 = vcmp.eq.f32.partialorder %v5713_v19, 8.507059e+37  ;;  %6023 = vmatpush.xpose.msra.mxu0 %v9938_v56 }
 0x6bc   : > { %11010 = vrcp.f32 %v5675_v10  ;;  %v5657_v16 = vadd.f32 %v5649_v0, %v5641_v14  ;;  %v5640_v11 = vadd.f32 %v5632_v18, %v5624_v31  ;;  %v5729_v17 = vand.u32 2147483648, %v5675_v10 }
 0x6bd   : > { %vm5723_vm9 = vweird.f32 %v5675_v10  ;;  %v5727_v13 = vand.u32 2147483647, %v5675_v10 }
 0x6be   : > { %v11009_v12 = vpop.eup %11008  ;;  %v5665_v53 = vrot.slane %v5657_v16, 1  ;;  %v5648_v63 = vrot.slane %v5640_v11, 2 }
 0x6bf   : > { %v5705_v26 = vmul.f32 %v11009_v12, %v5674_v28  ;;  %vm5710_vm15 = vweird.f32 %v11009_v12  ;;  %vm5728_vm14 = vcmp.eq.f32.partialorder %v5727_v13, 8.507059e+37  ;;  %v9939_v28 = vld [vmem:[%s16112_s7 + $0x48] sm:$0xff]  ;;  %6111 = vmatpush.xpose.msrb.mxu0 %v5984_v9 }
 0x6c0   : > { %v14599_v54 = vadd.f32 %v5665_v53, %v5657_v16  ;;  %v5656_v48 = vadd.f32 %v5648_v63, %v5640_v11  ;;  %vm5711_vm5 = vmor %vm5709_vm12, %vm5710_vm15  ;;  %vm5796_vm15 = vcmask 1045509   ;;  %vm5801_vm12 = vcmask 1046534   ;;  %6043 = vmatpush.xpose.msra.mxu1 %v9939_v28 }
 0x6c1   : > { %v5706_v4 = vsub.f32 1.0, %v5705_v26 }
 0x6c2   : > { %v11011_v6 = vpop.eup %11010  ;;  %11012 = vrcp.f32 %v14599_v54  ;;  %v5664_v20 = vrot.slane %v5656_v48, 1  ;;  %v5699_v27 = vand.u32 2147483647, %v14599_v54  ;;  %v5701_v33 = vand.u32 2147483648, %v14599_v54 }
 0x6c3   : > { %v5707_v52 = vmul.f32 %v11009_v12, %v5706_v4  ;;  %v5719_v1 = vmul.f32 %v11011_v6, %v5675_v10  ;;  %vm5724_vm8 = vweird.f32 %v11011_v6 }
 0x6c4   : > { %v14602_v41 = vadd.f32 %v5664_v20, %v5656_v48  ;;  %vm14607_vm10 = vmor %vm5723_vm9, %vm5724_vm8  ;;  %vm14648_vm8 = vcmp.eq.f32.partialorder %v5699_v27, 8.507059e+37  ;;  %v5702_v0 = vor.u32 1.1754944e-38, %v5701_v33  ;;  %v5985_v27 = vld [vmem:[%s16112_s7 + $0x28] sm:$0xf]  ;;  %v5986_v33 = vld [vmem:[%s16112_s7 + $0x30] sm:$0xf] }
 0x6c5   : > { %v5708_v47 = vadd.f32 %v11009_v12, %v5707_v52  ;;  %v5720_v34 = vsub.f32 1.0, %v5719_v1  ;;  %6131 = vmatpush.xpose.msrb.mxu1 %v5985_v27 }
 0x6c6   : > { %11014 = vrcp.f32 %v14602_v41  ;;  %v5685_v46 = vand.u32 2147483647, %v14602_v41  ;;  %v5687_v18 = vand.u32 2147483648, %v14602_v41 }
 0x6c7   : > { %v5712_v43 = vsel %vm5711_vm5, %v11009_v12, %v5708_v47  ;;  %v5721_v7 = vmul.f32 %v11011_v6, %v5720_v34  ;;  %vm5807_vm5 = vcmask 1046528   ;;  %v9941_v12 = vld [vmem:[%s16112_s7 + $0x58] sm:$0xff] }
 0x6c8   : > { %v5717_v62 = vsel %vm5714_vm7, %v5716_v15, %v5712_v43  ;;  %v14605_v5 = vpop.eup %11012  ;;  %vm5695_vm7 = vweird.f32 %v14599_v54  ;;  %6083 = vmatpush.xpose.msra.mxu3 %v9941_v12 }
 0x6c9   : > { %v5734_v30 = vperm.slane %v5717_v62, 0  ;;  %v5722_v2 = vadd.f32 %v11011_v6, %v5721_v7  ;;  %vm5696_vm9 = vweird.f32 %v14605_v5  ;;  %6132 = vmatpush.xpose.msrb.mxu1 %v5981_v50 }
 0x6ca   : > { %vm5697_vm4 = vmor %vm5695_vm7, %vm5696_vm9  ;;  %vm5809_vm9 = vcmask 1046533  }
 0x6cb   : > { %v5738_v22 = vmul.f32 %v14541_v23, %v5734_v30  ;;  %v5742_v8 = vmul.f32 %v14547_v60, %v5734_v30  ;;  %v14616_v35 = vmul.f32 %v14551_v44, %v5734_v30  ;;  %v5750_v42 = vmul.f32 %v14555_v3, %v5734_v30  ;;  %v9944_v23 = vld [vmem:[%s16112_s7 + $0x70] sm:$0xf] }
 0x6cc   : > { %v5726_v60 = vsel %vm14607_vm10, %v11011_v6, %v5722_v2  ;;  %v5730_v44 = vor.u32 1.1754944e-38, %v5729_v17  ;;  %v5691_v3 = vmul.f32 %v14605_v5, %v14599_v54  ;;  %6062 = vmatpush.xpose.msra.mxu2 %v9944_v23  ;;  %v14646_v14 = vpop.eup %11014  ;;  %vm5681_vm10 = vweird.f32 %v14602_v41  ;;  %6171 = vmatpush.xpose.msrb.mxu3 %v5987_v21 }
 0x6cd   : > { %v5677_v11 = vmul.f32 %v14646_v14, %v14602_v41  ;;  %v5769_v55 = vrot.slane %v5738_v22, 6  ;;  %v14665_v48 = vrot.slane %v5742_v8, 6  ;;  %v5778_v1 = vrot.slane %v5750_v42, 6 }
 0x6ce   : > { %v5731_v32 = vsel %vm5728_vm14, %v5730_v44, %v5726_v60  ;;  %v5692_v40 = vsub.f32 1.0, %v5691_v3  ;;  %vm14668_vm14 = vcmp.eq.f32.partialorder %v5685_v46, 8.507059e+37  ;;  %vm5682_vm2 = vweird.f32 %v14646_v14  ;;  %v5980_v3 = vld [vmem:[%s16112_s7] sm:$0xff] }
 0x6cf   : > { %v5735_v31 = vperm.slane %v5731_v32, 0  ;;  %v5678_v52 = vsub.f32 1.0, %v5677_v11  ;;  %vm14725_vm7 = vmor %vm5681_vm10, %vm5682_vm2  ;;  %vm5792_vm2 = vcmask 1043458   ;;  %6112 = vmatpush.xpose.msrb.mxu0 %v5980_v3  ;;  %vm16395_vm10 = vcmask 1044483  }
 0x6d0   : > { %v5693_v16 = vmul.f32 %v14605_v5, %v5692_v40  ;;  %6063 = vmatpush.xpose.msra.mxu2 %v9940_v59 }
 0x6d1   : > { %v5739_v26 = vmul.f32 %v14561_v57, %v5735_v31  ;;  %v5743_v53 = vmul.f32 %v14565_v61, %v5735_v31  ;;  %v5747_v63 = vmul.f32 %v14567_v37, %v5735_v31  ;;  %v5751_v4 = vmul.f32 %v14569_v25, %v5735_v31  ;;  %v5983_v31 = vld [vmem:[%s16112_s7 + $0x18] sm:$0xff] }
 0x6d2   : > { %v5694_v6 = vadd.f32 %v14605_v5, %v5693_v16  ;;  %v5688_v61 = vor.u32 1.1754944e-38, %v5687_v18  ;;  %v5679_v20 = vmul.f32 %v14646_v14, %v5678_v52  ;;  %6172 = vmatpush.xpose.msrb.mxu3 %v5983_v31 }
 0x6d3   : > { %v5770_v57 = vrot.slane %v5739_v26, 5  ;;  %v5779_v47 = vrot.slane %v5751_v4, 5  ;;  %v5773_v37 = vrot.slane %v5743_v53, 5  ;;  %v14741_v41 = vrot.slane %v5747_v63, 5 }
 0x6d4   : > { %v5698_v25 = vsel %vm5697_vm4, %v14605_v5, %v5694_v6  ;;  %v5680_v5 = vadd.f32 %v14646_v14, %v5679_v20  ;;  %vm5786_vm4 = vcmask 1042433   ;;  %6151 = vmatpush.xpose.msrb.mxu2 %v5986_v33 }
 0x6d5   : > { %v14680_v15 = vsel %vm490_vm1, %v5778_v1, %v5779_v47  ;;  %v14683_v34 = vsel %vm513_vm3, %v5778_v1, %v5779_v47  ;;  %v14686_v43 = vsel %vm5790_vm13, %v5778_v1, %v5779_v47  ;;  %v14689_v54 = vsel %vm5796_vm15, %v5778_v1, %v5779_v47 }
 0x6d6   : > { %v14692_v62 = vsel %vm5801_vm12, %v5778_v1, %v5779_v47  ;;  %v14695_v7 = vsel %vm5807_vm5, %v5779_v47, %v5778_v1  ;;  %v14698_v17 = vsel %vm488_vm0, %v5778_v1, %v5779_v47  ;;  %v14701_v30 = vsel %vm5783_vm11, %v5778_v1, %v5779_v47 }
 0x6d7   : > { %v5703_v13 = vsel %vm14648_vm8, %v5702_v0, %v5698_v25  ;;  %v14707_v2 = vsel %vm513_vm3, %v5769_v55, %v5770_v57  ;;  %v14719_v22 = vsel %vm490_vm1, %v5769_v55, %v5770_v57  ;;  %v14733_v45 = vsel %vm5790_vm13, %v5769_v55, %v5770_v57 }
 0x6d8   : > { %v5733_v8 = vperm.slane %v5703_v13, 0  ;;  %v14736_v23 = vsel %vm5796_vm15, %v5769_v55, %v5770_v57  ;;  %v14739_v60 = vsel %vm5801_vm12, %v5769_v55, %v5770_v57  ;;  %v5684_v44 = vsel %vm14725_vm7, %v14646_v14, %v5680_v5  ;;  %v5982_v14 = vld [vmem:[%s16112_s7 + $0x10] sm:$0xff] }
 0x6d9   : > { %v14753_v56 = vsel %vm5807_vm5, %v5770_v57, %v5769_v55  ;;  %v14756_v28 = vsel %vm488_vm0, %v5769_v55, %v5770_v57  ;;  %v5689_v10 = vsel %vm14668_vm14, %v5688_v61, %v5684_v44  ;;  %vm5803_vm8 = vcmask 1045508   ;;  %6152 = vmatpush.xpose.msrb.mxu2 %v5982_v14  ;;  %v9980_v13 = vld [vmem:[%s16112_s7 + $0x190] sm:$0xff] }
 0x6da   : > { %v5737_v32 = vmul.f32 %v14575_v39, %v5733_v8  ;;  %v14760_v40 = vmul.f32 %v14577_v38, %v5733_v8  ;;  %v14763_v46 = vmul.f32 %v14579_v51, %v5733_v8  ;;  %v5749_v59 = vmul.f32 %v14581_v36, %v5733_v8 }
 0x6db   : > { %v14775_v39 = vsel %vm5783_vm11, %v5769_v55, %v5770_v57  ;;  %v14779_v38 = vsel %vm490_vm1, %v14665_v48, %v5773_v37  ;;  %v14783_v51 = vsel %vm513_vm3, %v14665_v48, %v5773_v37  ;;  %v14786_v36 = vrot.slane %v14616_v35, 6 }
 0x6dc   : > { %v5777_v0 = vrot.slane %v5749_v59, 7  ;;  %v5732_v18 = vperm.slane %v5689_v10, 0  ;;  %v14790_v12 = vsel %vm5790_vm13, %v14665_v48, %v5773_v37  ;;  %v14794_v16 = vsel %vm5796_vm15, %v14665_v48, %v5773_v37 }
 0x6dd   : > { %v14798_v35 = vsel %vm5801_vm12, %v14665_v48, %v5773_v37  ;;  %v14802_v11 = vsel %vm5807_vm5, %v5773_v37, %v14665_v48  ;;  %v14806_v26 = vsel %vm488_vm0, %v14665_v48, %v5773_v37  ;;  %v14810_v53 = vsel %vm5783_vm11, %v14665_v48, %v5773_v37 }
 0x6de   : > { %v14815_v63 = vsel %vm490_vm1, %v14786_v36, %v14741_v41  ;;  %v5736_v4 = vmul.f32 %v14585_v58, %v5732_v18  ;;  %v14819_v55 = vmul.f32 %v14589_v49, %v5732_v18  ;;  %v14822_v6 = vmul.f32 %v14591_v24, %v5732_v18 }
 0x6df   : > { %v5748_v52 = vmul.f32 %v14593_v29, %v5732_v18  ;;  %v5768_v19 = vrot.slane %v5737_v32, 7  ;;  %vm5819_vm14 = vcmask 1046529   ;;  %vm16394_vm7 = vcmask 1041408  }
 0x6e1   : > { %v5884_v48 = vsel %vm488_vm0, %v5748_v52, %v5777_v0  ;;  %v5887_v1 = vsel %vm5783_vm11, %v5748_v52, %v5777_v0  ;;  %v5891_v57 = vsel %vm490_vm1, %v5748_v52, %v5777_v0  ;;  %v5895_v58 = vsel %vm513_vm3, %v5748_v52, %v5777_v0 }
 0x6e2   : > { %v5886_v49 = vsel %vm16394_vm7, %v5884_v48, %v14680_v15  ;;  %v5889_v24 = vsel %vm5786_vm4, %v5887_v1, %v14683_v34  ;;  %v5893_v29 = vsel %vm5792_vm2, %v5891_v57, %v14686_v43  ;;  %v5897_v47 = vsel %vm16395_vm10, %v5895_v58, %v14689_v54 }
 0x6e3   : > { %v5890_v61 = vrot.slane %v5889_v24, 1  ;;  %v5894_v37 = vrot.slane %v5893_v29, 2  ;;  %v5898_v25 = vrot.slane %v5897_v47, 3  ;;  %v5899_v20 = vsel %vm5790_vm13, %v5748_v52, %v5777_v0  ;;  %5971 = vst.msk [vmem:[#allocation4 + $0x60] sm:$0xf] %vm11169_vm6, %v5886_v49 }
 0x6e4   : > { %v5901_v15 = vsel %vm5803_vm8, %v5899_v20, %v14692_v62  ;;  %v5903_v5 = vsel %vm5796_vm15, %v5748_v52, %v5777_v0  ;;  %v5907_v34 = vsel %vm5801_vm12, %v5748_v52, %v5777_v0  ;;  %v5911_v43 = vsel %vm5807_vm5, %v5777_v0, %v5748_v52 }
 0x6e5   : > { %v5902_v9 = vrot.slane %v5901_v15, 4  ;;  %v5905_v54 = vsel %vm5809_vm9, %v5903_v5, %v14695_v7  ;;  %vm16397_vm10 = vcmask 1045504   ;;  %v5913_v33 = vsel %vm5819_vm14, %v14701_v30, %v5911_v43  ;;  %5972 = vst.msk [vmem:[#allocation4 + $0x64] sm:$0xf] %vm11169_vm6, %v5890_v61  ;;  %v9950_v43 = vld [vmem:[%s16112_s7 + $0xa0] sm:$0xf] }
 0x6e6   : > { %v5909_v27 = vsel %vm16397_vm10, %v14698_v17, %v5907_v34  ;;  %v5906_v62 = vrot.slane %v5905_v54, 5  ;;  %v5914_v42 = vrot.slane %v5913_v33, 7  ;;  %5973 = vst.msk [vmem:[#allocation4 + $0x68] sm:$0xf] %vm11169_vm6, %v5894_v37  ;;  %v5784_v21 = vsel %vm5783_vm11, %v5736_v4, %v5768_v19  ;;  %v9952_v54 = vld [vmem:[%s16112_s7 + $0xb0] sm:$0xf] }
 0x6e7   : > { %v5910_v8 = vrot.slane %v5909_v27, 6  ;;  %5974 = vst.msk [vmem:[#allocation4 + $0x6c] sm:$0xf] %vm11169_vm6, %v5898_v25  ;;  %v5787_v7 = vsel %vm5786_vm4, %v5784_v21, %v14707_v2  ;;  %v5780_v17 = vsel %vm488_vm0, %v5736_v4, %v5768_v19  ;;  %v5789_v30 = vsel %vm490_vm1, %v5736_v4, %v5768_v19  ;;  %v9953_v27 = vld [vmem:[%s16112_s7 + $0xb8] sm:$0xf] }
 0x6e8   : > { %v5795_v44 = vsel %vm513_vm3, %v5736_v4, %v5768_v19  ;;  %5975 = vst.msk [vmem:[#allocation4 + $0x70] sm:$0xf] %vm11169_vm6, %v5902_v9  ;;  %v5788_v3 = vrot.slane %v5787_v7, 1  ;;  %v5782_v50 = vsel %vm16394_vm7, %v5780_v17, %v14719_v22  ;;  %v5793_v32 = vsel %vm5792_vm2, %v5789_v30, %v14733_v45  ;;  %v9951_v9 = vld [vmem:[%s16112_s7 + $0xa8] sm:$0xf]  ;;  %v9946_v7 = vld [vmem:[%s16112_s7 + $0x80] sm:$0xff] }
 0x6e9   : > { %vm16398_vm10 = vcmask 1044483   ;;  %v5771_v2 = vrot.slane %v14760_v40, 7  ;;  %5976 = vst.msk [vmem:[#allocation4 + $0x74] sm:$0xf] %vm11169_vm6, %v5906_v62  ;;  %v5800_v14 = vsel %vm5790_vm13, %v5736_v4, %v5768_v19  ;;  %v5806_v31 = vsel %vm5796_vm15, %v5736_v4, %v5768_v19  ;;  %v9947_v17 = vld [vmem:[%s16112_s7 + $0x88] sm:$0xff] }
 0x6ea   : > { %v5798_v59 = vsel %vm16398_vm10, %v5795_v44, %v14736_v23  ;;  %v5812_v10 = vsel %vm5801_vm12, %v5736_v4, %v5768_v19  ;;  %5977 = vst.msk [vmem:[#allocation4 + $0x78] sm:$0xf] %vm11169_vm6, %v5910_v8  ;;  %v5794_v22 = vrot.slane %v5793_v32, 2  ;;  %v5804_v45 = vsel %vm5803_vm8, %v5800_v14, %v14739_v60  ;;  %v9948_v44 = vld [vmem:[%s16112_s7 + $0x90] sm:$0xff]  ;;  %v9958_v14 = vld [vmem:[%s16112_s7 + $0xe0] sm:$0xf] }
 0x6eb   : > { %v5810_v23 = vsel %vm5809_vm9, %v5806_v31, %v14753_v56  ;;  %vm16399_vm7 = vcmask 1045504   ;;  %v14886_v0 = vrot.slane %v14763_v46, 7  ;;  %5978 = vst.msk [vmem:[#allocation4 + $0x7c] sm:$0xf] %vm11169_vm6, %v5914_v42  ;;  %v5799_v18 = vrot.slane %v5798_v59, 3 }
 0x6ec   : > { %v5815_v40 = vsel %vm16399_vm7, %v14756_v28, %v5812_v10  ;;  %v5817_v52 = vsel %vm5807_vm5, %v5768_v19, %v5736_v4  ;;  %5948 = vst.msk [vmem:[#allocation4 + $0x4] sm:$0xf] %vm11169_vm6, %v5788_v3  ;;  %v5822_v56 = vsel %vm488_vm0, %v14819_v55, %v5771_v2  ;;  %v5825_v28 = vsel %vm5783_vm11, %v14819_v55, %v5771_v2  ;;  %v9949_v3 = vld [vmem:[%s16112_s7 + $0x98] sm:$0xff]  ;;  %v9959_v31 = vld [vmem:[%s16112_s7 + $0xe8] sm:$0xf] }
 0x6ed   : > { %v5820_v60 = vsel %vm5819_vm14, %v14775_v39, %v5817_v52  ;;  %v5829_v46 = vsel %vm490_vm1, %v14819_v55, %v5771_v2  ;;  %5947 = vst.msk [vmem:[#allocation4] sm:$0xf] %vm11169_vm6, %v5782_v50  ;;  %v5805_v48 = vrot.slane %v5804_v45, 4  ;;  %vm16400_vm10 = vcmask 1041408  }
 0x6ee   : > { %v14905_v4 = vsel %vm16400_vm10, %v5822_v56, %v14779_v38  ;;  %v14909_v39 = vsel %vm5786_vm4, %v5825_v28, %v14783_v51  ;;  %v14913_v19 = vsel %vm5792_vm2, %v5829_v46, %v14790_v12  ;;  %5949 = vst.msk [vmem:[#allocation4 + $0x8] sm:$0xf] %vm11169_vm6, %v5794_v22  ;;  %v5811_v1 = vrot.slane %v5810_v23, 5  ;;  %v9961_v46 = vld [vmem:[%s16112_s7 + $0xf8] sm:$0xf] }
 0x6ef   : > { %v5816_v57 = vrot.slane %v5815_v40, 6  ;;  %v5833_v58 = vsel %vm513_vm3, %v14819_v55, %v5771_v2  ;;  %v5837_v38 = vsel %vm5790_vm13, %v14819_v55, %v5771_v2  ;;  %5950 = vst.msk [vmem:[#allocation4 + $0xc] sm:$0xf] %vm11169_vm6, %v5799_v18  ;;  %vm16401_vm7 = vcmask 1044483   ;;  %v9960_v18 = vld [vmem:[%s16112_s7 + $0xf0] sm:$0xf] }
 0x6f0   : > { %v14925_v51 = vsel %vm16401_vm7, %v5833_v58, %v14794_v16  ;;  %v14929_v12 = vsel %vm5803_vm8, %v5837_v38, %v14798_v35  ;;  %v5841_v49 = vsel %vm5796_vm15, %v14819_v55, %v5771_v2  ;;  %v5845_v24 = vsel %vm5801_vm12, %v14819_v55, %v5771_v2  ;;  %5951 = vst.msk [vmem:[#allocation4 + $0x10] sm:$0xf] %vm11169_vm6, %v5805_v48 }
 0x6f1   : > { %v14937_v29 = vsel %vm5809_vm9, %v5841_v49, %v14802_v11  ;;  %vm16402_vm10 = vcmask 1045504   ;;  %v5849_v16 = vsel %vm5807_vm5, %v5771_v2, %v14819_v55  ;;  %v5853_v61 = vsel %vm488_vm0, %v14822_v6, %v14886_v0  ;;  %5952 = vst.msk [vmem:[#allocation4 + $0x14] sm:$0xf] %vm11169_vm6, %v5811_v1 }
 0x6f2   : > { %v14941_v47 = vsel %vm16402_vm10, %v14806_v26, %v5845_v24  ;;  %v14949_v35 = vsel %vm5819_vm14, %v14810_v53, %v5849_v16  ;;  %v5856_v11 = vsel %vm5783_vm11, %v14822_v6, %v14886_v0  ;;  %vm16403_vm7 = vcmask 1041408   ;;  %5953 = vst.msk [vmem:[#allocation4 + $0x18] sm:$0xf] %vm11169_vm6, %v5816_v57 }
 0x6f3   : > { %v14961_v26 = vsel %vm16403_vm7, %v5853_v61, %v14815_v63  ;;  %v5989_v55 = vld [vmem:[#allocation4 + $0x4] sm:$0xf]  ;;  %v5857_v53 = vsel %vm513_vm3, %v14786_v36, %v14741_v41  ;;  %v5860_v37 = vsel %vm490_vm1, %v14822_v6, %v14886_v0  ;;  %v5861_v25 = vsel %vm5790_vm13, %v14786_v36, %v14741_v41  ;;  %5955 = vst.msk [vmem:[#allocation4 + $0x20] sm:$0xf] %vm11169_vm6, %v14905_v4 }
 0x6f4   : > { %v5864_v63 = vsel %vm513_vm3, %v14822_v6, %v14886_v0  ;;  %v6000_v20 = vperm.slane %v5989_v55, 0  ;;  %v6001_v15 = vperm.slane %v5989_v55, 1  ;;  %v6002_v5 = vperm.slane %v5989_v55, 2  ;;  %v5979_v21 = vld [vmem:[#allocation4] sm:$0xf]  ;;  %vm16405_vm3 = vmmov %vm16402_vm10 }
 0x6f5   : > { %v6003_v34 = vperm.slane %v5989_v55, 3  ;;  %v5821_v33 = vrot.slane %v5820_v60, 7  ;;  %v14990_v62 = vsel %vm5786_vm4, %v5856_v11, %v5857_v53  ;;  %v14993_v8 = vsel %vm5792_vm2, %v5860_v37, %v5861_v25  ;;  %v9967_v11 = vld [vmem:[%s16112_s7 + $0x128] sm:$0xf]  ;;  %v9968_v55 = vld [vmem:[%s16112_s7 + $0x130] sm:$0xf] }
 0x6f6   : > { %6024 = vmatmul.f32.vlgmr.msra.gmra.mxu0 %v6000_v20  ;;  %6044 = vmatmul.f32.vlgmr.msra.gmra.mxu1 %v6001_v15  ;;  %v5865_v42 = vsel %vm5796_vm15, %v14786_v36, %v14741_v41  ;;  %v5828_v30 = vrot.slane %v14909_v39, 1  ;;  %v5832_v50 = vrot.slane %v14913_v19, 2  ;;  %vm16404_vm1 = vcmask 1044483   ;;  %v9969_v53 = vld [vmem:[%s16112_s7 + $0x138] sm:$0xf]  ;;  %v9962_v25 = vld [vmem:[%s16112_s7 + $0x100] sm:$0xff] }
 0x6f7   : > { %6064 = vmatmul.f32.vlgmr.msra.gmra.mxu2 %v6002_v5  ;;  %6084 = vmatmul.f32.vlgmr.msra.gmra.mxu3 %v6003_v34  ;;  %5954 = vst.msk [vmem:[#allocation4 + $0x1c] sm:$0xf] %vm11169_vm6, %v5821_v33  ;;  %v15015_v32 = vsel %vm16404_vm1, %v5864_v63, %v5865_v42  ;;  %v5868_v59 = vsel %vm5790_vm13, %v14822_v6, %v14886_v0  ;;  %v6089_v23 = vperm.slane %v5979_v21, 0  ;;  %v6090_v40 = vperm.slane %v5979_v21, 1  ;;  %v6279_v37 = vld [vmem:[#allocation4 + $0xc] sm:$0xf] }
 0x6f8   : > { %6211 = vmatpush.xpose.msra.mxu0 %v9950_v43  ;;  %6231 = vmatpush.xpose.msra.mxu1 %v9951_v9  ;;  %v5869_v2 = vsel %vm5801_vm12, %v14786_v36, %v14741_v41  ;;  %v5872_v22 = vsel %vm5796_vm15, %v14822_v6, %v14886_v0  ;;  %v5873_v45 = vsel %vm5807_vm5, %v14741_v41, %v14786_v36  ;;  %v5836_v52 = vrot.slane %v14925_v51, 3  ;;  %v9963_v63 = vld [vmem:[%s16112_s7 + $0x108] sm:$0xff]  ;;  %v9964_v20 = vld [vmem:[%s16112_s7 + $0x110] sm:$0xff]  ;;  %v9977_v42 = vld [vmem:[%s16112_s7 + $0x178] sm:$0xf] }
 0x6f9   : > { %6251 = vmatpush.xpose.msra.mxu2 %v9952_v54  ;;  %6271 = vmatpush.xpose.msra.mxu3 %v9953_v27  ;;  %v15030_v10 = vsel %vm5803_vm8, %v5868_v59, %v5869_v2  ;;  %v6091_v60 = vperm.slane %v5979_v21, 2  ;;  %v6092_v56 = vperm.slane %v5979_v21, 3  ;;  %5956 = vst.msk [vmem:[#allocation4 + $0x24] sm:$0xf] %vm11169_vm6, %v5828_v30  ;;  %v5840_v28 = vrot.slane %v14929_v12, 4  ;;  %v9970_v30 = vld [vmem:[%s16112_s7 + $0x140] sm:$0xff] }
 0x6fa   : > { %5957 = vst.msk [vmem:[#allocation4 + $0x28] sm:$0xf] %vm11169_vm6, %v5832_v50  ;;  %v5844_v48 = vrot.slane %v14937_v29, 5  ;;  %v15055_v4 = vsel %vm5809_vm9, %v5872_v22, %v5873_v45  ;;  %v5876_v39 = vsel %vm5801_vm12, %v14822_v6, %v14886_v0  ;;  %v5848_v19 = vrot.slane %v14941_v47, 6  ;;  %v6178_v12 = vld [vmem:[#allocation4 + $0x8] sm:$0xf] }
 0x6fb   : > { %v5877_v1 = vsel %vm488_vm0, %v14786_v36, %v14741_v41  ;;  %v5880_v57 = vsel %vm5807_vm5, %v14886_v0, %v14822_v6  ;;  %v5881_v58 = vsel %vm5783_vm11, %v14786_v36, %v14741_v41  ;;  %5958 = vst.msk [vmem:[#allocation4 + $0x2c] sm:$0xf] %vm11169_vm6, %v5836_v52  ;;  %v9954_v6 = vld [vmem:[%s16112_s7 + $0xc0] sm:$0xff]  ;;  %v9955_v41 = vld [vmem:[%s16112_s7 + $0xc8] sm:$0xff]  ;;  %v9956_v36 = vld [vmem:[%s16112_s7 + $0xd0] sm:$0xff]  ;;  %v5852_v49 = vrot.slane %v14949_v35, 7 }
 0x6fc   : > { %6212 = vmatpush.xpose.msra.mxu0 %v9946_v7  ;;  %6232 = vmatpush.xpose.msra.mxu1 %v9947_v17  ;;  %v15073_v38 = vsel %vm16405_vm3, %v5877_v1, %v5876_v39  ;;  %v15076_v51 = vsel %vm5819_vm14, %v5881_v58, %v5880_v57  ;;  %5959 = vst.msk [vmem:[#allocation4 + $0x30] sm:$0xf] %vm11169_vm6, %v5840_v28  ;;  %v9957_v0 = vld [vmem:[%s16112_s7 + $0xd8] sm:$0xff]  ;;  %v6189_v24 = vperm.slane %v6178_v12, 0  ;;  %v6190_v29 = vperm.slane %v6178_v12, 1  ;;  %v9979_v52 = vld [vmem:[%s16112_s7 + $0x188] sm:$0xff] }
 0x6fd   : > { %6252 = vmatpush.xpose.msra.mxu2 %v9948_v44  ;;  %6272 = vmatpush.xpose.msra.mxu3 %v9949_v3  ;;  %5960 = vst.msk [vmem:[#allocation4 + $0x34] sm:$0xf] %vm11169_vm6, %v5844_v48  ;;  %v9966_v47 = vld [vmem:[%s16112_s7 + $0x120] sm:$0xf]  ;;  %v6191_v16 = vperm.slane %v6178_v12, 2  ;;  %v6192_v61 = vperm.slane %v6178_v12, 3 }
 0x6fe   : > { %6113 = vmatmul.f32.vlgmr.msrb.gmra.mxu0 %v6089_v23  ;;  %6133 = vmatmul.f32.vlgmr.msrb.gmra.mxu1 %v6090_v40  ;;  %5961 = vst.msk [vmem:[#allocation4 + $0x38] sm:$0xf] %vm11169_vm6, %v5848_v19  ;;  %v5859_v35 = vrot.slane %v14990_v62, 1  ;;  %v5863_v15 = vrot.slane %v14993_v8, 2  ;;  %v6290_v5 = vperm.slane %v6279_v37, 0  ;;  %v6291_v34 = vperm.slane %v6279_v37, 1 }
 0x6ff   : > { %6153 = vmatmul.f32.vlgmr.msrb.gmra.mxu2 %v6091_v60  ;;  %6173 = vmatmul.f32.vlgmr.msrb.gmra.mxu3 %v6092_v56  ;;  %5962 = vst.msk [vmem:[#allocation4 + $0x3c] sm:$0xf] %vm11169_vm6, %v5852_v49  ;;  %v6292_v43 = vperm.slane %v6279_v37, 2  ;;  %v5867_v9 = vrot.slane %v15015_v32, 3  ;;  %v6293_v54 = vperm.slane %v6279_v37, 3  ;;  %v5871_v62 = vrot.slane %v15030_v10, 4 }
 0x700   : > { %6312 = vmatpush.xpose.msrb.mxu0 %v9958_v14  ;;  %6332 = vmatpush.xpose.msrb.mxu1 %v9959_v31  ;;  %5963 = vst.msk [vmem:[#allocation4 + $0x40] sm:$0xf] %vm11169_vm6, %v14961_v26  ;;  %v9965_v26 = vld [vmem:[%s16112_s7 + $0x118] sm:$0xff]  ;;  %v9974_v27 = vld [vmem:[%s16112_s7 + $0x160] sm:$0xf]  ;;  %v5875_v21 = vrot.slane %v15055_v4, 5 }
 0x701   : > { %6352 = vmatpush.xpose.msrb.mxu2 %v9960_v18  ;;  %6372 = vmatpush.xpose.msrb.mxu3 %v9961_v46  ;;  %5964 = vst.msk [vmem:[#allocation4 + $0x44] sm:$0xf] %vm11169_vm6, %v5859_v35  ;;  %v9975_v33 = vld [vmem:[%s16112_s7 + $0x168] sm:$0xf]  ;;  %v9976_v8 = vld [vmem:[%s16112_s7 + $0x170] sm:$0xf] }
 0x702   : > { %5965 = vst.msk [vmem:[#allocation4 + $0x48] sm:$0xf] %vm11169_vm6, %v5863_v15  ;;  %v5879_v7 = vrot.slane %v15073_v38, 6  ;;  %v6380_v17 = vld [vmem:[#allocation4 + $0x10] sm:$0xf]  ;;  %v9971_v44 = vld [vmem:[%s16112_s7 + $0x148] sm:$0xff] }
 0x703   : > { %5966 = vst.msk [vmem:[#allocation4 + $0x4c] sm:$0xf] %vm11169_vm6, %v5867_v9  ;;  %v9972_v3 = vld [vmem:[%s16112_s7 + $0x150] sm:$0xff]  ;;  %v9973_v50 = vld [vmem:[%s16112_s7 + $0x158] sm:$0xff]  ;;  %v6391_v32 = vperm.slane %v6380_v17, 0  ;;  %v6392_v59 = vperm.slane %v6380_v17, 1 }
 0x704   : > { %6313 = vmatpush.xpose.msrb.mxu0 %v9954_v6  ;;  %6333 = vmatpush.xpose.msrb.mxu1 %v9955_v41  ;;  %5967 = vst.msk [vmem:[#allocation4 + $0x50] sm:$0xf] %vm11169_vm6, %v5871_v62  ;;  %v5883_v2 = vrot.slane %v15076_v51, 7  ;;  %v6393_v14 = vperm.slane %v6380_v17, 2  ;;  %v6394_v31 = vperm.slane %v6380_v17, 3  ;;  %v9978_v18 = vld [vmem:[%s16112_s7 + $0x180] sm:$0xff] }
 0x705   : > { %6353 = vmatpush.xpose.msrb.mxu2 %v9956_v36  ;;  %6373 = vmatpush.xpose.msrb.mxu3 %v9957_v0  ;;  %5968 = vst.msk [vmem:[#allocation4 + $0x54] sm:$0xf] %vm11169_vm6, %v5875_v21  ;;  %v9982_v10 = vld [vmem:[%s16112_s7 + $0x1a0] sm:$0xf]  ;;  %v9983_v22 = vld [vmem:[%s16112_s7 + $0x1a8] sm:$0xf] }
 0x706   : > { %6213 = vmatmul.f32.vlgmr.msra.gmra.mxu0 %v6189_v24  ;;  %6233 = vmatmul.f32.vlgmr.msra.gmra.mxu1 %v6190_v29  ;;  %5969 = vst.msk [vmem:[#allocation4 + $0x58] sm:$0xf] %vm11169_vm6, %v5879_v7  ;;  %v9984_v45 = vld [vmem:[%s16112_s7 + $0x1b0] sm:$0xf]  ;;  %v9985_v23 = vld [vmem:[%s16112_s7 + $0x1b8] sm:$0xf] }
 0x707   : > { %6253 = vmatmul.f32.vlgmr.msra.gmra.mxu2 %v6191_v16  ;;  %6273 = vmatmul.f32.vlgmr.msra.gmra.mxu3 %v6192_v61  ;;  %5970 = vst.msk [vmem:[#allocation4 + $0x5c] sm:$0xf] %vm11169_vm6, %v5883_v2  ;;  %v6481_v40 = vld [vmem:[#allocation4 + $0x14] sm:$0xf]  ;;  %v9990_v4 = vld [vmem:[%s16112_s7 + $0x1e0] sm:$0xf] }
 0x708   : > { %6413 = vmatpush.xpose.msra.mxu0 %v9966_v47  ;;  %6433 = vmatpush.xpose.msra.mxu1 %v9967_v11  ;;  %v9981_v60 = vld [vmem:[%s16112_s7 + $0x198] sm:$0xff]  ;;  %v6492_v56 = vperm.slane %v6481_v40, 0  ;;  %v6493_v28 = vperm.slane %v6481_v40, 1  ;;  %v6494_v46 = vperm.slane %v6481_v40, 2  ;;  %v6495_v48 = vperm.slane %v6481_v40, 3  ;;  %v9986_v58 = vld [vmem:[%s16112_s7 + $0x1c0] sm:$0xff] }
 0x709   : > { %6453 = vmatpush.xpose.msra.mxu2 %v9968_v55  ;;  %6473 = vmatpush.xpose.msra.mxu3 %v9969_v53  ;;  %v9991_v39 = vld [vmem:[%s16112_s7 + $0x1e8] sm:$0xf]  ;;  %v9992_v19 = vld [vmem:[%s16112_s7 + $0x1f0] sm:$0xf]  ;;  %v9993_v1 = vld [vmem:[%s16112_s7 + $0x1f8] sm:$0xf] }
 0x70a   : > { %v6582_v57 = vld [vmem:[#allocation4 + $0x18] sm:$0xf]  ;;  %v9987_v38 = vld [vmem:[%s16112_s7 + $0x1c8] sm:$0xff]  ;;  %v9988_v51 = vld [vmem:[%s16112_s7 + $0x1d0] sm:$0xff]  ;;  %vm9269_vm6 = vcmask 121856   ;;  %vm9222_vm11 = vcmask 1043456  }
 0x70b   : > { %v9989_v12 = vld [vmem:[%s16112_s7 + $0x1d8] sm:$0xff]  ;;  %v6593_v6 = vperm.slane %v6582_v57, 0  ;;  %v6594_v41 = vperm.slane %v6582_v57, 1  ;;  %v6595_v36 = vperm.slane %v6582_v57, 2  ;;  %v6596_v0 = vperm.slane %v6582_v57, 3  ;;  %v9994_v61 = vld [vmem:[%s16112_s7 + $0x200] sm:$0xff] }
 0x70c   : > { %6414 = vmatpush.xpose.msra.mxu0 %v9962_v25  ;;  %6434 = vmatpush.xpose.msra.mxu1 %v9963_v63  ;;  %v9998_v49 = vld [vmem:[%s16112_s7 + $0x220] sm:$0xf]  ;;  %v9999_v24 = vld [vmem:[%s16112_s7 + $0x228] sm:$0xf]  ;;  %v10000_v29 = vld [vmem:[%s16112_s7 + $0x230] sm:$0xf] }
 0x70d   : > { %6454 = vmatpush.xpose.msra.mxu2 %v9964_v20  ;;  %6474 = vmatpush.xpose.msra.mxu3 %v9965_v26  ;;  %v10001_v47 = vld [vmem:[%s16112_s7 + $0x238] sm:$0xf]  ;;  %v6683_v16 = vld [vmem:[#allocation4 + $0x1c] sm:$0xf]  ;;  %v9995_v11 = vld [vmem:[%s16112_s7 + $0x208] sm:$0xff]  ;;  %vm9218_vm13 = vcmask 97280  }
 0x70e   : > { %6314 = vmatmul.f32.vlgmr.msrb.gmra.mxu0 %v6290_v5  ;;  %6334 = vmatmul.f32.vlgmr.msrb.gmra.mxu1 %v6291_v34  ;;  %v9996_v35 = vld [vmem:[%s16112_s7 + $0x210] sm:$0xff]  ;;  %v9997_v55 = vld [vmem:[%s16112_s7 + $0x218] sm:$0xff]  ;;  %v6694_v53 = vperm.slane %v6683_v16, 0  ;;  %v6695_v37 = vperm.slane %v6683_v16, 1  ;;  %v6696_v25 = vperm.slane %v6683_v16, 2  ;;  %v6697_v63 = vperm.slane %v6683_v16, 3 }
 0x70f   : > { %6354 = vmatmul.f32.vlgmr.msrb.gmra.mxu2 %v6292_v43  ;;  %6374 = vmatmul.f32.vlgmr.msrb.gmra.mxu3 %v6293_v54  ;;  %v10006_v20 = vld [vmem:[%s16112_s7 + $0x260] sm:$0xf]  ;;  %v10007_v26 = vld [vmem:[%s16112_s7 + $0x268] sm:$0xf]  ;;  %v10008_v15 = vld [vmem:[%s16112_s7 + $0x270] sm:$0xf] }
 0x710   : > { %6514 = vmatpush.xpose.msrb.mxu0 %v9974_v27  ;;  %6534 = vmatpush.xpose.msrb.mxu1 %v9975_v33  ;;  %v10009_v5 = vld [vmem:[%s16112_s7 + $0x278] sm:$0xf]  ;;  %v6784_v34 = vld [vmem:[#allocation4 + $0x20] sm:$0xf]  ;;  %v10002_v43 = vld [vmem:[%s16112_s7 + $0x240] sm:$0xff] }
 0x711   : > { %6554 = vmatpush.xpose.msrb.mxu2 %v9976_v8  ;;  %6574 = vmatpush.xpose.msrb.mxu3 %v9977_v42  ;;  %v10003_v9 = vld [vmem:[%s16112_s7 + $0x248] sm:$0xff]  ;;  %v10004_v54 = vld [vmem:[%s16112_s7 + $0x250] sm:$0xff]  ;;  %v10005_v27 = vld [vmem:[%s16112_s7 + $0x258] sm:$0xff]  ;;  %v6795_v33 = vperm.slane %v6784_v34, 0  ;;  %v6796_v62 = vperm.slane %v6784_v34, 1  ;;  %v6797_v8 = vperm.slane %v6784_v34, 2 }
 0x712   : > { %v6798_v42 = vperm.slane %v6784_v34, 3  ;;  %v10014_v21 = vld [vmem:[%s16112_s7 + $0x2a0] sm:$0xf]  ;;  %v10015_v7 = vld [vmem:[%s16112_s7 + $0x2a8] sm:$0xf] }
 0x713   : > { %v10016_v17 = vld [vmem:[%s16112_s7 + $0x2b0] sm:$0xf]  ;;  %v10025_v40 = vld [vmem:[%s16112_s7 + $0x2f8] sm:$0xf] }
 0x714   : > { %6515 = vmatpush.xpose.msrb.mxu0 %v9970_v30  ;;  %6535 = vmatpush.xpose.msrb.mxu1 %v9971_v44  ;;  %v10017_v30 = vld [vmem:[%s16112_s7 + $0x2b8] sm:$0xf]  ;;  %v6885_v44 = vld [vmem:[#allocation4 + $0x24] sm:$0xf] }
 0x715   : > { %6555 = vmatpush.xpose.msrb.mxu2 %v9972_v3  ;;  %6575 = vmatpush.xpose.msrb.mxu3 %v9973_v50  ;;  %v10010_v3 = vld [vmem:[%s16112_s7 + $0x280] sm:$0xff]  ;;  %v10011_v50 = vld [vmem:[%s16112_s7 + $0x288] sm:$0xff]  ;;  %v6896_v2 = vperm.slane %v6885_v44, 0  ;;  %v10033_v57 = vld [vmem:[%s16112_s7 + $0x338] sm:$0xf] }
 0x716   : > { %6415 = vmatmul.f32.vlgmr.msra.gmra.mxu0 %v6391_v32  ;;  %6435 = vmatmul.f32.vlgmr.msra.gmra.mxu1 %v6392_v59  ;;  %v10012_v32 = vld [vmem:[%s16112_s7 + $0x290] sm:$0xff]  ;;  %v10013_v59 = vld [vmem:[%s16112_s7 + $0x298] sm:$0xff] }
 0x717   : > { %6455 = vmatmul.f32.vlgmr.msra.gmra.mxu2 %v6393_v14  ;;  %6475 = vmatmul.f32.vlgmr.msra.gmra.mxu3 %v6394_v31  ;;  %v6897_v14 = vperm.slane %v6885_v44, 1  ;;  %v6898_v31 = vperm.slane %v6885_v44, 2  ;;  %v10041_v16 = vld [vmem:[%s16112_s7 + $0x378] sm:$0xf] }
 0x718   : > { %6615 = vmatpush.xpose.msra.mxu0 %v9982_v10  ;;  %6635 = vmatpush.xpose.msra.mxu1 %v9983_v22  ;;  %v6899_v10 = vperm.slane %v6885_v44, 3  ;;  %v10022_v22 = vld [vmem:[%s16112_s7 + $0x2e0] sm:$0xf]  ;;  %v10049_v34 = vld [vmem:[%s16112_s7 + $0x3b8] sm:$0xf] }
 0x719   : > { %6655 = vmatpush.xpose.msra.mxu2 %v9984_v45  ;;  %6675 = vmatpush.xpose.msra.mxu3 %v9985_v23  ;;  %v10023_v45 = vld [vmem:[%s16112_s7 + $0x2e8] sm:$0xf]  ;;  %v10024_v23 = vld [vmem:[%s16112_s7 + $0x2f0] sm:$0xf]  ;;  %v10057_v44 = vld [vmem:[%s16112_s7 + $0x3f8] sm:$0xf] }
 0x71c   : > { %6616 = vmatpush.xpose.msra.mxu0 %v9978_v18  ;;  %6636 = vmatpush.xpose.msra.mxu1 %v9979_v52  ;;  %v6986_v18 = vld [vmem:[#allocation4 + $0x28] sm:$0xf]  ;;  %v10018_v52 = vld [vmem:[%s16112_s7 + $0x2c0] sm:$0xff] }
 0x71d   : > { %6656 = vmatpush.xpose.msra.mxu2 %v9980_v13  ;;  %6676 = vmatpush.xpose.msra.mxu3 %v9981_v60  ;;  %v10019_v13 = vld [vmem:[%s16112_s7 + $0x2c8] sm:$0xff]  ;;  %v10020_v60 = vld [vmem:[%s16112_s7 + $0x2d0] sm:$0xff] }
 0x71e   : > { %6516 = vmatmul.f32.vlgmr.msrb.gmra.mxu0 %v6492_v56  ;;  %6536 = vmatmul.f32.vlgmr.msrb.gmra.mxu1 %v6493_v28  ;;  %v10021_v56 = vld [vmem:[%s16112_s7 + $0x2d8] sm:$0xff]  ;;  %v6997_v28 = vperm.slane %v6986_v18, 0 }
 0x71f   : > { %6556 = vmatmul.f32.vlgmr.msrb.gmra.mxu2 %v6494_v46  ;;  %6576 = vmatmul.f32.vlgmr.msrb.gmra.mxu3 %v6495_v48  ;;  %v6998_v46 = vperm.slane %v6986_v18, 1  ;;  %v6999_v48 = vperm.slane %v6986_v18, 2 }
 0x720   : > { %6716 = vmatpush.xpose.msrb.mxu0 %v9990_v4  ;;  %6736 = vmatpush.xpose.msrb.mxu1 %v9991_v39  ;;  %v7000_v4 = vperm.slane %v6986_v18, 3  ;;  %v10030_v39 = vld [vmem:[%s16112_s7 + $0x320] sm:$0xf]  ;;  %v10065_v18 = vld [vmem:[%s16112_s7 + $0x438] sm:$0xf] }
 0x721   : > { %6756 = vmatpush.xpose.msrb.mxu2 %v9992_v19  ;;  %6776 = vmatpush.xpose.msrb.mxu3 %v9993_v1  ;;  %v10031_v19 = vld [vmem:[%s16112_s7 + $0x328] sm:$0xf]  ;;  %v10032_v1 = vld [vmem:[%s16112_s7 + $0x330] sm:$0xf] }
 0x724   : > { %6717 = vmatpush.xpose.msrb.mxu0 %v9986_v58  ;;  %6737 = vmatpush.xpose.msrb.mxu1 %v9987_v38  ;;  %v7087_v58 = vld [vmem:[#allocation4 + $0x2c] sm:$0xf]  ;;  %v10026_v38 = vld [vmem:[%s16112_s7 + $0x300] sm:$0xff] }
 0x725   : > { %6757 = vmatpush.xpose.msrb.mxu2 %v9988_v51  ;;  %6777 = vmatpush.xpose.msrb.mxu3 %v9989_v12  ;;  %v10027_v51 = vld [vmem:[%s16112_s7 + $0x308] sm:$0xff]  ;;  %v10028_v12 = vld [vmem:[%s16112_s7 + $0x310] sm:$0xff] }
 0x726   : > { %6617 = vmatmul.f32.vlgmr.msra.gmra.mxu0 %v6593_v6  ;;  %6637 = vmatmul.f32.vlgmr.msra.gmra.mxu1 %v6594_v41  ;;  %v10029_v6 = vld [vmem:[%s16112_s7 + $0x318] sm:$0xff]  ;;  %v7098_v41 = vperm.slane %v7087_v58, 0 }
 0x727   : > { %6657 = vmatmul.f32.vlgmr.msra.gmra.mxu2 %v6595_v36  ;;  %6677 = vmatmul.f32.vlgmr.msra.gmra.mxu3 %v6596_v0  ;;  %v7099_v36 = vperm.slane %v7087_v58, 1  ;;  %v7100_v0 = vperm.slane %v7087_v58, 2 }
 0x728   : > { %6817 = vmatpush.xpose.msra.mxu0 %v9998_v49  ;;  %6837 = vmatpush.xpose.msra.mxu1 %v9999_v24  ;;  %v7101_v49 = vperm.slane %v7087_v58, 3  ;;  %v10038_v24 = vld [vmem:[%s16112_s7 + $0x360] sm:$0xf]  ;;  %v10073_v58 = vld [vmem:[%s16112_s7 + $0x478] sm:$0xf] }
 0x729   : > { %6857 = vmatpush.xpose.msra.mxu2 %v10000_v29  ;;  %6877 = vmatpush.xpose.msra.mxu3 %v10001_v47  ;;  %v10039_v29 = vld [vmem:[%s16112_s7 + $0x368] sm:$0xf]  ;;  %v10040_v47 = vld [vmem:[%s16112_s7 + $0x370] sm:$0xf] }
 0x72c   : > { %6818 = vmatpush.xpose.msra.mxu0 %v9994_v61  ;;  %6838 = vmatpush.xpose.msra.mxu1 %v9995_v11  ;;  %v7188_v61 = vld [vmem:[#allocation4 + $0x30] sm:$0xf]  ;;  %v10034_v11 = vld [vmem:[%s16112_s7 + $0x340] sm:$0xff] }
 0x72d   : > { %6858 = vmatpush.xpose.msra.mxu2 %v9996_v35  ;;  %6878 = vmatpush.xpose.msra.mxu3 %v9997_v55  ;;  %v10035_v35 = vld [vmem:[%s16112_s7 + $0x348] sm:$0xff]  ;;  %v10036_v55 = vld [vmem:[%s16112_s7 + $0x350] sm:$0xff] }
 0x72e   : > { %6718 = vmatmul.f32.vlgmr.msrb.gmra.mxu0 %v6694_v53  ;;  %6738 = vmatmul.f32.vlgmr.msrb.gmra.mxu1 %v6695_v37  ;;  %v10037_v53 = vld [vmem:[%s16112_s7 + $0x358] sm:$0xff]  ;;  %v7199_v37 = vperm.slane %v7188_v61, 0 }
 0x72f   : > { %6758 = vmatmul.f32.vlgmr.msrb.gmra.mxu2 %v6696_v25  ;;  %6778 = vmatmul.f32.vlgmr.msrb.gmra.mxu3 %v6697_v63  ;;  %v7200_v25 = vperm.slane %v7188_v61, 1  ;;  %v7201_v63 = vperm.slane %v7188_v61, 2 }
 0x730   : > { %6918 = vmatpush.xpose.msrb.mxu0 %v10006_v20  ;;  %6938 = vmatpush.xpose.msrb.mxu1 %v10007_v26  ;;  %v7202_v20 = vperm.slane %v7188_v61, 3  ;;  %v10046_v26 = vld [vmem:[%s16112_s7 + $0x3a0] sm:$0xf]  ;;  %v10079_v61 = vld [vmem:[%s16112_s7 + $0x4a8] sm:$0xf] }
 0x731   : > { %6958 = vmatpush.xpose.msrb.mxu2 %v10008_v15  ;;  %6978 = vmatpush.xpose.msrb.mxu3 %v10009_v5  ;;  %v10047_v15 = vld [vmem:[%s16112_s7 + $0x3a8] sm:$0xf]  ;;  %v10048_v5 = vld [vmem:[%s16112_s7 + $0x3b0] sm:$0xf] }
 0x734   : > { %6919 = vmatpush.xpose.msrb.mxu0 %v10002_v43  ;;  %6939 = vmatpush.xpose.msrb.mxu1 %v10003_v9  ;;  %v7289_v43 = vld [vmem:[#allocation4 + $0x34] sm:$0xf]  ;;  %v10042_v9 = vld [vmem:[%s16112_s7 + $0x380] sm:$0xff] }
 0x735   : > { %6959 = vmatpush.xpose.msrb.mxu2 %v10004_v54  ;;  %6979 = vmatpush.xpose.msrb.mxu3 %v10005_v27  ;;  %v10043_v54 = vld [vmem:[%s16112_s7 + $0x388] sm:$0xff]  ;;  %v10044_v27 = vld [vmem:[%s16112_s7 + $0x390] sm:$0xff] }
 0x736   : > { %6819 = vmatmul.f32.vlgmr.msra.gmra.mxu0 %v6795_v33  ;;  %6839 = vmatmul.f32.vlgmr.msra.gmra.mxu1 %v6796_v62  ;;  %v10045_v33 = vld [vmem:[%s16112_s7 + $0x398] sm:$0xff]  ;;  %v7300_v62 = vperm.slane %v7289_v43, 0 }
 0x737   : > { %6859 = vmatmul.f32.vlgmr.msra.gmra.mxu2 %v6797_v8  ;;  %6879 = vmatmul.f32.vlgmr.msra.gmra.mxu3 %v6798_v42  ;;  %v7301_v8 = vperm.slane %v7289_v43, 1  ;;  %v7302_v42 = vperm.slane %v7289_v43, 2 }
 0x738   : > { %7019 = vmatpush.xpose.msra.mxu0 %v10014_v21  ;;  %7039 = vmatpush.xpose.msra.mxu1 %v10015_v7  ;;  %v7303_v21 = vperm.slane %v7289_v43, 3  ;;  %v10054_v7 = vld [vmem:[%s16112_s7 + $0x3e0] sm:$0xf] }
 0x739   : > { %7059 = vmatpush.xpose.msra.mxu2 %v10016_v17  ;;  %7079 = vmatpush.xpose.msra.mxu3 %v10017_v30  ;;  %v10055_v17 = vld [vmem:[%s16112_s7 + $0x3e8] sm:$0xf]  ;;  %v10056_v30 = vld [vmem:[%s16112_s7 + $0x3f0] sm:$0xf] }
 0x73c   : > { %7020 = vmatpush.xpose.msra.mxu0 %v10010_v3  ;;  %7040 = vmatpush.xpose.msra.mxu1 %v10011_v50  ;;  %v7390_v3 = vld [vmem:[#allocation4 + $0x38] sm:$0xf] }
 0x73d   : > { %7060 = vmatpush.xpose.msra.mxu2 %v10012_v32  ;;  %7080 = vmatpush.xpose.msra.mxu3 %v10013_v59  ;;  %v10050_v50 = vld [vmem:[%s16112_s7 + $0x3c0] sm:$0xff]  ;;  %v10051_v32 = vld [vmem:[%s16112_s7 + $0x3c8] sm:$0xff]  ;;  %v10052_v59 = vld [vmem:[%s16112_s7 + $0x3d0] sm:$0xff] }
 0x73e   : > { %6920 = vmatmul.f32.vlgmr.msrb.gmra.mxu0 %v6896_v2  ;;  %6940 = vmatmul.f32.vlgmr.msrb.gmra.mxu1 %v6897_v14  ;;  %v10053_v2 = vld [vmem:[%s16112_s7 + $0x3d8] sm:$0xff]  ;;  %v7401_v14 = vperm.slane %v7390_v3, 0 }
 0x73f   : > { %6960 = vmatmul.f32.vlgmr.msrb.gmra.mxu2 %v6898_v31  ;;  %6980 = vmatmul.f32.vlgmr.msrb.gmra.mxu3 %v6899_v10  ;;  %v7402_v31 = vperm.slane %v7390_v3, 1  ;;  %v7403_v10 = vperm.slane %v7390_v3, 2 }
 0x740   : > { %7120 = vmatpush.xpose.msrb.mxu0 %v10022_v22  ;;  %7140 = vmatpush.xpose.msrb.mxu1 %v10023_v45  ;;  %v7404_v22 = vperm.slane %v7390_v3, 3  ;;  %v10062_v45 = vld [vmem:[%s16112_s7 + $0x420] sm:$0xf] }
 0x741   : > { %7160 = vmatpush.xpose.msrb.mxu2 %v10024_v23  ;;  %7180 = vmatpush.xpose.msrb.mxu3 %v10025_v40  ;;  %v10063_v23 = vld [vmem:[%s16112_s7 + $0x428] sm:$0xf]  ;;  %v10064_v40 = vld [vmem:[%s16112_s7 + $0x430] sm:$0xf]  ;;  %v10082_v3 = vld [vmem:[%s16112_s7 + $0x4c0] sm:$0xff] }
 0x744   : > { %7121 = vmatpush.xpose.msrb.mxu0 %v10018_v52  ;;  %7141 = vmatpush.xpose.msrb.mxu1 %v10019_v13  ;;  %v7491_v52 = vld [vmem:[#allocation4 + $0x3c] sm:$0xf] }
 0x745   : > { %7161 = vmatpush.xpose.msrb.mxu2 %v10020_v60  ;;  %7181 = vmatpush.xpose.msrb.mxu3 %v10021_v56  ;;  %v10058_v13 = vld [vmem:[%s16112_s7 + $0x400] sm:$0xff]  ;;  %v10059_v60 = vld [vmem:[%s16112_s7 + $0x408] sm:$0xff]  ;;  %v10060_v56 = vld [vmem:[%s16112_s7 + $0x410] sm:$0xff] }
 0x746   : > { %7021 = vmatmul.f32.vlgmr.msra.gmra.mxu0 %v6997_v28  ;;  %7041 = vmatmul.f32.vlgmr.msra.gmra.mxu1 %v6998_v46  ;;  %v10061_v28 = vld [vmem:[%s16112_s7 + $0x418] sm:$0xff]  ;;  %v7502_v46 = vperm.slane %v7491_v52, 0 }
 0x747   : > { %7061 = vmatmul.f32.vlgmr.msra.gmra.mxu2 %v6999_v48  ;;  %7081 = vmatmul.f32.vlgmr.msra.gmra.mxu3 %v7000_v4  ;;  %v7503_v48 = vperm.slane %v7491_v52, 1  ;;  %v7504_v4 = vperm.slane %v7491_v52, 2 }
 0x748   : > { %7221 = vmatpush.xpose.msra.mxu0 %v10030_v39  ;;  %7241 = vmatpush.xpose.msra.mxu1 %v10031_v19  ;;  %v7505_v39 = vperm.slane %v7491_v52, 3  ;;  %v10070_v19 = vld [vmem:[%s16112_s7 + $0x460] sm:$0xf] }
 0x749   : > { %7261 = vmatpush.xpose.msra.mxu2 %v10032_v1  ;;  %7281 = vmatpush.xpose.msra.mxu3 %v10033_v57  ;;  %v10071_v1 = vld [vmem:[%s16112_s7 + $0x468] sm:$0xf]  ;;  %v10072_v57 = vld [vmem:[%s16112_s7 + $0x470] sm:$0xf] }
 0x74c   : > { %7222 = vmatpush.xpose.msra.mxu0 %v10026_v38  ;;  %7242 = vmatpush.xpose.msra.mxu1 %v10027_v51  ;;  %v7592_v38 = vld [vmem:[#allocation4 + $0x40] sm:$0xf]  ;;  %v10066_v51 = vld [vmem:[%s16112_s7 + $0x440] sm:$0xff] }
 0x74d   : > { %7262 = vmatpush.xpose.msra.mxu2 %v10028_v12  ;;  %7282 = vmatpush.xpose.msra.mxu3 %v10029_v6  ;;  %v10067_v12 = vld [vmem:[%s16112_s7 + $0x448] sm:$0xff]  ;;  %v10068_v6 = vld [vmem:[%s16112_s7 + $0x450] sm:$0xff] }
 0x74e   : > { %7122 = vmatmul.f32.vlgmr.msrb.gmra.mxu0 %v7098_v41  ;;  %7142 = vmatmul.f32.vlgmr.msrb.gmra.mxu1 %v7099_v36  ;;  %v10069_v41 = vld [vmem:[%s16112_s7 + $0x458] sm:$0xff] }
 0x74f   : > { %7162 = vmatmul.f32.vlgmr.msrb.gmra.mxu2 %v7100_v0  ;;  %7182 = vmatmul.f32.vlgmr.msrb.gmra.mxu3 %v7101_v49  ;;  %v7603_v49 = vperm.slane %v7592_v38, 0 }
 0x750   : > { %7322 = vmatpush.xpose.msrb.mxu0 %v10038_v24  ;;  %7342 = vmatpush.xpose.msrb.mxu1 %v10039_v29  ;;  %v7604_v24 = vperm.slane %v7592_v38, 1  ;;  %v7605_v29 = vperm.slane %v7592_v38, 2 }
 0x751   : > { %7362 = vmatpush.xpose.msrb.mxu2 %v10040_v47  ;;  %7382 = vmatpush.xpose.msrb.mxu3 %v10041_v16  ;;  %v7606_v47 = vperm.slane %v7592_v38, 3  ;;  %v10078_v16 = vld [vmem:[%s16112_s7 + $0x4a0] sm:$0xf] }
 0x754   : > { %7323 = vmatpush.xpose.msrb.mxu0 %v10034_v11  ;;  %7343 = vmatpush.xpose.msrb.mxu1 %v10035_v35  ;;  %v10080_v11 = vld [vmem:[%s16112_s7 + $0x4b0] sm:$0xf]  ;;  %v10081_v35 = vld [vmem:[%s16112_s7 + $0x4b8] sm:$0xf] }
 0x755   : > { %7363 = vmatpush.xpose.msrb.mxu2 %v10036_v55  ;;  %7383 = vmatpush.xpose.msrb.mxu3 %v10037_v53  ;;  %v7693_v53 = vld [vmem:[#allocation4 + $0x44] sm:$0xf] }
 0x756   : > { %7223 = vmatmul.f32.vlgmr.msra.gmra.mxu0 %v7199_v37  ;;  %7243 = vmatmul.f32.vlgmr.msra.gmra.mxu1 %v7200_v25  ;;  %v10074_v37 = vld [vmem:[%s16112_s7 + $0x480] sm:$0xff]  ;;  %v10075_v25 = vld [vmem:[%s16112_s7 + $0x488] sm:$0xff] }
 0x757   : > { %7263 = vmatmul.f32.vlgmr.msra.gmra.mxu2 %v7201_v63  ;;  %7283 = vmatmul.f32.vlgmr.msra.gmra.mxu3 %v7202_v20 }
 0x758   : > { %7423 = vmatpush.xpose.msra.mxu0 %v10046_v26  ;;  %7443 = vmatpush.xpose.msra.mxu1 %v10047_v15  ;;  %v10076_v26 = vld [vmem:[%s16112_s7 + $0x490] sm:$0xff]  ;;  %v10077_v15 = vld [vmem:[%s16112_s7 + $0x498] sm:$0xff] }
 0x759   : > { %7463 = vmatpush.xpose.msra.mxu2 %v10048_v5  ;;  %7483 = vmatpush.xpose.msra.mxu3 %v10049_v34 }
 0x75c   : > { %7424 = vmatpush.xpose.msra.mxu0 %v10042_v9  ;;  %7444 = vmatpush.xpose.msra.mxu1 %v10043_v54  ;;  %v7704_v9 = vperm.slane %v7693_v53, 0  ;;  %v7705_v54 = vperm.slane %v7693_v53, 1 }
 0x75d   : > { %7464 = vmatpush.xpose.msra.mxu2 %v10044_v27  ;;  %7484 = vmatpush.xpose.msra.mxu3 %v10045_v33  ;;  %v7706_v33 = vperm.slane %v7693_v53, 2 }
 0x75e   : > { %7324 = vmatmul.f32.vlgmr.msrb.gmra.mxu0 %v7300_v62  ;;  %7344 = vmatmul.f32.vlgmr.msrb.gmra.mxu1 %v7301_v8  ;;  %v7707_v62 = vperm.slane %v7693_v53, 3  ;;  %v10086_v8 = vld [vmem:[%s16112_s7 + $0x4e0] sm:$0xf]  ;;  %v10099_v53 = vld [vmem:[%s16112_s7 + $0x548] sm:$0xff] }
 0x75f   : > { %7364 = vmatmul.f32.vlgmr.msrb.gmra.mxu2 %v7302_v42  ;;  %7384 = vmatmul.f32.vlgmr.msrb.gmra.mxu3 %v7303_v21  ;;  %v10087_v42 = vld [vmem:[%s16112_s7 + $0x4e8] sm:$0xf]  ;;  %v10088_v21 = vld [vmem:[%s16112_s7 + $0x4f0] sm:$0xf] }
 0x760   : > { %7524 = vmatpush.xpose.msrb.mxu0 %v10054_v7  ;;  %7544 = vmatpush.xpose.msrb.mxu1 %v10055_v17  ;;  %v10089_v7 = vld [vmem:[%s16112_s7 + $0x4f8] sm:$0xf] }
 0x761   : > { %7564 = vmatpush.xpose.msrb.mxu2 %v10056_v30  ;;  %7584 = vmatpush.xpose.msrb.mxu3 %v10057_v44  ;;  %v7794_v44 = vld [vmem:[#allocation4 + $0x48] sm:$0xf] }
 0x762   : > { %v7808_v52 = vperm.slane %v7794_v44, 3 }
 0x764   : > { %7525 = vmatpush.xpose.msrb.mxu0 %v10050_v50  ;;  %7545 = vmatpush.xpose.msrb.mxu1 %v10051_v32  ;;  %v10083_v50 = vld [vmem:[%s16112_s7 + $0x4c8] sm:$0xff] }
 0x765   : > { %7565 = vmatpush.xpose.msrb.mxu2 %v10052_v59  ;;  %7585 = vmatpush.xpose.msrb.mxu3 %v10053_v2  ;;  %v10084_v2 = vld [vmem:[%s16112_s7 + $0x4d0] sm:$0xff] }
 0x766   : > { %7425 = vmatmul.f32.vlgmr.msra.gmra.mxu0 %v7401_v14  ;;  %7445 = vmatmul.f32.vlgmr.msra.gmra.mxu1 %v7402_v31  ;;  %v10085_v14 = vld [vmem:[%s16112_s7 + $0x4d8] sm:$0xff] }
 0x767   : > { %7465 = vmatmul.f32.vlgmr.msra.gmra.mxu2 %v7403_v10  ;;  %7485 = vmatmul.f32.vlgmr.msra.gmra.mxu3 %v7404_v22 }
 0x768   : > { %7625 = vmatpush.xpose.msra.mxu0 %v10062_v45  ;;  %7645 = vmatpush.xpose.msra.mxu1 %v10063_v23  ;;  %v7805_v45 = vperm.slane %v7794_v44, 0  ;;  %v7806_v23 = vperm.slane %v7794_v44, 1 }
 0x769   : > { %7665 = vmatpush.xpose.msra.mxu2 %v10064_v40  ;;  %7685 = vmatpush.xpose.msra.mxu3 %v10065_v18  ;;  %v7807_v18 = vperm.slane %v7794_v44, 2  ;;  %v10107_v44 = vld [vmem:[%s16112_s7 + $0x588] sm:$0xff] }
 0x76c   : > { %7626 = vmatpush.xpose.msra.mxu0 %v10058_v13  ;;  %7646 = vmatpush.xpose.msra.mxu1 %v10059_v60  ;;  %v10094_v13 = vld [vmem:[%s16112_s7 + $0x520] sm:$0xf]  ;;  %v10095_v60 = vld [vmem:[%s16112_s7 + $0x528] sm:$0xf] }
 0x76d   : > { %7666 = vmatpush.xpose.msra.mxu2 %v10060_v56  ;;  %7686 = vmatpush.xpose.msra.mxu3 %v10061_v28  ;;  %v10096_v56 = vld [vmem:[%s16112_s7 + $0x530] sm:$0xf]  ;;  %v10097_v28 = vld [vmem:[%s16112_s7 + $0x538] sm:$0xf] }
 0x76e   : > { %7526 = vmatmul.f32.vlgmr.msrb.gmra.mxu0 %v7502_v46  ;;  %7546 = vmatmul.f32.vlgmr.msrb.gmra.mxu1 %v7503_v48  ;;  %v7895_v48 = vld [vmem:[#allocation4 + $0x4c] sm:$0xf] }
 0x76f   : > { %7566 = vmatmul.f32.vlgmr.msrb.gmra.mxu2 %v7504_v4  ;;  %7586 = vmatmul.f32.vlgmr.msrb.gmra.mxu3 %v7505_v39  ;;  %v10090_v4 = vld [vmem:[%s16112_s7 + $0x500] sm:$0xff]  ;;  %v10091_v39 = vld [vmem:[%s16112_s7 + $0x508] sm:$0xff] }
 0x770   : > { %7726 = vmatpush.xpose.msrb.mxu0 %v10070_v19  ;;  %7746 = vmatpush.xpose.msrb.mxu1 %v10071_v1 }
 0x771   : > { %7766 = vmatpush.xpose.msrb.mxu2 %v10072_v57  ;;  %7786 = vmatpush.xpose.msrb.mxu3 %v10073_v58  ;;  %v10092_v57 = vld [vmem:[%s16112_s7 + $0x510] sm:$0xff]  ;;  %v10093_v58 = vld [vmem:[%s16112_s7 + $0x518] sm:$0xff] }
 0x773   : > { %v6025_v36 = vpop.f32.mrf.mxu0  ;;  %v6045_v0 = vpop.f32.mrf.mxu1 }
 0x774   : > { %7727 = vmatpush.xpose.msrb.mxu0 %v10066_v51  ;;  %7747 = vmatpush.xpose.msrb.mxu1 %v10067_v12  ;;  %v6046_v55 = vadd.f32 %v6045_v0, %v6025_v36  ;;  %v7908_v0 = vperm.slane %v7895_v48, 2 }
 0x775   : > { %7767 = vmatpush.xpose.msrb.mxu2 %v10068_v6  ;;  %7787 = vmatpush.xpose.msrb.mxu3 %v10069_v41  ;;  %v7906_v6 = vperm.slane %v7895_v48, 0  ;;  %v7907_v41 = vperm.slane %v7895_v48, 1 }
 0x776   : > { %7627 = vmatmul.f32.vlgmr.msra.gmra.mxu0 %v7603_v49  ;;  %7647 = vmatmul.f32.vlgmr.msra.gmra.mxu1 %v7604_v24  ;;  %v7909_v49 = vperm.slane %v7895_v48, 3  ;;  %v10102_v24 = vld [vmem:[%s16112_s7 + $0x560] sm:$0xf] }
 0x777   : > { %7667 = vmatmul.f32.vlgmr.msra.gmra.mxu2 %v7605_v29  ;;  %7687 = vmatmul.f32.vlgmr.msra.gmra.mxu3 %v7606_v47  ;;  %v10103_v29 = vld [vmem:[%s16112_s7 + $0x568] sm:$0xf]  ;;  %v10104_v47 = vld [vmem:[%s16112_s7 + $0x570] sm:$0xf]  ;;  %v10114_v48 = vld [vmem:[%s16112_s7 + $0x5c0] sm:$0xff] }
 0x778   : > { %7827 = vmatpush.xpose.msra.mxu0 %v10078_v16  ;;  %7847 = vmatpush.xpose.msra.mxu1 %v10079_v61  ;;  %v10105_v16 = vld [vmem:[%s16112_s7 + $0x578] sm:$0xf] }
 0x779   : > { %7867 = vmatpush.xpose.msra.mxu2 %v10080_v11  ;;  %7887 = vmatpush.xpose.msra.mxu3 %v10081_v35  ;;  %v7996_v35 = vld [vmem:[#allocation4 + $0x50] sm:$0xf] }
 0x77a   : > { %v6065_v63 = vpop.f32.mrf.mxu2  ;;  %v6085_v20 = vpop.f32.mrf.mxu3 }
 0x77b   : > { %v6066_v5 = vadd.f32 %v6065_v63, %v6046_v55  ;;  %v6114_v34 = vpop.f32.mrf.mxu0  ;;  %v6134_v43 = vpop.f32.mrf.mxu1  ;;  %v10098_v55 = vld [vmem:[%s16112_s7 + $0x540] sm:$0xff]  ;;  %v10100_v63 = vld [vmem:[%s16112_s7 + $0x550] sm:$0xff] }
 0x77c   : > { %7828 = vmatpush.xpose.msra.mxu0 %v10074_v37  ;;  %7848 = vmatpush.xpose.msra.mxu1 %v10075_v25 }
 0x77d   : > { %v6086_v27 = vadd.f32 %v6085_v20, %v6066_v5  ;;  %7868 = vmatpush.xpose.msra.mxu2 %v10076_v26  ;;  %7888 = vmatpush.xpose.msra.mxu3 %v10077_v15  ;;  %v10101_v20 = vld [vmem:[%s16112_s7 + $0x558] sm:$0xff] }
 0x77e   : > { %7728 = vmatmul.f32.vlgmr.msrb.gmra.mxu0 %v7704_v9  ;;  %7748 = vmatmul.f32.vlgmr.msrb.gmra.mxu1 %v7705_v54  ;;  %v8009_v54 = vperm.slane %v7996_v35, 2 }
 0x77f   : > { %v6115_v17 = vadd.f32 %v6114_v34, %v6086_v27  ;;  %7768 = vmatmul.f32.vlgmr.msrb.gmra.mxu2 %v7706_v33  ;;  %7788 = vmatmul.f32.vlgmr.msrb.gmra.mxu3 %v7707_v62  ;;  %v8007_v34 = vperm.slane %v7996_v35, 0  ;;  %v8010_v27 = vperm.slane %v7996_v35, 3  ;;  %v10110_v33 = vld [vmem:[%s16112_s7 + $0x5a0] sm:$0xf]  ;;  %v10111_v62 = vld [vmem:[%s16112_s7 + $0x5a8] sm:$0xf] }
 0x780   : > { %7928 = vmatpush.xpose.msrb.mxu0 %v10086_v8  ;;  %7948 = vmatpush.xpose.msrb.mxu1 %v10087_v42  ;;  %v10112_v8 = vld [vmem:[%s16112_s7 + $0x5b0] sm:$0xf]  ;;  %v10113_v42 = vld [vmem:[%s16112_s7 + $0x5b8] sm:$0xf] }
 0x781   : > { %v6135_v30 = vadd.f32 %v6134_v43, %v6115_v17  ;;  %7968 = vmatpush.xpose.msrb.mxu2 %v10088_v21  ;;  %7988 = vmatpush.xpose.msrb.mxu3 %v10089_v7  ;;  %v8008_v43 = vperm.slane %v7996_v35, 1  ;;  %v8097_v17 = vld [vmem:[#allocation4 + $0x54] sm:$0xf]  ;;  %v10122_v35 = vld [vmem:[%s16112_s7 + $0x600] sm:$0xff] }
 0x782   : > { %v6154_v32 = vpop.f32.mrf.mxu2  ;;  %v6174_v59 = vpop.f32.mrf.mxu3 }
 0x783   : > { %v6155_v31 = vadd.f32 %v6154_v32, %v6135_v30  ;;  %v6214_v10 = vpop.f32.mrf.mxu0  ;;  %v6234_v22 = vpop.f32.mrf.mxu1  ;;  %v10106_v30 = vld [vmem:[%s16112_s7 + $0x580] sm:$0xff]  ;;  %v10108_v32 = vld [vmem:[%s16112_s7 + $0x590] sm:$0xff] }
 0x784   : > { %7929 = vmatpush.xpose.msrb.mxu0 %v10082_v3  ;;  %7949 = vmatpush.xpose.msrb.mxu1 %v10083_v50  ;;  %v6235_v46 = vadd.f32 %v6234_v22, %v6214_v10  ;;  %v8108_v10 = vperm.slane %v8097_v17, 0  ;;  %v8109_v22 = vperm.slane %v8097_v17, 1 }
 0x785   : > { %v6175_v40 = vadd.f32 %v6174_v59, %v6155_v31  ;;  %7969 = vmatpush.xpose.msrb.mxu2 %v10084_v2  ;;  %7989 = vmatpush.xpose.msrb.mxu3 %v10085_v14  ;;  %v10109_v59 = vld [vmem:[%s16112_s7 + $0x598] sm:$0xff] }
 0x786   : > { %7829 = vmatmul.f32.vlgmr.msra.gmra.mxu0 %v7805_v45  ;;  %7849 = vmatmul.f32.vlgmr.msra.gmra.mxu1 %v7806_v23  ;;  %v8110_v23 = vperm.slane %v8097_v17, 2 }
 0x787   : > { %7869 = vmatmul.f32.vlgmr.msra.gmra.mxu2 %v7807_v18  ;;  %7889 = vmatmul.f32.vlgmr.msra.gmra.mxu3 %v7808_v52  ;;  %v10118_v18 = vld [vmem:[%s16112_s7 + $0x5e0] sm:$0xf]  ;;  %v10119_v52 = vld [vmem:[%s16112_s7 + $0x5e8] sm:$0xf] }
 0x788   : > { %8029 = vmatpush.xpose.msra.mxu0 %v10094_v13  ;;  %8049 = vmatpush.xpose.msra.mxu1 %v10095_v60  ;;  %v10120_v13 = vld [vmem:[%s16112_s7 + $0x5f0] sm:$0xf]  ;;  %v10121_v60 = vld [vmem:[%s16112_s7 + $0x5f8] sm:$0xf] }
 0x789   : > { %8069 = vmatpush.xpose.msra.mxu2 %v10096_v56  ;;  %8089 = vmatpush.xpose.msra.mxu3 %v10097_v28 }
 0x78a   : > { %v6254_v19 = vpop.f32.mrf.mxu2  ;;  %v6274_v1 = vpop.f32.mrf.mxu3 }
 0x78b   : > { %v6255_v38 = vadd.f32 %v6254_v19, %v6235_v46  ;;  %v6315_v51 = vpop.f32.mrf.mxu0  ;;  %v6335_v12 = vpop.f32.mrf.mxu1  ;;  %v8198_v46 = vld [vmem:[#allocation4 + $0x58] sm:$0xf] }
 0x78c   : > { %8030 = vmatpush.xpose.msra.mxu0 %v10090_v4  ;;  %8050 = vmatpush.xpose.msra.mxu1 %v10091_v39  ;;  %v6336_v11 = vadd.f32 %v6335_v12, %v6315_v51  ;;  %v10115_v4 = vld [vmem:[%s16112_s7 + $0x5c8] sm:$0xff]  ;;  %v8209_v12 = vperm.slane %v8198_v46, 0 }
 0x78d   : > { %v6275_v36 = vadd.f32 %v6274_v1, %v6255_v38  ;;  %8070 = vmatpush.xpose.msra.mxu2 %v10092_v57  ;;  %8090 = vmatpush.xpose.msra.mxu3 %v10093_v58  ;;  %v10116_v1 = vld [vmem:[%s16112_s7 + $0x5d0] sm:$0xff]  ;;  %v10117_v57 = vld [vmem:[%s16112_s7 + $0x5d8] sm:$0xff] }
 0x78e   : > { %7930 = vmatmul.f32.vlgmr.msrb.gmra.mxu0 %v7906_v6  ;;  %7950 = vmatmul.f32.vlgmr.msrb.gmra.mxu1 %v7907_v41  ;;  %v8210_v6 = vperm.slane %v8198_v46, 1 }
 0x78f   : > { %v6277_v61 = vadd.f32 %v6275_v36, %v6175_v40  ;;  %7970 = vmatmul.f32.vlgmr.msrb.gmra.mxu2 %v7908_v0  ;;  %7990 = vmatmul.f32.vlgmr.msrb.gmra.mxu3 %v7909_v49  ;;  %v8111_v40 = vperm.slane %v8097_v17, 3  ;;  %v8211_v36 = vperm.slane %v8198_v46, 2  ;;  %v8212_v0 = vperm.slane %v8198_v46, 3  ;;  %v10126_v49 = vld [vmem:[%s16112_s7 + $0x620] sm:$0xf]  ;;  %v10139_v46 = vld [vmem:[%s16112_s7 + $0x688] sm:$0xff] }
 0x790   : > { %8130 = vmatpush.xpose.msrb.mxu0 %v10102_v24  ;;  %8150 = vmatpush.xpose.msrb.mxu1 %v10103_v29  ;;  %v10127_v24 = vld [vmem:[%s16112_s7 + $0x628] sm:$0xf]  ;;  %v10128_v29 = vld [vmem:[%s16112_s7 + $0x630] sm:$0xf]  ;;  %v10130_v17 = vld [vmem:[%s16112_s7 + $0x640] sm:$0xff] }
 0x791   : > { %8170 = vmatpush.xpose.msrb.mxu2 %v10104_v47  ;;  %8190 = vmatpush.xpose.msrb.mxu3 %v10105_v16  ;;  %v10129_v47 = vld [vmem:[%s16112_s7 + $0x638] sm:$0xf] }
 0x792   : > { %v6355_v37 = vpop.f32.mrf.mxu2  ;;  %v6375_v25 = vpop.f32.mrf.mxu3 }
 0x793   : > { %v6356_v26 = vadd.f32 %v6355_v37, %v6336_v11  ;;  %v6416_v15 = vpop.f32.mrf.mxu0  ;;  %v6436_v5 = vpop.f32.mrf.mxu1  ;;  %v8299_v11 = vld [vmem:[#allocation4 + $0x5c] sm:$0xf] }
 0x794   : > { %8131 = vmatpush.xpose.msrb.mxu0 %v10098_v55  ;;  %8151 = vmatpush.xpose.msrb.mxu1 %v10099_v53  ;;  %v6437_v7 = vadd.f32 %v6436_v5, %v6416_v15  ;;  %v10123_v55 = vld [vmem:[%s16112_s7 + $0x608] sm:$0xff]  ;;  %v8310_v5 = vperm.slane %v8299_v11, 0 }
 0x795   : > { %v6376_v9 = vadd.f32 %v6375_v25, %v6356_v26  ;;  %8171 = vmatpush.xpose.msrb.mxu2 %v10100_v63  ;;  %8191 = vmatpush.xpose.msrb.mxu3 %v10101_v20  ;;  %v10124_v25 = vld [vmem:[%s16112_s7 + $0x610] sm:$0xff]  ;;  %v10125_v63 = vld [vmem:[%s16112_s7 + $0x618] sm:$0xff] }
 0x796   : > { %8031 = vmatmul.f32.vlgmr.msra.gmra.mxu0 %v8007_v34  ;;  %8051 = vmatmul.f32.vlgmr.msra.gmra.mxu1 %v8008_v43  ;;  %v8311_v34 = vperm.slane %v8299_v11, 1 }
 0x797   : > { %v6378_v21 = vadd.f32 %v6376_v9, %v6277_v61  ;;  %8071 = vmatmul.f32.vlgmr.msra.gmra.mxu2 %v8009_v54  ;;  %8091 = vmatmul.f32.vlgmr.msra.gmra.mxu3 %v8010_v27  ;;  %v8312_v9 = vperm.slane %v8299_v11, 2  ;;  %v8313_v54 = vperm.slane %v8299_v11, 3  ;;  %v10134_v27 = vld [vmem:[%s16112_s7 + $0x660] sm:$0xf]  ;;  %v10148_v11 = vld [vmem:[%s16112_s7 + $0x6d0] sm:$0xff] }
 0x798   : > { %8231 = vmatpush.xpose.msra.mxu0 %v10110_v33  ;;  %8251 = vmatpush.xpose.msra.mxu1 %v10111_v62  ;;  %v10135_v33 = vld [vmem:[%s16112_s7 + $0x668] sm:$0xf]  ;;  %v10136_v62 = vld [vmem:[%s16112_s7 + $0x670] sm:$0xf] }
 0x799   : > { %8271 = vmatpush.xpose.msra.mxu2 %v10112_v8  ;;  %8291 = vmatpush.xpose.msra.mxu3 %v10113_v42  ;;  %v10137_v8 = vld [vmem:[%s16112_s7 + $0x678] sm:$0xf] }
 0x79a   : > { %v6456_v3 = vpop.f32.mrf.mxu2  ;;  %v6476_v50 = vpop.f32.mrf.mxu3 }
 0x79b   : > { %v6457_v2 = vadd.f32 %v6456_v3, %v6437_v7  ;;  %v6517_v14 = vpop.f32.mrf.mxu0  ;;  %v6537_v31 = vpop.f32.mrf.mxu1  ;;  %v8400_v7 = vld [vmem:[#allocation4 + $0x60] sm:$0xf] }
 0x79c   : > { %8232 = vmatpush.xpose.msra.mxu0 %v10106_v30  ;;  %8252 = vmatpush.xpose.msra.mxu1 %v10107_v44  ;;  %v6538_v28 = vadd.f32 %v6537_v31, %v6517_v14  ;;  %v10131_v30 = vld [vmem:[%s16112_s7 + $0x648] sm:$0xff]  ;;  %v8411_v31 = vperm.slane %v8400_v7, 0 }
 0x79d   : > { %v6477_v45 = vadd.f32 %v6476_v50, %v6457_v2  ;;  %8272 = vmatpush.xpose.msra.mxu2 %v10108_v32  ;;  %8292 = vmatpush.xpose.msra.mxu3 %v10109_v59  ;;  %v10132_v50 = vld [vmem:[%s16112_s7 + $0x650] sm:$0xff]  ;;  %v10133_v32 = vld [vmem:[%s16112_s7 + $0x658] sm:$0xff] }
 0x79e   : > { %8132 = vmatmul.f32.vlgmr.msrb.gmra.mxu0 %v8108_v10  ;;  %8152 = vmatmul.f32.vlgmr.msrb.gmra.mxu1 %v8109_v22  ;;  %v8412_v10 = vperm.slane %v8400_v7, 1 }
 0x79f   : > { %v6479_v56 = vadd.f32 %v6477_v45, %v6378_v21  ;;  %8172 = vmatmul.f32.vlgmr.msrb.gmra.mxu2 %v8110_v23  ;;  %8192 = vmatmul.f32.vlgmr.msrb.gmra.mxu3 %v8111_v40  ;;  %v8413_v45 = vperm.slane %v8400_v7, 2  ;;  %v8414_v23 = vperm.slane %v8400_v7, 3  ;;  %v10142_v40 = vld [vmem:[%s16112_s7 + $0x6a0] sm:$0xf] }
 0x7a0   : > { %8332 = vmatpush.xpose.msrb.mxu0 %v10118_v18  ;;  %8352 = vmatpush.xpose.msrb.mxu1 %v10119_v52  ;;  %v10143_v18 = vld [vmem:[%s16112_s7 + $0x6a8] sm:$0xf]  ;;  %v10144_v52 = vld [vmem:[%s16112_s7 + $0x6b0] sm:$0xf] }
 0x7a1   : > { %8372 = vmatpush.xpose.msrb.mxu2 %v10120_v13  ;;  %8392 = vmatpush.xpose.msrb.mxu3 %v10121_v60  ;;  %v10145_v13 = vld [vmem:[%s16112_s7 + $0x6b8] sm:$0xf] }
 0x7a2   : > { %v6557_v39 = vpop.f32.mrf.mxu2  ;;  %v6577_v19 = vpop.f32.mrf.mxu3 }
 0x7a3   : > { %v6558_v58 = vadd.f32 %v6557_v39, %v6538_v28  ;;  %v6618_v38 = vpop.f32.mrf.mxu0  ;;  %v6638_v51 = vpop.f32.mrf.mxu1  ;;  %v10138_v28 = vld [vmem:[%s16112_s7 + $0x680] sm:$0xff]  ;;  %v10140_v39 = vld [vmem:[%s16112_s7 + $0x690] sm:$0xff] }
 0x7a4   : > { %8333 = vmatpush.xpose.msrb.mxu0 %v10114_v48  ;;  %8353 = vmatpush.xpose.msrb.mxu1 %v10115_v4  ;;  %v6639_v61 = vadd.f32 %v6638_v51, %v6618_v38 }
 0x7a5   : > { %v6578_v41 = vadd.f32 %v6577_v19, %v6558_v58  ;;  %8373 = vmatpush.xpose.msrb.mxu2 %v10116_v1  ;;  %8393 = vmatpush.xpose.msrb.mxu3 %v10117_v57  ;;  %v10141_v19 = vld [vmem:[%s16112_s7 + $0x698] sm:$0xff] }
 0x7a6   : > { %8233 = vmatmul.f32.vlgmr.msra.gmra.mxu0 %v8209_v12  ;;  %8253 = vmatmul.f32.vlgmr.msra.gmra.mxu1 %v8210_v6  ;;  %v10150_v6 = vld [vmem:[%s16112_s7 + $0x6e0] sm:$0xf] }
 0x7a7   : > { %v6580_v16 = vadd.f32 %v6578_v41, %v6479_v56  ;;  %8273 = vmatmul.f32.vlgmr.msra.gmra.mxu2 %v8211_v36  ;;  %8293 = vmatmul.f32.vlgmr.msra.gmra.mxu3 %v8212_v0  ;;  %v8501_v56 = vld [vmem:[#allocation4 + $0x64] sm:$0xf]  ;;  %v10151_v41 = vld [vmem:[%s16112_s7 + $0x6e8] sm:$0xf]  ;;  %v10152_v36 = vld [vmem:[%s16112_s7 + $0x6f0] sm:$0xf] }
 0x7a8   : > { %8433 = vmatpush.xpose.msra.mxu0 %v10126_v49  ;;  %8453 = vmatpush.xpose.msra.mxu1 %v10127_v24  ;;  %v8512_v58 = vperm.slane %v8501_v56, 0  ;;  %v8513_v38 = vperm.slane %v8501_v56, 1  ;;  %v8514_v51 = vperm.slane %v8501_v56, 2  ;;  %v8515_v12 = vperm.slane %v8501_v56, 3  ;;  %v10153_v0 = vld [vmem:[%s16112_s7 + $0x6f8] sm:$0xf] }
 0x7a9   : > { %8473 = vmatpush.xpose.msra.mxu2 %v10128_v29  ;;  %8493 = vmatpush.xpose.msra.mxu3 %v10129_v47  ;;  %v8602_v24 = vld [vmem:[#allocation4 + $0x68] sm:$0xf]  ;;  %v10146_v29 = vld [vmem:[%s16112_s7 + $0x6c0] sm:$0xff]  ;;  %v10147_v47 = vld [vmem:[%s16112_s7 + $0x6c8] sm:$0xff] }
 0x7aa   : > { %v6658_v53 = vpop.f32.mrf.mxu2  ;;  %v6678_v37 = vpop.f32.mrf.mxu3  ;;  %v8804_v56 = vld [vmem:[#allocation4 + $0x70] sm:$0xf] }
 0x7ab   : > { %v6659_v20 = vadd.f32 %v6658_v53, %v6639_v61  ;;  %v6719_v26 = vpop.f32.mrf.mxu0  ;;  %v6739_v15 = vpop.f32.mrf.mxu1 }
 0x7ac   : > { %8434 = vmatpush.xpose.msra.mxu0 %v10122_v35  ;;  %8454 = vmatpush.xpose.msra.mxu1 %v10123_v55  ;;  %v6740_v21 = vadd.f32 %v6739_v15, %v6719_v26  ;;  %v10149_v35 = vld [vmem:[%s16112_s7 + $0x6d8] sm:$0xff]  ;;  %v8614_v26 = vperm.slane %v8602_v24, 1 }
 0x7ad   : > { %v6679_v43 = vadd.f32 %v6678_v37, %v6659_v20  ;;  %8474 = vmatpush.xpose.msra.mxu2 %v10124_v25  ;;  %8494 = vmatpush.xpose.msra.mxu3 %v10125_v63  ;;  %v8613_v20 = vperm.slane %v8602_v24, 0 }
 0x7ae   : > { %8334 = vmatmul.f32.vlgmr.msrb.gmra.mxu0 %v8310_v5  ;;  %8354 = vmatmul.f32.vlgmr.msrb.gmra.mxu1 %v8311_v34  ;;  %v8615_v5 = vperm.slane %v8602_v24, 2  ;;  %v8616_v34 = vperm.slane %v8602_v24, 3  ;;  %v10176_v24 = vld [vmem:[%s16112_s7 + $0x7b0] sm:$0xf] }
 0x7af   : > { %v6681_v42 = vadd.f32 %v6679_v43, %v6580_v16  ;;  %8374 = vmatmul.f32.vlgmr.msrb.gmra.mxu2 %v8312_v9  ;;  %8394 = vmatmul.f32.vlgmr.msrb.gmra.mxu3 %v8313_v54  ;;  %v10158_v43 = vld [vmem:[%s16112_s7 + $0x720] sm:$0xf]  ;;  %v10159_v9 = vld [vmem:[%s16112_s7 + $0x728] sm:$0xf]  ;;  %v10160_v54 = vld [vmem:[%s16112_s7 + $0x730] sm:$0xf] }
 0x7b0   : > { %8534 = vmatpush.xpose.msrb.mxu0 %v10134_v27  ;;  %8554 = vmatpush.xpose.msrb.mxu1 %v10135_v33  ;;  %v10161_v27 = vld [vmem:[%s16112_s7 + $0x738] sm:$0xf] }
 0x7b1   : > { %8574 = vmatpush.xpose.msrb.mxu2 %v10136_v62  ;;  %8594 = vmatpush.xpose.msrb.mxu3 %v10137_v8  ;;  %v8703_v8 = vld [vmem:[#allocation4 + $0x6c] sm:$0xf] }
 0x7b2   : > { %v6759_v44 = vpop.f32.mrf.mxu2  ;;  %v6779_v3 = vpop.f32.mrf.mxu3 }
 0x7b3   : > { %v6760_v59 = vadd.f32 %v6759_v44, %v6740_v21  ;;  %v6820_v2 = vpop.f32.mrf.mxu0  ;;  %v6840_v14 = vpop.f32.mrf.mxu1  ;;  %v10155_v21 = vld [vmem:[%s16112_s7 + $0x708] sm:$0xff]  ;;  %v10157_v44 = vld [vmem:[%s16112_s7 + $0x718] sm:$0xff] }
 0x7b4   : > { %8535 = vmatpush.xpose.msrb.mxu0 %v10130_v17  ;;  %8555 = vmatpush.xpose.msrb.mxu1 %v10131_v30  ;;  %v6841_v49 = vadd.f32 %v6840_v14, %v6820_v2  ;;  %v10156_v30 = vld [vmem:[%s16112_s7 + $0x710] sm:$0xff]  ;;  %v8714_v14 = vperm.slane %v8703_v8, 0 }
 0x7b5   : > { %v6780_v22 = vadd.f32 %v6779_v3, %v6760_v59  ;;  %8575 = vmatpush.xpose.msrb.mxu2 %v10132_v50  ;;  %8595 = vmatpush.xpose.msrb.mxu3 %v10133_v32 }
 0x7b6   : > { %8435 = vmatmul.f32.vlgmr.msra.gmra.mxu0 %v8411_v31  ;;  %8455 = vmatmul.f32.vlgmr.msra.gmra.mxu1 %v8412_v10  ;;  %v8715_v31 = vperm.slane %v8703_v8, 1 }
 0x7b7   : > { %v15663_v60 = vadd.f32 %v6780_v22, %v6681_v42  ;;  %8475 = vmatmul.f32.vlgmr.msra.gmra.mxu2 %v8413_v45  ;;  %8495 = vmatmul.f32.vlgmr.msra.gmra.mxu3 %v8414_v23  ;;  %v10154_v42 = vld [vmem:[%s16112_s7 + $0x700] sm:$0xff]  ;;  %v8716_v45 = vperm.slane %v8703_v8, 2  ;;  %v8717_v23 = vperm.slane %v8703_v8, 3 }
 0x7b8   : > { %8635 = vmatpush.xpose.msra.mxu0 %v10142_v40  ;;  %8655 = vmatpush.xpose.msra.mxu1 %v10143_v18  ;;  %v10166_v40 = vld [vmem:[%s16112_s7 + $0x760] sm:$0xf]  ;;  %v10167_v18 = vld [vmem:[%s16112_s7 + $0x768] sm:$0xf] }
 0x7b9   : > { %8675 = vmatpush.xpose.msra.mxu2 %v10144_v52  ;;  %8695 = vmatpush.xpose.msra.mxu3 %v10145_v13  ;;  %v10168_v52 = vld [vmem:[%s16112_s7 + $0x770] sm:$0xf]  ;;  %v10169_v13 = vld [vmem:[%s16112_s7 + $0x778] sm:$0xf] }
 0x7ba   : > { %v6860_v48 = vpop.f32.mrf.mxu2  ;;  %v6880_v4 = vpop.f32.mrf.mxu3 }
 0x7bb   : > { %v6921_v1 = vpop.f32.mrf.mxu0  ;;  %v6941_v57 = vpop.f32.mrf.mxu1  ;;  %v6861_v55 = vadd.f32 %v6860_v48, %v6841_v49  ;;  %v10175_v49 = vld [vmem:[%s16112_s7 + $0x7a8] sm:$0xf] }
 0x7bc   : > { %8636 = vmatpush.xpose.msra.mxu0 %v10138_v28  ;;  %8656 = vmatpush.xpose.msra.mxu1 %v10139_v46  ;;  %v6942_v53 = vadd.f32 %v6941_v57, %v6921_v1  ;;  %v10162_v28 = vld [vmem:[%s16112_s7 + $0x740] sm:$0xff]  ;;  %v10163_v46 = vld [vmem:[%s16112_s7 + $0x748] sm:$0xff] }
 0x7bd   : > { %8676 = vmatpush.xpose.msra.mxu2 %v10140_v39  ;;  %8696 = vmatpush.xpose.msra.mxu3 %v10141_v19  ;;  %v6881_v33 = vadd.f32 %v6880_v4, %v6861_v55  ;;  %v10164_v39 = vld [vmem:[%s16112_s7 + $0x750] sm:$0xff]  ;;  %v10165_v19 = vld [vmem:[%s16112_s7 + $0x758] sm:$0xff] }
 0x7be   : > { %8536 = vmatmul.f32.vlgmr.msrb.gmra.mxu0 %v8512_v58  ;;  %8556 = vmatmul.f32.vlgmr.msrb.gmra.mxu1 %v8513_v38 }
 0x7bf   : > { %8576 = vmatmul.f32.vlgmr.msrb.gmra.mxu2 %v8514_v51  ;;  %8596 = vmatmul.f32.vlgmr.msrb.gmra.mxu3 %v8515_v12  ;;  %v6883_v3 = vadd.f32 %v6881_v33, %v15663_v60  ;;  %v8815_v51 = vperm.slane %v8804_v56, 0  ;;  %v8816_v12 = vperm.slane %v8804_v56, 1  ;;  %v10184_v33 = vld [vmem:[%s16112_s7 + $0x7f0] sm:$0xf] }
 0x7c0   : > { %8736 = vmatpush.xpose.msrb.mxu0 %v10150_v6  ;;  %8756 = vmatpush.xpose.msrb.mxu1 %v10151_v41  ;;  %v8817_v41 = vperm.slane %v8804_v56, 2 }
 0x7c1   : > { %8776 = vmatpush.xpose.msrb.mxu2 %v10152_v36  ;;  %8796 = vmatpush.xpose.msrb.mxu3 %v10153_v0  ;;  %v8818_v36 = vperm.slane %v8804_v56, 3  ;;  %v10174_v0 = vld [vmem:[%s16112_s7 + $0x7a0] sm:$0xf] }
 0x7c2   : > { %v6961_v16 = vpop.f32.mrf.mxu2  ;;  %v6981_v61 = vpop.f32.mrf.mxu3 }
 0x7c3   : > { %v7022_v37 = vpop.f32.mrf.mxu0  ;;  %v7042_v25 = vpop.f32.mrf.mxu1  ;;  %v6962_v15 = vadd.f32 %v6961_v16, %v6942_v53  ;;  %v8905_v16 = vld [vmem:[#allocation4 + $0x74] sm:$0xf]  ;;  %v10172_v53 = vld [vmem:[%s16112_s7 + $0x790] sm:$0xff] }
 0x7c4   : > { %v7043_v63 = vadd.f32 %v7042_v25, %v7022_v37  ;;  %8737 = vmatpush.xpose.msrb.mxu0 %v10146_v29  ;;  %8757 = vmatpush.xpose.msrb.mxu1 %v10147_v47  ;;  %v10177_v29 = vld [vmem:[%s16112_s7 + $0x7b8] sm:$0xf] }
 0x7c5   : > { %8777 = vmatpush.xpose.msrb.mxu2 %v10148_v11  ;;  %8797 = vmatpush.xpose.msrb.mxu3 %v10149_v35  ;;  %v6982_v62 = vadd.f32 %v6981_v61, %v6962_v15  ;;  %v10170_v61 = vld [vmem:[%s16112_s7 + $0x780] sm:$0xff]  ;;  %v10171_v11 = vld [vmem:[%s16112_s7 + $0x788] sm:$0xff]  ;;  %v10173_v37 = vld [vmem:[%s16112_s7 + $0x798] sm:$0xff]  ;;  %v8916_v15 = vperm.slane %v8905_v16, 0 }
 0x7c6   : > { %8637 = vmatmul.f32.vlgmr.msra.gmra.mxu0 %v8613_v20  ;;  %8657 = vmatmul.f32.vlgmr.msra.gmra.mxu1 %v8614_v26 }
 0x7c7   : > { %8677 = vmatmul.f32.vlgmr.msra.gmra.mxu2 %v8615_v5  ;;  %8697 = vmatmul.f32.vlgmr.msra.gmra.mxu3 %v8616_v34  ;;  %v6984_v10 = vadd.f32 %v6982_v62, %v6883_v3  ;;  %v8917_v5 = vperm.slane %v8905_v16, 1  ;;  %v10185_v62 = vld [vmem:[%s16112_s7 + $0x7f8] sm:$0xf] }
 0x7c8   : > { %8837 = vmatpush.xpose.msra.mxu0 %v10158_v43  ;;  %8857 = vmatpush.xpose.msra.mxu1 %v10159_v9  ;;  %v8918_v43 = vperm.slane %v8905_v16, 2  ;;  %v8919_v9 = vperm.slane %v8905_v16, 3  ;;  %v10181_v3 = vld [vmem:[%s16112_s7 + $0x7d8] sm:$0xff] }
 0x7c9   : > { %8877 = vmatpush.xpose.msra.mxu2 %v10160_v54  ;;  %8897 = vmatpush.xpose.msra.mxu3 %v10161_v27  ;;  %v10182_v54 = vld [vmem:[%s16112_s7 + $0x7e0] sm:$0xf]  ;;  %v10183_v27 = vld [vmem:[%s16112_s7 + $0x7e8] sm:$0xf] }
 0x7ca   : > { %v7062_v7 = vpop.f32.mrf.mxu2  ;;  %v7082_v17 = vpop.f32.mrf.mxu3 }
 0x7cb   : > { %v7063_v50 = vadd.f32 %v7062_v7, %v7043_v63  ;;  %v7123_v32 = vpop.f32.mrf.mxu0  ;;  %v7143_v59 = vpop.f32.mrf.mxu1  ;;  %v10179_v7 = vld [vmem:[%s16112_s7 + $0x7c8] sm:$0xff] }
 0x7cc   : > { %v7144_v2 = vadd.f32 %v7143_v59, %v7123_v32  ;;  %8838 = vmatpush.xpose.msra.mxu0 %v10154_v42  ;;  %8858 = vmatpush.xpose.msra.mxu1 %v10155_v21  ;;  %v9006_v42 = vld [vmem:[#allocation4 + $0x78] sm:$0xf] }
 0x7cd   : > { %v7083_v22 = vadd.f32 %v7082_v17, %v7063_v50  ;;  %8878 = vmatpush.xpose.msra.mxu2 %v10156_v30  ;;  %8898 = vmatpush.xpose.msra.mxu3 %v10157_v44  ;;  %v10178_v21 = vld [vmem:[%s16112_s7 + $0x7c0] sm:$0xff]  ;;  %v10180_v44 = vld [vmem:[%s16112_s7 + $0x7d0] sm:$0xff] }
 0x7ce   : > { %8738 = vmatmul.f32.vlgmr.msrb.gmra.mxu0 %v8714_v14  ;;  %8758 = vmatmul.f32.vlgmr.msrb.gmra.mxu1 %v8715_v31  ;;  %v9017_v14 = vperm.slane %v9006_v42, 0  ;;  %v9018_v31 = vperm.slane %v9006_v42, 1 }
 0x7cf   : > { %v7085_v60 = vadd.f32 %v7083_v22, %v6984_v10  ;;  %8778 = vmatmul.f32.vlgmr.msrb.gmra.mxu2 %v8716_v45  ;;  %8798 = vmatmul.f32.vlgmr.msrb.gmra.mxu3 %v8717_v23  ;;  %v9019_v22 = vperm.slane %v9006_v42, 2  ;;  %v9020_v45 = vperm.slane %v9006_v42, 3 }
 0x7d0   : > { %8938 = vmatpush.xpose.msrb.mxu0 %v10166_v40  ;;  %8958 = vmatpush.xpose.msrb.mxu1 %v10167_v18  ;;  %v9107_v40 = vld [vmem:[#allocation4 + $0x7c] sm:$0xf] }
 0x7d1   : > { %8978 = vmatpush.xpose.msrb.mxu2 %v10168_v52  ;;  %8998 = vmatpush.xpose.msrb.mxu3 %v10169_v13 }
 0x7d2   : > { %v7163_v48 = vpop.f32.mrf.mxu2  ;;  %v7183_v4 = vpop.f32.mrf.mxu3 }
 0x7d3   : > { %v7164_v1 = vadd.f32 %v7163_v48, %v7144_v2  ;;  %v7224_v57 = vpop.f32.mrf.mxu0  ;;  %v7244_v58 = vpop.f32.mrf.mxu1  ;;  %v9119_v48 = vperm.slane %v9107_v40, 1 }
 0x7d4   : > { %v7245_v38 = vadd.f32 %v7244_v58, %v7224_v57  ;;  %8939 = vmatpush.xpose.msrb.mxu0 %v10162_v28  ;;  %8959 = vmatpush.xpose.msrb.mxu1 %v10163_v46  ;;  %v9118_v46 = vperm.slane %v9107_v40, 0 }
 0x7d5   : > { %v7184_v6 = vadd.f32 %v7183_v4, %v7164_v1  ;;  %8979 = vmatpush.xpose.msrb.mxu2 %v10164_v39  ;;  %8999 = vmatpush.xpose.msrb.mxu3 %v10165_v19  ;;  %v9120_v39 = vperm.slane %v9107_v40, 2  ;;  %v9121_v19 = vperm.slane %v9107_v40, 3 }
 0x7d6   : > { %8839 = vmatmul.f32.vlgmr.msra.gmra.mxu0 %v8815_v51  ;;  %8859 = vmatmul.f32.vlgmr.msra.gmra.mxu1 %v8816_v12 }
 0x7d7   : > { %v7186_v47 = vadd.f32 %v7184_v6, %v7085_v60  ;;  %8879 = vmatmul.f32.vlgmr.msra.gmra.mxu2 %v8817_v41  ;;  %8899 = vmatmul.f32.vlgmr.msra.gmra.mxu3 %v8818_v36 }
 0x7d8   : > { %9039 = vmatpush.xpose.msra.mxu0 %v10174_v0  ;;  %9059 = vmatpush.xpose.msra.mxu1 %v10175_v49 }
 0x7d9   : > { %9079 = vmatpush.xpose.msra.mxu2 %v10176_v24  ;;  %9099 = vmatpush.xpose.msra.mxu3 %v10177_v29 }
 0x7da   : > { %v7264_v35 = vpop.f32.mrf.mxu2  ;;  %v7284_v55 = vpop.f32.mrf.mxu3 }
 0x7db   : > { %v7265_v25 = vadd.f32 %v7264_v35, %v7245_v38  ;;  %v7325_v63 = vpop.f32.mrf.mxu0  ;;  %v7345_v20 = vpop.f32.mrf.mxu1 }
 0x7dc   : > { %v7346_v26 = vadd.f32 %v7345_v20, %v7325_v63  ;;  %9040 = vmatpush.xpose.msra.mxu0 %v10170_v61  ;;  %9060 = vmatpush.xpose.msra.mxu1 %v10171_v11 }
 0x7dd   : > { %v7285_v34 = vadd.f32 %v7284_v55, %v7265_v25  ;;  %9080 = vmatpush.xpose.msra.mxu2 %v10172_v53  ;;  %9100 = vmatpush.xpose.msra.mxu3 %v10173_v37 }
 0x7de   : > { %8940 = vmatmul.f32.vlgmr.msrb.gmra.mxu0 %v8916_v15  ;;  %8960 = vmatmul.f32.vlgmr.msrb.gmra.mxu1 %v8917_v5 }
 0x7df   : > { %v7287_v8 = vadd.f32 %v7285_v34, %v7186_v47  ;;  %8980 = vmatmul.f32.vlgmr.msrb.gmra.mxu2 %v8918_v43  ;;  %9000 = vmatmul.f32.vlgmr.msrb.gmra.mxu3 %v8919_v9 }
 0x7e0   : > { %9140 = vmatpush.xpose.msrb.mxu0 %v10182_v54  ;;  %9160 = vmatpush.xpose.msrb.mxu1 %v10183_v27 }
 0x7e1   : > { %9180 = vmatpush.xpose.msrb.mxu2 %v10184_v33  ;;  %9200 = vmatpush.xpose.msrb.mxu3 %v10185_v62 }
 0x7e2   : > { %v7365_v17 = vpop.f32.mrf.mxu2  ;;  %v7385_v30 = vpop.f32.mrf.mxu3 }
 0x7e3   : > { %v7366_v50 = vadd.f32 %v7365_v17, %v7346_v26  ;;  %v7426_v32 = vpop.f32.mrf.mxu0  ;;  %v7446_v59 = vpop.f32.mrf.mxu1 }
 0x7e4   : > { %v7447_v2 = vadd.f32 %v7446_v59, %v7426_v32  ;;  %9141 = vmatpush.xpose.msrb.mxu0 %v10178_v21  ;;  %9161 = vmatpush.xpose.msrb.mxu1 %v10179_v7 }
 0x7e5   : > { %v7386_v10 = vadd.f32 %v7385_v30, %v7366_v50  ;;  %9181 = vmatpush.xpose.msrb.mxu2 %v10180_v44  ;;  %9201 = vmatpush.xpose.msrb.mxu3 %v10181_v3 }
 0x7e6   : > { %9041 = vmatmul.f32.vlgmr.msra.gmra.mxu0 %v9017_v14  ;;  %9061 = vmatmul.f32.vlgmr.msra.gmra.mxu1 %v9018_v31 }
 0x7e7   : > { %v7388_v23 = vadd.f32 %v7386_v10, %v7287_v8  ;;  %9081 = vmatmul.f32.vlgmr.msra.gmra.mxu2 %v9019_v22  ;;  %9101 = vmatmul.f32.vlgmr.msra.gmra.mxu3 %v9020_v45 }
 0x7ea   : > { %v7466_v18 = vpop.f32.mrf.mxu2  ;;  %v7486_v52 = vpop.f32.mrf.mxu3 }
 0x7eb   : > { %v7467_v13 = vadd.f32 %v7466_v18, %v7447_v2  ;;  %v7527_v60 = vpop.f32.mrf.mxu0  ;;  %v7547_v56 = vpop.f32.mrf.mxu1 }
 0x7ec   : > { %v7548_v28 = vadd.f32 %v7547_v56, %v7527_v60 }
 0x7ed   : > { %v7487_v4 = vadd.f32 %v7486_v52, %v7467_v13 }
 0x7ee   : > { %9142 = vmatmul.f32.vlgmr.msrb.gmra.mxu0 %v9118_v46  ;;  %9162 = vmatmul.f32.vlgmr.msrb.gmra.mxu1 %v9119_v48 }
 0x7ef   : > { %v7489_v1 = vadd.f32 %v7487_v4, %v7388_v23  ;;  %9182 = vmatmul.f32.vlgmr.msrb.gmra.mxu2 %v9120_v39  ;;  %9202 = vmatmul.f32.vlgmr.msrb.gmra.mxu3 %v9121_v19 }
 0x7f2   : > { %v7567_v57 = vpop.f32.mrf.mxu2  ;;  %v7587_v58 = vpop.f32.mrf.mxu3 }
 0x7f3   : > { %v7568_v38 = vadd.f32 %v7567_v57, %v7548_v28  ;;  %v7628_v51 = vpop.f32.mrf.mxu0  ;;  %v7648_v12 = vpop.f32.mrf.mxu1 }
 0x7f4   : > { %v7649_v6 = vadd.f32 %v7648_v12, %v7628_v51 }
 0x7f5   : > { %v7588_v41 = vadd.f32 %v7587_v58, %v7568_v38 }
 0x7f7   : > { %v7590_v36 = vadd.f32 %v7588_v41, %v7489_v1 }
 0x7fa   : > { %v7668_v0 = vpop.f32.mrf.mxu2  ;;  %v7688_v49 = vpop.f32.mrf.mxu3 }
 0x7fb   : > { %v7669_v24 = vadd.f32 %v7668_v0, %v7649_v6  ;;  %v7729_v29 = vpop.f32.mrf.mxu0  ;;  %v7749_v47 = vpop.f32.mrf.mxu1 }
 0x7fc   : > { %v7750_v16 = vadd.f32 %v7749_v47, %v7729_v29  ;;  %v9212_v47 = vld [vmem:[%s16114_s9 + $0x10] sm:$0x7f] }
 0x7fd   : > { %v7689_v61 = vadd.f32 %v7688_v49, %v7669_v24  ;;  %10190 = vmatpush.msk.msra.mxu2 %vm5807_vm5, %v9212_v47 }
 0x7ff   : > { %v7691_v11 = vadd.f32 %v7689_v61, %v7590_v36  ;;  %v9210_v61 = vld [vmem:[%s16114_s9] sm:$0xff] }
 0x800   : > { %9294 = vmatpush.msra.mxu2 %v9210_v61  ;;  %v9382_v61 = vld [vmem:[%s16117_s12 + $0x1a8] sm:$0xff] }
 0x802   : > { %v7769_v35 = vpop.f32.mrf.mxu2  ;;  %v7789_v55 = vpop.f32.mrf.mxu3 }
 0x803   : > { %v7770_v53 = vadd.f32 %v7769_v35, %v7750_v16  ;;  %v7830_v37 = vpop.f32.mrf.mxu0  ;;  %v7850_v25 = vpop.f32.mrf.mxu1  ;;  %v9213_v16 = vld [vmem:[%s16114_s9 + $0x18] sm:$0x7f] }
 0x804   : > { %v7851_v63 = vadd.f32 %v7850_v25, %v7830_v37  ;;  %10192 = vmatpush.msk.msra.mxu3 %vm5807_vm5, %v9213_v16  ;;  %v9211_v37 = vld [vmem:[%s16114_s9 + $0x8] sm:$0xff]  ;;  %v9209_v25 = vld [vmem:[%s470_s19] sm:$0x1] }
 0x805   : > { %v7790_v20 = vadd.f32 %v7789_v55, %v7770_v53  ;;  %10191 = vmatmul.msk.f32.vlgmr.msra.gmra.mxu2 %vm9269_vm6, %v9209_v25 }
 0x806   : > { %9314 = vmatpush.msra.mxu3 %v9211_v37 }
 0x807   : > { %v7792_v26 = vadd.f32 %v7790_v20, %v7691_v11  ;;  %10193 = vmatmul.msk.f32.vlgmr.msra.gmra.mxu3 %vm9269_vm6, %v9209_v25  ;;  %v9348_v25 = vld [vmem:[%s16117_s12 + $0x98] sm:$0xff] }
 0x80a   : > { %v7870_v15 = vpop.f32.mrf.mxu2  ;;  %v7890_v5 = vpop.f32.mrf.mxu3 }
 0x80b   : > { %v7871_v34 = vadd.f32 %v7870_v15, %v7851_v63  ;;  %v7931_v43 = vpop.f32.mrf.mxu0  ;;  %v7951_v9 = vpop.f32.mrf.mxu1  ;;  %v9216_v63 = vld [vmem:[%s16115_s10 + $0x10] sm:$0xf]  ;;  %v9217_v15 = vld [vmem:[%s16115_s10 + $0x18] sm:$0xf] }
 0x80c   : > { %v7952_v54 = vadd.f32 %v7951_v9, %v7931_v43  ;;  %10186 = vmatpush.msk.msra.mxu0 %vm9222_vm11, %v9216_v63  ;;  %v9359_v9 = vld [vmem:[%s16117_s12 + $0xf0] sm:$0xff]  ;;  %10188 = vmatpush.msk.msra.mxu1 %vm9222_vm11, %v9217_v15  ;;  %v9380_v63 = vld [vmem:[%s16117_s12 + $0x198] sm:$0xff] }
 0x80d   : > { %v7891_v27 = vadd.f32 %v7890_v5, %v7871_v34  ;;  %v9214_v5 = vld [vmem:[%s16115_s10] sm:$0xff] }
 0x80e   : > { %9244 = vmatpush.msra.mxu0 %v9214_v5 }
 0x80f   : > { %v7893_v33 = vadd.f32 %v7891_v27, %v7792_v26  ;;  %v9215_v27 = vld [vmem:[%s16115_s10 + $0x8] sm:$0xff] }
 0x810   : > { %9399 = vmatpush.msrb.mxu0 %v9359_v9  ;;  %9264 = vmatpush.msra.mxu1 %v9215_v27  ;;  %v9346_v9 = vld [vmem:[%s16117_s12 + $0x88] sm:$0xff]  ;;  %v9377_v27 = vld [vmem:[%s16117_s12 + $0x180] sm:$0xff] }
 0x812   : > { %v7971_v62 = vpop.f32.mrf.mxu2  ;;  %v7991_v8 = vpop.f32.mrf.mxu3 }
 0x813   : > { %v7972_v42 = vadd.f32 %v7971_v62, %v7952_v54  ;;  %v8032_v21 = vpop.f32.mrf.mxu0  ;;  %v8052_v7 = vpop.f32.mrf.mxu1  ;;  %v9360_v54 = vld [vmem:[%s16117_s12 + $0xf8] sm:$0xff] }
 0x814   : > { %v8053_v17 = vadd.f32 %v8052_v7, %v8032_v21  ;;  %v9391_v21 = vld [vmem:[%s16117_s12 + $0x1f0] sm:$0xff]  ;;  %v9357_v7 = vld [vmem:[%s16117_s12 + $0xe0] sm:$0xff]  ;;  %9439 = vmatpush.msrb.mxu2 %v9360_v54  ;;  %v9378_v54 = vld [vmem:[%s16117_s12 + $0x188] sm:$0xff] }
 0x815   : > { %v7992_v30 = vadd.f32 %v7991_v8, %v7972_v42  ;;  %9419 = vmatpush.msrb.mxu1 %v9391_v21  ;;  %9400 = vmatpush.msrb.mxu0 %v9357_v7  ;;  %v9376_v21 = vld [vmem:[%s16117_s12 + $0x178] sm:$0xff] }
 0x817   : > { %v7994_v44 = vadd.f32 %v7992_v30, %v7893_v33  ;;  %v9392_v33 = vld [vmem:[%s16117_s12 + $0x1f8] sm:$0xff]  ;;  %v9390_v30 = vld [vmem:[%s16117_s12 + $0x1e8] sm:$0xff] }
 0x818   : > { %9459 = vmatpush.msrb.mxu3 %v9392_v33 }
 0x81a   : > { %v8072_v3 = vpop.f32.mrf.mxu2  ;;  %v8092_v50 = vpop.f32.mrf.mxu3  ;;  %9460 = vmatpush.msrb.mxu3 %v9390_v30  ;;  %v9375_v30 = vld [vmem:[%s16117_s12 + $0x170] sm:$0xff] }
 0x81b   : > { %v8073_v32 = vadd.f32 %v8072_v3, %v8053_v17  ;;  %v8133_v59 = vpop.f32.mrf.mxu0  ;;  %v8153_v2 = vpop.f32.mrf.mxu1  ;;  %v9358_v17 = vld [vmem:[%s16117_s12 + $0xe8] sm:$0xff] }
 0x81c   : > { %v8154_v29 = vadd.f32 %v8153_v2, %v8133_v59  ;;  %v9355_v59 = vld [vmem:[%s16117_s12 + $0xd0] sm:$0xff]  ;;  %v9356_v2 = vld [vmem:[%s16117_s12 + $0xd8] sm:$0xff]  ;;  %9440 = vmatpush.msrb.mxu2 %v9358_v17 }
 0x81d   : > { %v8093_v14 = vadd.f32 %v8092_v50, %v8073_v32  ;;  %v9389_v32 = vld [vmem:[%s16117_s12 + $0x1e0] sm:$0xff]  ;;  %9401 = vmatpush.msrb.mxu0 %v9355_v59 }
 0x81e   : > { %9420 = vmatpush.msrb.mxu1 %v9389_v32  ;;  %9441 = vmatpush.msrb.mxu2 %v9356_v2  ;;  %v9374_v32 = vld [vmem:[%s16117_s12 + $0x168] sm:$0xff]  ;;  %v9373_v59 = vld [vmem:[%s16117_s12 + $0x160] sm:$0xff]  ;;  %v9339_v2 = vld [vmem:[%s16117_s12 + $0x50] sm:$0xff] }
 0x81f   : > { %v15798_v31 = vadd.f32 %v8093_v14, %v7994_v44  ;;  %v9388_v14 = vld [vmem:[%s16117_s12 + $0x1d8] sm:$0xff] }
 0x820   : > { %9461 = vmatpush.msrb.mxu3 %v9388_v14 }
 0x822   : > { %v8173_v10 = vpop.f32.mrf.mxu2  ;;  %v8193_v22 = vpop.f32.mrf.mxu3 }
 0x823   : > { %v8234_v45 = vpop.f32.mrf.mxu0  ;;  %v8254_v23 = vpop.f32.mrf.mxu1  ;;  %v8174_v11 = vadd.f32 %v8173_v10, %v8154_v29 }
 0x824   : > { %v8255_v35 = vadd.f32 %v8254_v23, %v8234_v45 }
 0x825   : > { %v8194_v62 = vadd.f32 %v8193_v22, %v8174_v11 }
 0x827   : > { %v8196_v10 = vadd.f32 %v8194_v62, %v15798_v31 }
 0x82a   : > { %v8274_v40 = vpop.f32.mrf.mxu2  ;;  %v15800_v18 = vpop.f32.mrf.mxu3 }
 0x82b   : > { %v8335_v52 = vpop.f32.mrf.mxu0  ;;  %v8355_v13 = vpop.f32.mrf.mxu1  ;;  %v8275_v34 = vadd.f32 %v8274_v40, %v8255_v35 }
 0x82c   : > { %v8356_v43 = vadd.f32 %v8355_v13, %v8335_v52  ;;  %v9353_v52 = vld [vmem:[%s16117_s12 + $0xc0] sm:$0xff]  ;;  %v9354_v13 = vld [vmem:[%s16117_s12 + $0xc8] sm:$0xff] }
 0x82d   : > { %v8295_v44 = vadd.f32 %v15800_v18, %v8275_v34  ;;  %v9387_v18 = vld [vmem:[%s16117_s12 + $0x1d0] sm:$0xff]  ;;  %9402 = vmatpush.msrb.mxu0 %v9353_v52  ;;  %9442 = vmatpush.msrb.mxu2 %v9354_v13  ;;  %v9337_v52 = vld [vmem:[%s16117_s12 + $0x40] sm:$0xff] }
 0x82e   : > { %9421 = vmatpush.msrb.mxu1 %v9387_v18  ;;  %v9371_v18 = vld [vmem:[%s16117_s12 + $0x150] sm:$0xff] }
 0x832   : > { %v8375_v60 = vpop.f32.mrf.mxu2  ;;  %v15802_v56 = vpop.f32.mrf.mxu3 }
 0x833   : > { %v8436_v28 = vpop.f32.mrf.mxu0  ;;  %v8456_v46 = vpop.f32.mrf.mxu1  ;;  %v8376_v8 = vadd.f32 %v8375_v60, %v8356_v43  ;;  %v9386_v60 = vld [vmem:[%s16117_s12 + $0x1c8] sm:$0xff] }
 0x834   : > { %v8457_v42 = vadd.f32 %v8456_v46, %v8436_v28  ;;  %9462 = vmatpush.msrb.mxu3 %v9386_v60  ;;  %v9338_v60 = vld [vmem:[%s16117_s12 + $0x48] sm:$0xff] }
 0x835   : > { %v8396_v22 = vadd.f32 %v15802_v56, %v8376_v8  ;;  %v8297_v56 = vadd.f32 %v8295_v44, %v8196_v10 }
 0x837   : > { %v8398_v29 = vadd.f32 %v8396_v22, %v8297_v56  ;;  %v9370_v56 = vld [vmem:[%s16117_s12 + $0x148] sm:$0xff] }
 0x83a   : > { %v8476_v48 = vpop.f32.mrf.mxu2  ;;  %v15804_v4 = vpop.f32.mrf.mxu3 }
 0x83b   : > { %v8537_v39 = vpop.f32.mrf.mxu0  ;;  %v8557_v19 = vpop.f32.mrf.mxu1  ;;  %v8477_v3 = vadd.f32 %v8476_v48, %v8457_v42  ;;  %v9344_v42 = vld [vmem:[%s16117_s12 + $0x78] sm:$0xff] }
 0x83c   : > { %v8558_v50 = vadd.f32 %v8557_v19, %v8537_v39  ;;  %v9385_v39 = vld [vmem:[%s16117_s12 + $0x1c0] sm:$0xff]  ;;  %v9351_v19 = vld [vmem:[%s16117_s12 + $0xb0] sm:$0xff] }
 0x83d   : > { %v8497_v28 = vadd.f32 %v15804_v4, %v8477_v3  ;;  %v9352_v4 = vld [vmem:[%s16117_s12 + $0xb8] sm:$0xff]  ;;  %9422 = vmatpush.msrb.mxu1 %v9385_v39  ;;  %9403 = vmatpush.msrb.mxu0 %v9351_v19  ;;  %v9207_v19 = vld [vmem:[%s16113_s8] sm:$0x1] }
 0x83e   : > { %9443 = vmatpush.msrb.mxu2 %v9352_v4  ;;  %v9335_v4 = vld [vmem:[%s16117_s12 + $0x30] sm:$0xff] }
 0x83f   : > { %v8499_v11 = vadd.f32 %v8497_v28, %v8398_v29  ;;  %v9336_v29 = vld [vmem:[%s16117_s12 + $0x38] sm:$0xff] }
 0x842   : > { %v15806_v1 = vpop.f32.mrf.mxu2  ;;  %v15808_v57 = vpop.f32.mrf.mxu3 }
 0x843   : > { %v15810_v58 = vpop.f32.mrf.mxu0  ;;  %v15812_v38 = vpop.f32.mrf.mxu1  ;;  %v8578_v45 = vadd.f32 %v15806_v1, %v8558_v50  ;;  %v9342_v50 = vld [vmem:[%s16117_s12 + $0x68] sm:$0xff] }
 0x844   : > { %v8659_v31 = vadd.f32 %v15812_v38, %v15810_v58  ;;  %v9384_v38 = vld [vmem:[%s16117_s12 + $0x1b8] sm:$0xff] }
 0x845   : > { %v8598_v47 = vadd.f32 %v15808_v57, %v8578_v45  ;;  %v9350_v57 = vld [vmem:[%s16117_s12 + $0xa8] sm:$0xff]  ;;  %9463 = vmatpush.msrb.mxu3 %v9384_v38  ;;  %v9340_v45 = vld [vmem:[%s16117_s12 + $0x58] sm:$0xff]  ;;  %v9367_v38 = vld [vmem:[%s16117_s12 + $0x130] sm:$0xff] }
 0x846   : > { %9444 = vmatpush.msrb.mxu2 %v9350_v57  ;;  %v9331_v57 = vld [vmem:[%s16117_s12 + $0x10] sm:$0xff] }
 0x847   : > { %v8600_v15 = vadd.f32 %v8598_v47, %v8499_v11  ;;  %9464 = vmatpush.msrb.mxu3 %v9382_v61  ;;  %v9368_v47 = vld [vmem:[%s16117_s12 + $0x138] sm:$0xff]  ;;  %v9363_v61 = vld [vmem:[%s16117_s12 + $0x110] sm:$0xff] }
 0x848   : > { %9445 = vmatpush.msrb.mxu2 %v9348_v25  ;;  %v9332_v11 = vld [vmem:[%s16117_s12 + $0x18] sm:$0xff]  ;;  %v9319_v25 = vld [vmem:[%s16116_s11] sm:$0x3] }
 0x849   : > { %9465 = vmatpush.msrb.mxu3 %v9380_v63 }
 0x84a   : > { %v15814_v51 = vpop.f32.mrf.mxu2  ;;  %v15816_v12 = vpop.f32.mrf.mxu3  ;;  %9446 = vmatpush.msrb.mxu2 %v9346_v9 }
 0x84b   : > { %v15818_v6 = vpop.f32.mrf.mxu0  ;;  %v15820_v41 = vpop.f32.mrf.mxu1  ;;  %v8679_v1 = vadd.f32 %v15814_v51, %v8659_v31  ;;  %v9383_v51 = vld [vmem:[%s16117_s12 + $0x1b0] sm:$0xff]  ;;  %9466 = vmatpush.msrb.mxu3 %v9378_v54 }
 0x84c   : > { %v8760_v58 = vadd.f32 %v15820_v41, %v15818_v6  ;;  %v9349_v6 = vld [vmem:[%s16117_s12 + $0xa0] sm:$0xff]  ;;  %9423 = vmatpush.msrb.mxu1 %v9383_v51  ;;  %9447 = vmatpush.msrb.mxu2 %v9344_v42 }
 0x84d   : > { %9404 = vmatpush.msrb.mxu0 %v9349_v6  ;;  %9467 = vmatpush.msrb.mxu3 %v9376_v21  ;;  %v9333_v51 = vld [vmem:[%s16117_s12 + $0x20] sm:$0xff] }
 0x84e   : > { %9448 = vmatpush.msrb.mxu2 %v9342_v50  ;;  %v9365_v6 = vld [vmem:[%s16117_s12 + $0x120] sm:$0xff] }
 0x84f   : > { %9468 = vmatpush.msrb.mxu3 %v9374_v32 }
 0x850   : > { %9449 = vmatpush.msrb.mxu2 %v9340_v45 }
 0x852   : > { %v15822_v36 = vpop.f32.mrf.mxu2  ;;  %v15824_v0 = vpop.f32.mrf.mxu3  ;;  %9450 = vmatpush.msrb.mxu2 %v9338_v60 }
 0x853   : > { %v15826_v49 = vpop.f32.mrf.mxu0  ;;  %v15828_v24 = vpop.f32.mrf.mxu1  ;;  %v8780_v41 = vadd.f32 %v15822_v36, %v8760_v58  ;;  %v9381_v36 = vld [vmem:[%s16117_s12 + $0x1a0] sm:$0xff] }
 0x854   : > { %v8861_v16 = vadd.f32 %v15828_v24, %v15826_v49  ;;  %v9347_v49 = vld [vmem:[%s16117_s12 + $0x90] sm:$0xff]  ;;  %v8699_v24 = vadd.f32 %v15816_v12, %v8679_v1  ;;  %9424 = vmatpush.msrb.mxu1 %v9381_v36  ;;  %9451 = vmatpush.msrb.mxu2 %v9336_v29  ;;  %v9364_v36 = vld [vmem:[%s16117_s12 + $0x118] sm:$0xff] }
 0x855   : > { %v9379_v12 = vld [vmem:[%s16117_s12 + $0x190] sm:$0xff]  ;;  %9405 = vmatpush.msrb.mxu0 %v9347_v49  ;;  %v9329_v49 = vld [vmem:[%s16117_s12] sm:$0xff] }
 0x856   : > { %v8701_v33 = vadd.f32 %v8699_v24, %v8600_v15  ;;  %9425 = vmatpush.msrb.mxu1 %v9379_v12  ;;  %v9361_v24 = vld [vmem:[%s16117_s12 + $0x100] sm:$0xff] }
 0x858   : > { %9426 = vmatpush.msrb.mxu1 %v9377_v27 }
 0x85a   : > { %v15843_v55 = vpop.f32.mrf.mxu2  ;;  %v15845_v53 = vpop.f32.mrf.mxu3  ;;  %9427 = vmatpush.msrb.mxu1 %v9375_v30 }
 0x85b   : > { %v15855_v20 = vpop.f32.mrf.mxu0  ;;  %v15857_v26 = vpop.f32.mrf.mxu1  ;;  %v8881_v35 = vadd.f32 %v15843_v55, %v8861_v16  ;;  %v9345_v55 = vld [vmem:[%s16117_s12 + $0x80] sm:$0xff]  ;;  %v9366_v16 = vld [vmem:[%s16117_s12 + $0x128] sm:$0xff] }
 0x85c   : > { %v8962_v37 = vadd.f32 %v15857_v26, %v15855_v20  ;;  %v8800_v20 = vadd.f32 %v15824_v0, %v8780_v41  ;;  %v9343_v0 = vld [vmem:[%s16117_s12 + $0x70] sm:$0xff]  ;;  %9406 = vmatpush.msrb.mxu0 %v9345_v55  ;;  %9428 = vmatpush.msrb.mxu1 %v9373_v59  ;;  %v9334_v41 = vld [vmem:[%s16117_s12 + $0x28] sm:$0xff]  ;;  %v16406_v59 = vlaneseq }
 0x85d   : > { %v8901_v62 = vadd.f32 %v15845_v53, %v8881_v35  ;;  %v9341_v53 = vld [vmem:[%s16117_s12 + $0x60] sm:$0xff]  ;;  %9452 = vmatpush.msrb.mxu2 %v9334_v41  ;;  %v9330_v35 = vld [vmem:[%s16117_s12 + $0x8] sm:$0xff] }
 0x85e   : > { %v8802_v44 = vadd.f32 %v8800_v20, %v8701_v33  ;;  %9407 = vmatpush.msrb.mxu0 %v9343_v0  ;;  %9429 = vmatpush.msrb.mxu1 %v9371_v18  ;;  %v9393_v0 = vld [vmem:[%s16118_s13] sm:$0x3]  ;;  %vm9486_vm15 = vcmp.lt.s32.totalorder %v16406_v59, 256 }
 0x85f   : > { %9453 = vmatpush.msrb.mxu2 %v9332_v11  ;;  %v9395_v33 = vperm.slane %v9393_v0, 0 }
 0x860   : > { %v8903_v14 = vadd.f32 %v8901_v62, %v8802_v44  ;;  %9408 = vmatpush.msrb.mxu0 %v9341_v53 }
 0x861   : > { %9454 = vmatpush.msrb.mxu2 %v9330_v35 }
 0x862   : > { %v8981_v23 = vpop.f32.mrf.mxu2  ;;  %v15909_v40 = vpop.f32.mrf.mxu3  ;;  %9409 = vmatpush.msrb.mxu0 %v9339_v2 }
 0x863   : > { %v9042_v46 = vpop.f32.mrf.mxu0  ;;  %v9062_v48 = vpop.f32.mrf.mxu1  ;;  %v8982_v26 = vadd.f32 %v8981_v23, %v8962_v37  ;;  %v9372_v23 = vld [vmem:[%s16117_s12 + $0x158] sm:$0xff]  ;;  %v9362_v37 = vld [vmem:[%s16117_s12 + $0x108] sm:$0xff] }
 0x864   : > { %v9063_v43 = vadd.f32 %v9062_v48, %v9042_v46  ;;  %9469 = vmatpush.msrb.mxu3 %v9372_v23  ;;  %v9369_v46 = vld [vmem:[%s16117_s12 + $0x140] sm:$0xff]  ;;  %9410 = vmatpush.msrb.mxu0 %v9337_v52 }
 0x865   : > { %v9002_v3 = vadd.f32 %v15909_v40, %v8982_v26  ;;  %9430 = vmatpush.msrb.mxu1 %v9369_v46 }
 0x866   : > { %9470 = vmatpush.msrb.mxu3 %v9370_v56  ;;  %9411 = vmatpush.msrb.mxu0 %v9335_v4 }
 0x867   : > { %v9004_v31 = vadd.f32 %v9002_v3, %v8903_v14  ;;  %9431 = vmatpush.msrb.mxu1 %v9367_v38 }
 0x868   : > { %9471 = vmatpush.msrb.mxu3 %v9368_v47  ;;  %9412 = vmatpush.msrb.mxu0 %v9333_v51 }
 0x869   : > { %9432 = vmatpush.msrb.mxu1 %v9365_v6 }
 0x86a   : > { %v9082_v5 = vpop.f32.mrf.mxu2  ;;  %v9102_v34 = vpop.f32.mrf.mxu3  ;;  %9472 = vmatpush.msrb.mxu3 %v9366_v16  ;;  %9413 = vmatpush.msrb.mxu0 %v9331_v57 }
 0x86b   : > { %v9083_v8 = vadd.f32 %v9082_v5, %v9063_v43  ;;  %v9143_v7 = vpop.f32.mrf.mxu0  ;;  %v9163_v17 = vpop.f32.mrf.mxu1  ;;  %9433 = vmatpush.msrb.mxu1 %v9363_v61  ;;  %v9321_v5 = vperm.slane %v9319_v25, 0 }
 0x86c   : > { %v9164_v22 = vadd.f32 %v9163_v17, %v9143_v7  ;;  %9473 = vmatpush.msrb.mxu3 %v9364_v36  ;;  %9414 = vmatpush.msrb.mxu0 %v9329_v49 }
 0x86d   : > { %v9103_v10 = vadd.f32 %v9102_v34, %v9083_v8  ;;  %9434 = vmatpush.msrb.mxu1 %v9361_v24  ;;  %v9322_v34 = vperm.slane %v9319_v25, 1  ;;  %v9396_v8 = vperm.slane %v9393_v0, 1 }
 0x86e   : > { %9474 = vmatpush.msrb.mxu3 %v9362_v37 }
 0x86f   : > { %v9105_v48 = vadd.f32 %v9103_v10, %v9004_v31 }
 0x872   : > { %v9183_v40 = vpop.f32.mrf.mxu2  ;;  %v9203_v28 = vpop.f32.mrf.mxu3 }
 0x873   : > { %v9184_v13 = vadd.f32 %v9183_v40, %v9164_v22 }
 0x875   : > { %v9204_v39 = vadd.f32 %v9203_v28, %v9184_v13 }
 0x877   : > { %v9206_v1 = vadd.f32 %v9204_v39, %v9105_v48 }
 0x879   : > { %v9208_v58 = vadd.f32 %v9207_v19, %v9206_v1 }
 0x87b   : > { %10187 = vmatmul.msk.f32.vlgmr.msra.gmra.mxu0 %vm9218_vm13, %v9208_v58  ;;  %10189 = vmatmul.msk.f32.vlgmr.msra.gmra.mxu1 %vm9218_vm13, %v9208_v58 }
 0x888   : > { %v9296_v63 = vpop.f32.mrf.mxu2 }
 0x88a   : > { %v9316_v15 = vpop.f32.mrf.mxu3 }
 0x8f8   : > { %v9246_v12 = vpop.f32.mrf.mxu0  ;;  %v9266_v55 = vpop.f32.mrf.mxu1 }
 0x8f9   : > { %v9297_v20 = vadd.f32 %v9296_v63, %v9246_v12  ;;  %v9317_v26 = vadd.f32 %v9316_v15, %v9266_v55 }
 0x8fb   : > { %v9325_v43 = vadd.f32 %v9321_v5, %v9297_v20  ;;  %v9326_v9 = vadd.f32 %v9322_v34, %v9317_v26 }
 0x8fd   : > { %v9327_v54 = vmax.f32 %v9325_v43, 0.0  ;;  %v9328_v27 = vmax.f32 %v9326_v9, 0.0 }
 0x8ff   : > { %9415 = vmatmul.f32.vlgmr.msrb.gmra.mxu0 %v9327_v54  ;;  %9435 = vmatmul.f32.vlgmr.msrb.gmra.mxu1 %v9328_v27 }
 0x900   : > { %9455 = vmatmul.f32.vlgmr.msrb.gmra.mxu2 %v9327_v54  ;;  %9475 = vmatmul.f32.vlgmr.msrb.gmra.mxu3 %v9328_v27 }
 0x97c   : > { %v9416_v62 = vpop.f32.mrf.mxu0  ;;  %v9436_v17 = vpop.f32.mrf.mxu1 }
 0x97d   : > { %v9417_v42 = vadd.f32 %v9416_v62, %v9395_v33 }
 0x97f   : > { %v9437_v53 = vadd.f32 %v9436_v17, %v9417_v42 }
 0x981   : > { %v9479_v50 = vmax.f32 %v9437_v53, 0.0 }
 0x983   : > { %v9456_v21 = vpop.f32.mrf.mxu2  ;;  %v9476_v30 = vpop.f32.mrf.mxu3 }
 0x984   : > { %v9457_v7 = vadd.f32 %v9456_v21, %v9396_v8 }
 0x986   : > { %v9477_v44 = vadd.f32 %v9476_v30, %v9457_v7 }
 0x988   : > { %v9480_v3 = vmax.f32 %v9477_v44, 0.0 }
 0x98a   : > { %v9483_v32 = vrot.slane %v9480_v3, 7 }
 0x98c   : > { %v9484_v2 = vsel %vm488_vm0, %v9479_v50, %v9483_v32 }
 0x98d   : > { %9488 = vst.msk [vmem:[%s479_s16] sm:$0x3] %vm9486_vm15, %v9484_v2 }
 0x98e PF: > { %s24_s29 = sadd.s32 1, %s11042_s29  }
 0x98f   : > { %p21_p4 = scmp.ge.s32.totalorder %s24_s29, 4  }
 0x991   :  { %23 = sbr.rel (!%p21_p4) target bundleno = 1 (0x1), region = 249 }

</bundles_post_ra>
